<compile_context>
chip_gen: v7x
topology: tpu7x:2x2x1
jax: 0.10.0
libtpu: 0.0.40
codegen_flags: <defaults>
</compile_context>

<pallas_src>
import functools
import numpy as np
import jax
import jax.numpy as jnp
from jax.experimental import pallas as pl
from jax.experimental.pallas import tpu as pltpu

# ----------------------- hyperparameters (small, forward-consistent) -----------------------
CONTEXT_LEN = 8
PRED_LEN = 4
INPUT_SIZE = 1
NUM_FEAT_DYNAMIC_REAL = 1
NUM_FEAT_STATIC_REAL = 1
NUM_FEAT_STATIC_CAT = 1
CARDINALITY = [5]
EMBED_DIMS = [min(50, (c + 1) // 2) for c in CARDINALITY]          # -> [3]
LAGS_SEQ = [lag - 1 for lag in [1, 2, 3]]                          # module does lag-1 -> [0,1,2]
MAX_LAG = max(LAGS_SEQ)
PAST_LEN = CONTEXT_LEN + MAX_LAG                                   # context_length + max(lags) = 10
HIDDEN = 32                                                        # hidden_size
NUM_LAYERS = 2
N_TIMESTEP = 8
NSTEPS = N_TIMESTEP - 1                                            # reverse-diffusion steps (n = 7..1)
LINEAR_START = 1e-4
LINEAR_END = 2e-2
NUM_PARALLEL_SAMPLES = 4
TIME_EMB = 32
UNET_HIDDEN = 64
NUM_FEATURES = sum(EMBED_DIMS) + NUM_FEAT_DYNAMIC_REAL + NUM_FEAT_STATIC_REAL + 2 * INPUT_SIZE  # 7
RNN_INPUT_SIZE = INPUT_SIZE * len(LAGS_SEQ) + NUM_FEATURES         # 10
MINIMUM_SCALE = 1e-10
DEFAULT_SCALE = 0.0                                                # default_scale arg of MeanScaler

# I2SB beta schedule exactly as in __init__ (numpy, host-side constants)
_BETAS = np.linspace(LINEAR_START ** 0.5, LINEAR_END ** 0.5, N_TIMESTEP, dtype=np.float64) ** 2
_BETAS = np.concatenate([_BETAS[:N_TIMESTEP // 2], np.flip(_BETAS[:N_TIMESTEP // 2])])
STD_FWD = np.sqrt(np.cumsum(_BETAS))                               # std_fwd[n] = sqrt(sum_{i<=n} beta_i)


def _posterior_coef_table():
    """Row s corresponds to reverse step n = N_TIMESTEP-1-s: [std_fwd_n, mu_x0, mu_xn, std_post]."""
    rows = []
    for n in range(N_TIMESTEP - 1, 0, -1):
        s_n = STD_FWD[n]
        s_p = STD_FWD[n - 1]
        s_delta2 = s_n ** 2 - s_p ** 2
        mu_x0 = s_delta2 / (s_n ** 2)
        mu_xn = (s_p ** 2) / (s_n ** 2)
        var = (s_p ** 2) * s_delta2 / (s_n ** 2)
        std_post = np.sqrt(var) if (n - 1) > 0 else 0.0
        rows.append([s_n, mu_x0, mu_xn, std_post])
    return np.asarray(rows, dtype=np.float32)                      # (NSTEPS, 4)


def _sinusoidal_embedding_table():
    """Time embeddings for steps n = N_TIMESTEP-1 .. 1 (same row order as the coef table)."""
    half = TIME_EMB // 2
    freqs = np.exp(-np.log(10000.0) * np.arange(half) / (half - 1))
    steps = np.arange(N_TIMESTEP - 1, 0, -1, dtype=np.float64)[:, None]
    ang = steps * freqs[None, :]
    return np.concatenate([np.sin(ang), np.cos(ang)], axis=1).astype(np.float32)  # (NSTEPS, TIME_EMB)


COEF_TABLE = _posterior_coef_table()
TEMB_TABLE = _sinusoidal_embedding_table()


# =========================== shared fused-gate LSTM cell (in-kernel) ===========================
def _lstm_cell(x, h, c, wx, wh, b):
    """One LSTM cell step with fused (4H)-wide gate matmul. PyTorch gate order i,f,g,o."""
    z = (jnp.dot(x, wx, preferred_element_type=jnp.float32)
         + jnp.dot(h, wh, preferred_element_type=jnp.float32)
         + b)                                                       # (rows, 4H) -- 4H = 128 lanes
    i = jax.nn.sigmoid(z[:, 0 * HIDDEN:1 * HIDDEN])
    f = jax.nn.sigmoid(z[:, 1 * HIDDEN:2 * HIDDEN])
    g = jnp.tanh(z[:, 2 * HIDDEN:3 * HIDDEN])
    o = jax.nn.sigmoid(z[:, 3 * HIDDEN:4 * HIDDEN])
    c_new = f * c + i * g
    h_new = o * jnp.tanh(c_new)
    return h_new, c_new


# =========================== Pallas kernel 1: context LSTM (single launch) ===========================
def _context_lstm_kernel(x_ref, wx0_ref, wh0_ref, b0_ref, wx1_ref, wh1_ref, b1_ref,
                         h_ref, c_ref):
    T = x_ref.shape[0]
    B = x_ref.shape[1]
    # weights resident in VMEM, loaded once for the whole unroll
    wx0 = wx0_ref[...]; wh0 = wh0_ref[...]; b0 = b0_ref[...]
    wx1 = wx1_ref[...]; wh1 = wh1_ref[...]; b1 = b1_ref[...]

    h0 = jnp.zeros((B, HIDDEN), jnp.float32)
    c0 = jnp.zeros((B, HIDDEN), jnp.float32)
    h1 = jnp.zeros((B, HIDDEN), jnp.float32)
    c1 = jnp.zeros((B, HIDDEN), jnp.float32)

    for t in range(T):                                              # T=8, fully unrolled in-kernel
        xt = x_ref[t]                                               # (B, RNN_INPUT_SIZE)
        h0, c0 = _lstm_cell(xt, h0, c0, wx0, wh0, b0)
        h1, c1 = _lstm_cell(h0, h1, c1, wx1, wh1, b1)

    h_ref[0] = h0
    h_ref[1] = h1
    c_ref[0] = c0
    c_ref[1] = c1


def context_lstm(x_btf, lstm_params):
    """x_btf: (B, T, I) batch-first. Returns final states (h, c), each (NUM_LAYERS, B, H).
    Note: rnn_output[:, -1, :] == h[-1], which is all the forward needs from the context pass."""
    B, T, _ = x_btf.shape
    x_tbf = jnp.transpose(x_btf, (1, 0, 2))                         # time-major
    vmem = pl.BlockSpec(memory_space=pltpu.MemorySpace.VMEM)
    hN, cN = pl.pallas_call(
        _context_lstm_kernel,
        in_specs=[vmem] * 7,
        out_specs=[vmem, vmem],
        out_shape=[jax.ShapeDtypeStruct((NUM_LAYERS, B, HIDDEN), jnp.float32),
                   jax.ShapeDtypeStruct((NUM_LAYERS, B, HIDDEN), jnp.float32)],
    )(x_tbf, lstm_params["wx0"], lstm_params["wh0"], lstm_params["b0"],
      lstm_params["wx1"], lstm_params["wh1"], lstm_params["b1"])
    return hN, cN


# ========== Pallas kernel 2: fused autoregressive decode (LSTM steps + I2SB reverse diffusion) ==========
# TODO(synk): exact EpsilonTheta (dilated-conv residual net) and Diffusion.sample bodies are not part
# of the provided module; a conditional MLP denoiser with the same (inputs, time, cond) contract and
# the standard I2SB DDPM-posterior recursion (ot_ode=False) are used.
def _decode_kernel(h_init_ref, c_init_ref, lag_seed_ref, feats_ref, noise_ref,
                   temb_proj_ref, coef_ref,
                   wx0_ref, wh0_ref, b0_ref, wx1_ref, wh1_ref, b1_ref,
                   w_in_ref, w_c_ref, b_h_ref, w_1_ref, b_1_ref, w_out_ref, b_out_ref,
                   out_ref):
    # ---- load all weights once; they stay resident across every prediction/diffusion step ----
    wx0 = wx0_ref[...]; wh0 = wh0_ref[...]; b0 = b0_ref[...]
    wx1 = wx1_ref[...]; wh1 = wh1_ref[...]; b1 = b1_ref[...]
    w_in = w_in_ref[...]; w_c = w_c_ref[...]; b_h = b_h_ref[...]
    w_1 = w_1_ref[...]; b_1 = b_1_ref[...]
    w_out = w_out_ref[...]; b_out = b_out_ref[...]

    h0 = h_init_ref[0]; h1 = h_init_ref[1]                          # (N, H)
    c0 = c_init_ref[0]; c1 = c_init_ref[1]

    prev2 = lag_seed_ref[:, 0:1]                                    # scaled past_target[-2]
    prev1 = lag_seed_ref[:, 1:2]                                    # scaled past_target[-1]

    def diffuse(x1, cond, k):
        # cond projection is invariant across the NSTEPS reverse steps -> compute once per sample
        cond_proj = jnp.dot(cond, w_c, preferred_element_type=jnp.float32) + b_h   # (N, UNET_HIDDEN)
        xt = x1
        for s in range(NSTEPS):                                     # n = N_TIMESTEP-1 .. 1
            temb_p = temb_proj_ref[s:s + 1, :]                      # (1, UNET_HIDDEN), precomputed temb @ w_t
            h = xt * w_in + cond_proj + temb_p                      # (N,1)*(1,UH) broadcast
            h = jax.nn.silu(h)
            h = h + jax.nn.silu(jnp.dot(h, w_1, preferred_element_type=jnp.float32) + b_1)
            eps = jnp.dot(h, w_out, preferred_element_type=jnp.float32) + b_out     # (N, 1)

            std_fwd_n = coef_ref[s, 0]
            mu_x0 = coef_ref[s, 1]
            mu_xn = coef_ref[s, 2]
            std_post = coef_ref[s, 3]
            pred_x0 = xt - std_fwd_n * eps                          # compute_pred_x0
            xt = mu_x0 * pred_x0 + mu_xn * xt + std_post * noise_ref[k, s]   # p_posterior
        return xt

    # prediction step 0: cond is the last-layer hidden of the context LSTM (== rnn_output[:, -1, :]),
    # x_1 is the last scaled past observation (start_noise=False)
    ns = diffuse(prev1, h1, 0)
    out_ref[:, 0:1] = ns

    for k in range(1, PRED_LEN):
        lags = jnp.concatenate([ns, prev1, prev2], axis=1)          # lagged_sequence_values, lags [0,1,2]
        x_in = jnp.concatenate([lags, feats_ref[k]], axis=1)        # (N, RNN_INPUT_SIZE)
        h0, c0 = _lstm_cell(x_in, h0, c0, wx0, wh0, b0)
        h1, c1 = _lstm_cell(h0, h1, c1, wx1, wh1, b1)
        new_ns = diffuse(ns, h1, k)                                 # x_1 = previous sample, cond = step output
        out_ref[:, k:k + 1] = new_ns
        prev2 = prev1
        prev1 = ns
        ns = new_ns


def decode(h_init, c_init, lag_seed, feats, noise, temb_proj, coefs, lstm_params, unet_params):
    N = h_init.shape[1]
    vmem = pl.BlockSpec(memory_space=pltpu.MemorySpace.VMEM)
    smem = pl.BlockSpec(memory_space=pltpu.MemorySpace.SMEM)
    return pl.pallas_call(
        _decode_kernel,
        in_specs=[vmem, vmem, vmem, vmem, vmem, vmem, smem] + [vmem] * 13,
        out_specs=vmem,
        out_shape=jax.ShapeDtypeStruct((N, PRED_LEN), jnp.float32),
    )(h_init, c_init, lag_seed, feats, noise, temb_proj, coefs,
      lstm_params["wx0"], lstm_params["wh0"], lstm_params["b0"],
      lstm_params["wx1"], lstm_params["wh1"], lstm_params["b1"],
      unet_params["w_in"], unet_params["w_c"], unet_params["b_h"],
      unet_params["w_1"], unet_params["b_1"], unet_params["w_out"], unet_params["b_out"])


# ======================================= JAX glue =======================================
def mean_scaler(data, weights):
    """MeanScaler(dim=1, keepdim=True, default_scale=0.0) in plain JAX (tiny; XLA fuses it)."""
    ts_sum = jnp.sum(jnp.abs(data * weights), axis=1, keepdims=True)
    num_obs = jnp.sum(weights, axis=1, keepdims=True)
    scale = ts_sum / jnp.maximum(num_obs, 1.0)
    scale = jnp.where(num_obs > 0, scale, jnp.full_like(scale, DEFAULT_SCALE))
    scale = jnp.maximum(scale, MINIMUM_SCALE)
    loc = jnp.zeros_like(scale)
    return data / scale, loc, scale


def lagged_sequence_values(indices, prior, seq):
    """prior: (N, Lp), seq: (N, T) -> (N, T, len(indices)) (gluonts semantics, input_size=1)."""
    full = jnp.concatenate([prior, seq], axis=1)
    T = seq.shape[1]
    vals = []
    for lag in indices:
        end = full.shape[1] - lag
        vals.append(full[:, end - T:end])
    return jnp.stack(vals, axis=-1)


def t2tsb_forward(params, feat_static_cat, feat_static_real, past_time_feat,
                  past_target, past_observed_values, future_time_feat, key,
                  num_parallel_samples=NUM_PARALLEL_SAMPLES):
    B = past_target.shape[0]
    P = num_parallel_samples
    N = B * P

    # ---------------- prepare_rnn_input (plain JAX: tiny glue, fully fused by XLA) ----------------
    context = past_target[:, -CONTEXT_LEN:]
    observed_context = past_observed_values[:, -CONTEXT_LEN:]
    scaled_input, loc, scale = mean_scaler(context, observed_context)      # (B,C), (B,1), (B,1)

    prior_input = (past_target[:, :-CONTEXT_LEN] - loc) / scale            # (B, max_lag)
    lags = lagged_sequence_values(LAGS_SEQ, prior_input, scaled_input)     # (B, C, n_lags)

    time_feat = jnp.concatenate(
        [past_time_feat[:, -CONTEXT_LEN + 1:], future_time_feat[:, :1]], axis=1)   # (B, C, 1)

    embedded_cat = jnp.concatenate(
        [jnp.take(params["emb_tables"][i], feat_static_cat[:, i], axis=0)
         for i in range(NUM_FEAT_STATIC_CAT)], axis=-1)                    # (B, 3)
    log_abs_loc = jnp.log1p(jnp.abs(loc))
    log_scale = jnp.log(scale)
    static_feat = jnp.concatenate(
        [embedded_cat, feat_static_real, log_abs_loc, log_scale], axis=-1)  # (B, 6)
    expanded_static = jnp.broadcast_to(
        static_feat[:, None, :], (B, time_feat.shape[1], static_feat.shape[-1]))
    features = jnp.concatenate([expanded_static, time_feat], axis=-1)       # (B, C, 7)
    rnn_input = jnp.concatenate([lags, features], axis=-1)                  # (B, C, 10)

    # ---------------- context LSTM: 1 pallas_call ----------------
    hN, cN = context_lstm(rnn_input, params["lstm"])                        # (2, B, H) each

    # ---------------- repeat_interleave across parallel samples ----------------
    rep = lambda x: jnp.repeat(x, P, axis=0)
    repeated_scale = rep(scale)                                             # (N, 1)
    repeated_loc = rep(loc)
    repeated_static_feat = rep(static_feat)                                 # (N, 6)
    repeated_past_target = (rep(past_target) - repeated_loc) / repeated_scale   # (N, past_len)
    repeated_time_feat = rep(future_time_feat)                              # (N, pred_len, 1)
    h_init = jnp.repeat(hN, P, axis=1)                                      # (2, N, H)
    c_init = jnp.repeat(cN, P, axis=1)

    # decode-step covariates for every prediction step: (PRED_LEN, N, NUM_FEATURES); row 0 unused
    feats = jnp.concatenate(
        [jnp.broadcast_to(repeated_static_feat[None],
                          (PRED_LEN, N, repeated_static_feat.shape[-1])),
         jnp.transpose(repeated_time_feat, (1, 0, 2))], axis=-1)

    lag_seed = repeated_past_target[:, -2:]                                 # (N, 2): [t-2, t-1] scaled
    temb_proj = jnp.dot(jnp.asarray(TEMB_TABLE), params["unet"]["w_t"])     # (NSTEPS, UNET_HIDDEN)
    coefs = jnp.asarray(COEF_TABLE)                                         # (NSTEPS, 4)
    noise = jax.random.normal(key, (PRED_LEN, NSTEPS, N, 1), dtype=jnp.float32)

    # ---------------- fused autoregressive decode + diffusion: 1 pallas_call ----------------
    samples = decode(h_init, c_init, lag_seed, feats, noise, temb_proj, coefs,
                     params["lstm"], params["unet"])                        # (N, PRED_LEN), scaled space

    out = samples * repeated_scale + repeated_loc
    out = out.reshape(-1, P, PRED_LEN, INPUT_SIZE)
    return jnp.squeeze(out, axis=-1)                                        # (B, P, pred_len)


# ======================================= parameters =======================================
def init_params(key):
    keys = jax.random.split(key, 16)
    nrm = lambda k, shape, s=0.1: s * jax.random.normal(k, shape, dtype=jnp.float32)
    # Fused-gate LSTM weights in PyTorch gate order (i, f, g, o), lane width 4*H = 128.
    # NOTE: bias corresponds to PyTorch's b_ih + b_hh (export as their sum when porting weights).
    lstm = {
        "wx0": nrm(keys[0], (RNN_INPUT_SIZE, 4 * HIDDEN)),
        "wh0": nrm(keys[1], (HIDDEN, 4 * HIDDEN)),
        "b0":  nrm(keys[2], (1, 4 * HIDDEN)),
        "wx1": nrm(keys[3], (HIDDEN, 4 * HIDDEN)),
        "wh1": nrm(keys[4], (HIDDEN, 4 * HIDDEN)),
        "b1":  nrm(keys[5], (1, 4 * HIDDEN)),
    }
    unet = {
        "w_in":  nrm(keys[6], (1, UNET_HIDDEN)),
        "w_t":   nrm(keys[7], (TIME_EMB, UNET_HIDDEN)),
        "w_c":   nrm(keys[8], (HIDDEN, UNET_HIDDEN)),
        "b_h":   nrm(keys[9], (1, UNET_HIDDEN)),
        "w_1":   nrm(keys[10], (UNET_HIDDEN, UNET_HIDDEN)),
        "b_1":   nrm(keys[11], (1, UNET_HIDDEN)),
        "w_out": nrm(keys[12], (UNET_HIDDEN, 1)),
        "b_out": nrm(keys[13], (1, 1)),
    }
    emb_tables = [nrm(keys[14], (CARDINALITY[i], EMBED_DIMS[i])) for i in range(NUM_FEAT_STATIC_CAT)]
    return {"lstm": lstm, "unet": unet, "emb_tables": emb_tables}


if __name__ == "__main__":
    key = jax.random.PRNGKey(0)
    pkey, dkey, skey = jax.random.split(key, 3)
    params = init_params(pkey)

    B = 2
    ks = jax.random.split(dkey, 6)
    feat_static_cat = jax.random.randint(ks[0], (B, NUM_FEAT_STATIC_CAT), 0, CARDINALITY[0], dtype=jnp.int32)
    feat_static_real = jax.random.normal(ks[1], (B, NUM_FEAT_STATIC_REAL), dtype=jnp.float32)
    past_time_feat = jax.random.normal(ks[2], (B, PAST_LEN, NUM_FEAT_DYNAMIC_REAL), dtype=jnp.float32)
    past_target = jnp.abs(jax.random.normal(ks[3], (B, PAST_LEN), dtype=jnp.float32)) + 0.5
    past_observed_values = jnp.ones((B, PAST_LEN), dtype=jnp.float32)
    future_time_feat = jax.random.normal(ks[5], (B, PRED_LEN, NUM_FEAT_DYNAMIC_REAL), dtype=jnp.float32)

    fwd = jax.jit(functools.partial(t2tsb_forward, params))
    out = fwd(feat_static_cat, feat_static_real, past_time_feat,
              past_target, past_observed_values, future_time_feat, skey)
    out = jax.block_until_ready(out)
    assert out.shape == (B, NUM_PARALLEL_SAMPLES, PRED_LEN)
    assert bool(jnp.all(jnp.isfinite(out)))
    print("KERNEL_OK")
</pallas_src>

<mosaic_0001>
module attributes {stable_mosaic.version = 11 : i64} {
  func.func @_decode_kernel(%arg0: memref<2x8x32xf32, #tpu.memory_space<vmem>>, %arg1: memref<2x8x32xf32, #tpu.memory_space<vmem>>, %arg2: memref<8x2xf32, #tpu.memory_space<vmem>>, %arg3: memref<4x8x7xf32, #tpu.memory_space<vmem>>, %arg4: memref<4x7x8x1xf32, #tpu.memory_space<vmem>>, %arg5: memref<7x64xf32, #tpu.memory_space<vmem>>, %arg6: memref<7x4xf32, #tpu.memory_space<smem>>, %arg7: memref<10x128xf32, #tpu.memory_space<vmem>>, %arg8: memref<32x128xf32, #tpu.memory_space<vmem>>, %arg9: memref<1x128xf32, #tpu.memory_space<vmem>>, %arg10: memref<32x128xf32, #tpu.memory_space<vmem>>, %arg11: memref<32x128xf32, #tpu.memory_space<vmem>>, %arg12: memref<1x128xf32, #tpu.memory_space<vmem>>, %arg13: memref<1x64xf32, #tpu.memory_space<vmem>>, %arg14: memref<32x64xf32, #tpu.memory_space<vmem>>, %arg15: memref<1x64xf32, #tpu.memory_space<vmem>>, %arg16: memref<64x64xf32, #tpu.memory_space<vmem>>, %arg17: memref<1x64xf32, #tpu.memory_space<vmem>>, %arg18: memref<64x1xf32, #tpu.memory_space<vmem>>, %arg19: memref<1x1xf32, #tpu.memory_space<vmem>>, %arg20: memref<8x4xf32, #tpu.memory_space<vmem>>) attributes {dimension_semantics = [], scalar_prefetch = 0 : i64, scratch_operands = 0 : i64, tpu.core_type = #tpu.core_type<tc>} {
    %c0 = arith.constant 0 : index
    %c0_0 = arith.constant 0 : index
    %0 = vector.load %arg7[%c0, %c0_0] : memref<10x128xf32, #tpu.memory_space<vmem>>, vector<10x128xf32>
    %c0_1 = arith.constant 0 : index
    %c0_2 = arith.constant 0 : index
    %1 = vector.load %arg8[%c0_1, %c0_2] : memref<32x128xf32, #tpu.memory_space<vmem>>, vector<32x128xf32>
    %c0_3 = arith.constant 0 : index
    %c0_4 = arith.constant 0 : index
    %2 = vector.load %arg9[%c0_3, %c0_4] : memref<1x128xf32, #tpu.memory_space<vmem>>, vector<1x128xf32>
    %c0_5 = arith.constant 0 : index
    %c0_6 = arith.constant 0 : index
    %3 = vector.load %arg10[%c0_5, %c0_6] : memref<32x128xf32, #tpu.memory_space<vmem>>, vector<32x128xf32>
    %c0_7 = arith.constant 0 : index
    %c0_8 = arith.constant 0 : index
    %4 = vector.load %arg11[%c0_7, %c0_8] : memref<32x128xf32, #tpu.memory_space<vmem>>, vector<32x128xf32>
    %c0_9 = arith.constant 0 : index
    %c0_10 = arith.constant 0 : index
    %5 = vector.load %arg12[%c0_9, %c0_10] : memref<1x128xf32, #tpu.memory_space<vmem>>, vector<1x128xf32>
    %c0_11 = arith.constant 0 : index
    %c0_12 = arith.constant 0 : index
    %6 = vector.load %arg13[%c0_11, %c0_12] : memref<1x64xf32, #tpu.memory_space<vmem>>, vector<1x64xf32>
    %c0_13 = arith.constant 0 : index
    %c0_14 = arith.constant 0 : index
    %7 = vector.load %arg14[%c0_13, %c0_14] : memref<32x64xf32, #tpu.memory_space<vmem>>, vector<32x64xf32>
    %c0_15 = arith.constant 0 : index
    %c0_16 = arith.constant 0 : index
    %8 = vector.load %arg15[%c0_15, %c0_16] : memref<1x64xf32, #tpu.memory_space<vmem>>, vector<1x64xf32>
    %c0_17 = arith.constant 0 : index
    %c0_18 = arith.constant 0 : index
    %9 = vector.load %arg16[%c0_17, %c0_18] : memref<64x64xf32, #tpu.memory_space<vmem>>, vector<64x64xf32>
    %c0_19 = arith.constant 0 : index
    %c0_20 = arith.constant 0 : index
    %10 = vector.load %arg17[%c0_19, %c0_20] : memref<1x64xf32, #tpu.memory_space<vmem>>, vector<1x64xf32>
    %c0_21 = arith.constant 0 : index
    %c0_22 = arith.constant 0 : index
    %11 = vector.load %arg18[%c0_21, %c0_22] : memref<64x1xf32, #tpu.memory_space<vmem>>, vector<64x1xf32>
    %c0_23 = arith.constant 0 : index
    %c0_24 = arith.constant 0 : index
    %12 = vector.load %arg19[%c0_23, %c0_24] : memref<1x1xf32, #tpu.memory_space<vmem>>, vector<1x1xf32>
    %c0_25 = arith.constant 0 : index
    %c0_26 = arith.constant 0 : index
    %c0_27 = arith.constant 0 : index
    %13 = vector.load %arg0[%c0_25, %c0_26, %c0_27] : memref<2x8x32xf32, #tpu.memory_space<vmem>>, vector<1x8x32xf32>
    %14 = vector.shape_cast %13 : vector<1x8x32xf32> to vector<8x32xf32>
    %c1 = arith.constant 1 : index
    %c0_28 = arith.constant 0 : index
    %c0_29 = arith.constant 0 : index
    %15 = vector.load %arg0[%c1, %c0_28, %c0_29] : memref<2x8x32xf32, #tpu.memory_space<vmem>>, vector<1x8x32xf32>
    %16 = vector.shape_cast %15 : vector<1x8x32xf32> to vector<8x32xf32>
    %c0_30 = arith.constant 0 : index
    %c0_31 = arith.constant 0 : index
    %c0_32 = arith.constant 0 : index
    %17 = vector.load %arg1[%c0_30, %c0_31, %c0_32] : memref<2x8x32xf32, #tpu.memory_space<vmem>>, vector<1x8x32xf32>
    %18 = vector.shape_cast %17 : vector<1x8x32xf32> to vector<8x32xf32>
    %c1_33 = arith.constant 1 : index
    %c0_34 = arith.constant 0 : index
    %c0_35 = arith.constant 0 : index
    %19 = vector.load %arg1[%c1_33, %c0_34, %c0_35] : memref<2x8x32xf32, #tpu.memory_space<vmem>>, vector<1x8x32xf32>
    %20 = vector.shape_cast %19 : vector<1x8x32xf32> to vector<8x32xf32>
    %c0_36 = arith.constant 0 : index
    %c0_37 = arith.constant 0 : index
    %21 = vector.load %arg2[%c0_36, %c0_37] : memref<8x2xf32, #tpu.memory_space<vmem>>, vector<8x1xf32>
    %c0_38 = arith.constant 0 : index
    %c1_39 = arith.constant 1 : index
    %22 = vector.load %arg2[%c0_38, %c1_39] : memref<8x2xf32, #tpu.memory_space<vmem>>, vector<8x1xf32>
    %cst = arith.constant dense<0.000000e+00> : vector<8x64xf32>
    %23 = tpu.matmul %16, %7, %cst {dimension_numbers = #tpu.dot_dimension_numbers<[1], [0], [0], [1], [0, 0, 1, 1], [], []>} : vector<8x32xf32>, vector<32x64xf32>, vector<8x64xf32> -> vector<8x64xf32>
    %24 = vector.broadcast %8 : vector<1x64xf32> to vector<8x64xf32>
    %25 = arith.addf %23, %24 : vector<8x64xf32>
    %c0_40 = arith.constant 0 : index
    %c0_41 = arith.constant 0 : index
    %26 = vector.load %arg5[%c0_40, %c0_41] : memref<7x64xf32, #tpu.memory_space<vmem>>, vector<1x64xf32>
    %27 = vector.broadcast %22 : vector<8x1xf32> to vector<8x64xf32>
    %28 = vector.broadcast %6 : vector<1x64xf32> to vector<8x64xf32>
    %29 = arith.mulf %27, %28 : vector<8x64xf32>
    %30 = arith.addf %29, %25 : vector<8x64xf32>
    %31 = vector.broadcast %26 : vector<1x64xf32> to vector<8x64xf32>
    %32 = arith.addf %30, %31 : vector<8x64xf32>
    %33 = arith.negf %32 : vector<8x64xf32>
    %34 = math.exp %33 : vector<8x64xf32>
    %cst_42 = arith.constant 1.000000e+00 : f32
    %35 = vector.broadcast %cst_42 : f32 to vector<8x64xf32>
    %36 = arith.addf %35, %34 : vector<8x64xf32>
    %37 = arith.divf %35, %36 : vector<8x64xf32>
    %38 = arith.mulf %32, %37 : vector<8x64xf32>
    %cst_43 = arith.constant dense<0.000000e+00> : vector<8x64xf32>
    %39 = tpu.matmul %38, %9, %cst_43 {dimension_numbers = #tpu.dot_dimension_numbers<[1], [0], [0], [1], [0, 0, 1, 1], [], []>} : vector<8x64xf32>, vector<64x64xf32>, vector<8x64xf32> -> vector<8x64xf32>
    %40 = vector.broadcast %10 : vector<1x64xf32> to vector<8x64xf32>
    %41 = arith.addf %39, %40 : vector<8x64xf32>
    %42 = arith.negf %41 : vector<8x64xf32>
    %43 = math.exp %42 : vector<8x64xf32>
    %cst_44 = arith.constant 1.000000e+00 : f32
    %44 = vector.broadcast %cst_44 : f32 to vector<8x64xf32>
    %45 = arith.addf %44, %43 : vector<8x64xf32>
    %46 = arith.divf %44, %45 : vector<8x64xf32>
    %47 = arith.mulf %41, %46 : vector<8x64xf32>
    %48 = arith.addf %38, %47 : vector<8x64xf32>
    %cst_45 = arith.constant dense<0.000000e+00> : vector<8x1xf32>
    %49 = tpu.matmul %48, %11, %cst_45 {dimension_numbers = #tpu.dot_dimension_numbers<[1], [0], [0], [1], [0, 0, 1, 1], [], []>} : vector<8x64xf32>, vector<64x1xf32>, vector<8x1xf32> -> vector<8x1xf32>
    %50 = vector.broadcast %12 : vector<1x1xf32> to vector<8x1xf32>
    %51 = arith.addf %49, %50 : vector<8x1xf32>
    %c0_46 = arith.constant 0 : index
    %c0_47 = arith.constant 0 : index
    %52 = memref.load %arg6[%c0_46, %c0_47] : memref<7x4xf32, #tpu.memory_space<smem>>
    %c0_48 = arith.constant 0 : index
    %c1_49 = arith.constant 1 : index
    %53 = memref.load %arg6[%c0_48, %c1_49] : memref<7x4xf32, #tpu.memory_space<smem>>
    %c0_50 = arith.constant 0 : index
    %c2 = arith.constant 2 : index
    %54 = memref.load %arg6[%c0_50, %c2] : memref<7x4xf32, #tpu.memory_space<smem>>
    %c0_51 = arith.constant 0 : index
    %c3 = arith.constant 3 : index
    %55 = memref.load %arg6[%c0_51, %c3] : memref<7x4xf32, #tpu.memory_space<smem>>
    %56 = vector.broadcast %52 : f32 to vector<8x1xf32>
    %57 = arith.mulf %56, %51 : vector<8x1xf32>
    %58 = arith.subf %22, %57 : vector<8x1xf32>
    %59 = vector.broadcast %53 : f32 to vector<8x1xf32>
    %60 = arith.mulf %59, %58 : vector<8x1xf32>
    %61 = vector.broadcast %54 : f32 to vector<8x1xf32>
    %62 = arith.mulf %61, %22 : vector<8x1xf32>
    %63 = arith.addf %60, %62 : vector<8x1xf32>
    %c0_52 = arith.constant 0 : index
    %c0_53 = arith.constant 0 : index
    %c0_54 = arith.constant 0 : index
    %c0_55 = arith.constant 0 : index
    %64 = vector.load %arg4[%c0_52, %c0_53, %c0_54, %c0_55] : memref<4x7x8x1xf32, #tpu.memory_space<vmem>>, vector<1x1x8x1xf32>
    %65 = vector.shape_cast %64 : vector<1x1x8x1xf32> to vector<8x1xf32>
    %66 = vector.broadcast %55 : f32 to vector<8x1xf32>
    %67 = arith.mulf %66, %65 : vector<8x1xf32>
    %68 = arith.addf %63, %67 : vector<8x1xf32>
    %c1_56 = arith.constant 1 : index
    %c0_57 = arith.constant 0 : index
    %69 = vector.load %arg5[%c1_56, %c0_57] : memref<7x64xf32, #tpu.memory_space<vmem>>, vector<1x64xf32>
    %70 = vector.broadcast %68 : vector<8x1xf32> to vector<8x64xf32>
    %71 = vector.broadcast %6 : vector<1x64xf32> to vector<8x64xf32>
    %72 = arith.mulf %70, %71 : vector<8x64xf32>
    %73 = arith.addf %72, %25 : vector<8x64xf32>
    %74 = vector.broadcast %69 : vector<1x64xf32> to vector<8x64xf32>
    %75 = arith.addf %73, %74 : vector<8x64xf32>
    %76 = arith.negf %75 : vector<8x64xf32>
    %77 = math.exp %76 : vector<8x64xf32>
    %cst_58 = arith.constant 1.000000e+00 : f32
    %78 = vector.broadcast %cst_58 : f32 to vector<8x64xf32>
    %79 = arith.addf %78, %77 : vector<8x64xf32>
    %80 = arith.divf %78, %79 : vector<8x64xf32>
    %81 = arith.mulf %75, %80 : vector<8x64xf32>
    %cst_59 = arith.constant dense<0.000000e+00> : vector<8x64xf32>
    %82 = tpu.matmul %81, %9, %cst_59 {dimension_numbers = #tpu.dot_dimension_numbers<[1], [0], [0], [1], [0, 0, 1, 1], [], []>} : vector<8x64xf32>, vector<64x64xf32>, vector<8x64xf32> -> vector<8x64xf32>
    %83 = vector.broadcast %10 : vector<1x64xf32> to vector<8x64xf32>
    %84 = arith.addf %82, %83 : vector<8x64xf32>
    %85 = arith.negf %84 : vector<8x64xf32>
    %86 = math.exp %85 : vector<8x64xf32>
    %cst_60 = arith.constant 1.000000e+00 : f32
    %87 = vector.broadcast %cst_60 : f32 to vector<8x64xf32>
    %88 = arith.addf %87, %86 : vector<8x64xf32>
    %89 = arith.divf %87, %88 : vector<8x64xf32>
    %90 = arith.mulf %84, %89 : vector<8x64xf32>
    %91 = arith.addf %81, %90 : vector<8x64xf32>
    %cst_61 = arith.constant dense<0.000000e+00> : vector<8x1xf32>
    %92 = tpu.matmul %91, %11, %cst_61 {dimension_numbers = #tpu.dot_dimension_numbers<[1], [0], [0], [1], [0, 0, 1, 1], [], []>} : vector<8x64xf32>, vector<64x1xf32>, vector<8x1xf32> -> vector<8x1xf32>
    %93 = vector.broadcast %12 : vector<1x1xf32> to vector<8x1xf32>
    %94 = arith.addf %92, %93 : vector<8x1xf32>
    %c1_62 = arith.constant 1 : index
    %c0_63 = arith.constant 0 : index
    %95 = memref.load %arg6[%c1_62, %c0_63] : memref<7x4xf32, #tpu.memory_space<smem>>
    %c1_64 = arith.constant 1 : index
    %c1_65 = arith.constant 1 : index
    %96 = memref.load %arg6[%c1_64, %c1_65] : memref<7x4xf32, #tpu.memory_space<smem>>
    %c1_66 = arith.constant 1 : index
    %c2_67 = arith.constant 2 : index
    %97 = memref.load %arg6[%c1_66, %c2_67] : memref<7x4xf32, #tpu.memory_space<smem>>
    %c1_68 = arith.constant 1 : index
    %c3_69 = arith.constant 3 : index
    %98 = memref.load %arg6[%c1_68, %c3_69] : memref<7x4xf32, #tpu.memory_space<smem>>
    %99 = vector.broadcast %95 : f32 to vector<8x1xf32>
    %100 = arith.mulf %99, %94 : vector<8x1xf32>
    %101 = arith.subf %68, %100 : vector<8x1xf32>
    %102 = vector.broadcast %96 : f32 to vector<8x1xf32>
    %103 = arith.mulf %102, %101 : vector<8x1xf32>
    %104 = vector.broadcast %97 : f32 to vector<8x1xf32>
    %105 = arith.mulf %104, %68 : vector<8x1xf32>
    %106 = arith.addf %103, %105 : vector<8x1xf32>
    %c0_70 = arith.constant 0 : index
    %c1_71 = arith.constant 1 : index
    %c0_72 = arith.constant 0 : index
    %c0_73 = arith.constant 0 : index
    %107 = vector.load %arg4[%c0_70, %c1_71, %c0_72, %c0_73] : memref<4x7x8x1xf32, #tpu.memory_space<vmem>>, vector<1x1x8x1xf32>
    %108 = vector.shape_cast %107 : vector<1x1x8x1xf32> to vector<8x1xf32>
    %109 = vector.broadcast %98 : f32 to vector<8x1xf32>
    %110 = arith.mulf %109, %108 : vector<8x1xf32>
    %111 = arith.addf %106, %110 : vector<8x1xf32>
    %c2_74 = arith.constant 2 : index
    %c0_75 = arith.constant 0 : index
    %112 = vector.load %arg5[%c2_74, %c0_75] : memref<7x64xf32, #tpu.memory_space<vmem>>, vector<1x64xf32>
    %113 = vector.broadcast %111 : vector<8x1xf32> to vector<8x64xf32>
    %114 = vector.broadcast %6 : vector<1x64xf32> to vector<8x64xf32>
    %115 = arith.mulf %113, %114 : vector<8x64xf32>
    %116 = arith.addf %115, %25 : vector<8x64xf32>
    %117 = vector.broadcast %112 : vector<1x64xf32> to vector<8x64xf32>
    %118 = arith.addf %116, %117 : vector<8x64xf32>
    %119 = arith.negf %118 : vector<8x64xf32>
    %120 = math.exp %119 : vector<8x64xf32>
    %cst_76 = arith.constant 1.000000e+00 : f32
    %121 = vector.broadcast %cst_76 : f32 to vector<8x64xf32>
    %122 = arith.addf %121, %120 : vector<8x64xf32>
    %123 = arith.divf %121, %122 : vector<8x64xf32>
    %124 = arith.mulf %118, %123 : vector<8x64xf32>
    %cst_77 = arith.constant dense<0.000000e+00> : vector<8x64xf32>
    %125 = tpu.matmul %124, %9, %cst_77 {dimension_numbers = #tpu.dot_dimension_numbers<[1], [0], [0], [1], [0, 0, 1, 1], [], []>} : vector<8x64xf32>, vector<64x64xf32>, vector<8x64xf32> -> vector<8x64xf32>
    %126 = vector.broadcast %10 : vector<1x64xf32> to vector<8x64xf32>
    %127 = arith.addf %125, %126 : vector<8x64xf32>
    %128 = arith.negf %127 : vector<8x64xf32>
    %129 = math.exp %128 : vector<8x64xf32>
    %cst_78 = arith.constant 1.000000e+00 : f32
    %130 = vector.broadcast %cst_78 : f32 to vector<8x64xf32>
    %131 = arith.addf %130, %129 : vector<8x64xf32>
    %132 = arith.divf %130, %131 : vector<8x64xf32>
    %133 = arith.mulf %127, %132 : vector<8x64xf32>
    %134 = arith.addf %124, %133 : vector<8x64xf32>
    %cst_79 = arith.constant dense<0.000000e+00> : vector<8x1xf32>
    %135 = tpu.matmul %134, %11, %cst_79 {dimension_numbers = #tpu.dot_dimension_numbers<[1], [0], [0], [1], [0, 0, 1, 1], [], []>} : vector<8x64xf32>, vector<64x1xf32>, vector<8x1xf32> -> vector<8x1xf32>
    %136 = vector.broadcast %12 : vector<1x1xf32> to vector<8x1xf32>
    %137 = arith.addf %135, %136 : vector<8x1xf32>
    %c2_80 = arith.constant 2 : index
    %c0_81 = arith.constant 0 : index
    %138 = memref.load %arg6[%c2_80, %c0_81] : memref<7x4xf32, #tpu.memory_space<smem>>
    %c2_82 = arith.constant 2 : index
    %c1_83 = arith.constant 1 : index
    %139 = memref.load %arg6[%c2_82, %c1_83] : memref<7x4xf32, #tpu.memory_space<smem>>
    %c2_84 = arith.constant 2 : index
    %c2_85 = arith.constant 2 : index
    %140 = memref.load %arg6[%c2_84, %c2_85] : memref<7x4xf32, #tpu.memory_space<smem>>
    %c2_86 = arith.constant 2 : index
    %c3_87 = arith.constant 3 : index
    %141 = memref.load %arg6[%c2_86, %c3_87] : memref<7x4xf32, #tpu.memory_space<smem>>
    %142 = vector.broadcast %138 : f32 to vector<8x1xf32>
    %143 = arith.mulf %142, %137 : vector<8x1xf32>
    %144 = arith.subf %111, %143 : vector<8x1xf32>
    %145 = vector.broadcast %139 : f32 to vector<8x1xf32>
    %146 = arith.mulf %145, %144 : vector<8x1xf32>
    %147 = vector.broadcast %140 : f32 to vector<8x1xf32>
    %148 = arith.mulf %147, %111 : vector<8x1xf32>
    %149 = arith.addf %146, %148 : vector<8x1xf32>
    %c0_88 = arith.constant 0 : index
    %c2_89 = arith.constant 2 : index
    %c0_90 = arith.constant 0 : index
    %c0_91 = arith.constant 0 : index
    %150 = vector.load %arg4[%c0_88, %c2_89, %c0_90, %c0_91] : memref<4x7x8x1xf32, #tpu.memory_space<vmem>>, vector<1x1x8x1xf32>
    %151 = vector.shape_cast %150 : vector<1x1x8x1xf32> to vector<8x1xf32>
    %152 = vector.broadcast %141 : f32 to vector<8x1xf32>
    %153 = arith.mulf %152, %151 : vector<8x1xf32>
    %154 = arith.addf %149, %153 : vector<8x1xf32>
    %c3_92 = arith.constant 3 : index
    %c0_93 = arith.constant 0 : index
    %155 = vector.load %arg5[%c3_92, %c0_93] : memref<7x64xf32, #tpu.memory_space<vmem>>, vector<1x64xf32>
    %156 = vector.broadcast %154 : vector<8x1xf32> to vector<8x64xf32>
    %157 = vector.broadcast %6 : vector<1x64xf32> to vector<8x64xf32>
    %158 = arith.mulf %156, %157 : vector<8x64xf32>
    %159 = arith.addf %158, %25 : vector<8x64xf32>
    %160 = vector.broadcast %155 : vector<1x64xf32> to vector<8x64xf32>
    %161 = arith.addf %159, %160 : vector<8x64xf32>
    %162 = arith.negf %161 : vector<8x64xf32>
    %163 = math.exp %162 : vector<8x64xf32>
    %cst_94 = arith.constant 1.000000e+00 : f32
    %164 = vector.broadcast %cst_94 : f32 to vector<8x64xf32>
    %165 = arith.addf %164, %163 : vector<8x64xf32>
    %166 = arith.divf %164, %165 : vector<8x64xf32>
    %167 = arith.mulf %161, %166 : vector<8x64xf32>
    %cst_95 = arith.constant dense<0.000000e+00> : vector<8x64xf32>
    %168 = tpu.matmul %167, %9, %cst_95 {dimension_numbers = #tpu.dot_dimension_numbers<[1], [0], [0], [1], [0, 0, 1, 1], [], []>} : vector<8x64xf32>, vector<64x64xf32>, vector<8x64xf32> -> vector<8x64xf32>
    %169 = vector.broadcast %10 : vector<1x64xf32> to vector<8x64xf32>
    %170 = arith.addf %168, %169 : vector<8x64xf32>
    %171 = arith.negf %170 : vector<8x64xf32>
    %172 = math.exp %171 : vector<8x64xf32>
    %cst_96 = arith.constant 1.000000e+00 : f32
    %173 = vector.broadcast %cst_96 : f32 to vector<8x64xf32>
    %174 = arith.addf %173, %172 : vector<8x64xf32>
    %175 = arith.divf %173, %174 : vector<8x64xf32>
    %176 = arith.mulf %170, %175 : vector<8x64xf32>
    %177 = arith.addf %167, %176 : vector<8x64xf32>
    %cst_97 = arith.constant dense<0.000000e+00> : vector<8x1xf32>
    %178 = tpu.matmul %177, %11, %cst_97 {dimension_numbers = #tpu.dot_dimension_numbers<[1], [0], [0], [1], [0, 0, 1, 1], [], []>} : vector<8x64xf32>, vector<64x1xf32>, vector<8x1xf32> -> vector<8x1xf32>
    %179 = vector.broadcast %12 : vector<1x1xf32> to vector<8x1xf32>
    %180 = arith.addf %178, %179 : vector<8x1xf32>
    %c3_98 = arith.constant 3 : index
    %c0_99 = arith.constant 0 : index
    %181 = memref.load %arg6[%c3_98, %c0_99] : memref<7x4xf32, #tpu.memory_space<smem>>
    %c3_100 = arith.constant 3 : index
    %c1_101 = arith.constant 1 : index
    %182 = memref.load %arg6[%c3_100, %c1_101] : memref<7x4xf32, #tpu.memory_space<smem>>
    %c3_102 = arith.constant 3 : index
    %c2_103 = arith.constant 2 : index
    %183 = memref.load %arg6[%c3_102, %c2_103] : memref<7x4xf32, #tpu.memory_space<smem>>
    %c3_104 = arith.constant 3 : index
    %c3_105 = arith.constant 3 : index
    %184 = memref.load %arg6[%c3_104, %c3_105] : memref<7x4xf32, #tpu.memory_space<smem>>
    %185 = vector.broadcast %181 : f32 to vector<8x1xf32>
    %186 = arith.mulf %185, %180 : vector<8x1xf32>
    %187 = arith.subf %154, %186 : vector<8x1xf32>
    %188 = vector.broadcast %182 : f32 to vector<8x1xf32>
    %189 = arith.mulf %188, %187 : vector<8x1xf32>
    %190 = vector.broadcast %183 : f32 to vector<8x1xf32>
    %191 = arith.mulf %190, %154 : vector<8x1xf32>
    %192 = arith.addf %189, %191 : vector<8x1xf32>
    %c0_106 = arith.constant 0 : index
    %c3_107 = arith.constant 3 : index
    %c0_108 = arith.constant 0 : index
    %c0_109 = arith.constant 0 : index
    %193 = vector.load %arg4[%c0_106, %c3_107, %c0_108, %c0_109] : memref<4x7x8x1xf32, #tpu.memory_space<vmem>>, vector<1x1x8x1xf32>
    %194 = vector.shape_cast %193 : vector<1x1x8x1xf32> to vector<8x1xf32>
    %195 = vector.broadcast %184 : f32 to vector<8x1xf32>
    %196 = arith.mulf %195, %194 : vector<8x1xf32>
    %197 = arith.addf %192, %196 : vector<8x1xf32>
    %c4 = arith.constant 4 : index
    %c0_110 = arith.constant 0 : index
    %198 = vector.load %arg5[%c4, %c0_110] : memref<7x64xf32, #tpu.memory_space<vmem>>, vector<1x64xf32>
    %199 = vector.broadcast %197 : vector<8x1xf32> to vector<8x64xf32>
    %200 = vector.broadcast %6 : vector<1x64xf32> to vector<8x64xf32>
    %201 = arith.mulf %199, %200 : vector<8x64xf32>
    %202 = arith.addf %201, %25 : vector<8x64xf32>
    %203 = vector.broadcast %198 : vector<1x64xf32> to vector<8x64xf32>
    %204 = arith.addf %202, %203 : vector<8x64xf32>
    %205 = arith.negf %204 : vector<8x64xf32>
    %206 = math.exp %205 : vector<8x64xf32>
    %cst_111 = arith.constant 1.000000e+00 : f32
    %207 = vector.broadcast %cst_111 : f32 to vector<8x64xf32>
    %208 = arith.addf %207, %206 : vector<8x64xf32>
    %209 = arith.divf %207, %208 : vector<8x64xf32>
    %210 = arith.mulf %204, %209 : vector<8x64xf32>
    %cst_112 = arith.constant dense<0.000000e+00> : vector<8x64xf32>
    %211 = tpu.matmul %210, %9, %cst_112 {dimension_numbers = #tpu.dot_dimension_numbers<[1], [0], [0], [1], [0, 0, 1, 1], [], []>} : vector<8x64xf32>, vector<64x64xf32>, vector<8x64xf32> -> vector<8x64xf32>
    %212 = vector.broadcast %10 : vector<1x64xf32> to vector<8x64xf32>
    %213 = arith.addf %211, %212 : vector<8x64xf32>
    %214 = arith.negf %213 : vector<8x64xf32>
    %215 = math.exp %214 : vector<8x64xf32>
    %cst_113 = arith.constant 1.000000e+00 : f32
    %216 = vector.broadcast %cst_113 : f32 to vector<8x64xf32>
    %217 = arith.addf %216, %215 : vector<8x64xf32>
    %218 = arith.divf %216, %217 : vector<8x64xf32>
    %219 = arith.mulf %213, %218 : vector<8x64xf32>
    %220 = arith.addf %210, %219 : vector<8x64xf32>
    %cst_114 = arith.constant dense<0.000000e+00> : vector<8x1xf32>
    %221 = tpu.matmul %220, %11, %cst_114 {dimension_numbers = #tpu.dot_dimension_numbers<[1], [0], [0], [1], [0, 0, 1, 1], [], []>} : vector<8x64xf32>, vector<64x1xf32>, vector<8x1xf32> -> vector<8x1xf32>
    %222 = vector.broadcast %12 : vector<1x1xf32> to vector<8x1xf32>
    %223 = arith.addf %221, %222 : vector<8x1xf32>
    %c4_115 = arith.constant 4 : index
    %c0_116 = arith.constant 0 : index
    %224 = memref.load %arg6[%c4_115, %c0_116] : memref<7x4xf32, #tpu.memory_space<smem>>
    %c4_117 = arith.constant 4 : index
    %c1_118 = arith.constant 1 : index
    %225 = memref.load %arg6[%c4_117, %c1_118] : memref<7x4xf32, #tpu.memory_space<smem>>
    %c4_119 = arith.constant 4 : index
    %c2_120 = arith.constant 2 : index
    %226 = memref.load %arg6[%c4_119, %c2_120] : memref<7x4xf32, #tpu.memory_space<smem>>
    %c4_121 = arith.constant 4 : index
    %c3_122 = arith.constant 3 : index
    %227 = memref.load %arg6[%c4_121, %c3_122] : memref<7x4xf32, #tpu.memory_space<smem>>
    %228 = vector.broadcast %224 : f32 to vector<8x1xf32>
    %229 = arith.mulf %228, %223 : vector<8x1xf32>
    %230 = arith.subf %197, %229 : vector<8x1xf32>
    %231 = vector.broadcast %225 : f32 to vector<8x1xf32>
    %232 = arith.mulf %231, %230 : vector<8x1xf32>
    %233 = vector.broadcast %226 : f32 to vector<8x1xf32>
    %234 = arith.mulf %233, %197 : vector<8x1xf32>
    %235 = arith.addf %232, %234 : vector<8x1xf32>
    %c0_123 = arith.constant 0 : index
    %c4_124 = arith.constant 4 : index
    %c0_125 = arith.constant 0 : index
    %c0_126 = arith.constant 0 : index
    %236 = vector.load %arg4[%c0_123, %c4_124, %c0_125, %c0_126] : memref<4x7x8x1xf32, #tpu.memory_space<vmem>>, vector<1x1x8x1xf32>
    %237 = vector.shape_cast %236 : vector<1x1x8x1xf32> to vector<8x1xf32>
    %238 = vector.broadcast %227 : f32 to vector<8x1xf32>
    %239 = arith.mulf %238, %237 : vector<8x1xf32>
    %240 = arith.addf %235, %239 : vector<8x1xf32>
    %c5 = arith.constant 5 : index
    %c0_127 = arith.constant 0 : index
    %241 = vector.load %arg5[%c5, %c0_127] : memref<7x64xf32, #tpu.memory_space<vmem>>, vector<1x64xf32>
    %242 = vector.broadcast %240 : vector<8x1xf32> to vector<8x64xf32>
    %243 = vector.broadcast %6 : vector<1x64xf32> to vector<8x64xf32>
    %244 = arith.mulf %242, %243 : vector<8x64xf32>
    %245 = arith.addf %244, %25 : vector<8x64xf32>
    %246 = vector.broadcast %241 : vector<1x64xf32> to vector<8x64xf32>
    %247 = arith.addf %245, %246 : vector<8x64xf32>
    %248 = arith.negf %247 : vector<8x64xf32>
    %249 = math.exp %248 : vector<8x64xf32>
    %cst_128 = arith.constant 1.000000e+00 : f32
    %250 = vector.broadcast %cst_128 : f32 to vector<8x64xf32>
    %251 = arith.addf %250, %249 : vector<8x64xf32>
    %252 = arith.divf %250, %251 : vector<8x64xf32>
    %253 = arith.mulf %247, %252 : vector<8x64xf32>
    %cst_129 = arith.constant dense<0.000000e+00> : vector<8x64xf32>
    %254 = tpu.matmul %253, %9, %cst_129 {dimension_numbers = #tpu.dot_dimension_numbers<[1], [0], [0], [1], [0, 0, 1, 1], [], []>} : vector<8x64xf32>, vector<64x64xf32>, vector<8x64xf32> -> vector<8x64xf32>
    %255 = vector.broadcast %10 : vector<1x64xf32> to vector<8x64xf32>
    %256 = arith.addf %254, %255 : vector<8x64xf32>
    %257 = arith.negf %256 : vector<8x64xf32>
    %258 = math.exp %257 : vector<8x64xf32>
    %cst_130 = arith.constant 1.000000e+00 : f32
    %259 = vector.broadcast %cst_130 : f32 to vector<8x64xf32>
    %260 = arith.addf %259, %258 : vector<8x64xf32>
    %261 = arith.divf %259, %260 : vector<8x64xf32>
    %262 = arith.mulf %256, %261 : vector<8x64xf32>
    %263 = arith.addf %253, %262 : vector<8x64xf32>
    %cst_131 = arith.constant dense<0.000000e+00> : vector<8x1xf32>
    %264 = tpu.matmul %263, %11, %cst_131 {dimension_numbers = #tpu.dot_dimension_numbers<[1], [0], [0], [1], [0, 0, 1, 1], [], []>} : vector<8x64xf32>, vector<64x1xf32>, vector<8x1xf32> -> vector<8x1xf32>
    %265 = vector.broadcast %12 : vector<1x1xf32> to vector<8x1xf32>
    %266 = arith.addf %264, %265 : vector<8x1xf32>
    %c5_132 = arith.constant 5 : index
    %c0_133 = arith.constant 0 : index
    %267 = memref.load %arg6[%c5_132, %c0_133] : memref<7x4xf32, #tpu.memory_space<smem>>
    %c5_134 = arith.constant 5 : index
    %c1_135 = arith.constant 1 : index
    %268 = memref.load %arg6[%c5_134, %c1_135] : memref<7x4xf32, #tpu.memory_space<smem>>
    %c5_136 = arith.constant 5 : index
    %c2_137 = arith.constant 2 : index
    %269 = memref.load %arg6[%c5_136, %c2_137] : memref<7x4xf32, #tpu.memory_space<smem>>
    %c5_138 = arith.constant 5 : index
    %c3_139 = arith.constant 3 : index
    %270 = memref.load %arg6[%c5_138, %c3_139] : memref<7x4xf32, #tpu.memory_space<smem>>
    %271 = vector.broadcast %267 : f32 to vector<8x1xf32>
    %272 = arith.mulf %271, %266 : vector<8x1xf32>
    %273 = arith.subf %240, %272 : vector<8x1xf32>
    %274 = vector.broadcast %268 : f32 to vector<8x1xf32>
    %275 = arith.mulf %274, %273 : vector<8x1xf32>
    %276 = vector.broadcast %269 : f32 to vector<8x1xf32>
    %277 = arith.mulf %276, %240 : vector<8x1xf32>
    %278 = arith.addf %275, %277 : vector<8x1xf32>
    %c0_140 = arith.constant 0 : index
    %c5_141 = arith.constant 5 : index
    %c0_142 = arith.constant 0 : index
    %c0_143 = arith.constant 0 : index
    %279 = vector.load %arg4[%c0_140, %c5_141, %c0_142, %c0_143] : memref<4x7x8x1xf32, #tpu.memory_space<vmem>>, vector<1x1x8x1xf32>
    %280 = vector.shape_cast %279 : vector<1x1x8x1xf32> to vector<8x1xf32>
    %281 = vector.broadcast %270 : f32 to vector<8x1xf32>
    %282 = arith.mulf %281, %280 : vector<8x1xf32>
    %283 = arith.addf %278, %282 : vector<8x1xf32>
    %c6 = arith.constant 6 : index
    %c0_144 = arith.constant 0 : index
    %284 = vector.load %arg5[%c6, %c0_144] : memref<7x64xf32, #tpu.memory_space<vmem>>, vector<1x64xf32>
    %285 = vector.broadcast %283 : vector<8x1xf32> to vector<8x64xf32>
    %286 = vector.broadcast %6 : vector<1x64xf32> to vector<8x64xf32>
    %287 = arith.mulf %285, %286 : vector<8x64xf32>
    %288 = arith.addf %287, %25 : vector<8x64xf32>
    %289 = vector.broadcast %284 : vector<1x64xf32> to vector<8x64xf32>
    %290 = arith.addf %288, %289 : vector<8x64xf32>
    %291 = arith.negf %290 : vector<8x64xf32>
    %292 = math.exp %291 : vector<8x64xf32>
    %cst_145 = arith.constant 1.000000e+00 : f32
    %293 = vector.broadcast %cst_145 : f32 to vector<8x64xf32>
    %294 = arith.addf %293, %292 : vector<8x64xf32>
    %295 = arith.divf %293, %294 : vector<8x64xf32>
    %296 = arith.mulf %290, %295 : vector<8x64xf32>
    %cst_146 = arith.constant dense<0.000000e+00> : vector<8x64xf32>
    %297 = tpu.matmul %296, %9, %cst_146 {dimension_numbers = #tpu.dot_dimension_numbers<[1], [0], [0], [1], [0, 0, 1, 1], [], []>} : vector<8x64xf32>, vector<64x64xf32>, vector<8x64xf32> -> vector<8x64xf32>
    %298 = vector.broadcast %10 : vector<1x64xf32> to vector<8x64xf32>
    %299 = arith.addf %297, %298 : vector<8x64xf32>
    %300 = arith.negf %299 : vector<8x64xf32>
    %301 = math.exp %300 : vector<8x64xf32>
    %cst_147 = arith.constant 1.000000e+00 : f32
    %302 = vector.broadcast %cst_147 : f32 to vector<8x64xf32>
    %303 = arith.addf %302, %301 : vector<8x64xf32>
    %304 = arith.divf %302, %303 : vector<8x64xf32>
    %305 = arith.mulf %299, %304 : vector<8x64xf32>
    %306 = arith.addf %296, %305 : vector<8x64xf32>
    %cst_148 = arith.constant dense<0.000000e+00> : vector<8x1xf32>
    %307 = tpu.matmul %306, %11, %cst_148 {dimension_numbers = #tpu.dot_dimension_numbers<[1], [0], [0], [1], [0, 0, 1, 1], [], []>} : vector<8x64xf32>, vector<64x1xf32>, vector<8x1xf32> -> vector<8x1xf32>
    %308 = vector.broadcast %12 : vector<1x1xf32> to vector<8x1xf32>
    %309 = arith.addf %307, %308 : vector<8x1xf32>
    %c6_149 = arith.constant 6 : index
    %c0_150 = arith.constant 0 : index
    %310 = memref.load %arg6[%c6_149, %c0_150] : memref<7x4xf32, #tpu.memory_space<smem>>
    %c6_151 = arith.constant 6 : index
    %c1_152 = arith.constant 1 : index
    %311 = memref.load %arg6[%c6_151, %c1_152] : memref<7x4xf32, #tpu.memory_space<smem>>
    %c6_153 = arith.constant 6 : index
    %c2_154 = arith.constant 2 : index
    %312 = memref.load %arg6[%c6_153, %c2_154] : memref<7x4xf32, #tpu.memory_space<smem>>
    %c6_155 = arith.constant 6 : index
    %c3_156 = arith.constant 3 : index
    %313 = memref.load %arg6[%c6_155, %c3_156] : memref<7x4xf32, #tpu.memory_space<smem>>
    %314 = vector.broadcast %310 : f32 to vector<8x1xf32>
    %315 = arith.mulf %314, %309 : vector<8x1xf32>
    %316 = arith.subf %283, %315 : vector<8x1xf32>
    %317 = vector.broadcast %311 : f32 to vector<8x1xf32>
    %318 = arith.mulf %317, %316 : vector<8x1xf32>
    %319 = vector.broadcast %312 : f32 to vector<8x1xf32>
    %320 = arith.mulf %319, %283 : vector<8x1xf32>
    %321 = arith.addf %318, %320 : vector<8x1xf32>
    %c0_157 = arith.constant 0 : index
    %c6_158 = arith.constant 6 : index
    %c0_159 = arith.constant 0 : index
    %c0_160 = arith.constant 0 : index
    %322 = vector.load %arg4[%c0_157, %c6_158, %c0_159, %c0_160] : memref<4x7x8x1xf32, #tpu.memory_space<vmem>>, vector<1x1x8x1xf32>
    %323 = vector.shape_cast %322 : vector<1x1x8x1xf32> to vector<8x1xf32>
    %324 = vector.broadcast %313 : f32 to vector<8x1xf32>
    %325 = arith.mulf %324, %323 : vector<8x1xf32>
    %326 = arith.addf %321, %325 : vector<8x1xf32>
    %c0_161 = arith.constant 0 : index
    %c0_162 = arith.constant 0 : index
    %327 = vector.load %arg20[%c0_161, %c0_162] : memref<8x4xf32, #tpu.memory_space<vmem>>, vector<8x1xf32>
    tpu.vector_store %arg20[%c0_161, %c0_162], %326 {strides = array<i32>} : memref<8x4xf32, #tpu.memory_space<vmem>>, vector<8x1xf32>,
    %328 = tpu.concatenate %326, %22, %21 in 1 : vector<8x1xf32>, vector<8x1xf32>, vector<8x1xf32> -> vector<8x3xf32>
    %c1_163 = arith.constant 1 : index
    %c0_164 = arith.constant 0 : index
    %c0_165 = arith.constant 0 : index
    %329 = vector.load %arg3[%c1_163, %c0_164, %c0_165] : memref<4x8x7xf32, #tpu.memory_space<vmem>>, vector<1x8x7xf32>
    %330 = vector.shape_cast %329 : vector<1x8x7xf32> to vector<8x7xf32>
    %331 = tpu.concatenate %328, %330 in 1 : vector<8x3xf32>, vector<8x7xf32> -> vector<8x10xf32>
    %cst_166 = arith.constant dense<0.000000e+00> : vector<8x128xf32>
    %332 = tpu.matmul %331, %0, %cst_166 {dimension_numbers = #tpu.dot_dimension_numbers<[1], [0], [0], [1], [0, 0, 1, 1], [], []>} : vector<8x10xf32>, vector<10x128xf32>, vector<8x128xf32> -> vector<8x128xf32>
    %cst_167 = arith.constant dense<0.000000e+00> : vector<8x128xf32>
    %333 = tpu.matmul %14, %1, %cst_167 {dimension_numbers = #tpu.dot_dimension_numbers<[1], [0], [0], [1], [0, 0, 1, 1], [], []>} : vector<8x32xf32>, vector<32x128xf32>, vector<8x128xf32> -> vector<8x128xf32>
    %334 = arith.addf %332, %333 : vector<8x128xf32>
    %335 = vector.broadcast %2 : vector<1x128xf32> to vector<8x128xf32>
    %336 = arith.addf %334, %335 : vector<8x128xf32>
    %337 = vector.extract_strided_slice %336 {offsets = [0, 0], sizes = [8, 32], strides = [1, 1]} : vector<8x128xf32> to vector<8x32xf32>
    %338 = arith.negf %337 : vector<8x32xf32>
    %339 = math.exp %338 : vector<8x32xf32>
    %cst_168 = arith.constant 1.000000e+00 : f32
    %340 = vector.broadcast %cst_168 : f32 to vector<8x32xf32>
    %341 = arith.addf %340, %339 : vector<8x32xf32>
    %342 = arith.divf %340, %341 : vector<8x32xf32>
    %343 = vector.extract_strided_slice %336 {offsets = [0, 32], sizes = [8, 32], strides = [1, 1]} : vector<8x128xf32> to vector<8x32xf32>
    %344 = arith.negf %343 : vector<8x32xf32>
    %345 = math.exp %344 : vector<8x32xf32>
    %cst_169 = arith.constant 1.000000e+00 : f32
    %346 = vector.broadcast %cst_169 : f32 to vector<8x32xf32>
    %347 = arith.addf %346, %345 : vector<8x32xf32>
    %348 = arith.divf %346, %347 : vector<8x32xf32>
    %349 = vector.extract_strided_slice %336 {offsets = [0, 64], sizes = [8, 32], strides = [1, 1]} : vector<8x128xf32> to vector<8x32xf32>
    %350 = math.tanh %349 : vector<8x32xf32>
    %351 = vector.extract_strided_slice %336 {offsets = [0, 96], sizes = [8, 32], strides = [1, 1]} : vector<8x128xf32> to vector<8x32xf32>
    %352 = arith.negf %351 : vector<8x32xf32>
    %353 = math.exp %352 : vector<8x32xf32>
    %cst_170 = arith.constant 1.000000e+00 : f32
    %354 = vector.broadcast %cst_170 : f32 to vector<8x32xf32>
    %355 = arith.addf %354, %353 : vector<8x32xf32>
    %356 = arith.divf %354, %355 : vector<8x32xf32>
    %357 = arith.mulf %348, %18 : vector<8x32xf32>
    %358 = arith.mulf %342, %350 : vector<8x32xf32>
    %359 = arith.addf %357, %358 : vector<8x32xf32>
    %360 = math.tanh %359 : vector<8x32xf32>
    %361 = arith.mulf %356, %360 : vector<8x32xf32>
    %cst_171 = arith.constant dense<0.000000e+00> : vector<8x128xf32>
    %362 = tpu.matmul %361, %3, %cst_171 {dimension_numbers = #tpu.dot_dimension_numbers<[1], [0], [0], [1], [0, 0, 1, 1], [], []>} : vector<8x32xf32>, vector<32x128xf32>, vector<8x128xf32> -> vector<8x128xf32>
    %cst_172 = arith.constant dense<0.000000e+00> : vector<8x128xf32>
    %363 = tpu.matmul %16, %4, %cst_172 {dimension_numbers = #tpu.dot_dimension_numbers<[1], [0], [0], [1], [0, 0, 1, 1], [], []>} : vector<8x32xf32>, vector<32x128xf32>, vector<8x128xf32> -> vector<8x128xf32>
    %364 = arith.addf %362, %363 : vector<8x128xf32>
    %365 = vector.broadcast %5 : vector<1x128xf32> to vector<8x128xf32>
    %366 = arith.addf %364, %365 : vector<8x128xf32>
    %367 = vector.extract_strided_slice %366 {offsets = [0, 0], sizes = [8, 32], strides = [1, 1]} : vector<8x128xf32> to vector<8x32xf32>
    %368 = arith.negf %367 : vector<8x32xf32>
    %369 = math.exp %368 : vector<8x32xf32>
    %cst_173 = arith.constant 1.000000e+00 : f32
    %370 = vector.broadcast %cst_173 : f32 to vector<8x32xf32>
    %371 = arith.addf %370, %369 : vector<8x32xf32>
    %372 = arith.divf %370, %371 : vector<8x32xf32>
    %373 = vector.extract_strided_slice %366 {offsets = [0, 32], sizes = [8, 32], strides = [1, 1]} : vector<8x128xf32> to vector<8x32xf32>
    %374 = arith.negf %373 : vector<8x32xf32>
    %375 = math.exp %374 : vector<8x32xf32>
    %cst_174 = arith.constant 1.000000e+00 : f32
    %376 = vector.broadcast %cst_174 : f32 to vector<8x32xf32>
    %377 = arith.addf %376, %375 : vector<8x32xf32>
    %378 = arith.divf %376, %377 : vector<8x32xf32>
    %379 = vector.extract_strided_slice %366 {offsets = [0, 64], sizes = [8, 32], strides = [1, 1]} : vector<8x128xf32> to vector<8x32xf32>
    %380 = math.tanh %379 : vector<8x32xf32>
    %381 = vector.extract_strided_slice %366 {offsets = [0, 96], sizes = [8, 32], strides = [1, 1]} : vector<8x128xf32> to vector<8x32xf32>
    %382 = arith.negf %381 : vector<8x32xf32>
    %383 = math.exp %382 : vector<8x32xf32>
    %cst_175 = arith.constant 1.000000e+00 : f32
    %384 = vector.broadcast %cst_175 : f32 to vector<8x32xf32>
    %385 = arith.addf %384, %383 : vector<8x32xf32>
    %386 = arith.divf %384, %385 : vector<8x32xf32>
    %387 = arith.mulf %378, %20 : vector<8x32xf32>
    %388 = arith.mulf %372, %380 : vector<8x32xf32>
    %389 = arith.addf %387, %388 : vector<8x32xf32>
    %390 = math.tanh %389 : vector<8x32xf32>
    %391 = arith.mulf %386, %390 : vector<8x32xf32>
    %cst_176 = arith.constant dense<0.000000e+00> : vector<8x64xf32>
    %392 = tpu.matmul %391, %7, %cst_176 {dimension_numbers = #tpu.dot_dimension_numbers<[1], [0], [0], [1], [0, 0, 1, 1], [], []>} : vector<8x32xf32>, vector<32x64xf32>, vector<8x64xf32> -> vector<8x64xf32>
    %393 = vector.broadcast %8 : vector<1x64xf32> to vector<8x64xf32>
    %394 = arith.addf %392, %393 : vector<8x64xf32>
    %c0_177 = arith.constant 0 : index
    %c0_178 = arith.constant 0 : index
    %395 = vector.load %arg5[%c0_177, %c0_178] : memref<7x64xf32, #tpu.memory_space<vmem>>, vector<1x64xf32>
    %396 = vector.broadcast %326 : vector<8x1xf32> to vector<8x64xf32>
    %397 = vector.broadcast %6 : vector<1x64xf32> to vector<8x64xf32>
    %398 = arith.mulf %396, %397 : vector<8x64xf32>
    %399 = arith.addf %398, %394 : vector<8x64xf32>
    %400 = vector.broadcast %395 : vector<1x64xf32> to vector<8x64xf32>
    %401 = arith.addf %399, %400 : vector<8x64xf32>
    %402 = arith.negf %401 : vector<8x64xf32>
    %403 = math.exp %402 : vector<8x64xf32>
    %cst_179 = arith.constant 1.000000e+00 : f32
    %404 = vector.broadcast %cst_179 : f32 to vector<8x64xf32>
    %405 = arith.addf %404, %403 : vector<8x64xf32>
    %406 = arith.divf %404, %405 : vector<8x64xf32>
    %407 = arith.mulf %401, %406 : vector<8x64xf32>
    %cst_180 = arith.constant dense<0.000000e+00> : vector<8x64xf32>
    %408 = tpu.matmul %407, %9, %cst_180 {dimension_numbers = #tpu.dot_dimension_numbers<[1], [0], [0], [1], [0, 0, 1, 1], [], []>} : vector<8x64xf32>, vector<64x64xf32>, vector<8x64xf32> -> vector<8x64xf32>
    %409 = vector.broadcast %10 : vector<1x64xf32> to vector<8x64xf32>
    %410 = arith.addf %408, %409 : vector<8x64xf32>
    %411 = arith.negf %410 : vector<8x64xf32>
    %412 = math.exp %411 : vector<8x64xf32>
    %cst_181 = arith.constant 1.000000e+00 : f32
    %413 = vector.broadcast %cst_181 : f32 to vector<8x64xf32>
    %414 = arith.addf %413, %412 : vector<8x64xf32>
    %415 = arith.divf %413, %414 : vector<8x64xf32>
    %416 = arith.mulf %410, %415 : vector<8x64xf32>
    %417 = arith.addf %407, %416 : vector<8x64xf32>
    %cst_182 = arith.constant dense<0.000000e+00> : vector<8x1xf32>
    %418 = tpu.matmul %417, %11, %cst_182 {dimension_numbers = #tpu.dot_dimension_numbers<[1], [0], [0], [1], [0, 0, 1, 1], [], []>} : vector<8x64xf32>, vector<64x1xf32>, vector<8x1xf32> -> vector<8x1xf32>
    %419 = vector.broadcast %12 : vector<1x1xf32> to vector<8x1xf32>
    %420 = arith.addf %418, %419 : vector<8x1xf32>
    %c0_183 = arith.constant 0 : index
    %c0_184 = arith.constant 0 : index
    %421 = memref.load %arg6[%c0_183, %c0_184] : memref<7x4xf32, #tpu.memory_space<smem>>
    %c0_185 = arith.constant 0 : index
    %c1_186 = arith.constant 1 : index
    %422 = memref.load %arg6[%c0_185, %c1_186] : memref<7x4xf32, #tpu.memory_space<smem>>
    %c0_187 = arith.constant 0 : index
    %c2_188 = arith.constant 2 : index
    %423 = memref.load %arg6[%c0_187, %c2_188] : memref<7x4xf32, #tpu.memory_space<smem>>
    %c0_189 = arith.constant 0 : index
    %c3_190 = arith.constant 3 : index
    %424 = memref.load %arg6[%c0_189, %c3_190] : memref<7x4xf32, #tpu.memory_space<smem>>
    %425 = vector.broadcast %421 : f32 to vector<8x1xf32>
    %426 = arith.mulf %425, %420 : vector<8x1xf32>
    %427 = arith.subf %326, %426 : vector<8x1xf32>
    %428 = vector.broadcast %422 : f32 to vector<8x1xf32>
    %429 = arith.mulf %428, %427 : vector<8x1xf32>
    %430 = vector.broadcast %423 : f32 to vector<8x1xf32>
    %431 = arith.mulf %430, %326 : vector<8x1xf32>
    %432 = arith.addf %429, %431 : vector<8x1xf32>
    %c1_191 = arith.constant 1 : index
    %c0_192 = arith.constant 0 : index
    %c0_193 = arith.constant 0 : index
    %c0_194 = arith.constant 0 : index
    %433 = vector.load %arg4[%c1_191, %c0_192, %c0_193, %c0_194] : memref<4x7x8x1xf32, #tpu.memory_space<vmem>>, vector<1x1x8x1xf32>
    %434 = vector.shape_cast %433 : vector<1x1x8x1xf32> to vector<8x1xf32>
    %435 = vector.broadcast %424 : f32 to vector<8x1xf32>
    %436 = arith.mulf %435, %434 : vector<8x1xf32>
    %437 = arith.addf %432, %436 : vector<8x1xf32>
    %c1_195 = arith.constant 1 : index
    %c0_196 = arith.constant 0 : index
    %438 = vector.load %arg5[%c1_195, %c0_196] : memref<7x64xf32, #tpu.memory_space<vmem>>, vector<1x64xf32>
    %439 = vector.broadcast %437 : vector<8x1xf32> to vector<8x64xf32>
    %440 = vector.broadcast %6 : vector<1x64xf32> to vector<8x64xf32>
    %441 = arith.mulf %439, %440 : vector<8x64xf32>
    %442 = arith.addf %441, %394 : vector<8x64xf32>
    %443 = vector.broadcast %438 : vector<1x64xf32> to vector<8x64xf32>
    %444 = arith.addf %442, %443 : vector<8x64xf32>
    %445 = arith.negf %444 : vector<8x64xf32>
    %446 = math.exp %445 : vector<8x64xf32>
    %cst_197 = arith.constant 1.000000e+00 : f32
    %447 = vector.broadcast %cst_197 : f32 to vector<8x64xf32>
    %448 = arith.addf %447, %446 : vector<8x64xf32>
    %449 = arith.divf %447, %448 : vector<8x64xf32>
    %450 = arith.mulf %444, %449 : vector<8x64xf32>
    %cst_198 = arith.constant dense<0.000000e+00> : vector<8x64xf32>
    %451 = tpu.matmul %450, %9, %cst_198 {dimension_numbers = #tpu.dot_dimension_numbers<[1], [0], [0], [1], [0, 0, 1, 1], [], []>} : vector<8x64xf32>, vector<64x64xf32>, vector<8x64xf32> -> vector<8x64xf32>
    %452 = vector.broadcast %10 : vector<1x64xf32> to vector<8x64xf32>
    %453 = arith.addf %451, %452 : vector<8x64xf32>
    %454 = arith.negf %453 : vector<8x64xf32>
    %455 = math.exp %454 : vector<8x64xf32>
    %cst_199 = arith.constant 1.000000e+00 : f32
    %456 = vector.broadcast %cst_199 : f32 to vector<8x64xf32>
    %457 = arith.addf %456, %455 : vector<8x64xf32>
    %458 = arith.divf %456, %457 : vector<8x64xf32>
    %459 = arith.mulf %453, %458 : vector<8x64xf32>
    %460 = arith.addf %450, %459 : vector<8x64xf32>
    %cst_200 = arith.constant dense<0.000000e+00> : vector<8x1xf32>
    %461 = tpu.matmul %460, %11, %cst_200 {dimension_numbers = #tpu.dot_dimension_numbers<[1], [0], [0], [1], [0, 0, 1, 1], [], []>} : vector<8x64xf32>, vector<64x1xf32>, vector<8x1xf32> -> vector<8x1xf32>
    %462 = vector.broadcast %12 : vector<1x1xf32> to vector<8x1xf32>
    %463 = arith.addf %461, %462 : vector<8x1xf32>
    %c1_201 = arith.constant 1 : index
    %c0_202 = arith.constant 0 : index
    %464 = memref.load %arg6[%c1_201, %c0_202] : memref<7x4xf32, #tpu.memory_space<smem>>
    %c1_203 = arith.constant 1 : index
    %c1_204 = arith.constant 1 : index
    %465 = memref.load %arg6[%c1_203, %c1_204] : memref<7x4xf32, #tpu.memory_space<smem>>
    %c1_205 = arith.constant 1 : index
    %c2_206 = arith.constant 2 : index
    %466 = memref.load %arg6[%c1_205, %c2_206] : memref<7x4xf32, #tpu.memory_space<smem>>
    %c1_207 = arith.constant 1 : index
    %c3_208 = arith.constant 3 : index
    %467 = memref.load %arg6[%c1_207, %c3_208] : memref<7x4xf32, #tpu.memory_space<smem>>
    %468 = vector.broadcast %464 : f32 to vector<8x1xf32>
    %469 = arith.mulf %468, %463 : vector<8x1xf32>
    %470 = arith.subf %437, %469 : vector<8x1xf32>
    %471 = vector.broadcast %465 : f32 to vector<8x1xf32>
    %472 = arith.mulf %471, %470 : vector<8x1xf32>
    %473 = vector.broadcast %466 : f32 to vector<8x1xf32>
    %474 = arith.mulf %473, %437 : vector<8x1xf32>
    %475 = arith.addf %472, %474 : vector<8x1xf32>
    %c1_209 = arith.constant 1 : index
    %c1_210 = arith.constant 1 : index
    %c0_211 = arith.constant 0 : index
    %c0_212 = arith.constant 0 : index
    %476 = vector.load %arg4[%c1_209, %c1_210, %c0_211, %c0_212] : memref<4x7x8x1xf32, #tpu.memory_space<vmem>>, vector<1x1x8x1xf32>
    %477 = vector.shape_cast %476 : vector<1x1x8x1xf32> to vector<8x1xf32>
    %478 = vector.broadcast %467 : f32 to vector<8x1xf32>
    %479 = arith.mulf %478, %477 : vector<8x1xf32>
    %480 = arith.addf %475, %479 : vector<8x1xf32>
    %c2_213 = arith.constant 2 : index
    %c0_214 = arith.constant 0 : index
    %481 = vector.load %arg5[%c2_213, %c0_214] : memref<7x64xf32, #tpu.memory_space<vmem>>, vector<1x64xf32>
    %482 = vector.broadcast %480 : vector<8x1xf32> to vector<8x64xf32>
    %483 = vector.broadcast %6 : vector<1x64xf32> to vector<8x64xf32>
    %484 = arith.mulf %482, %483 : vector<8x64xf32>
    %485 = arith.addf %484, %394 : vector<8x64xf32>
    %486 = vector.broadcast %481 : vector<1x64xf32> to vector<8x64xf32>
    %487 = arith.addf %485, %486 : vector<8x64xf32>
    %488 = arith.negf %487 : vector<8x64xf32>
    %489 = math.exp %488 : vector<8x64xf32>
    %cst_215 = arith.constant 1.000000e+00 : f32
    %490 = vector.broadcast %cst_215 : f32 to vector<8x64xf32>
    %491 = arith.addf %490, %489 : vector<8x64xf32>
    %492 = arith.divf %490, %491 : vector<8x64xf32>
    %493 = arith.mulf %487, %492 : vector<8x64xf32>
    %cst_216 = arith.constant dense<0.000000e+00> : vector<8x64xf32>
    %494 = tpu.matmul %493, %9, %cst_216 {dimension_numbers = #tpu.dot_dimension_numbers<[1], [0], [0], [1], [0, 0, 1, 1], [], []>} : vector<8x64xf32>, vector<64x64xf32>, vector<8x64xf32> -> vector<8x64xf32>
    %495 = vector.broadcast %10 : vector<1x64xf32> to vector<8x64xf32>
    %496 = arith.addf %494, %495 : vector<8x64xf32>
    %497 = arith.negf %496 : vector<8x64xf32>
    %498 = math.exp %497 : vector<8x64xf32>
    %cst_217 = arith.constant 1.000000e+00 : f32
    %499 = vector.broadcast %cst_217 : f32 to vector<8x64xf32>
    %500 = arith.addf %499, %498 : vector<8x64xf32>
    %501 = arith.divf %499, %500 : vector<8x64xf32>
    %502 = arith.mulf %496, %501 : vector<8x64xf32>
    %503 = arith.addf %493, %502 : vector<8x64xf32>
    %cst_218 = arith.constant dense<0.000000e+00> : vector<8x1xf32>
    %504 = tpu.matmul %503, %11, %cst_218 {dimension_numbers = #tpu.dot_dimension_numbers<[1], [0], [0], [1], [0, 0, 1, 1], [], []>} : vector<8x64xf32>, vector<64x1xf32>, vector<8x1xf32> -> vector<8x1xf32>
    %505 = vector.broadcast %12 : vector<1x1xf32> to vector<8x1xf32>
    %506 = arith.addf %504, %505 : vector<8x1xf32>
    %c2_219 = arith.constant 2 : index
    %c0_220 = arith.constant 0 : index
    %507 = memref.load %arg6[%c2_219, %c0_220] : memref<7x4xf32, #tpu.memory_space<smem>>
    %c2_221 = arith.constant 2 : index
    %c1_222 = arith.constant 1 : index
    %508 = memref.load %arg6[%c2_221, %c1_222] : memref<7x4xf32, #tpu.memory_space<smem>>
    %c2_223 = arith.constant 2 : index
    %c2_224 = arith.constant 2 : index
    %509 = memref.load %arg6[%c2_223, %c2_224] : memref<7x4xf32, #tpu.memory_space<smem>>
    %c2_225 = arith.constant 2 : index
    %c3_226 = arith.constant 3 : index
    %510 = memref.load %arg6[%c2_225, %c3_226] : memref<7x4xf32, #tpu.memory_space<smem>>
    %511 = vector.broadcast %507 : f32 to vector<8x1xf32>
    %512 = arith.mulf %511, %506 : vector<8x1xf32>
    %513 = arith.subf %480, %512 : vector<8x1xf32>
    %514 = vector.broadcast %508 : f32 to vector<8x1xf32>
    %515 = arith.mulf %514, %513 : vector<8x1xf32>
    %516 = vector.broadcast %509 : f32 to vector<8x1xf32>
    %517 = arith.mulf %516, %480 : vector<8x1xf32>
    %518 = arith.addf %515, %517 : vector<8x1xf32>
    %c1_227 = arith.constant 1 : index
    %c2_228 = arith.constant 2 : index
    %c0_229 = arith.constant 0 : index
    %c0_230 = arith.constant 0 : index
    %519 = vector.load %arg4[%c1_227, %c2_228, %c0_229, %c0_230] : memref<4x7x8x1xf32, #tpu.memory_space<vmem>>, vector<1x1x8x1xf32>
    %520 = vector.shape_cast %519 : vector<1x1x8x1xf32> to vector<8x1xf32>
    %521 = vector.broadcast %510 : f32 to vector<8x1xf32>
    %522 = arith.mulf %521, %520 : vector<8x1xf32>
    %523 = arith.addf %518, %522 : vector<8x1xf32>
    %c3_231 = arith.constant 3 : index
    %c0_232 = arith.constant 0 : index
    %524 = vector.load %arg5[%c3_231, %c0_232] : memref<7x64xf32, #tpu.memory_space<vmem>>, vector<1x64xf32>
    %525 = vector.broadcast %523 : vector<8x1xf32> to vector<8x64xf32>
    %526 = vector.broadcast %6 : vector<1x64xf32> to vector<8x64xf32>
    %527 = arith.mulf %525, %526 : vector<8x64xf32>
    %528 = arith.addf %527, %394 : vector<8x64xf32>
    %529 = vector.broadcast %524 : vector<1x64xf32> to vector<8x64xf32>
    %530 = arith.addf %528, %529 : vector<8x64xf32>
    %531 = arith.negf %530 : vector<8x64xf32>
    %532 = math.exp %531 : vector<8x64xf32>
    %cst_233 = arith.constant 1.000000e+00 : f32
    %533 = vector.broadcast %cst_233 : f32 to vector<8x64xf32>
    %534 = arith.addf %533, %532 : vector<8x64xf32>
    %535 = arith.divf %533, %534 : vector<8x64xf32>
    %536 = arith.mulf %530, %535 : vector<8x64xf32>
    %cst_234 = arith.constant dense<0.000000e+00> : vector<8x64xf32>
    %537 = tpu.matmul %536, %9, %cst_234 {dimension_numbers = #tpu.dot_dimension_numbers<[1], [0], [0], [1], [0, 0, 1, 1], [], []>} : vector<8x64xf32>, vector<64x64xf32>, vector<8x64xf32> -> vector<8x64xf32>
    %538 = vector.broadcast %10 : vector<1x64xf32> to vector<8x64xf32>
    %539 = arith.addf %537, %538 : vector<8x64xf32>
    %540 = arith.negf %539 : vector<8x64xf32>
    %541 = math.exp %540 : vector<8x64xf32>
    %cst_235 = arith.constant 1.000000e+00 : f32
    %542 = vector.broadcast %cst_235 : f32 to vector<8x64xf32>
    %543 = arith.addf %542, %541 : vector<8x64xf32>
    %544 = arith.divf %542, %543 : vector<8x64xf32>
    %545 = arith.mulf %539, %544 : vector<8x64xf32>
    %546 = arith.addf %536, %545 : vector<8x64xf32>
    %cst_236 = arith.constant dense<0.000000e+00> : vector<8x1xf32>
    %547 = tpu.matmul %546, %11, %cst_236 {dimension_numbers = #tpu.dot_dimension_numbers<[1], [0], [0], [1], [0, 0, 1, 1], [], []>} : vector<8x64xf32>, vector<64x1xf32>, vector<8x1xf32> -> vector<8x1xf32>
    %548 = vector.broadcast %12 : vector<1x1xf32> to vector<8x1xf32>
    %549 = arith.addf %547, %548 : vector<8x1xf32>
    %c3_237 = arith.constant 3 : index
    %c0_238 = arith.constant 0 : index
    %550 = memref.load %arg6[%c3_237, %c0_238] : memref<7x4xf32, #tpu.memory_space<smem>>
    %c3_239 = arith.constant 3 : index
    %c1_240 = arith.constant 1 : index
    %551 = memref.load %arg6[%c3_239, %c1_240] : memref<7x4xf32, #tpu.memory_space<smem>>
    %c3_241 = arith.constant 3 : index
    %c2_242 = arith.constant 2 : index
    %552 = memref.load %arg6[%c3_241, %c2_242] : memref<7x4xf32, #tpu.memory_space<smem>>
    %c3_243 = arith.constant 3 : index
    %c3_244 = arith.constant 3 : index
    %553 = memref.load %arg6[%c3_243, %c3_244] : memref<7x4xf32, #tpu.memory_space<smem>>
    %554 = vector.broadcast %550 : f32 to vector<8x1xf32>
    %555 = arith.mulf %554, %549 : vector<8x1xf32>
    %556 = arith.subf %523, %555 : vector<8x1xf32>
    %557 = vector.broadcast %551 : f32 to vector<8x1xf32>
    %558 = arith.mulf %557, %556 : vector<8x1xf32>
    %559 = vector.broadcast %552 : f32 to vector<8x1xf32>
    %560 = arith.mulf %559, %523 : vector<8x1xf32>
    %561 = arith.addf %558, %560 : vector<8x1xf32>
    %c1_245 = arith.constant 1 : index
    %c3_246 = arith.constant 3 : index
    %c0_247 = arith.constant 0 : index
    %c0_248 = arith.constant 0 : index
    %562 = vector.load %arg4[%c1_245, %c3_246, %c0_247, %c0_248] : memref<4x7x8x1xf32, #tpu.memory_space<vmem>>, vector<1x1x8x1xf32>
    %563 = vector.shape_cast %562 : vector<1x1x8x1xf32> to vector<8x1xf32>
    %564 = vector.broadcast %553 : f32 to vector<8x1xf32>
    %565 = arith.mulf %564, %563 : vector<8x1xf32>
    %566 = arith.addf %561, %565 : vector<8x1xf32>
    %c4_249 = arith.constant 4 : index
    %c0_250 = arith.constant 0 : index
    %567 = vector.load %arg5[%c4_249, %c0_250] : memref<7x64xf32, #tpu.memory_space<vmem>>, vector<1x64xf32>
    %568 = vector.broadcast %566 : vector<8x1xf32> to vector<8x64xf32>
    %569 = vector.broadcast %6 : vector<1x64xf32> to vector<8x64xf32>
    %570 = arith.mulf %568, %569 : vector<8x64xf32>
    %571 = arith.addf %570, %394 : vector<8x64xf32>
    %572 = vector.broadcast %567 : vector<1x64xf32> to vector<8x64xf32>
    %573 = arith.addf %571, %572 : vector<8x64xf32>
    %574 = arith.negf %573 : vector<8x64xf32>
    %575 = math.exp %574 : vector<8x64xf32>
    %cst_251 = arith.constant 1.000000e+00 : f32
    %576 = vector.broadcast %cst_251 : f32 to vector<8x64xf32>
    %577 = arith.addf %576, %575 : vector<8x64xf32>
    %578 = arith.divf %576, %577 : vector<8x64xf32>
    %579 = arith.mulf %573, %578 : vector<8x64xf32>
    %cst_252 = arith.constant dense<0.000000e+00> : vector<8x64xf32>
    %580 = tpu.matmul %579, %9, %cst_252 {dimension_numbers = #tpu.dot_dimension_numbers<[1], [0], [0], [1], [0, 0, 1, 1], [], []>} : vector<8x64xf32>, vector<64x64xf32>, vector<8x64xf32> -> vector<8x64xf32>
    %581 = vector.broadcast %10 : vector<1x64xf32> to vector<8x64xf32>
    %582 = arith.addf %580, %581 : vector<8x64xf32>
    %583 = arith.negf %582 : vector<8x64xf32>
    %584 = math.exp %583 : vector<8x64xf32>
    %cst_253 = arith.constant 1.000000e+00 : f32
    %585 = vector.broadcast %cst_253 : f32 to vector<8x64xf32>
    %586 = arith.addf %585, %584 : vector<8x64xf32>
    %587 = arith.divf %585, %586 : vector<8x64xf32>
    %588 = arith.mulf %582, %587 : vector<8x64xf32>
    %589 = arith.addf %579, %588 : vector<8x64xf32>
    %cst_254 = arith.constant dense<0.000000e+00> : vector<8x1xf32>
    %590 = tpu.matmul %589, %11, %cst_254 {dimension_numbers = #tpu.dot_dimension_numbers<[1], [0], [0], [1], [0, 0, 1, 1], [], []>} : vector<8x64xf32>, vector<64x1xf32>, vector<8x1xf32> -> vector<8x1xf32>
    %591 = vector.broadcast %12 : vector<1x1xf32> to vector<8x1xf32>
    %592 = arith.addf %590, %591 : vector<8x1xf32>
    %c4_255 = arith.constant 4 : index
    %c0_256 = arith.constant 0 : index
    %593 = memref.load %arg6[%c4_255, %c0_256] : memref<7x4xf32, #tpu.memory_space<smem>>
    %c4_257 = arith.constant 4 : index
    %c1_258 = arith.constant 1 : index
    %594 = memref.load %arg6[%c4_257, %c1_258] : memref<7x4xf32, #tpu.memory_space<smem>>
    %c4_259 = arith.constant 4 : index
    %c2_260 = arith.constant 2 : index
    %595 = memref.load %arg6[%c4_259, %c2_260] : memref<7x4xf32, #tpu.memory_space<smem>>
    %c4_261 = arith.constant 4 : index
    %c3_262 = arith.constant 3 : index
    %596 = memref.load %arg6[%c4_261, %c3_262] : memref<7x4xf32, #tpu.memory_space<smem>>
    %597 = vector.broadcast %593 : f32 to vector<8x1xf32>
    %598 = arith.mulf %597, %592 : vector<8x1xf32>
    %599 = arith.subf %566, %598 : vector<8x1xf32>
    %600 = vector.broadcast %594 : f32 to vector<8x1xf32>
    %601 = arith.mulf %600, %599 : vector<8x1xf32>
    %602 = vector.broadcast %595 : f32 to vector<8x1xf32>
    %603 = arith.mulf %602, %566 : vector<8x1xf32>
    %604 = arith.addf %601, %603 : vector<8x1xf32>
    %c1_263 = arith.constant 1 : index
    %c4_264 = arith.constant 4 : index
    %c0_265 = arith.constant 0 : index
    %c0_266 = arith.constant 0 : index
    %605 = vector.load %arg4[%c1_263, %c4_264, %c0_265, %c0_266] : memref<4x7x8x1xf32, #tpu.memory_space<vmem>>, vector<1x1x8x1xf32>
    %606 = vector.shape_cast %605 : vector<1x1x8x1xf32> to vector<8x1xf32>
    %607 = vector.broadcast %596 : f32 to vector<8x1xf32>
    %608 = arith.mulf %607, %606 : vector<8x1xf32>
    %609 = arith.addf %604, %608 : vector<8x1xf32>
    %c5_267 = arith.constant 5 : index
    %c0_268 = arith.constant 0 : index
    %610 = vector.load %arg5[%c5_267, %c0_268] : memref<7x64xf32, #tpu.memory_space<vmem>>, vector<1x64xf32>
    %611 = vector.broadcast %609 : vector<8x1xf32> to vector<8x64xf32>
    %612 = vector.broadcast %6 : vector<1x64xf32> to vector<8x64xf32>
    %613 = arith.mulf %611, %612 : vector<8x64xf32>
    %614 = arith.addf %613, %394 : vector<8x64xf32>
    %615 = vector.broadcast %610 : vector<1x64xf32> to vector<8x64xf32>
    %616 = arith.addf %614, %615 : vector<8x64xf32>
    %617 = arith.negf %616 : vector<8x64xf32>
    %618 = math.exp %617 : vector<8x64xf32>
    %cst_269 = arith.constant 1.000000e+00 : f32
    %619 = vector.broadcast %cst_269 : f32 to vector<8x64xf32>
    %620 = arith.addf %619, %618 : vector<8x64xf32>
    %621 = arith.divf %619, %620 : vector<8x64xf32>
    %622 = arith.mulf %616, %621 : vector<8x64xf32>
    %cst_270 = arith.constant dense<0.000000e+00> : vector<8x64xf32>
    %623 = tpu.matmul %622, %9, %cst_270 {dimension_numbers = #tpu.dot_dimension_numbers<[1], [0], [0], [1], [0, 0, 1, 1], [], []>} : vector<8x64xf32>, vector<64x64xf32>, vector<8x64xf32> -> vector<8x64xf32>
    %624 = vector.broadcast %10 : vector<1x64xf32> to vector<8x64xf32>
    %625 = arith.addf %623, %624 : vector<8x64xf32>
    %626 = arith.negf %625 : vector<8x64xf32>
    %627 = math.exp %626 : vector<8x64xf32>
    %cst_271 = arith.constant 1.000000e+00 : f32
    %628 = vector.broadcast %cst_271 : f32 to vector<8x64xf32>
    %629 = arith.addf %628, %627 : vector<8x64xf32>
    %630 = arith.divf %628, %629 : vector<8x64xf32>
    %631 = arith.mulf %625, %630 : vector<8x64xf32>
    %632 = arith.addf %622, %631 : vector<8x64xf32>
    %cst_272 = arith.constant dense<0.000000e+00> : vector<8x1xf32>
    %633 = tpu.matmul %632, %11, %cst_272 {dimension_numbers = #tpu.dot_dimension_numbers<[1], [0], [0], [1], [0, 0, 1, 1], [], []>} : vector<8x64xf32>, vector<64x1xf32>, vector<8x1xf32> -> vector<8x1xf32>
    %634 = vector.broadcast %12 : vector<1x1xf32> to vector<8x1xf32>
    %635 = arith.addf %633, %634 : vector<8x1xf32>
    %c5_273 = arith.constant 5 : index
    %c0_274 = arith.constant 0 : index
    %636 = memref.load %arg6[%c5_273, %c0_274] : memref<7x4xf32, #tpu.memory_space<smem>>
    %c5_275 = arith.constant 5 : index
    %c1_276 = arith.constant 1 : index
    %637 = memref.load %arg6[%c5_275, %c1_276] : memref<7x4xf32, #tpu.memory_space<smem>>
    %c5_277 = arith.constant 5 : index
    %c2_278 = arith.constant 2 : index
    %638 = memref.load %arg6[%c5_277, %c2_278] : memref<7x4xf32, #tpu.memory_space<smem>>
    %c5_279 = arith.constant 5 : index
    %c3_280 = arith.constant 3 : index
    %639 = memref.load %arg6[%c5_279, %c3_280] : memref<7x4xf32, #tpu.memory_space<smem>>
    %640 = vector.broadcast %636 : f32 to vector<8x1xf32>
    %641 = arith.mulf %640, %635 : vector<8x1xf32>
    %642 = arith.subf %609, %641 : vector<8x1xf32>
    %643 = vector.broadcast %637 : f32 to vector<8x1xf32>
    %644 = arith.mulf %643, %642 : vector<8x1xf32>
    %645 = vector.broadcast %638 : f32 to vector<8x1xf32>
    %646 = arith.mulf %645, %609 : vector<8x1xf32>
    %647 = arith.addf %644, %646 : vector<8x1xf32>
    %c1_281 = arith.constant 1 : index
    %c5_282 = arith.constant 5 : index
    %c0_283 = arith.constant 0 : index
    %c0_284 = arith.constant 0 : index
    %648 = vector.load %arg4[%c1_281, %c5_282, %c0_283, %c0_284] : memref<4x7x8x1xf32, #tpu.memory_space<vmem>>, vector<1x1x8x1xf32>
    %649 = vector.shape_cast %648 : vector<1x1x8x1xf32> to vector<8x1xf32>
    %650 = vector.broadcast %639 : f32 to vector<8x1xf32>
    %651 = arith.mulf %650, %649 : vector<8x1xf32>
    %652 = arith.addf %647, %651 : vector<8x1xf32>
    %c6_285 = arith.constant 6 : index
    %c0_286 = arith.constant 0 : index
    %653 = vector.load %arg5[%c6_285, %c0_286] : memref<7x64xf32, #tpu.memory_space<vmem>>, vector<1x64xf32>
    %654 = vector.broadcast %652 : vector<8x1xf32> to vector<8x64xf32>
    %655 = vector.broadcast %6 : vector<1x64xf32> to vector<8x64xf32>
    %656 = arith.mulf %654, %655 : vector<8x64xf32>
    %657 = arith.addf %656, %394 : vector<8x64xf32>
    %658 = vector.broadcast %653 : vector<1x64xf32> to vector<8x64xf32>
    %659 = arith.addf %657, %658 : vector<8x64xf32>
    %660 = arith.negf %659 : vector<8x64xf32>
    %661 = math.exp %660 : vector<8x64xf32>
    %cst_287 = arith.constant 1.000000e+00 : f32
    %662 = vector.broadcast %cst_287 : f32 to vector<8x64xf32>
    %663 = arith.addf %662, %661 : vector<8x64xf32>
    %664 = arith.divf %662, %663 : vector<8x64xf32>
    %665 = arith.mulf %659, %664 : vector<8x64xf32>
    %cst_288 = arith.constant dense<0.000000e+00> : vector<8x64xf32>
    %666 = tpu.matmul %665, %9, %cst_288 {dimension_numbers = #tpu.dot_dimension_numbers<[1], [0], [0], [1], [0, 0, 1, 1], [], []>} : vector<8x64xf32>, vector<64x64xf32>, vector<8x64xf32> -> vector<8x64xf32>
    %667 = vector.broadcast %10 : vector<1x64xf32> to vector<8x64xf32>
    %668 = arith.addf %666, %667 : vector<8x64xf32>
    %669 = arith.negf %668 : vector<8x64xf32>
    %670 = math.exp %669 : vector<8x64xf32>
    %cst_289 = arith.constant 1.000000e+00 : f32
    %671 = vector.broadcast %cst_289 : f32 to vector<8x64xf32>
    %672 = arith.addf %671, %670 : vector<8x64xf32>
    %673 = arith.divf %671, %672 : vector<8x64xf32>
    %674 = arith.mulf %668, %673 : vector<8x64xf32>
    %675 = arith.addf %665, %674 : vector<8x64xf32>
    %cst_290 = arith.constant dense<0.000000e+00> : vector<8x1xf32>
    %676 = tpu.matmul %675, %11, %cst_290 {dimension_numbers = #tpu.dot_dimension_numbers<[1], [0], [0], [1], [0, 0, 1, 1], [], []>} : vector<8x64xf32>, vector<64x1xf32>, vector<8x1xf32> -> vector<8x1xf32>
    %677 = vector.broadcast %12 : vector<1x1xf32> to vector<8x1xf32>
    %678 = arith.addf %676, %677 : vector<8x1xf32>
    %c6_291 = arith.constant 6 : index
    %c0_292 = arith.constant 0 : index
    %679 = memref.load %arg6[%c6_291, %c0_292] : memref<7x4xf32, #tpu.memory_space<smem>>
    %c6_293 = arith.constant 6 : index
    %c1_294 = arith.constant 1 : index
    %680 = memref.load %arg6[%c6_293, %c1_294] : memref<7x4xf32, #tpu.memory_space<smem>>
    %c6_295 = arith.constant 6 : index
    %c2_296 = arith.constant 2 : index
    %681 = memref.load %arg6[%c6_295, %c2_296] : memref<7x4xf32, #tpu.memory_space<smem>>
    %c6_297 = arith.constant 6 : index
    %c3_298 = arith.constant 3 : index
    %682 = memref.load %arg6[%c6_297, %c3_298] : memref<7x4xf32, #tpu.memory_space<smem>>
    %683 = vector.broadcast %679 : f32 to vector<8x1xf32>
    %684 = arith.mulf %683, %678 : vector<8x1xf32>
    %685 = arith.subf %652, %684 : vector<8x1xf32>
    %686 = vector.broadcast %680 : f32 to vector<8x1xf32>
    %687 = arith.mulf %686, %685 : vector<8x1xf32>
    %688 = vector.broadcast %681 : f32 to vector<8x1xf32>
    %689 = arith.mulf %688, %652 : vector<8x1xf32>
    %690 = arith.addf %687, %689 : vector<8x1xf32>
    %c1_299 = arith.constant 1 : index
    %c6_300 = arith.constant 6 : index
    %c0_301 = arith.constant 0 : index
    %c0_302 = arith.constant 0 : index
    %691 = vector.load %arg4[%c1_299, %c6_300, %c0_301, %c0_302] : memref<4x7x8x1xf32, #tpu.memory_space<vmem>>, vector<1x1x8x1xf32>
    %692 = vector.shape_cast %691 : vector<1x1x8x1xf32> to vector<8x1xf32>
    %693 = vector.broadcast %682 : f32 to vector<8x1xf32>
    %694 = arith.mulf %693, %692 : vector<8x1xf32>
    %695 = arith.addf %690, %694 : vector<8x1xf32>
    %c0_303 = arith.constant 0 : index
    %c1_304 = arith.constant 1 : index
    %696 = vector.load %arg20[%c0_303, %c1_304] : memref<8x4xf32, #tpu.memory_space<vmem>>, vector<8x1xf32>
    tpu.vector_store %arg20[%c0_303, %c1_304], %695 {strides = array<i32>} : memref<8x4xf32, #tpu.memory_space<vmem>>, vector<8x1xf32>,
    %697 = tpu.concatenate %695, %326, %22 in 1 : vector<8x1xf32>, vector<8x1xf32>, vector<8x1xf32> -> vector<8x3xf32>
    %c2_305 = arith.constant 2 : index
    %c0_306 = arith.constant 0 : index
    %c0_307 = arith.constant 0 : index
    %698 = vector.load %arg3[%c2_305, %c0_306, %c0_307] : memref<4x8x7xf32, #tpu.memory_space<vmem>>, vector<1x8x7xf32>
    %699 = vector.shape_cast %698 : vector<1x8x7xf32> to vector<8x7xf32>
    %700 = tpu.concatenate %697, %699 in 1 : vector<8x3xf32>, vector<8x7xf32> -> vector<8x10xf32>
    %cst_308 = arith.constant dense<0.000000e+00> : vector<8x128xf32>
    %701 = tpu.matmul %700, %0, %cst_308 {dimension_numbers = #tpu.dot_dimension_numbers<[1], [0], [0], [1], [0, 0, 1, 1], [], []>} : vector<8x10xf32>, vector<10x128xf32>, vector<8x128xf32> -> vector<8x128xf32>
    %cst_309 = arith.constant dense<0.000000e+00> : vector<8x128xf32>
    %702 = tpu.matmul %361, %1, %cst_309 {dimension_numbers = #tpu.dot_dimension_numbers<[1], [0], [0], [1], [0, 0, 1, 1], [], []>} : vector<8x32xf32>, vector<32x128xf32>, vector<8x128xf32> -> vector<8x128xf32>
    %703 = arith.addf %701, %702 : vector<8x128xf32>
    %704 = vector.broadcast %2 : vector<1x128xf32> to vector<8x128xf32>
    %705 = arith.addf %703, %704 : vector<8x128xf32>
    %706 = vector.extract_strided_slice %705 {offsets = [0, 0], sizes = [8, 32], strides = [1, 1]} : vector<8x128xf32> to vector<8x32xf32>
    %707 = arith.negf %706 : vector<8x32xf32>
    %708 = math.exp %707 : vector<8x32xf32>
    %cst_310 = arith.constant 1.000000e+00 : f32
    %709 = vector.broadcast %cst_310 : f32 to vector<8x32xf32>
    %710 = arith.addf %709, %708 : vector<8x32xf32>
    %711 = arith.divf %709, %710 : vector<8x32xf32>
    %712 = vector.extract_strided_slice %705 {offsets = [0, 32], sizes = [8, 32], strides = [1, 1]} : vector<8x128xf32> to vector<8x32xf32>
    %713 = arith.negf %712 : vector<8x32xf32>
    %714 = math.exp %713 : vector<8x32xf32>
    %cst_311 = arith.constant 1.000000e+00 : f32
    %715 = vector.broadcast %cst_311 : f32 to vector<8x32xf32>
    %716 = arith.addf %715, %714 : vector<8x32xf32>
    %717 = arith.divf %715, %716 : vector<8x32xf32>
    %718 = vector.extract_strided_slice %705 {offsets = [0, 64], sizes = [8, 32], strides = [1, 1]} : vector<8x128xf32> to vector<8x32xf32>
    %719 = math.tanh %718 : vector<8x32xf32>
    %720 = vector.extract_strided_slice %705 {offsets = [0, 96], sizes = [8, 32], strides = [1, 1]} : vector<8x128xf32> to vector<8x32xf32>
    %721 = arith.negf %720 : vector<8x32xf32>
    %722 = math.exp %721 : vector<8x32xf32>
    %cst_312 = arith.constant 1.000000e+00 : f32
    %723 = vector.broadcast %cst_312 : f32 to vector<8x32xf32>
    %724 = arith.addf %723, %722 : vector<8x32xf32>
    %725 = arith.divf %723, %724 : vector<8x32xf32>
    %726 = arith.mulf %717, %359 : vector<8x32xf32>
    %727 = arith.mulf %711, %719 : vector<8x32xf32>
    %728 = arith.addf %726, %727 : vector<8x32xf32>
    %729 = math.tanh %728 : vector<8x32xf32>
    %730 = arith.mulf %725, %729 : vector<8x32xf32>
    %cst_313 = arith.constant dense<0.000000e+00> : vector<8x128xf32>
    %731 = tpu.matmul %730, %3, %cst_313 {dimension_numbers = #tpu.dot_dimension_numbers<[1], [0], [0], [1], [0, 0, 1, 1], [], []>} : vector<8x32xf32>, vector<32x128xf32>, vector<8x128xf32> -> vector<8x128xf32>
    %cst_314 = arith.constant dense<0.000000e+00> : vector<8x128xf32>
    %732 = tpu.matmul %391, %4, %cst_314 {dimension_numbers = #tpu.dot_dimension_numbers<[1], [0], [0], [1], [0, 0, 1, 1], [], []>} : vector<8x32xf32>, vector<32x128xf32>, vector<8x128xf32> -> vector<8x128xf32>
    %733 = arith.addf %731, %732 : vector<8x128xf32>
    %734 = vector.broadcast %5 : vector<1x128xf32> to vector<8x128xf32>
    %735 = arith.addf %733, %734 : vector<8x128xf32>
    %736 = vector.extract_strided_slice %735 {offsets = [0, 0], sizes = [8, 32], strides = [1, 1]} : vector<8x128xf32> to vector<8x32xf32>
    %737 = arith.negf %736 : vector<8x32xf32>
    %738 = math.exp %737 : vector<8x32xf32>
    %cst_315 = arith.constant 1.000000e+00 : f32
    %739 = vector.broadcast %cst_315 : f32 to vector<8x32xf32>
    %740 = arith.addf %739, %738 : vector<8x32xf32>
    %741 = arith.divf %739, %740 : vector<8x32xf32>
    %742 = vector.extract_strided_slice %735 {offsets = [0, 32], sizes = [8, 32], strides = [1, 1]} : vector<8x128xf32> to vector<8x32xf32>
    %743 = arith.negf %742 : vector<8x32xf32>
    %744 = math.exp %743 : vector<8x32xf32>
    %cst_316 = arith.constant 1.000000e+00 : f32
    %745 = vector.broadcast %cst_316 : f32 to vector<8x32xf32>
    %746 = arith.addf %745, %744 : vector<8x32xf32>
    %747 = arith.divf %745, %746 : vector<8x32xf32>
    %748 = vector.extract_strided_slice %735 {offsets = [0, 64], sizes = [8, 32], strides = [1, 1]} : vector<8x128xf32> to vector<8x32xf32>
    %749 = math.tanh %748 : vector<8x32xf32>
    %750 = vector.extract_strided_slice %735 {offsets = [0, 96], sizes = [8, 32], strides = [1, 1]} : vector<8x128xf32> to vector<8x32xf32>
    %751 = arith.negf %750 : vector<8x32xf32>
    %752 = math.exp %751 : vector<8x32xf32>
    %cst_317 = arith.constant 1.000000e+00 : f32
    %753 = vector.broadcast %cst_317 : f32 to vector<8x32xf32>
    %754 = arith.addf %753, %752 : vector<8x32xf32>
    %755 = arith.divf %753, %754 : vector<8x32xf32>
    %756 = arith.mulf %747, %389 : vector<8x32xf32>
    %757 = arith.mulf %741, %749 : vector<8x32xf32>
    %758 = arith.addf %756, %757 : vector<8x32xf32>
    %759 = math.tanh %758 : vector<8x32xf32>
    %760 = arith.mulf %755, %759 : vector<8x32xf32>
    %cst_318 = arith.constant dense<0.000000e+00> : vector<8x64xf32>
    %761 = tpu.matmul %760, %7, %cst_318 {dimension_numbers = #tpu.dot_dimension_numbers<[1], [0], [0], [1], [0, 0, 1, 1], [], []>} : vector<8x32xf32>, vector<32x64xf32>, vector<8x64xf32> -> vector<8x64xf32>
    %762 = vector.broadcast %8 : vector<1x64xf32> to vector<8x64xf32>
    %763 = arith.addf %761, %762 : vector<8x64xf32>
    %c0_319 = arith.constant 0 : index
    %c0_320 = arith.constant 0 : index
    %764 = vector.load %arg5[%c0_319, %c0_320] : memref<7x64xf32, #tpu.memory_space<vmem>>, vector<1x64xf32>
    %765 = vector.broadcast %695 : vector<8x1xf32> to vector<8x64xf32>
    %766 = vector.broadcast %6 : vector<1x64xf32> to vector<8x64xf32>
    %767 = arith.mulf %765, %766 : vector<8x64xf32>
    %768 = arith.addf %767, %763 : vector<8x64xf32>
    %769 = vector.broadcast %764 : vector<1x64xf32> to vector<8x64xf32>
    %770 = arith.addf %768, %769 : vector<8x64xf32>
    %771 = arith.negf %770 : vector<8x64xf32>
    %772 = math.exp %771 : vector<8x64xf32>
    %cst_321 = arith.constant 1.000000e+00 : f32
    %773 = vector.broadcast %cst_321 : f32 to vector<8x64xf32>
    %774 = arith.addf %773, %772 : vector<8x64xf32>
    %775 = arith.divf %773, %774 : vector<8x64xf32>
    %776 = arith.mulf %770, %775 : vector<8x64xf32>
    %cst_322 = arith.constant dense<0.000000e+00> : vector<8x64xf32>
    %777 = tpu.matmul %776, %9, %cst_322 {dimension_numbers = #tpu.dot_dimension_numbers<[1], [0], [0], [1], [0, 0, 1, 1], [], []>} : vector<8x64xf32>, vector<64x64xf32>, vector<8x64xf32> -> vector<8x64xf32>
    %778 = vector.broadcast %10 : vector<1x64xf32> to vector<8x64xf32>
    %779 = arith.addf %777, %778 : vector<8x64xf32>
    %780 = arith.negf %779 : vector<8x64xf32>
    %781 = math.exp %780 : vector<8x64xf32>
    %cst_323 = arith.constant 1.000000e+00 : f32
    %782 = vector.broadcast %cst_323 : f32 to vector<8x64xf32>
    %783 = arith.addf %782, %781 : vector<8x64xf32>
    %784 = arith.divf %782, %783 : vector<8x64xf32>
    %785 = arith.mulf %779, %784 : vector<8x64xf32>
    %786 = arith.addf %776, %785 : vector<8x64xf32>
    %cst_324 = arith.constant dense<0.000000e+00> : vector<8x1xf32>
    %787 = tpu.matmul %786, %11, %cst_324 {dimension_numbers = #tpu.dot_dimension_numbers<[1], [0], [0], [1], [0, 0, 1, 1], [], []>} : vector<8x64xf32>, vector<64x1xf32>, vector<8x1xf32> -> vector<8x1xf32>
    %788 = vector.broadcast %12 : vector<1x1xf32> to vector<8x1xf32>
    %789 = arith.addf %787, %788 : vector<8x1xf32>
    %c0_325 = arith.constant 0 : index
    %c0_326 = arith.constant 0 : index
    %790 = memref.load %arg6[%c0_325, %c0_326] : memref<7x4xf32, #tpu.memory_space<smem>>
    %c0_327 = arith.constant 0 : index
    %c1_328 = arith.constant 1 : index
    %791 = memref.load %arg6[%c0_327, %c1_328] : memref<7x4xf32, #tpu.memory_space<smem>>
    %c0_329 = arith.constant 0 : index
    %c2_330 = arith.constant 2 : index
    %792 = memref.load %arg6[%c0_329, %c2_330] : memref<7x4xf32, #tpu.memory_space<smem>>
    %c0_331 = arith.constant 0 : index
    %c3_332 = arith.constant 3 : index
    %793 = memref.load %arg6[%c0_331, %c3_332] : memref<7x4xf32, #tpu.memory_space<smem>>
    %794 = vector.broadcast %790 : f32 to vector<8x1xf32>
    %795 = arith.mulf %794, %789 : vector<8x1xf32>
    %796 = arith.subf %695, %795 : vector<8x1xf32>
    %797 = vector.broadcast %791 : f32 to vector<8x1xf32>
    %798 = arith.mulf %797, %796 : vector<8x1xf32>
    %799 = vector.broadcast %792 : f32 to vector<8x1xf32>
    %800 = arith.mulf %799, %695 : vector<8x1xf32>
    %801 = arith.addf %798, %800 : vector<8x1xf32>
    %c2_333 = arith.constant 2 : index
    %c0_334 = arith.constant 0 : index
    %c0_335 = arith.constant 0 : index
    %c0_336 = arith.constant 0 : index
    %802 = vector.load %arg4[%c2_333, %c0_334, %c0_335, %c0_336] : memref<4x7x8x1xf32, #tpu.memory_space<vmem>>, vector<1x1x8x1xf32>
    %803 = vector.shape_cast %802 : vector<1x1x8x1xf32> to vector<8x1xf32>
    %804 = vector.broadcast %793 : f32 to vector<8x1xf32>
    %805 = arith.mulf %804, %803 : vector<8x1xf32>
    %806 = arith.addf %801, %805 : vector<8x1xf32>
    %c1_337 = arith.constant 1 : index
    %c0_338 = arith.constant 0 : index
    %807 = vector.load %arg5[%c1_337, %c0_338] : memref<7x64xf32, #tpu.memory_space<vmem>>, vector<1x64xf32>
    %808 = vector.broadcast %806 : vector<8x1xf32> to vector<8x64xf32>
    %809 = vector.broadcast %6 : vector<1x64xf32> to vector<8x64xf32>
    %810 = arith.mulf %808, %809 : vector<8x64xf32>
    %811 = arith.addf %810, %763 : vector<8x64xf32>
    %812 = vector.broadcast %807 : vector<1x64xf32> to vector<8x64xf32>
    %813 = arith.addf %811, %812 : vector<8x64xf32>
    %814 = arith.negf %813 : vector<8x64xf32>
    %815 = math.exp %814 : vector<8x64xf32>
    %cst_339 = arith.constant 1.000000e+00 : f32
    %816 = vector.broadcast %cst_339 : f32 to vector<8x64xf32>
    %817 = arith.addf %816, %815 : vector<8x64xf32>
    %818 = arith.divf %816, %817 : vector<8x64xf32>
    %819 = arith.mulf %813, %818 : vector<8x64xf32>
    %cst_340 = arith.constant dense<0.000000e+00> : vector<8x64xf32>
    %820 = tpu.matmul %819, %9, %cst_340 {dimension_numbers = #tpu.dot_dimension_numbers<[1], [0], [0], [1], [0, 0, 1, 1], [], []>} : vector<8x64xf32>, vector<64x64xf32>, vector<8x64xf32> -> vector<8x64xf32>
    %821 = vector.broadcast %10 : vector<1x64xf32> to vector<8x64xf32>
    %822 = arith.addf %820, %821 : vector<8x64xf32>
    %823 = arith.negf %822 : vector<8x64xf32>
    %824 = math.exp %823 : vector<8x64xf32>
    %cst_341 = arith.constant 1.000000e+00 : f32
    %825 = vector.broadcast %cst_341 : f32 to vector<8x64xf32>
    %826 = arith.addf %825, %824 : vector<8x64xf32>
    %827 = arith.divf %825, %826 : vector<8x64xf32>
    %828 = arith.mulf %822, %827 : vector<8x64xf32>
    %829 = arith.addf %819, %828 : vector<8x64xf32>
    %cst_342 = arith.constant dense<0.000000e+00> : vector<8x1xf32>
    %830 = tpu.matmul %829, %11, %cst_342 {dimension_numbers = #tpu.dot_dimension_numbers<[1], [0], [0], [1], [0, 0, 1, 1], [], []>} : vector<8x64xf32>, vector<64x1xf32>, vector<8x1xf32> -> vector<8x1xf32>
    %831 = vector.broadcast %12 : vector<1x1xf32> to vector<8x1xf32>
    %832 = arith.addf %830, %831 : vector<8x1xf32>
    %c1_343 = arith.constant 1 : index
    %c0_344 = arith.constant 0 : index
    %833 = memref.load %arg6[%c1_343, %c0_344] : memref<7x4xf32, #tpu.memory_space<smem>>
    %c1_345 = arith.constant 1 : index
    %c1_346 = arith.constant 1 : index
    %834 = memref.load %arg6[%c1_345, %c1_346] : memref<7x4xf32, #tpu.memory_space<smem>>
    %c1_347 = arith.constant 1 : index
    %c2_348 = arith.constant 2 : index
    %835 = memref.load %arg6[%c1_347, %c2_348] : memref<7x4xf32, #tpu.memory_space<smem>>
    %c1_349 = arith.constant 1 : index
    %c3_350 = arith.constant 3 : index
    %836 = memref.load %arg6[%c1_349, %c3_350] : memref<7x4xf32, #tpu.memory_space<smem>>
    %837 = vector.broadcast %833 : f32 to vector<8x1xf32>
    %838 = arith.mulf %837, %832 : vector<8x1xf32>
    %839 = arith.subf %806, %838 : vector<8x1xf32>
    %840 = vector.broadcast %834 : f32 to vector<8x1xf32>
    %841 = arith.mulf %840, %839 : vector<8x1xf32>
    %842 = vector.broadcast %835 : f32 to vector<8x1xf32>
    %843 = arith.mulf %842, %806 : vector<8x1xf32>
    %844 = arith.addf %841, %843 : vector<8x1xf32>
    %c2_351 = arith.constant 2 : index
    %c1_352 = arith.constant 1 : index
    %c0_353 = arith.constant 0 : index
    %c0_354 = arith.constant 0 : index
    %845 = vector.load %arg4[%c2_351, %c1_352, %c0_353, %c0_354] : memref<4x7x8x1xf32, #tpu.memory_space<vmem>>, vector<1x1x8x1xf32>
    %846 = vector.shape_cast %845 : vector<1x1x8x1xf32> to vector<8x1xf32>
    %847 = vector.broadcast %836 : f32 to vector<8x1xf32>
    %848 = arith.mulf %847, %846 : vector<8x1xf32>
    %849 = arith.addf %844, %848 : vector<8x1xf32>
    %c2_355 = arith.constant 2 : index
    %c0_356 = arith.constant 0 : index
    %850 = vector.load %arg5[%c2_355, %c0_356] : memref<7x64xf32, #tpu.memory_space<vmem>>, vector<1x64xf32>
    %851 = vector.broadcast %849 : vector<8x1xf32> to vector<8x64xf32>
    %852 = vector.broadcast %6 : vector<1x64xf32> to vector<8x64xf32>
    %853 = arith.mulf %851, %852 : vector<8x64xf32>
    %854 = arith.addf %853, %763 : vector<8x64xf32>
    %855 = vector.broadcast %850 : vector<1x64xf32> to vector<8x64xf32>
    %856 = arith.addf %854, %855 : vector<8x64xf32>
    %857 = arith.negf %856 : vector<8x64xf32>
    %858 = math.exp %857 : vector<8x64xf32>
    %cst_357 = arith.constant 1.000000e+00 : f32
    %859 = vector.broadcast %cst_357 : f32 to vector<8x64xf32>
    %860 = arith.addf %859, %858 : vector<8x64xf32>
    %861 = arith.divf %859, %860 : vector<8x64xf32>
    %862 = arith.mulf %856, %861 : vector<8x64xf32>
    %cst_358 = arith.constant dense<0.000000e+00> : vector<8x64xf32>
    %863 = tpu.matmul %862, %9, %cst_358 {dimension_numbers = #tpu.dot_dimension_numbers<[1], [0], [0], [1], [0, 0, 1, 1], [], []>} : vector<8x64xf32>, vector<64x64xf32>, vector<8x64xf32> -> vector<8x64xf32>
    %864 = vector.broadcast %10 : vector<1x64xf32> to vector<8x64xf32>
    %865 = arith.addf %863, %864 : vector<8x64xf32>
    %866 = arith.negf %865 : vector<8x64xf32>
    %867 = math.exp %866 : vector<8x64xf32>
    %cst_359 = arith.constant 1.000000e+00 : f32
    %868 = vector.broadcast %cst_359 : f32 to vector<8x64xf32>
    %869 = arith.addf %868, %867 : vector<8x64xf32>
    %870 = arith.divf %868, %869 : vector<8x64xf32>
    %871 = arith.mulf %865, %870 : vector<8x64xf32>
    %872 = arith.addf %862, %871 : vector<8x64xf32>
    %cst_360 = arith.constant dense<0.000000e+00> : vector<8x1xf32>
    %873 = tpu.matmul %872, %11, %cst_360 {dimension_numbers = #tpu.dot_dimension_numbers<[1], [0], [0], [1], [0, 0, 1, 1], [], []>} : vector<8x64xf32>, vector<64x1xf32>, vector<8x1xf32> -> vector<8x1xf32>
    %874 = vector.broadcast %12 : vector<1x1xf32> to vector<8x1xf32>
    %875 = arith.addf %873, %874 : vector<8x1xf32>
    %c2_361 = arith.constant 2 : index
    %c0_362 = arith.constant 0 : index
    %876 = memref.load %arg6[%c2_361, %c0_362] : memref<7x4xf32, #tpu.memory_space<smem>>
    %c2_363 = arith.constant 2 : index
    %c1_364 = arith.constant 1 : index
    %877 = memref.load %arg6[%c2_363, %c1_364] : memref<7x4xf32, #tpu.memory_space<smem>>
    %c2_365 = arith.constant 2 : index
    %c2_366 = arith.constant 2 : index
    %878 = memref.load %arg6[%c2_365, %c2_366] : memref<7x4xf32, #tpu.memory_space<smem>>
    %c2_367 = arith.constant 2 : index
    %c3_368 = arith.constant 3 : index
    %879 = memref.load %arg6[%c2_367, %c3_368] : memref<7x4xf32, #tpu.memory_space<smem>>
    %880 = vector.broadcast %876 : f32 to vector<8x1xf32>
    %881 = arith.mulf %880, %875 : vector<8x1xf32>
    %882 = arith.subf %849, %881 : vector<8x1xf32>
    %883 = vector.broadcast %877 : f32 to vector<8x1xf32>
    %884 = arith.mulf %883, %882 : vector<8x1xf32>
    %885 = vector.broadcast %878 : f32 to vector<8x1xf32>
    %886 = arith.mulf %885, %849 : vector<8x1xf32>
    %887 = arith.addf %884, %886 : vector<8x1xf32>
    %c2_369 = arith.constant 2 : index
    %c2_370 = arith.constant 2 : index
    %c0_371 = arith.constant 0 : index
    %c0_372 = arith.constant 0 : index
    %888 = vector.load %arg4[%c2_369, %c2_370, %c0_371, %c0_372] : memref<4x7x8x1xf32, #tpu.memory_space<vmem>>, vector<1x1x8x1xf32>
    %889 = vector.shape_cast %888 : vector<1x1x8x1xf32> to vector<8x1xf32>
    %890 = vector.broadcast %879 : f32 to vector<8x1xf32>
    %891 = arith.mulf %890, %889 : vector<8x1xf32>
    %892 = arith.addf %887, %891 : vector<8x1xf32>
    %c3_373 = arith.constant 3 : index
    %c0_374 = arith.constant 0 : index
    %893 = vector.load %arg5[%c3_373, %c0_374] : memref<7x64xf32, #tpu.memory_space<vmem>>, vector<1x64xf32>
    %894 = vector.broadcast %892 : vector<8x1xf32> to vector<8x64xf32>
    %895 = vector.broadcast %6 : vector<1x64xf32> to vector<8x64xf32>
    %896 = arith.mulf %894, %895 : vector<8x64xf32>
    %897 = arith.addf %896, %763 : vector<8x64xf32>
    %898 = vector.broadcast %893 : vector<1x64xf32> to vector<8x64xf32>
    %899 = arith.addf %897, %898 : vector<8x64xf32>
    %900 = arith.negf %899 : vector<8x64xf32>
    %901 = math.exp %900 : vector<8x64xf32>
    %cst_375 = arith.constant 1.000000e+00 : f32
    %902 = vector.broadcast %cst_375 : f32 to vector<8x64xf32>
    %903 = arith.addf %902, %901 : vector<8x64xf32>
    %904 = arith.divf %902, %903 : vector<8x64xf32>
    %905 = arith.mulf %899, %904 : vector<8x64xf32>
    %cst_376 = arith.constant dense<0.000000e+00> : vector<8x64xf32>
    %906 = tpu.matmul %905, %9, %cst_376 {dimension_numbers = #tpu.dot_dimension_numbers<[1], [0], [0], [1], [0, 0, 1, 1], [], []>} : vector<8x64xf32>, vector<64x64xf32>, vector<8x64xf32> -> vector<8x64xf32>
    %907 = vector.broadcast %10 : vector<1x64xf32> to vector<8x64xf32>
    %908 = arith.addf %906, %907 : vector<8x64xf32>
    %909 = arith.negf %908 : vector<8x64xf32>
    %910 = math.exp %909 : vector<8x64xf32>
    %cst_377 = arith.constant 1.000000e+00 : f32
    %911 = vector.broadcast %cst_377 : f32 to vector<8x64xf32>
    %912 = arith.addf %911, %910 : vector<8x64xf32>
    %913 = arith.divf %911, %912 : vector<8x64xf32>
    %914 = arith.mulf %908, %913 : vector<8x64xf32>
    %915 = arith.addf %905, %914 : vector<8x64xf32>
    %cst_378 = arith.constant dense<0.000000e+00> : vector<8x1xf32>
    %916 = tpu.matmul %915, %11, %cst_378 {dimension_numbers = #tpu.dot_dimension_numbers<[1], [0], [0], [1], [0, 0, 1, 1], [], []>} : vector<8x64xf32>, vector<64x1xf32>, vector<8x1xf32> -> vector<8x1xf32>
    %917 = vector.broadcast %12 : vector<1x1xf32> to vector<8x1xf32>
    %918 = arith.addf %916, %917 : vector<8x1xf32>
    %c3_379 = arith.constant 3 : index
    %c0_380 = arith.constant 0 : index
    %919 = memref.load %arg6[%c3_379, %c0_380] : memref<7x4xf32, #tpu.memory_space<smem>>
    %c3_381 = arith.constant 3 : index
    %c1_382 = arith.constant 1 : index
    %920 = memref.load %arg6[%c3_381, %c1_382] : memref<7x4xf32, #tpu.memory_space<smem>>
    %c3_383 = arith.constant 3 : index
    %c2_384 = arith.constant 2 : index
    %921 = memref.load %arg6[%c3_383, %c2_384] : memref<7x4xf32, #tpu.memory_space<smem>>
    %c3_385 = arith.constant 3 : index
    %c3_386 = arith.constant 3 : index
    %922 = memref.load %arg6[%c3_385, %c3_386] : memref<7x4xf32, #tpu.memory_space<smem>>
    %923 = vector.broadcast %919 : f32 to vector<8x1xf32>
    %924 = arith.mulf %923, %918 : vector<8x1xf32>
    %925 = arith.subf %892, %924 : vector<8x1xf32>
    %926 = vector.broadcast %920 : f32 to vector<8x1xf32>
    %927 = arith.mulf %926, %925 : vector<8x1xf32>
    %928 = vector.broadcast %921 : f32 to vector<8x1xf32>
    %929 = arith.mulf %928, %892 : vector<8x1xf32>
    %930 = arith.addf %927, %929 : vector<8x1xf32>
    %c2_387 = arith.constant 2 : index
    %c3_388 = arith.constant 3 : index
    %c0_389 = arith.constant 0 : index
    %c0_390 = arith.constant 0 : index
    %931 = vector.load %arg4[%c2_387, %c3_388, %c0_389, %c0_390] : memref<4x7x8x1xf32, #tpu.memory_space<vmem>>, vector<1x1x8x1xf32>
    %932 = vector.shape_cast %931 : vector<1x1x8x1xf32> to vector<8x1xf32>
    %933 = vector.broadcast %922 : f32 to vector<8x1xf32>
    %934 = arith.mulf %933, %932 : vector<8x1xf32>
    %935 = arith.addf %930, %934 : vector<8x1xf32>
    %c4_391 = arith.constant 4 : index
    %c0_392 = arith.constant 0 : index
    %936 = vector.load %arg5[%c4_391, %c0_392] : memref<7x64xf32, #tpu.memory_space<vmem>>, vector<1x64xf32>
    %937 = vector.broadcast %935 : vector<8x1xf32> to vector<8x64xf32>
    %938 = vector.broadcast %6 : vector<1x64xf32> to vector<8x64xf32>
    %939 = arith.mulf %937, %938 : vector<8x64xf32>
    %940 = arith.addf %939, %763 : vector<8x64xf32>
    %941 = vector.broadcast %936 : vector<1x64xf32> to vector<8x64xf32>
    %942 = arith.addf %940, %941 : vector<8x64xf32>
    %943 = arith.negf %942 : vector<8x64xf32>
    %944 = math.exp %943 : vector<8x64xf32>
    %cst_393 = arith.constant 1.000000e+00 : f32
    %945 = vector.broadcast %cst_393 : f32 to vector<8x64xf32>
    %946 = arith.addf %945, %944 : vector<8x64xf32>
    %947 = arith.divf %945, %946 : vector<8x64xf32>
    %948 = arith.mulf %942, %947 : vector<8x64xf32>
    %cst_394 = arith.constant dense<0.000000e+00> : vector<8x64xf32>
    %949 = tpu.matmul %948, %9, %cst_394 {dimension_numbers = #tpu.dot_dimension_numbers<[1], [0], [0], [1], [0, 0, 1, 1], [], []>} : vector<8x64xf32>, vector<64x64xf32>, vector<8x64xf32> -> vector<8x64xf32>
    %950 = vector.broadcast %10 : vector<1x64xf32> to vector<8x64xf32>
    %951 = arith.addf %949, %950 : vector<8x64xf32>
    %952 = arith.negf %951 : vector<8x64xf32>
    %953 = math.exp %952 : vector<8x64xf32>
    %cst_395 = arith.constant 1.000000e+00 : f32
    %954 = vector.broadcast %cst_395 : f32 to vector<8x64xf32>
    %955 = arith.addf %954, %953 : vector<8x64xf32>
    %956 = arith.divf %954, %955 : vector<8x64xf32>
    %957 = arith.mulf %951, %956 : vector<8x64xf32>
    %958 = arith.addf %948, %957 : vector<8x64xf32>
    %cst_396 = arith.constant dense<0.000000e+00> : vector<8x1xf32>
    %959 = tpu.matmul %958, %11, %cst_396 {dimension_numbers = #tpu.dot_dimension_numbers<[1], [0], [0], [1], [0, 0, 1, 1], [], []>} : vector<8x64xf32>, vector<64x1xf32>, vector<8x1xf32> -> vector<8x1xf32>
    %960 = vector.broadcast %12 : vector<1x1xf32> to vector<8x1xf32>
    %961 = arith.addf %959, %960 : vector<8x1xf32>
    %c4_397 = arith.constant 4 : index
    %c0_398 = arith.constant 0 : index
    %962 = memref.load %arg6[%c4_397, %c0_398] : memref<7x4xf32, #tpu.memory_space<smem>>
    %c4_399 = arith.constant 4 : index
    %c1_400 = arith.constant 1 : index
    %963 = memref.load %arg6[%c4_399, %c1_400] : memref<7x4xf32, #tpu.memory_space<smem>>
    %c4_401 = arith.constant 4 : index
    %c2_402 = arith.constant 2 : index
    %964 = memref.load %arg6[%c4_401, %c2_402] : memref<7x4xf32, #tpu.memory_space<smem>>
    %c4_403 = arith.constant 4 : index
    %c3_404 = arith.constant 3 : index
    %965 = memref.load %arg6[%c4_403, %c3_404] : memref<7x4xf32, #tpu.memory_space<smem>>
    %966 = vector.broadcast %962 : f32 to vector<8x1xf32>
    %967 = arith.mulf %966, %961 : vector<8x1xf32>
    %968 = arith.subf %935, %967 : vector<8x1xf32>
    %969 = vector.broadcast %963 : f32 to vector<8x1xf32>
    %970 = arith.mulf %969, %968 : vector<8x1xf32>
    %971 = vector.broadcast %964 : f32 to vector<8x1xf32>
    %972 = arith.mulf %971, %935 : vector<8x1xf32>
    %973 = arith.addf %970, %972 : vector<8x1xf32>
    %c2_405 = arith.constant 2 : index
    %c4_406 = arith.constant 4 : index
    %c0_407 = arith.constant 0 : index
    %c0_408 = arith.constant 0 : index
    %974 = vector.load %arg4[%c2_405, %c4_406, %c0_407, %c0_408] : memref<4x7x8x1xf32, #tpu.memory_space<vmem>>, vector<1x1x8x1xf32>
    %975 = vector.shape_cast %974 : vector<1x1x8x1xf32> to vector<8x1xf32>
    %976 = vector.broadcast %965 : f32 to vector<8x1xf32>
    %977 = arith.mulf %976, %975 : vector<8x1xf32>
    %978 = arith.addf %973, %977 : vector<8x1xf32>
    %c5_409 = arith.constant 5 : index
    %c0_410 = arith.constant 0 : index
    %979 = vector.load %arg5[%c5_409, %c0_410] : memref<7x64xf32, #tpu.memory_space<vmem>>, vector<1x64xf32>
    %980 = vector.broadcast %978 : vector<8x1xf32> to vector<8x64xf32>
    %981 = vector.broadcast %6 : vector<1x64xf32> to vector<8x64xf32>
    %982 = arith.mulf %980, %981 : vector<8x64xf32>
    %983 = arith.addf %982, %763 : vector<8x64xf32>
    %984 = vector.broadcast %979 : vector<1x64xf32> to vector<8x64xf32>
    %985 = arith.addf %983, %984 : vector<8x64xf32>
    %986 = arith.negf %985 : vector<8x64xf32>
    %987 = math.exp %986 : vector<8x64xf32>
    %cst_411 = arith.constant 1.000000e+00 : f32
    %988 = vector.broadcast %cst_411 : f32 to vector<8x64xf32>
    %989 = arith.addf %988, %987 : vector<8x64xf32>
    %990 = arith.divf %988, %989 : vector<8x64xf32>
    %991 = arith.mulf %985, %990 : vector<8x64xf32>
    %cst_412 = arith.constant dense<0.000000e+00> : vector<8x64xf32>
    %992 = tpu.matmul %991, %9, %cst_412 {dimension_numbers = #tpu.dot_dimension_numbers<[1], [0], [0], [1], [0, 0, 1, 1], [], []>} : vector<8x64xf32>, vector<64x64xf32>, vector<8x64xf32> -> vector<8x64xf32>
    %993 = vector.broadcast %10 : vector<1x64xf32> to vector<8x64xf32>
    %994 = arith.addf %992, %993 : vector<8x64xf32>
    %995 = arith.negf %994 : vector<8x64xf32>
    %996 = math.exp %995 : vector<8x64xf32>
    %cst_413 = arith.constant 1.000000e+00 : f32
    %997 = vector.broadcast %cst_413 : f32 to vector<8x64xf32>
    %998 = arith.addf %997, %996 : vector<8x64xf32>
    %999 = arith.divf %997, %998 : vector<8x64xf32>
    %1000 = arith.mulf %994, %999 : vector<8x64xf32>
    %1001 = arith.addf %991, %1000 : vector<8x64xf32>
    %cst_414 = arith.constant dense<0.000000e+00> : vector<8x1xf32>
    %1002 = tpu.matmul %1001, %11, %cst_414 {dimension_numbers = #tpu.dot_dimension_numbers<[1], [0], [0], [1], [0, 0, 1, 1], [], []>} : vector<8x64xf32>, vector<64x1xf32>, vector<8x1xf32> -> vector<8x1xf32>
    %1003 = vector.broadcast %12 : vector<1x1xf32> to vector<8x1xf32>
    %1004 = arith.addf %1002, %1003 : vector<8x1xf32>
    %c5_415 = arith.constant 5 : index
    %c0_416 = arith.constant 0 : index
    %1005 = memref.load %arg6[%c5_415, %c0_416] : memref<7x4xf32, #tpu.memory_space<smem>>
    %c5_417 = arith.constant 5 : index
    %c1_418 = arith.constant 1 : index
    %1006 = memref.load %arg6[%c5_417, %c1_418] : memref<7x4xf32, #tpu.memory_space<smem>>
    %c5_419 = arith.constant 5 : index
    %c2_420 = arith.constant 2 : index
    %1007 = memref.load %arg6[%c5_419, %c2_420] : memref<7x4xf32, #tpu.memory_space<smem>>
    %c5_421 = arith.constant 5 : index
    %c3_422 = arith.constant 3 : index
    %1008 = memref.load %arg6[%c5_421, %c3_422] : memref<7x4xf32, #tpu.memory_space<smem>>
    %1009 = vector.broadcast %1005 : f32 to vector<8x1xf32>
    %1010 = arith.mulf %1009, %1004 : vector<8x1xf32>
    %1011 = arith.subf %978, %1010 : vector<8x1xf32>
    %1012 = vector.broadcast %1006 : f32 to vector<8x1xf32>
    %1013 = arith.mulf %1012, %1011 : vector<8x1xf32>
    %1014 = vector.broadcast %1007 : f32 to vector<8x1xf32>
    %1015 = arith.mulf %1014, %978 : vector<8x1xf32>
    %1016 = arith.addf %1013, %1015 : vector<8x1xf32>
    %c2_423 = arith.constant 2 : index
    %c5_424 = arith.constant 5 : index
    %c0_425 = arith.constant 0 : index
    %c0_426 = arith.constant 0 : index
    %1017 = vector.load %arg4[%c2_423, %c5_424, %c0_425, %c0_426] : memref<4x7x8x1xf32, #tpu.memory_space<vmem>>, vector<1x1x8x1xf32>
    %1018 = vector.shape_cast %1017 : vector<1x1x8x1xf32> to vector<8x1xf32>
    %1019 = vector.broadcast %1008 : f32 to vector<8x1xf32>
    %1020 = arith.mulf %1019, %1018 : vector<8x1xf32>
    %1021 = arith.addf %1016, %1020 : vector<8x1xf32>
    %c6_427 = arith.constant 6 : index
    %c0_428 = arith.constant 0 : index
    %1022 = vector.load %arg5[%c6_427, %c0_428] : memref<7x64xf32, #tpu.memory_space<vmem>>, vector<1x64xf32>
    %1023 = vector.broadcast %1021 : vector<8x1xf32> to vector<8x64xf32>
    %1024 = vector.broadcast %6 : vector<1x64xf32> to vector<8x64xf32>
    %1025 = arith.mulf %1023, %1024 : vector<8x64xf32>
    %1026 = arith.addf %1025, %763 : vector<8x64xf32>
    %1027 = vector.broadcast %1022 : vector<1x64xf32> to vector<8x64xf32>
    %1028 = arith.addf %1026, %1027 : vector<8x64xf32>
    %1029 = arith.negf %1028 : vector<8x64xf32>
    %1030 = math.exp %1029 : vector<8x64xf32>
    %cst_429 = arith.constant 1.000000e+00 : f32
    %1031 = vector.broadcast %cst_429 : f32 to vector<8x64xf32>
    %1032 = arith.addf %1031, %1030 : vector<8x64xf32>
    %1033 = arith.divf %1031, %1032 : vector<8x64xf32>
    %1034 = arith.mulf %1028, %1033 : vector<8x64xf32>
    %cst_430 = arith.constant dense<0.000000e+00> : vector<8x64xf32>
    %1035 = tpu.matmul %1034, %9, %cst_430 {dimension_numbers = #tpu.dot_dimension_numbers<[1], [0], [0], [1], [0, 0, 1, 1], [], []>} : vector<8x64xf32>, vector<64x64xf32>, vector<8x64xf32> -> vector<8x64xf32>
    %1036 = vector.broadcast %10 : vector<1x64xf32> to vector<8x64xf32>
    %1037 = arith.addf %1035, %1036 : vector<8x64xf32>
    %1038 = arith.negf %1037 : vector<8x64xf32>
    %1039 = math.exp %1038 : vector<8x64xf32>
    %cst_431 = arith.constant 1.000000e+00 : f32
    %1040 = vector.broadcast %cst_431 : f32 to vector<8x64xf32>
    %1041 = arith.addf %1040, %1039 : vector<8x64xf32>
    %1042 = arith.divf %1040, %1041 : vector<8x64xf32>
    %1043 = arith.mulf %1037, %1042 : vector<8x64xf32>
    %1044 = arith.addf %1034, %1043 : vector<8x64xf32>
    %cst_432 = arith.constant dense<0.000000e+00> : vector<8x1xf32>
    %1045 = tpu.matmul %1044, %11, %cst_432 {dimension_numbers = #tpu.dot_dimension_numbers<[1], [0], [0], [1], [0, 0, 1, 1], [], []>} : vector<8x64xf32>, vector<64x1xf32>, vector<8x1xf32> -> vector<8x1xf32>
    %1046 = vector.broadcast %12 : vector<1x1xf32> to vector<8x1xf32>
    %1047 = arith.addf %1045, %1046 : vector<8x1xf32>
    %c6_433 = arith.constant 6 : index
    %c0_434 = arith.constant 0 : index
    %1048 = memref.load %arg6[%c6_433, %c0_434] : memref<7x4xf32, #tpu.memory_space<smem>>
    %c6_435 = arith.constant 6 : index
    %c1_436 = arith.constant 1 : index
    %1049 = memref.load %arg6[%c6_435, %c1_436] : memref<7x4xf32, #tpu.memory_space<smem>>
    %c6_437 = arith.constant 6 : index
    %c2_438 = arith.constant 2 : index
    %1050 = memref.load %arg6[%c6_437, %c2_438] : memref<7x4xf32, #tpu.memory_space<smem>>
    %c6_439 = arith.constant 6 : index
    %c3_440 = arith.constant 3 : index
    %1051 = memref.load %arg6[%c6_439, %c3_440] : memref<7x4xf32, #tpu.memory_space<smem>>
    %1052 = vector.broadcast %1048 : f32 to vector<8x1xf32>
    %1053 = arith.mulf %1052, %1047 : vector<8x1xf32>
    %1054 = arith.subf %1021, %1053 : vector<8x1xf32>
    %1055 = vector.broadcast %1049 : f32 to vector<8x1xf32>
    %1056 = arith.mulf %1055, %1054 : vector<8x1xf32>
    %1057 = vector.broadcast %1050 : f32 to vector<8x1xf32>
    %1058 = arith.mulf %1057, %1021 : vector<8x1xf32>
    %1059 = arith.addf %1056, %1058 : vector<8x1xf32>
    %c2_441 = arith.constant 2 : index
    %c6_442 = arith.constant 6 : index
    %c0_443 = arith.constant 0 : index
    %c0_444 = arith.constant 0 : index
    %1060 = vector.load %arg4[%c2_441, %c6_442, %c0_443, %c0_444] : memref<4x7x8x1xf32, #tpu.memory_space<vmem>>, vector<1x1x8x1xf32>
    %1061 = vector.shape_cast %1060 : vector<1x1x8x1xf32> to vector<8x1xf32>
    %1062 = vector.broadcast %1051 : f32 to vector<8x1xf32>
    %1063 = arith.mulf %1062, %1061 : vector<8x1xf32>
    %1064 = arith.addf %1059, %1063 : vector<8x1xf32>
    %c0_445 = arith.constant 0 : index
    %c2_446 = arith.constant 2 : index
    %1065 = vector.load %arg20[%c0_445, %c2_446] : memref<8x4xf32, #tpu.memory_space<vmem>>, vector<8x1xf32>
    tpu.vector_store %arg20[%c0_445, %c2_446], %1064 {strides = array<i32>} : memref<8x4xf32, #tpu.memory_space<vmem>>, vector<8x1xf32>,
    %1066 = tpu.concatenate %1064, %695, %326 in 1 : vector<8x1xf32>, vector<8x1xf32>, vector<8x1xf32> -> vector<8x3xf32>
    %c3_447 = arith.constant 3 : index
    %c0_448 = arith.constant 0 : index
    %c0_449 = arith.constant 0 : index
    %1067 = vector.load %arg3[%c3_447, %c0_448, %c0_449] : memref<4x8x7xf32, #tpu.memory_space<vmem>>, vector<1x8x7xf32>
    %1068 = vector.shape_cast %1067 : vector<1x8x7xf32> to vector<8x7xf32>
    %1069 = tpu.concatenate %1066, %1068 in 1 : vector<8x3xf32>, vector<8x7xf32> -> vector<8x10xf32>
    %cst_450 = arith.constant dense<0.000000e+00> : vector<8x128xf32>
    %1070 = tpu.matmul %1069, %0, %cst_450 {dimension_numbers = #tpu.dot_dimension_numbers<[1], [0], [0], [1], [0, 0, 1, 1], [], []>} : vector<8x10xf32>, vector<10x128xf32>, vector<8x128xf32> -> vector<8x128xf32>
    %cst_451 = arith.constant dense<0.000000e+00> : vector<8x128xf32>
    %1071 = tpu.matmul %730, %1, %cst_451 {dimension_numbers = #tpu.dot_dimension_numbers<[1], [0], [0], [1], [0, 0, 1, 1], [], []>} : vector<8x32xf32>, vector<32x128xf32>, vector<8x128xf32> -> vector<8x128xf32>
    %1072 = arith.addf %1070, %1071 : vector<8x128xf32>
    %1073 = vector.broadcast %2 : vector<1x128xf32> to vector<8x128xf32>
    %1074 = arith.addf %1072, %1073 : vector<8x128xf32>
    %1075 = vector.extract_strided_slice %1074 {offsets = [0, 0], sizes = [8, 32], strides = [1, 1]} : vector<8x128xf32> to vector<8x32xf32>
    %1076 = arith.negf %1075 : vector<8x32xf32>
    %1077 = math.exp %1076 : vector<8x32xf32>
    %cst_452 = arith.constant 1.000000e+00 : f32
    %1078 = vector.broadcast %cst_452 : f32 to vector<8x32xf32>
    %1079 = arith.addf %1078, %1077 : vector<8x32xf32>
    %1080 = arith.divf %1078, %1079 : vector<8x32xf32>
    %1081 = vector.extract_strided_slice %1074 {offsets = [0, 32], sizes = [8, 32], strides = [1, 1]} : vector<8x128xf32> to vector<8x32xf32>
    %1082 = arith.negf %1081 : vector<8x32xf32>
    %1083 = math.exp %1082 : vector<8x32xf32>
    %cst_453 = arith.constant 1.000000e+00 : f32
    %1084 = vector.broadcast %cst_453 : f32 to vector<8x32xf32>
    %1085 = arith.addf %1084, %1083 : vector<8x32xf32>
    %1086 = arith.divf %1084, %1085 : vector<8x32xf32>
    %1087 = vector.extract_strided_slice %1074 {offsets = [0, 64], sizes = [8, 32], strides = [1, 1]} : vector<8x128xf32> to vector<8x32xf32>
    %1088 = math.tanh %1087 : vector<8x32xf32>
    %1089 = vector.extract_strided_slice %1074 {offsets = [0, 96], sizes = [8, 32], strides = [1, 1]} : vector<8x128xf32> to vector<8x32xf32>
    %1090 = arith.negf %1089 : vector<8x32xf32>
    %1091 = math.exp %1090 : vector<8x32xf32>
    %cst_454 = arith.constant 1.000000e+00 : f32
    %1092 = vector.broadcast %cst_454 : f32 to vector<8x32xf32>
    %1093 = arith.addf %1092, %1091 : vector<8x32xf32>
    %1094 = arith.divf %1092, %1093 : vector<8x32xf32>
    %1095 = arith.mulf %1086, %728 : vector<8x32xf32>
    %1096 = arith.mulf %1080, %1088 : vector<8x32xf32>
    %1097 = arith.addf %1095, %1096 : vector<8x32xf32>
    %1098 = math.tanh %1097 : vector<8x32xf32>
    %1099 = arith.mulf %1094, %1098 : vector<8x32xf32>
    %cst_455 = arith.constant dense<0.000000e+00> : vector<8x128xf32>
    %1100 = tpu.matmul %1099, %3, %cst_455 {dimension_numbers = #tpu.dot_dimension_numbers<[1], [0], [0], [1], [0, 0, 1, 1], [], []>} : vector<8x32xf32>, vector<32x128xf32>, vector<8x128xf32> -> vector<8x128xf32>
    %cst_456 = arith.constant dense<0.000000e+00> : vector<8x128xf32>
    %1101 = tpu.matmul %760, %4, %cst_456 {dimension_numbers = #tpu.dot_dimension_numbers<[1], [0], [0], [1], [0, 0, 1, 1], [], []>} : vector<8x32xf32>, vector<32x128xf32>, vector<8x128xf32> -> vector<8x128xf32>
    %1102 = arith.addf %1100, %1101 : vector<8x128xf32>
    %1103 = vector.broadcast %5 : vector<1x128xf32> to vector<8x128xf32>
    %1104 = arith.addf %1102, %1103 : vector<8x128xf32>
    %1105 = vector.extract_strided_slice %1104 {offsets = [0, 0], sizes = [8, 32], strides = [1, 1]} : vector<8x128xf32> to vector<8x32xf32>
    %1106 = arith.negf %1105 : vector<8x32xf32>
    %1107 = math.exp %1106 : vector<8x32xf32>
    %cst_457 = arith.constant 1.000000e+00 : f32
    %1108 = vector.broadcast %cst_457 : f32 to vector<8x32xf32>
    %1109 = arith.addf %1108, %1107 : vector<8x32xf32>
    %1110 = arith.divf %1108, %1109 : vector<8x32xf32>
    %1111 = vector.extract_strided_slice %1104 {offsets = [0, 32], sizes = [8, 32], strides = [1, 1]} : vector<8x128xf32> to vector<8x32xf32>
    %1112 = arith.negf %1111 : vector<8x32xf32>
    %1113 = math.exp %1112 : vector<8x32xf32>
    %cst_458 = arith.constant 1.000000e+00 : f32
    %1114 = vector.broadcast %cst_458 : f32 to vector<8x32xf32>
    %1115 = arith.addf %1114, %1113 : vector<8x32xf32>
    %1116 = arith.divf %1114, %1115 : vector<8x32xf32>
    %1117 = vector.extract_strided_slice %1104 {offsets = [0, 64], sizes = [8, 32], strides = [1, 1]} : vector<8x128xf32> to vector<8x32xf32>
    %1118 = math.tanh %1117 : vector<8x32xf32>
    %1119 = vector.extract_strided_slice %1104 {offsets = [0, 96], sizes = [8, 32], strides = [1, 1]} : vector<8x128xf32> to vector<8x32xf32>
    %1120 = arith.negf %1119 : vector<8x32xf32>
    %1121 = math.exp %1120 : vector<8x32xf32>
    %cst_459 = arith.constant 1.000000e+00 : f32
    %1122 = vector.broadcast %cst_459 : f32 to vector<8x32xf32>
    %1123 = arith.addf %1122, %1121 : vector<8x32xf32>
    %1124 = arith.divf %1122, %1123 : vector<8x32xf32>
    %1125 = arith.mulf %1116, %758 : vector<8x32xf32>
    %1126 = arith.mulf %1110, %1118 : vector<8x32xf32>
    %1127 = arith.addf %1125, %1126 : vector<8x32xf32>
    %1128 = math.tanh %1127 : vector<8x32xf32>
    %1129 = arith.mulf %1124, %1128 : vector<8x32xf32>
    %cst_460 = arith.constant dense<0.000000e+00> : vector<8x64xf32>
    %1130 = tpu.matmul %1129, %7, %cst_460 {dimension_numbers = #tpu.dot_dimension_numbers<[1], [0], [0], [1], [0, 0, 1, 1], [], []>} : vector<8x32xf32>, vector<32x64xf32>, vector<8x64xf32> -> vector<8x64xf32>
    %1131 = vector.broadcast %8 : vector<1x64xf32> to vector<8x64xf32>
    %1132 = arith.addf %1130, %1131 : vector<8x64xf32>
    %c0_461 = arith.constant 0 : index
    %c0_462 = arith.constant 0 : index
    %1133 = vector.load %arg5[%c0_461, %c0_462] : memref<7x64xf32, #tpu.memory_space<vmem>>, vector<1x64xf32>
    %1134 = vector.broadcast %1064 : vector<8x1xf32> to vector<8x64xf32>
    %1135 = vector.broadcast %6 : vector<1x64xf32> to vector<8x64xf32>
    %1136 = arith.mulf %1134, %1135 : vector<8x64xf32>
    %1137 = arith.addf %1136, %1132 : vector<8x64xf32>
    %1138 = vector.broadcast %1133 : vector<1x64xf32> to vector<8x64xf32>
    %1139 = arith.addf %1137, %1138 : vector<8x64xf32>
    %1140 = arith.negf %1139 : vector<8x64xf32>
    %1141 = math.exp %1140 : vector<8x64xf32>
    %cst_463 = arith.constant 1.000000e+00 : f32
    %1142 = vector.broadcast %cst_463 : f32 to vector<8x64xf32>
    %1143 = arith.addf %1142, %1141 : vector<8x64xf32>
    %1144 = arith.divf %1142, %1143 : vector<8x64xf32>
    %1145 = arith.mulf %1139, %1144 : vector<8x64xf32>
    %cst_464 = arith.constant dense<0.000000e+00> : vector<8x64xf32>
    %1146 = tpu.matmul %1145, %9, %cst_464 {dimension_numbers = #tpu.dot_dimension_numbers<[1], [0], [0], [1], [0, 0, 1, 1], [], []>} : vector<8x64xf32>, vector<64x64xf32>, vector<8x64xf32> -> vector<8x64xf32>
    %1147 = vector.broadcast %10 : vector<1x64xf32> to vector<8x64xf32>
    %1148 = arith.addf %1146, %1147 : vector<8x64xf32>
    %1149 = arith.negf %1148 : vector<8x64xf32>
    %1150 = math.exp %1149 : vector<8x64xf32>
    %cst_465 = arith.constant 1.000000e+00 : f32
    %1151 = vector.broadcast %cst_465 : f32 to vector<8x64xf32>
    %1152 = arith.addf %1151, %1150 : vector<8x64xf32>
    %1153 = arith.divf %1151, %1152 : vector<8x64xf32>
    %1154 = arith.mulf %1148, %1153 : vector<8x64xf32>
    %1155 = arith.addf %1145, %1154 : vector<8x64xf32>
    %cst_466 = arith.constant dense<0.000000e+00> : vector<8x1xf32>
    %1156 = tpu.matmul %1155, %11, %cst_466 {dimension_numbers = #tpu.dot_dimension_numbers<[1], [0], [0], [1], [0, 0, 1, 1], [], []>} : vector<8x64xf32>, vector<64x1xf32>, vector<8x1xf32> -> vector<8x1xf32>
    %1157 = vector.broadcast %12 : vector<1x1xf32> to vector<8x1xf32>
    %1158 = arith.addf %1156, %1157 : vector<8x1xf32>
    %c0_467 = arith.constant 0 : index
    %c0_468 = arith.constant 0 : index
    %1159 = memref.load %arg6[%c0_467, %c0_468] : memref<7x4xf32, #tpu.memory_space<smem>>
    %c0_469 = arith.constant 0 : index
    %c1_470 = arith.constant 1 : index
    %1160 = memref.load %arg6[%c0_469, %c1_470] : memref<7x4xf32, #tpu.memory_space<smem>>
    %c0_471 = arith.constant 0 : index
    %c2_472 = arith.constant 2 : index
    %1161 = memref.load %arg6[%c0_471, %c2_472] : memref<7x4xf32, #tpu.memory_space<smem>>
    %c0_473 = arith.constant 0 : index
    %c3_474 = arith.constant 3 : index
    %1162 = memref.load %arg6[%c0_473, %c3_474] : memref<7x4xf32, #tpu.memory_space<smem>>
    %1163 = vector.broadcast %1159 : f32 to vector<8x1xf32>
    %1164 = arith.mulf %1163, %1158 : vector<8x1xf32>
    %1165 = arith.subf %1064, %1164 : vector<8x1xf32>
    %1166 = vector.broadcast %1160 : f32 to vector<8x1xf32>
    %1167 = arith.mulf %1166, %1165 : vector<8x1xf32>
    %1168 = vector.broadcast %1161 : f32 to vector<8x1xf32>
    %1169 = arith.mulf %1168, %1064 : vector<8x1xf32>
    %1170 = arith.addf %1167, %1169 : vector<8x1xf32>
    %c3_475 = arith.constant 3 : index
    %c0_476 = arith.constant 0 : index
    %c0_477 = arith.constant 0 : index
    %c0_478 = arith.constant 0 : index
    %1171 = vector.load %arg4[%c3_475, %c0_476, %c0_477, %c0_478] : memref<4x7x8x1xf32, #tpu.memory_space<vmem>>, vector<1x1x8x1xf32>
    %1172 = vector.shape_cast %1171 : vector<1x1x8x1xf32> to vector<8x1xf32>
    %1173 = vector.broadcast %1162 : f32 to vector<8x1xf32>
    %1174 = arith.mulf %1173, %1172 : vector<8x1xf32>
    %1175 = arith.addf %1170, %1174 : vector<8x1xf32>
    %c1_479 = arith.constant 1 : index
    %c0_480 = arith.constant 0 : index
    %1176 = vector.load %arg5[%c1_479, %c0_480] : memref<7x64xf32, #tpu.memory_space<vmem>>, vector<1x64xf32>
    %1177 = vector.broadcast %1175 : vector<8x1xf32> to vector<8x64xf32>
    %1178 = vector.broadcast %6 : vector<1x64xf32> to vector<8x64xf32>
    %1179 = arith.mulf %1177, %1178 : vector<8x64xf32>
    %1180 = arith.addf %1179, %1132 : vector<8x64xf32>
    %1181 = vector.broadcast %1176 : vector<1x64xf32> to vector<8x64xf32>
    %1182 = arith.addf %1180, %1181 : vector<8x64xf32>
    %1183 = arith.negf %1182 : vector<8x64xf32>
    %1184 = math.exp %1183 : vector<8x64xf32>
    %cst_481 = arith.constant 1.000000e+00 : f32
    %1185 = vector.broadcast %cst_481 : f32 to vector<8x64xf32>
    %1186 = arith.addf %1185, %1184 : vector<8x64xf32>
    %1187 = arith.divf %1185, %1186 : vector<8x64xf32>
    %1188 = arith.mulf %1182, %1187 : vector<8x64xf32>
    %cst_482 = arith.constant dense<0.000000e+00> : vector<8x64xf32>
    %1189 = tpu.matmul %1188, %9, %cst_482 {dimension_numbers = #tpu.dot_dimension_numbers<[1], [0], [0], [1], [0, 0, 1, 1], [], []>} : vector<8x64xf32>, vector<64x64xf32>, vector<8x64xf32> -> vector<8x64xf32>
    %1190 = vector.broadcast %10 : vector<1x64xf32> to vector<8x64xf32>
    %1191 = arith.addf %1189, %1190 : vector<8x64xf32>
    %1192 = arith.negf %1191 : vector<8x64xf32>
    %1193 = math.exp %1192 : vector<8x64xf32>
    %cst_483 = arith.constant 1.000000e+00 : f32
    %1194 = vector.broadcast %cst_483 : f32 to vector<8x64xf32>
    %1195 = arith.addf %1194, %1193 : vector<8x64xf32>
    %1196 = arith.divf %1194, %1195 : vector<8x64xf32>
    %1197 = arith.mulf %1191, %1196 : vector<8x64xf32>
    %1198 = arith.addf %1188, %1197 : vector<8x64xf32>
    %cst_484 = arith.constant dense<0.000000e+00> : vector<8x1xf32>
    %1199 = tpu.matmul %1198, %11, %cst_484 {dimension_numbers = #tpu.dot_dimension_numbers<[1], [0], [0], [1], [0, 0, 1, 1], [], []>} : vector<8x64xf32>, vector<64x1xf32>, vector<8x1xf32> -> vector<8x1xf32>
    %1200 = vector.broadcast %12 : vector<1x1xf32> to vector<8x1xf32>
    %1201 = arith.addf %1199, %1200 : vector<8x1xf32>
    %c1_485 = arith.constant 1 : index
    %c0_486 = arith.constant 0 : index
    %1202 = memref.load %arg6[%c1_485, %c0_486] : memref<7x4xf32, #tpu.memory_space<smem>>
    %c1_487 = arith.constant 1 : index
    %c1_488 = arith.constant 1 : index
    %1203 = memref.load %arg6[%c1_487, %c1_488] : memref<7x4xf32, #tpu.memory_space<smem>>
    %c1_489 = arith.constant 1 : index
    %c2_490 = arith.constant 2 : index
    %1204 = memref.load %arg6[%c1_489, %c2_490] : memref<7x4xf32, #tpu.memory_space<smem>>
    %c1_491 = arith.constant 1 : index
    %c3_492 = arith.constant 3 : index
    %1205 = memref.load %arg6[%c1_491, %c3_492] : memref<7x4xf32, #tpu.memory_space<smem>>
    %1206 = vector.broadcast %1202 : f32 to vector<8x1xf32>
    %1207 = arith.mulf %1206, %1201 : vector<8x1xf32>
    %1208 = arith.subf %1175, %1207 : vector<8x1xf32>
    %1209 = vector.broadcast %1203 : f32 to vector<8x1xf32>
    %1210 = arith.mulf %1209, %1208 : vector<8x1xf32>
    %1211 = vector.broadcast %1204 : f32 to vector<8x1xf32>
    %1212 = arith.mulf %1211, %1175 : vector<8x1xf32>
    %1213 = arith.addf %1210, %1212 : vector<8x1xf32>
    %c3_493 = arith.constant 3 : index
    %c1_494 = arith.constant 1 : index
    %c0_495 = arith.constant 0 : index
    %c0_496 = arith.constant 0 : index
    %1214 = vector.load %arg4[%c3_493, %c1_494, %c0_495, %c0_496] : memref<4x7x8x1xf32, #tpu.memory_space<vmem>>, vector<1x1x8x1xf32>
    %1215 = vector.shape_cast %1214 : vector<1x1x8x1xf32> to vector<8x1xf32>
    %1216 = vector.broadcast %1205 : f32 to vector<8x1xf32>
    %1217 = arith.mulf %1216, %1215 : vector<8x1xf32>
    %1218 = arith.addf %1213, %1217 : vector<8x1xf32>
    %c2_497 = arith.constant 2 : index
    %c0_498 = arith.constant 0 : index
    %1219 = vector.load %arg5[%c2_497, %c0_498] : memref<7x64xf32, #tpu.memory_space<vmem>>, vector<1x64xf32>
    %1220 = vector.broadcast %1218 : vector<8x1xf32> to vector<8x64xf32>
    %1221 = vector.broadcast %6 : vector<1x64xf32> to vector<8x64xf32>
    %1222 = arith.mulf %1220, %1221 : vector<8x64xf32>
    %1223 = arith.addf %1222, %1132 : vector<8x64xf32>
    %1224 = vector.broadcast %1219 : vector<1x64xf32> to vector<8x64xf32>
    %1225 = arith.addf %1223, %1224 : vector<8x64xf32>
    %1226 = arith.negf %1225 : vector<8x64xf32>
    %1227 = math.exp %1226 : vector<8x64xf32>
    %cst_499 = arith.constant 1.000000e+00 : f32
    %1228 = vector.broadcast %cst_499 : f32 to vector<8x64xf32>
    %1229 = arith.addf %1228, %1227 : vector<8x64xf32>
    %1230 = arith.divf %1228, %1229 : vector<8x64xf32>
    %1231 = arith.mulf %1225, %1230 : vector<8x64xf32>
    %cst_500 = arith.constant dense<0.000000e+00> : vector<8x64xf32>
    %1232 = tpu.matmul %1231, %9, %cst_500 {dimension_numbers = #tpu.dot_dimension_numbers<[1], [0], [0], [1], [0, 0, 1, 1], [], []>} : vector<8x64xf32>, vector<64x64xf32>, vector<8x64xf32> -> vector<8x64xf32>
    %1233 = vector.broadcast %10 : vector<1x64xf32> to vector<8x64xf32>
    %1234 = arith.addf %1232, %1233 : vector<8x64xf32>
    %1235 = arith.negf %1234 : vector<8x64xf32>
    %1236 = math.exp %1235 : vector<8x64xf32>
    %cst_501 = arith.constant 1.000000e+00 : f32
    %1237 = vector.broadcast %cst_501 : f32 to vector<8x64xf32>
    %1238 = arith.addf %1237, %1236 : vector<8x64xf32>
    %1239 = arith.divf %1237, %1238 : vector<8x64xf32>
    %1240 = arith.mulf %1234, %1239 : vector<8x64xf32>
    %1241 = arith.addf %1231, %1240 : vector<8x64xf32>
    %cst_502 = arith.constant dense<0.000000e+00> : vector<8x1xf32>
    %1242 = tpu.matmul %1241, %11, %cst_502 {dimension_numbers = #tpu.dot_dimension_numbers<[1], [0], [0], [1], [0, 0, 1, 1], [], []>} : vector<8x64xf32>, vector<64x1xf32>, vector<8x1xf32> -> vector<8x1xf32>
    %1243 = vector.broadcast %12 : vector<1x1xf32> to vector<8x1xf32>
    %1244 = arith.addf %1242, %1243 : vector<8x1xf32>
    %c2_503 = arith.constant 2 : index
    %c0_504 = arith.constant 0 : index
    %1245 = memref.load %arg6[%c2_503, %c0_504] : memref<7x4xf32, #tpu.memory_space<smem>>
    %c2_505 = arith.constant 2 : index
    %c1_506 = arith.constant 1 : index
    %1246 = memref.load %arg6[%c2_505, %c1_506] : memref<7x4xf32, #tpu.memory_space<smem>>
    %c2_507 = arith.constant 2 : index
    %c2_508 = arith.constant 2 : index
    %1247 = memref.load %arg6[%c2_507, %c2_508] : memref<7x4xf32, #tpu.memory_space<smem>>
    %c2_509 = arith.constant 2 : index
    %c3_510 = arith.constant 3 : index
    %1248 = memref.load %arg6[%c2_509, %c3_510] : memref<7x4xf32, #tpu.memory_space<smem>>
    %1249 = vector.broadcast %1245 : f32 to vector<8x1xf32>
    %1250 = arith.mulf %1249, %1244 : vector<8x1xf32>
    %1251 = arith.subf %1218, %1250 : vector<8x1xf32>
    %1252 = vector.broadcast %1246 : f32 to vector<8x1xf32>
    %1253 = arith.mulf %1252, %1251 : vector<8x1xf32>
    %1254 = vector.broadcast %1247 : f32 to vector<8x1xf32>
    %1255 = arith.mulf %1254, %1218 : vector<8x1xf32>
    %1256 = arith.addf %1253, %1255 : vector<8x1xf32>
    %c3_511 = arith.constant 3 : index
    %c2_512 = arith.constant 2 : index
    %c0_513 = arith.constant 0 : index
    %c0_514 = arith.constant 0 : index
    %1257 = vector.load %arg4[%c3_511, %c2_512, %c0_513, %c0_514] : memref<4x7x8x1xf32, #tpu.memory_space<vmem>>, vector<1x1x8x1xf32>
    %1258 = vector.shape_cast %1257 : vector<1x1x8x1xf32> to vector<8x1xf32>
    %1259 = vector.broadcast %1248 : f32 to vector<8x1xf32>
    %1260 = arith.mulf %1259, %1258 : vector<8x1xf32>
    %1261 = arith.addf %1256, %1260 : vector<8x1xf32>
    %c3_515 = arith.constant 3 : index
    %c0_516 = arith.constant 0 : index
    %1262 = vector.load %arg5[%c3_515, %c0_516] : memref<7x64xf32, #tpu.memory_space<vmem>>, vector<1x64xf32>
    %1263 = vector.broadcast %1261 : vector<8x1xf32> to vector<8x64xf32>
    %1264 = vector.broadcast %6 : vector<1x64xf32> to vector<8x64xf32>
    %1265 = arith.mulf %1263, %1264 : vector<8x64xf32>
    %1266 = arith.addf %1265, %1132 : vector<8x64xf32>
    %1267 = vector.broadcast %1262 : vector<1x64xf32> to vector<8x64xf32>
    %1268 = arith.addf %1266, %1267 : vector<8x64xf32>
    %1269 = arith.negf %1268 : vector<8x64xf32>
    %1270 = math.exp %1269 : vector<8x64xf32>
    %cst_517 = arith.constant 1.000000e+00 : f32
    %1271 = vector.broadcast %cst_517 : f32 to vector<8x64xf32>
    %1272 = arith.addf %1271, %1270 : vector<8x64xf32>
    %1273 = arith.divf %1271, %1272 : vector<8x64xf32>
    %1274 = arith.mulf %1268, %1273 : vector<8x64xf32>
    %cst_518 = arith.constant dense<0.000000e+00> : vector<8x64xf32>
    %1275 = tpu.matmul %1274, %9, %cst_518 {dimension_numbers = #tpu.dot_dimension_numbers<[1], [0], [0], [1], [0, 0, 1, 1], [], []>} : vector<8x64xf32>, vector<64x64xf32>, vector<8x64xf32> -> vector<8x64xf32>
    %1276 = vector.broadcast %10 : vector<1x64xf32> to vector<8x64xf32>
    %1277 = arith.addf %1275, %1276 : vector<8x64xf32>
    %1278 = arith.negf %1277 : vector<8x64xf32>
    %1279 = math.exp %1278 : vector<8x64xf32>
    %cst_519 = arith.constant 1.000000e+00 : f32
    %1280 = vector.broadcast %cst_519 : f32 to vector<8x64xf32>
    %1281 = arith.addf %1280, %1279 : vector<8x64xf32>
    %1282 = arith.divf %1280, %1281 : vector<8x64xf32>
    %1283 = arith.mulf %1277, %1282 : vector<8x64xf32>
    %1284 = arith.addf %1274, %1283 : vector<8x64xf32>
    %cst_520 = arith.constant dense<0.000000e+00> : vector<8x1xf32>
    %1285 = tpu.matmul %1284, %11, %cst_520 {dimension_numbers = #tpu.dot_dimension_numbers<[1], [0], [0], [1], [0, 0, 1, 1], [], []>} : vector<8x64xf32>, vector<64x1xf32>, vector<8x1xf32> -> vector<8x1xf32>
    %1286 = vector.broadcast %12 : vector<1x1xf32> to vector<8x1xf32>
    %1287 = arith.addf %1285, %1286 : vector<8x1xf32>
    %c3_521 = arith.constant 3 : index
    %c0_522 = arith.constant 0 : index
    %1288 = memref.load %arg6[%c3_521, %c0_522] : memref<7x4xf32, #tpu.memory_space<smem>>
    %c3_523 = arith.constant 3 : index
    %c1_524 = arith.constant 1 : index
    %1289 = memref.load %arg6[%c3_523, %c1_524] : memref<7x4xf32, #tpu.memory_space<smem>>
    %c3_525 = arith.constant 3 : index
    %c2_526 = arith.constant 2 : index
    %1290 = memref.load %arg6[%c3_525, %c2_526] : memref<7x4xf32, #tpu.memory_space<smem>>
    %c3_527 = arith.constant 3 : index
    %c3_528 = arith.constant 3 : index
    %1291 = memref.load %arg6[%c3_527, %c3_528] : memref<7x4xf32, #tpu.memory_space<smem>>
    %1292 = vector.broadcast %1288 : f32 to vector<8x1xf32>
    %1293 = arith.mulf %1292, %1287 : vector<8x1xf32>
    %1294 = arith.subf %1261, %1293 : vector<8x1xf32>
    %1295 = vector.broadcast %1289 : f32 to vector<8x1xf32>
    %1296 = arith.mulf %1295, %1294 : vector<8x1xf32>
    %1297 = vector.broadcast %1290 : f32 to vector<8x1xf32>
    %1298 = arith.mulf %1297, %1261 : vector<8x1xf32>
    %1299 = arith.addf %1296, %1298 : vector<8x1xf32>
    %c3_529 = arith.constant 3 : index
    %c3_530 = arith.constant 3 : index
    %c0_531 = arith.constant 0 : index
    %c0_532 = arith.constant 0 : index
    %1300 = vector.load %arg4[%c3_529, %c3_530, %c0_531, %c0_532] : memref<4x7x8x1xf32, #tpu.memory_space<vmem>>, vector<1x1x8x1xf32>
    %1301 = vector.shape_cast %1300 : vector<1x1x8x1xf32> to vector<8x1xf32>
    %1302 = vector.broadcast %1291 : f32 to vector<8x1xf32>
    %1303 = arith.mulf %1302, %1301 : vector<8x1xf32>
    %1304 = arith.addf %1299, %1303 : vector<8x1xf32>
    %c4_533 = arith.constant 4 : index
    %c0_534 = arith.constant 0 : index
    %1305 = vector.load %arg5[%c4_533, %c0_534] : memref<7x64xf32, #tpu.memory_space<vmem>>, vector<1x64xf32>
    %1306 = vector.broadcast %1304 : vector<8x1xf32> to vector<8x64xf32>
    %1307 = vector.broadcast %6 : vector<1x64xf32> to vector<8x64xf32>
    %1308 = arith.mulf %1306, %1307 : vector<8x64xf32>
    %1309 = arith.addf %1308, %1132 : vector<8x64xf32>
    %1310 = vector.broadcast %1305 : vector<1x64xf32> to vector<8x64xf32>
    %1311 = arith.addf %1309, %1310 : vector<8x64xf32>
    %1312 = arith.negf %1311 : vector<8x64xf32>
    %1313 = math.exp %1312 : vector<8x64xf32>
    %cst_535 = arith.constant 1.000000e+00 : f32
    %1314 = vector.broadcast %cst_535 : f32 to vector<8x64xf32>
    %1315 = arith.addf %1314, %1313 : vector<8x64xf32>
    %1316 = arith.divf %1314, %1315 : vector<8x64xf32>
    %1317 = arith.mulf %1311, %1316 : vector<8x64xf32>
    %cst_536 = arith.constant dense<0.000000e+00> : vector<8x64xf32>
    %1318 = tpu.matmul %1317, %9, %cst_536 {dimension_numbers = #tpu.dot_dimension_numbers<[1], [0], [0], [1], [0, 0, 1, 1], [], []>} : vector<8x64xf32>, vector<64x64xf32>, vector<8x64xf32> -> vector<8x64xf32>
    %1319 = vector.broadcast %10 : vector<1x64xf32> to vector<8x64xf32>
    %1320 = arith.addf %1318, %1319 : vector<8x64xf32>
    %1321 = arith.negf %1320 : vector<8x64xf32>
    %1322 = math.exp %1321 : vector<8x64xf32>
    %cst_537 = arith.constant 1.000000e+00 : f32
    %1323 = vector.broadcast %cst_537 : f32 to vector<8x64xf32>
    %1324 = arith.addf %1323, %1322 : vector<8x64xf32>
    %1325 = arith.divf %1323, %1324 : vector<8x64xf32>
    %1326 = arith.mulf %1320, %1325 : vector<8x64xf32>
    %1327 = arith.addf %1317, %1326 : vector<8x64xf32>
    %cst_538 = arith.constant dense<0.000000e+00> : vector<8x1xf32>
    %1328 = tpu.matmul %1327, %11, %cst_538 {dimension_numbers = #tpu.dot_dimension_numbers<[1], [0], [0], [1], [0, 0, 1, 1], [], []>} : vector<8x64xf32>, vector<64x1xf32>, vector<8x1xf32> -> vector<8x1xf32>
    %1329 = vector.broadcast %12 : vector<1x1xf32> to vector<8x1xf32>
    %1330 = arith.addf %1328, %1329 : vector<8x1xf32>
    %c4_539 = arith.constant 4 : index
    %c0_540 = arith.constant 0 : index
    %1331 = memref.load %arg6[%c4_539, %c0_540] : memref<7x4xf32, #tpu.memory_space<smem>>
    %c4_541 = arith.constant 4 : index
    %c1_542 = arith.constant 1 : index
    %1332 = memref.load %arg6[%c4_541, %c1_542] : memref<7x4xf32, #tpu.memory_space<smem>>
    %c4_543 = arith.constant 4 : index
    %c2_544 = arith.constant 2 : index
    %1333 = memref.load %arg6[%c4_543, %c2_544] : memref<7x4xf32, #tpu.memory_space<smem>>
    %c4_545 = arith.constant 4 : index
    %c3_546 = arith.constant 3 : index
    %1334 = memref.load %arg6[%c4_545, %c3_546] : memref<7x4xf32, #tpu.memory_space<smem>>
    %1335 = vector.broadcast %1331 : f32 to vector<8x1xf32>
    %1336 = arith.mulf %1335, %1330 : vector<8x1xf32>
    %1337 = arith.subf %1304, %1336 : vector<8x1xf32>
    %1338 = vector.broadcast %1332 : f32 to vector<8x1xf32>
    %1339 = arith.mulf %1338, %1337 : vector<8x1xf32>
    %1340 = vector.broadcast %1333 : f32 to vector<8x1xf32>
    %1341 = arith.mulf %1340, %1304 : vector<8x1xf32>
    %1342 = arith.addf %1339, %1341 : vector<8x1xf32>
    %c3_547 = arith.constant 3 : index
    %c4_548 = arith.constant 4 : index
    %c0_549 = arith.constant 0 : index
    %c0_550 = arith.constant 0 : index
    %1343 = vector.load %arg4[%c3_547, %c4_548, %c0_549, %c0_550] : memref<4x7x8x1xf32, #tpu.memory_space<vmem>>, vector<1x1x8x1xf32>
    %1344 = vector.shape_cast %1343 : vector<1x1x8x1xf32> to vector<8x1xf32>
    %1345 = vector.broadcast %1334 : f32 to vector<8x1xf32>
    %1346 = arith.mulf %1345, %1344 : vector<8x1xf32>
    %1347 = arith.addf %1342, %1346 : vector<8x1xf32>
    %c5_551 = arith.constant 5 : index
    %c0_552 = arith.constant 0 : index
    %1348 = vector.load %arg5[%c5_551, %c0_552] : memref<7x64xf32, #tpu.memory_space<vmem>>, vector<1x64xf32>
    %1349 = vector.broadcast %1347 : vector<8x1xf32> to vector<8x64xf32>
    %1350 = vector.broadcast %6 : vector<1x64xf32> to vector<8x64xf32>
    %1351 = arith.mulf %1349, %1350 : vector<8x64xf32>
    %1352 = arith.addf %1351, %1132 : vector<8x64xf32>
    %1353 = vector.broadcast %1348 : vector<1x64xf32> to vector<8x64xf32>
    %1354 = arith.addf %1352, %1353 : vector<8x64xf32>
    %1355 = arith.negf %1354 : vector<8x64xf32>
    %1356 = math.exp %1355 : vector<8x64xf32>
    %cst_553 = arith.constant 1.000000e+00 : f32
    %1357 = vector.broadcast %cst_553 : f32 to vector<8x64xf32>
    %1358 = arith.addf %1357, %1356 : vector<8x64xf32>
    %1359 = arith.divf %1357, %1358 : vector<8x64xf32>
    %1360 = arith.mulf %1354, %1359 : vector<8x64xf32>
    %cst_554 = arith.constant dense<0.000000e+00> : vector<8x64xf32>
    %1361 = tpu.matmul %1360, %9, %cst_554 {dimension_numbers = #tpu.dot_dimension_numbers<[1], [0], [0], [1], [0, 0, 1, 1], [], []>} : vector<8x64xf32>, vector<64x64xf32>, vector<8x64xf32> -> vector<8x64xf32>
    %1362 = vector.broadcast %10 : vector<1x64xf32> to vector<8x64xf32>
    %1363 = arith.addf %1361, %1362 : vector<8x64xf32>
    %1364 = arith.negf %1363 : vector<8x64xf32>
    %1365 = math.exp %1364 : vector<8x64xf32>
    %cst_555 = arith.constant 1.000000e+00 : f32
    %1366 = vector.broadcast %cst_555 : f32 to vector<8x64xf32>
    %1367 = arith.addf %1366, %1365 : vector<8x64xf32>
    %1368 = arith.divf %1366, %1367 : vector<8x64xf32>
    %1369 = arith.mulf %1363, %1368 : vector<8x64xf32>
    %1370 = arith.addf %1360, %1369 : vector<8x64xf32>
    %cst_556 = arith.constant dense<0.000000e+00> : vector<8x1xf32>
    %1371 = tpu.matmul %1370, %11, %cst_556 {dimension_numbers = #tpu.dot_dimension_numbers<[1], [0], [0], [1], [0, 0, 1, 1], [], []>} : vector<8x64xf32>, vector<64x1xf32>, vector<8x1xf32> -> vector<8x1xf32>
    %1372 = vector.broadcast %12 : vector<1x1xf32> to vector<8x1xf32>
    %1373 = arith.addf %1371, %1372 : vector<8x1xf32>
    %c5_557 = arith.constant 5 : index
    %c0_558 = arith.constant 0 : index
    %1374 = memref.load %arg6[%c5_557, %c0_558] : memref<7x4xf32, #tpu.memory_space<smem>>
    %c5_559 = arith.constant 5 : index
    %c1_560 = arith.constant 1 : index
    %1375 = memref.load %arg6[%c5_559, %c1_560] : memref<7x4xf32, #tpu.memory_space<smem>>
    %c5_561 = arith.constant 5 : index
    %c2_562 = arith.constant 2 : index
    %1376 = memref.load %arg6[%c5_561, %c2_562] : memref<7x4xf32, #tpu.memory_space<smem>>
    %c5_563 = arith.constant 5 : index
    %c3_564 = arith.constant 3 : index
    %1377 = memref.load %arg6[%c5_563, %c3_564] : memref<7x4xf32, #tpu.memory_space<smem>>
    %1378 = vector.broadcast %1374 : f32 to vector<8x1xf32>
    %1379 = arith.mulf %1378, %1373 : vector<8x1xf32>
    %1380 = arith.subf %1347, %1379 : vector<8x1xf32>
    %1381 = vector.broadcast %1375 : f32 to vector<8x1xf32>
    %1382 = arith.mulf %1381, %1380 : vector<8x1xf32>
    %1383 = vector.broadcast %1376 : f32 to vector<8x1xf32>
    %1384 = arith.mulf %1383, %1347 : vector<8x1xf32>
    %1385 = arith.addf %1382, %1384 : vector<8x1xf32>
    %c3_565 = arith.constant 3 : index
    %c5_566 = arith.constant 5 : index
    %c0_567 = arith.constant 0 : index
    %c0_568 = arith.constant 0 : index
    %1386 = vector.load %arg4[%c3_565, %c5_566, %c0_567, %c0_568] : memref<4x7x8x1xf32, #tpu.memory_space<vmem>>, vector<1x1x8x1xf32>
    %1387 = vector.shape_cast %1386 : vector<1x1x8x1xf32> to vector<8x1xf32>
    %1388 = vector.broadcast %1377 : f32 to vector<8x1xf32>
    %1389 = arith.mulf %1388, %1387 : vector<8x1xf32>
    %1390 = arith.addf %1385, %1389 : vector<8x1xf32>
    %c6_569 = arith.constant 6 : index
    %c0_570 = arith.constant 0 : index
    %1391 = vector.load %arg5[%c6_569, %c0_570] : memref<7x64xf32, #tpu.memory_space<vmem>>, vector<1x64xf32>
    %1392 = vector.broadcast %1390 : vector<8x1xf32> to vector<8x64xf32>
    %1393 = vector.broadcast %6 : vector<1x64xf32> to vector<8x64xf32>
    %1394 = arith.mulf %1392, %1393 : vector<8x64xf32>
    %1395 = arith.addf %1394, %1132 : vector<8x64xf32>
    %1396 = vector.broadcast %1391 : vector<1x64xf32> to vector<8x64xf32>
    %1397 = arith.addf %1395, %1396 : vector<8x64xf32>
    %1398 = arith.negf %1397 : vector<8x64xf32>
    %1399 = math.exp %1398 : vector<8x64xf32>
    %cst_571 = arith.constant 1.000000e+00 : f32
    %1400 = vector.broadcast %cst_571 : f32 to vector<8x64xf32>
    %1401 = arith.addf %1400, %1399 : vector<8x64xf32>
    %1402 = arith.divf %1400, %1401 : vector<8x64xf32>
    %1403 = arith.mulf %1397, %1402 : vector<8x64xf32>
    %cst_572 = arith.constant dense<0.000000e+00> : vector<8x64xf32>
    %1404 = tpu.matmul %1403, %9, %cst_572 {dimension_numbers = #tpu.dot_dimension_numbers<[1], [0], [0], [1], [0, 0, 1, 1], [], []>} : vector<8x64xf32>, vector<64x64xf32>, vector<8x64xf32> -> vector<8x64xf32>
    %1405 = vector.broadcast %10 : vector<1x64xf32> to vector<8x64xf32>
    %1406 = arith.addf %1404, %1405 : vector<8x64xf32>
    %1407 = arith.negf %1406 : vector<8x64xf32>
    %1408 = math.exp %1407 : vector<8x64xf32>
    %cst_573 = arith.constant 1.000000e+00 : f32
    %1409 = vector.broadcast %cst_573 : f32 to vector<8x64xf32>
    %1410 = arith.addf %1409, %1408 : vector<8x64xf32>
    %1411 = arith.divf %1409, %1410 : vector<8x64xf32>
    %1412 = arith.mulf %1406, %1411 : vector<8x64xf32>
    %1413 = arith.addf %1403, %1412 : vector<8x64xf32>
    %cst_574 = arith.constant dense<0.000000e+00> : vector<8x1xf32>
    %1414 = tpu.matmul %1413, %11, %cst_574 {dimension_numbers = #tpu.dot_dimension_numbers<[1], [0], [0], [1], [0, 0, 1, 1], [], []>} : vector<8x64xf32>, vector<64x1xf32>, vector<8x1xf32> -> vector<8x1xf32>
    %1415 = vector.broadcast %12 : vector<1x1xf32> to vector<8x1xf32>
    %1416 = arith.addf %1414, %1415 : vector<8x1xf32>
    %c6_575 = arith.constant 6 : index
    %c0_576 = arith.constant 0 : index
    %1417 = memref.load %arg6[%c6_575, %c0_576] : memref<7x4xf32, #tpu.memory_space<smem>>
    %c6_577 = arith.constant 6 : index
    %c1_578 = arith.constant 1 : index
    %1418 = memref.load %arg6[%c6_577, %c1_578] : memref<7x4xf32, #tpu.memory_space<smem>>
    %c6_579 = arith.constant 6 : index
    %c2_580 = arith.constant 2 : index
    %1419 = memref.load %arg6[%c6_579, %c2_580] : memref<7x4xf32, #tpu.memory_space<smem>>
    %c6_581 = arith.constant 6 : index
    %c3_582 = arith.constant 3 : index
    %1420 = memref.load %arg6[%c6_581, %c3_582] : memref<7x4xf32, #tpu.memory_space<smem>>
    %1421 = vector.broadcast %1417 : f32 to vector<8x1xf32>
    %1422 = arith.mulf %1421, %1416 : vector<8x1xf32>
    %1423 = arith.subf %1390, %1422 : vector<8x1xf32>
    %1424 = vector.broadcast %1418 : f32 to vector<8x1xf32>
    %1425 = arith.mulf %1424, %1423 : vector<8x1xf32>
    %1426 = vector.broadcast %1419 : f32 to vector<8x1xf32>
    %1427 = arith.mulf %1426, %1390 : vector<8x1xf32>
    %1428 = arith.addf %1425, %1427 : vector<8x1xf32>
    %c3_583 = arith.constant 3 : index
    %c6_584 = arith.constant 6 : index
    %c0_585 = arith.constant 0 : index
    %c0_586 = arith.constant 0 : index
    %1429 = vector.load %arg4[%c3_583, %c6_584, %c0_585, %c0_586] : memref<4x7x8x1xf32, #tpu.memory_space<vmem>>, vector<1x1x8x1xf32>
    %1430 = vector.shape_cast %1429 : vector<1x1x8x1xf32> to vector<8x1xf32>
    %1431 = vector.broadcast %1420 : f32 to vector<8x1xf32>
    %1432 = arith.mulf %1431, %1430 : vector<8x1xf32>
    %1433 = arith.addf %1428, %1432 : vector<8x1xf32>
    %c0_587 = arith.constant 0 : index
    %c3_588 = arith.constant 3 : index
    %1434 = vector.load %arg20[%c0_587, %c3_588] : memref<8x4xf32, #tpu.memory_space<vmem>>, vector<8x1xf32>
    tpu.vector_store %arg20[%c0_587, %c3_588], %1433 {strides = array<i32>} : memref<8x4xf32, #tpu.memory_space<vmem>>, vector<8x1xf32>,
    return
  }
}

module attributes {stable_mosaic.version = 11 : i64} {
  func.func @_context_lstm_kernel(%arg0: memref<8x2x10xf32, #tpu.memory_space<vmem>>, %arg1: memref<10x128xf32, #tpu.memory_space<vmem>>, %arg2: memref<32x128xf32, #tpu.memory_space<vmem>>, %arg3: memref<1x128xf32, #tpu.memory_space<vmem>>, %arg4: memref<32x128xf32, #tpu.memory_space<vmem>>, %arg5: memref<32x128xf32, #tpu.memory_space<vmem>>, %arg6: memref<1x128xf32, #tpu.memory_space<vmem>>, %arg7: memref<2x2x32xf32, #tpu.memory_space<vmem>>, %arg8: memref<2x2x32xf32, #tpu.memory_space<vmem>>) attributes {dimension_semantics = [], scalar_prefetch = 0 : i64, scratch_operands = 0 : i64, tpu.core_type = #tpu.core_type<tc>} {
    %c0 = arith.constant 0 : index
    %c0_0 = arith.constant 0 : index
    %0 = vector.load %arg1[%c0, %c0_0] : memref<10x128xf32, #tpu.memory_space<vmem>>, vector<10x128xf32>
    %c0_1 = arith.constant 0 : index
    %c0_2 = arith.constant 0 : index
    %1 = vector.load %arg2[%c0_1, %c0_2] : memref<32x128xf32, #tpu.memory_space<vmem>>, vector<32x128xf32>
    %c0_3 = arith.constant 0 : index
    %c0_4 = arith.constant 0 : index
    %2 = vector.load %arg3[%c0_3, %c0_4] : memref<1x128xf32, #tpu.memory_space<vmem>>, vector<1x128xf32>
    %c0_5 = arith.constant 0 : index
    %c0_6 = arith.constant 0 : index
    %3 = vector.load %arg4[%c0_5, %c0_6] : memref<32x128xf32, #tpu.memory_space<vmem>>, vector<32x128xf32>
    %c0_7 = arith.constant 0 : index
    %c0_8 = arith.constant 0 : index
    %4 = vector.load %arg5[%c0_7, %c0_8] : memref<32x128xf32, #tpu.memory_space<vmem>>, vector<32x128xf32>
    %c0_9 = arith.constant 0 : index
    %c0_10 = arith.constant 0 : index
    %5 = vector.load %arg6[%c0_9, %c0_10] : memref<1x128xf32, #tpu.memory_space<vmem>>, vector<1x128xf32>
    %cst = arith.constant 0.000000e+00 : f32
    %6 = vector.broadcast %cst : f32 to vector<2x32xf32>
    %cst_11 = arith.constant 0.000000e+00 : f32
    %7 = vector.broadcast %cst_11 : f32 to vector<2x32xf32>
    %cst_12 = arith.constant 0.000000e+00 : f32
    %8 = vector.broadcast %cst_12 : f32 to vector<2x32xf32>
    %cst_13 = arith.constant 0.000000e+00 : f32
    %9 = vector.broadcast %cst_13 : f32 to vector<2x32xf32>
    %c0_14 = arith.constant 0 : index
    %c0_15 = arith.constant 0 : index
    %c0_16 = arith.constant 0 : index
    %10 = vector.load %arg0[%c0_14, %c0_15, %c0_16] : memref<8x2x10xf32, #tpu.memory_space<vmem>>, vector<1x2x10xf32>
    %11 = vector.shape_cast %10 : vector<1x2x10xf32> to vector<2x10xf32>
    %cst_17 = arith.constant dense<0.000000e+00> : vector<2x128xf32>
    %12 = tpu.matmul %11, %0, %cst_17 {dimension_numbers = #tpu.dot_dimension_numbers<[1], [0], [0], [1], [0, 0, 1, 1], [], []>} : vector<2x10xf32>, vector<10x128xf32>, vector<2x128xf32> -> vector<2x128xf32>
    %cst_18 = arith.constant dense<0.000000e+00> : vector<2x128xf32>
    %13 = tpu.matmul %6, %1, %cst_18 {dimension_numbers = #tpu.dot_dimension_numbers<[1], [0], [0], [1], [0, 0, 1, 1], [], []>} : vector<2x32xf32>, vector<32x128xf32>, vector<2x128xf32> -> vector<2x128xf32>
    %14 = arith.addf %12, %13 : vector<2x128xf32>
    %15 = vector.broadcast %2 : vector<1x128xf32> to vector<2x128xf32>
    %16 = arith.addf %14, %15 : vector<2x128xf32>
    %17 = vector.extract_strided_slice %16 {offsets = [0, 0], sizes = [2, 32], strides = [1, 1]} : vector<2x128xf32> to vector<2x32xf32>
    %18 = arith.negf %17 : vector<2x32xf32>
    %19 = math.exp %18 : vector<2x32xf32>
    %cst_19 = arith.constant 1.000000e+00 : f32
    %20 = vector.broadcast %cst_19 : f32 to vector<2x32xf32>
    %21 = arith.addf %20, %19 : vector<2x32xf32>
    %22 = arith.divf %20, %21 : vector<2x32xf32>
    %23 = vector.extract_strided_slice %16 {offsets = [0, 32], sizes = [2, 32], strides = [1, 1]} : vector<2x128xf32> to vector<2x32xf32>
    %24 = arith.negf %23 : vector<2x32xf32>
    %25 = math.exp %24 : vector<2x32xf32>
    %cst_20 = arith.constant 1.000000e+00 : f32
    %26 = vector.broadcast %cst_20 : f32 to vector<2x32xf32>
    %27 = arith.addf %26, %25 : vector<2x32xf32>
    %28 = arith.divf %26, %27 : vector<2x32xf32>
    %29 = vector.extract_strided_slice %16 {offsets = [0, 64], sizes = [2, 32], strides = [1, 1]} : vector<2x128xf32> to vector<2x32xf32>
    %30 = math.tanh %29 : vector<2x32xf32>
    %31 = vector.extract_strided_slice %16 {offsets = [0, 96], sizes = [2, 32], strides = [1, 1]} : vector<2x128xf32> to vector<2x32xf32>
    %32 = arith.negf %31 : vector<2x32xf32>
    %33 = math.exp %32 : vector<2x32xf32>
    %cst_21 = arith.constant 1.000000e+00 : f32
    %34 = vector.broadcast %cst_21 : f32 to vector<2x32xf32>
    %35 = arith.addf %34, %33 : vector<2x32xf32>
    %36 = arith.divf %34, %35 : vector<2x32xf32>
    %37 = arith.mulf %28, %7 : vector<2x32xf32>
    %38 = arith.mulf %22, %30 : vector<2x32xf32>
    %39 = arith.addf %37, %38 : vector<2x32xf32>
    %40 = math.tanh %39 : vector<2x32xf32>
    %41 = arith.mulf %36, %40 : vector<2x32xf32>
    %cst_22 = arith.constant dense<0.000000e+00> : vector<2x128xf32>
    %42 = tpu.matmul %41, %3, %cst_22 {dimension_numbers = #tpu.dot_dimension_numbers<[1], [0], [0], [1], [0, 0, 1, 1], [], []>} : vector<2x32xf32>, vector<32x128xf32>, vector<2x128xf32> -> vector<2x128xf32>
    %cst_23 = arith.constant dense<0.000000e+00> : vector<2x128xf32>
    %43 = tpu.matmul %8, %4, %cst_23 {dimension_numbers = #tpu.dot_dimension_numbers<[1], [0], [0], [1], [0, 0, 1, 1], [], []>} : vector<2x32xf32>, vector<32x128xf32>, vector<2x128xf32> -> vector<2x128xf32>
    %44 = arith.addf %42, %43 : vector<2x128xf32>
    %45 = vector.broadcast %5 : vector<1x128xf32> to vector<2x128xf32>
    %46 = arith.addf %44, %45 : vector<2x128xf32>
    %47 = vector.extract_strided_slice %46 {offsets = [0, 0], sizes = [2, 32], strides = [1, 1]} : vector<2x128xf32> to vector<2x32xf32>
    %48 = arith.negf %47 : vector<2x32xf32>
    %49 = math.exp %48 : vector<2x32xf32>
    %cst_24 = arith.constant 1.000000e+00 : f32
    %50 = vector.broadcast %cst_24 : f32 to vector<2x32xf32>
    %51 = arith.addf %50, %49 : vector<2x32xf32>
    %52 = arith.divf %50, %51 : vector<2x32xf32>
    %53 = vector.extract_strided_slice %46 {offsets = [0, 32], sizes = [2, 32], strides = [1, 1]} : vector<2x128xf32> to vector<2x32xf32>
    %54 = arith.negf %53 : vector<2x32xf32>
    %55 = math.exp %54 : vector<2x32xf32>
    %cst_25 = arith.constant 1.000000e+00 : f32
    %56 = vector.broadcast %cst_25 : f32 to vector<2x32xf32>
    %57 = arith.addf %56, %55 : vector<2x32xf32>
    %58 = arith.divf %56, %57 : vector<2x32xf32>
    %59 = vector.extract_strided_slice %46 {offsets = [0, 64], sizes = [2, 32], strides = [1, 1]} : vector<2x128xf32> to vector<2x32xf32>
    %60 = math.tanh %59 : vector<2x32xf32>
    %61 = vector.extract_strided_slice %46 {offsets = [0, 96], sizes = [2, 32], strides = [1, 1]} : vector<2x128xf32> to vector<2x32xf32>
    %62 = arith.negf %61 : vector<2x32xf32>
    %63 = math.exp %62 : vector<2x32xf32>
    %cst_26 = arith.constant 1.000000e+00 : f32
    %64 = vector.broadcast %cst_26 : f32 to vector<2x32xf32>
    %65 = arith.addf %64, %63 : vector<2x32xf32>
    %66 = arith.divf %64, %65 : vector<2x32xf32>
    %67 = arith.mulf %58, %9 : vector<2x32xf32>
    %68 = arith.mulf %52, %60 : vector<2x32xf32>
    %69 = arith.addf %67, %68 : vector<2x32xf32>
    %70 = math.tanh %69 : vector<2x32xf32>
    %71 = arith.mulf %66, %70 : vector<2x32xf32>
    %c1 = arith.constant 1 : index
    %c0_27 = arith.constant 0 : index
    %c0_28 = arith.constant 0 : index
    %72 = vector.load %arg0[%c1, %c0_27, %c0_28] : memref<8x2x10xf32, #tpu.memory_space<vmem>>, vector<1x2x10xf32>
    %73 = vector.shape_cast %72 : vector<1x2x10xf32> to vector<2x10xf32>
    %cst_29 = arith.constant dense<0.000000e+00> : vector<2x128xf32>
    %74 = tpu.matmul %73, %0, %cst_29 {dimension_numbers = #tpu.dot_dimension_numbers<[1], [0], [0], [1], [0, 0, 1, 1], [], []>} : vector<2x10xf32>, vector<10x128xf32>, vector<2x128xf32> -> vector<2x128xf32>
    %cst_30 = arith.constant dense<0.000000e+00> : vector<2x128xf32>
    %75 = tpu.matmul %41, %1, %cst_30 {dimension_numbers = #tpu.dot_dimension_numbers<[1], [0], [0], [1], [0, 0, 1, 1], [], []>} : vector<2x32xf32>, vector<32x128xf32>, vector<2x128xf32> -> vector<2x128xf32>
    %76 = arith.addf %74, %75 : vector<2x128xf32>
    %77 = vector.broadcast %2 : vector<1x128xf32> to vector<2x128xf32>
    %78 = arith.addf %76, %77 : vector<2x128xf32>
    %79 = vector.extract_strided_slice %78 {offsets = [0, 0], sizes = [2, 32], strides = [1, 1]} : vector<2x128xf32> to vector<2x32xf32>
    %80 = arith.negf %79 : vector<2x32xf32>
    %81 = math.exp %80 : vector<2x32xf32>
    %cst_31 = arith.constant 1.000000e+00 : f32
    %82 = vector.broadcast %cst_31 : f32 to vector<2x32xf32>
    %83 = arith.addf %82, %81 : vector<2x32xf32>
    %84 = arith.divf %82, %83 : vector<2x32xf32>
    %85 = vector.extract_strided_slice %78 {offsets = [0, 32], sizes = [2, 32], strides = [1, 1]} : vector<2x128xf32> to vector<2x32xf32>
    %86 = arith.negf %85 : vector<2x32xf32>
    %87 = math.exp %86 : vector<2x32xf32>
    %cst_32 = arith.constant 1.000000e+00 : f32
    %88 = vector.broadcast %cst_32 : f32 to vector<2x32xf32>
    %89 = arith.addf %88, %87 : vector<2x32xf32>
    %90 = arith.divf %88, %89 : vector<2x32xf32>
    %91 = vector.extract_strided_slice %78 {offsets = [0, 64], sizes = [2, 32], strides = [1, 1]} : vector<2x128xf32> to vector<2x32xf32>
    %92 = math.tanh %91 : vector<2x32xf32>
    %93 = vector.extract_strided_slice %78 {offsets = [0, 96], sizes = [2, 32], strides = [1, 1]} : vector<2x128xf32> to vector<2x32xf32>
    %94 = arith.negf %93 : vector<2x32xf32>
    %95 = math.exp %94 : vector<2x32xf32>
    %cst_33 = arith.constant 1.000000e+00 : f32
    %96 = vector.broadcast %cst_33 : f32 to vector<2x32xf32>
    %97 = arith.addf %96, %95 : vector<2x32xf32>
    %98 = arith.divf %96, %97 : vector<2x32xf32>
    %99 = arith.mulf %90, %39 : vector<2x32xf32>
    %100 = arith.mulf %84, %92 : vector<2x32xf32>
    %101 = arith.addf %99, %100 : vector<2x32xf32>
    %102 = math.tanh %101 : vector<2x32xf32>
    %103 = arith.mulf %98, %102 : vector<2x32xf32>
    %cst_34 = arith.constant dense<0.000000e+00> : vector<2x128xf32>
    %104 = tpu.matmul %103, %3, %cst_34 {dimension_numbers = #tpu.dot_dimension_numbers<[1], [0], [0], [1], [0, 0, 1, 1], [], []>} : vector<2x32xf32>, vector<32x128xf32>, vector<2x128xf32> -> vector<2x128xf32>
    %cst_35 = arith.constant dense<0.000000e+00> : vector<2x128xf32>
    %105 = tpu.matmul %71, %4, %cst_35 {dimension_numbers = #tpu.dot_dimension_numbers<[1], [0], [0], [1], [0, 0, 1, 1], [], []>} : vector<2x32xf32>, vector<32x128xf32>, vector<2x128xf32> -> vector<2x128xf32>
    %106 = arith.addf %104, %105 : vector<2x128xf32>
    %107 = vector.broadcast %5 : vector<1x128xf32> to vector<2x128xf32>
    %108 = arith.addf %106, %107 : vector<2x128xf32>
    %109 = vector.extract_strided_slice %108 {offsets = [0, 0], sizes = [2, 32], strides = [1, 1]} : vector<2x128xf32> to vector<2x32xf32>
    %110 = arith.negf %109 : vector<2x32xf32>
    %111 = math.exp %110 : vector<2x32xf32>
    %cst_36 = arith.constant 1.000000e+00 : f32
    %112 = vector.broadcast %cst_36 : f32 to vector<2x32xf32>
    %113 = arith.addf %112, %111 : vector<2x32xf32>
    %114 = arith.divf %112, %113 : vector<2x32xf32>
    %115 = vector.extract_strided_slice %108 {offsets = [0, 32], sizes = [2, 32], strides = [1, 1]} : vector<2x128xf32> to vector<2x32xf32>
    %116 = arith.negf %115 : vector<2x32xf32>
    %117 = math.exp %116 : vector<2x32xf32>
    %cst_37 = arith.constant 1.000000e+00 : f32
    %118 = vector.broadcast %cst_37 : f32 to vector<2x32xf32>
    %119 = arith.addf %118, %117 : vector<2x32xf32>
    %120 = arith.divf %118, %119 : vector<2x32xf32>
    %121 = vector.extract_strided_slice %108 {offsets = [0, 64], sizes = [2, 32], strides = [1, 1]} : vector<2x128xf32> to vector<2x32xf32>
    %122 = math.tanh %121 : vector<2x32xf32>
    %123 = vector.extract_strided_slice %108 {offsets = [0, 96], sizes = [2, 32], strides = [1, 1]} : vector<2x128xf32> to vector<2x32xf32>
    %124 = arith.negf %123 : vector<2x32xf32>
    %125 = math.exp %124 : vector<2x32xf32>
    %cst_38 = arith.constant 1.000000e+00 : f32
    %126 = vector.broadcast %cst_38 : f32 to vector<2x32xf32>
    %127 = arith.addf %126, %125 : vector<2x32xf32>
    %128 = arith.divf %126, %127 : vector<2x32xf32>
    %129 = arith.mulf %120, %69 : vector<2x32xf32>
    %130 = arith.mulf %114, %122 : vector<2x32xf32>
    %131 = arith.addf %129, %130 : vector<2x32xf32>
    %132 = math.tanh %131 : vector<2x32xf32>
    %133 = arith.mulf %128, %132 : vector<2x32xf32>
    %c2 = arith.constant 2 : index
    %c0_39 = arith.constant 0 : index
    %c0_40 = arith.constant 0 : index
    %134 = vector.load %arg0[%c2, %c0_39, %c0_40] : memref<8x2x10xf32, #tpu.memory_space<vmem>>, vector<1x2x10xf32>
    %135 = vector.shape_cast %134 : vector<1x2x10xf32> to vector<2x10xf32>
    %cst_41 = arith.constant dense<0.000000e+00> : vector<2x128xf32>
    %136 = tpu.matmul %135, %0, %cst_41 {dimension_numbers = #tpu.dot_dimension_numbers<[1], [0], [0], [1], [0, 0, 1, 1], [], []>} : vector<2x10xf32>, vector<10x128xf32>, vector<2x128xf32> -> vector<2x128xf32>
    %cst_42 = arith.constant dense<0.000000e+00> : vector<2x128xf32>
    %137 = tpu.matmul %103, %1, %cst_42 {dimension_numbers = #tpu.dot_dimension_numbers<[1], [0], [0], [1], [0, 0, 1, 1], [], []>} : vector<2x32xf32>, vector<32x128xf32>, vector<2x128xf32> -> vector<2x128xf32>
    %138 = arith.addf %136, %137 : vector<2x128xf32>
    %139 = vector.broadcast %2 : vector<1x128xf32> to vector<2x128xf32>
    %140 = arith.addf %138, %139 : vector<2x128xf32>
    %141 = vector.extract_strided_slice %140 {offsets = [0, 0], sizes = [2, 32], strides = [1, 1]} : vector<2x128xf32> to vector<2x32xf32>
    %142 = arith.negf %141 : vector<2x32xf32>
    %143 = math.exp %142 : vector<2x32xf32>
    %cst_43 = arith.constant 1.000000e+00 : f32
    %144 = vector.broadcast %cst_43 : f32 to vector<2x32xf32>
    %145 = arith.addf %144, %143 : vector<2x32xf32>
    %146 = arith.divf %144, %145 : vector<2x32xf32>
    %147 = vector.extract_strided_slice %140 {offsets = [0, 32], sizes = [2, 32], strides = [1, 1]} : vector<2x128xf32> to vector<2x32xf32>
    %148 = arith.negf %147 : vector<2x32xf32>
    %149 = math.exp %148 : vector<2x32xf32>
    %cst_44 = arith.constant 1.000000e+00 : f32
    %150 = vector.broadcast %cst_44 : f32 to vector<2x32xf32>
    %151 = arith.addf %150, %149 : vector<2x32xf32>
    %152 = arith.divf %150, %151 : vector<2x32xf32>
    %153 = vector.extract_strided_slice %140 {offsets = [0, 64], sizes = [2, 32], strides = [1, 1]} : vector<2x128xf32> to vector<2x32xf32>
    %154 = math.tanh %153 : vector<2x32xf32>
    %155 = vector.extract_strided_slice %140 {offsets = [0, 96], sizes = [2, 32], strides = [1, 1]} : vector<2x128xf32> to vector<2x32xf32>
    %156 = arith.negf %155 : vector<2x32xf32>
    %157 = math.exp %156 : vector<2x32xf32>
    %cst_45 = arith.constant 1.000000e+00 : f32
    %158 = vector.broadcast %cst_45 : f32 to vector<2x32xf32>
    %159 = arith.addf %158, %157 : vector<2x32xf32>
    %160 = arith.divf %158, %159 : vector<2x32xf32>
    %161 = arith.mulf %152, %101 : vector<2x32xf32>
    %162 = arith.mulf %146, %154 : vector<2x32xf32>
    %163 = arith.addf %161, %162 : vector<2x32xf32>
    %164 = math.tanh %163 : vector<2x32xf32>
    %165 = arith.mulf %160, %164 : vector<2x32xf32>
    %cst_46 = arith.constant dense<0.000000e+00> : vector<2x128xf32>
    %166 = tpu.matmul %165, %3, %cst_46 {dimension_numbers = #tpu.dot_dimension_numbers<[1], [0], [0], [1], [0, 0, 1, 1], [], []>} : vector<2x32xf32>, vector<32x128xf32>, vector<2x128xf32> -> vector<2x128xf32>
    %cst_47 = arith.constant dense<0.000000e+00> : vector<2x128xf32>
    %167 = tpu.matmul %133, %4, %cst_47 {dimension_numbers = #tpu.dot_dimension_numbers<[1], [0], [0], [1], [0, 0, 1, 1], [], []>} : vector<2x32xf32>, vector<32x128xf32>, vector<2x128xf32> -> vector<2x128xf32>
    %168 = arith.addf %166, %167 : vector<2x128xf32>
    %169 = vector.broadcast %5 : vector<1x128xf32> to vector<2x128xf32>
    %170 = arith.addf %168, %169 : vector<2x128xf32>
    %171 = vector.extract_strided_slice %170 {offsets = [0, 0], sizes = [2, 32], strides = [1, 1]} : vector<2x128xf32> to vector<2x32xf32>
    %172 = arith.negf %171 : vector<2x32xf32>
    %173 = math.exp %172 : vector<2x32xf32>
    %cst_48 = arith.constant 1.000000e+00 : f32
    %174 = vector.broadcast %cst_48 : f32 to vector<2x32xf32>
    %175 = arith.addf %174, %173 : vector<2x32xf32>
    %176 = arith.divf %174, %175 : vector<2x32xf32>
    %177 = vector.extract_strided_slice %170 {offsets = [0, 32], sizes = [2, 32], strides = [1, 1]} : vector<2x128xf32> to vector<2x32xf32>
    %178 = arith.negf %177 : vector<2x32xf32>
    %179 = math.exp %178 : vector<2x32xf32>
    %cst_49 = arith.constant 1.000000e+00 : f32
    %180 = vector.broadcast %cst_49 : f32 to vector<2x32xf32>
    %181 = arith.addf %180, %179 : vector<2x32xf32>
    %182 = arith.divf %180, %181 : vector<2x32xf32>
    %183 = vector.extract_strided_slice %170 {offsets = [0, 64], sizes = [2, 32], strides = [1, 1]} : vector<2x128xf32> to vector<2x32xf32>
    %184 = math.tanh %183 : vector<2x32xf32>
    %185 = vector.extract_strided_slice %170 {offsets = [0, 96], sizes = [2, 32], strides = [1, 1]} : vector<2x128xf32> to vector<2x32xf32>
    %186 = arith.negf %185 : vector<2x32xf32>
    %187 = math.exp %186 : vector<2x32xf32>
    %cst_50 = arith.constant 1.000000e+00 : f32
    %188 = vector.broadcast %cst_50 : f32 to vector<2x32xf32>
    %189 = arith.addf %188, %187 : vector<2x32xf32>
    %190 = arith.divf %188, %189 : vector<2x32xf32>
    %191 = arith.mulf %182, %131 : vector<2x32xf32>
    %192 = arith.mulf %176, %184 : vector<2x32xf32>
    %193 = arith.addf %191, %192 : vector<2x32xf32>
    %194 = math.tanh %193 : vector<2x32xf32>
    %195 = arith.mulf %190, %194 : vector<2x32xf32>
    %c3 = arith.constant 3 : index
    %c0_51 = arith.constant 0 : index
    %c0_52 = arith.constant 0 : index
    %196 = vector.load %arg0[%c3, %c0_51, %c0_52] : memref<8x2x10xf32, #tpu.memory_space<vmem>>, vector<1x2x10xf32>
    %197 = vector.shape_cast %196 : vector<1x2x10xf32> to vector<2x10xf32>
    %cst_53 = arith.constant dense<0.000000e+00> : vector<2x128xf32>
    %198 = tpu.matmul %197, %0, %cst_53 {dimension_numbers = #tpu.dot_dimension_numbers<[1], [0], [0], [1], [0, 0, 1, 1], [], []>} : vector<2x10xf32>, vector<10x128xf32>, vector<2x128xf32> -> vector<2x128xf32>
    %cst_54 = arith.constant dense<0.000000e+00> : vector<2x128xf32>
    %199 = tpu.matmul %165, %1, %cst_54 {dimension_numbers = #tpu.dot_dimension_numbers<[1], [0], [0], [1], [0, 0, 1, 1], [], []>} : vector<2x32xf32>, vector<32x128xf32>, vector<2x128xf32> -> vector<2x128xf32>
    %200 = arith.addf %198, %199 : vector<2x128xf32>
    %201 = vector.broadcast %2 : vector<1x128xf32> to vector<2x128xf32>
    %202 = arith.addf %200, %201 : vector<2x128xf32>
    %203 = vector.extract_strided_slice %202 {offsets = [0, 0], sizes = [2, 32], strides = [1, 1]} : vector<2x128xf32> to vector<2x32xf32>
    %204 = arith.negf %203 : vector<2x32xf32>
    %205 = math.exp %204 : vector<2x32xf32>
    %cst_55 = arith.constant 1.000000e+00 : f32
    %206 = vector.broadcast %cst_55 : f32 to vector<2x32xf32>
    %207 = arith.addf %206, %205 : vector<2x32xf32>
    %208 = arith.divf %206, %207 : vector<2x32xf32>
    %209 = vector.extract_strided_slice %202 {offsets = [0, 32], sizes = [2, 32], strides = [1, 1]} : vector<2x128xf32> to vector<2x32xf32>
    %210 = arith.negf %209 : vector<2x32xf32>
    %211 = math.exp %210 : vector<2x32xf32>
    %cst_56 = arith.constant 1.000000e+00 : f32
    %212 = vector.broadcast %cst_56 : f32 to vector<2x32xf32>
    %213 = arith.addf %212, %211 : vector<2x32xf32>
    %214 = arith.divf %212, %213 : vector<2x32xf32>
    %215 = vector.extract_strided_slice %202 {offsets = [0, 64], sizes = [2, 32], strides = [1, 1]} : vector<2x128xf32> to vector<2x32xf32>
    %216 = math.tanh %215 : vector<2x32xf32>
    %217 = vector.extract_strided_slice %202 {offsets = [0, 96], sizes = [2, 32], strides = [1, 1]} : vector<2x128xf32> to vector<2x32xf32>
    %218 = arith.negf %217 : vector<2x32xf32>
    %219 = math.exp %218 : vector<2x32xf32>
    %cst_57 = arith.constant 1.000000e+00 : f32
    %220 = vector.broadcast %cst_57 : f32 to vector<2x32xf32>
    %221 = arith.addf %220, %219 : vector<2x32xf32>
    %222 = arith.divf %220, %221 : vector<2x32xf32>
    %223 = arith.mulf %214, %163 : vector<2x32xf32>
    %224 = arith.mulf %208, %216 : vector<2x32xf32>
    %225 = arith.addf %223, %224 : vector<2x32xf32>
    %226 = math.tanh %225 : vector<2x32xf32>
    %227 = arith.mulf %222, %226 : vector<2x32xf32>
    %cst_58 = arith.constant dense<0.000000e+00> : vector<2x128xf32>
    %228 = tpu.matmul %227, %3, %cst_58 {dimension_numbers = #tpu.dot_dimension_numbers<[1], [0], [0], [1], [0, 0, 1, 1], [], []>} : vector<2x32xf32>, vector<32x128xf32>, vector<2x128xf32> -> vector<2x128xf32>
    %cst_59 = arith.constant dense<0.000000e+00> : vector<2x128xf32>
    %229 = tpu.matmul %195, %4, %cst_59 {dimension_numbers = #tpu.dot_dimension_numbers<[1], [0], [0], [1], [0, 0, 1, 1], [], []>} : vector<2x32xf32>, vector<32x128xf32>, vector<2x128xf32> -> vector<2x128xf32>
    %230 = arith.addf %228, %229 : vector<2x128xf32>
    %231 = vector.broadcast %5 : vector<1x128xf32> to vector<2x128xf32>
    %232 = arith.addf %230, %231 : vector<2x128xf32>
    %233 = vector.extract_strided_slice %232 {offsets = [0, 0], sizes = [2, 32], strides = [1, 1]} : vector<2x128xf32> to vector<2x32xf32>
    %234 = arith.negf %233 : vector<2x32xf32>
    %235 = math.exp %234 : vector<2x32xf32>
    %cst_60 = arith.constant 1.000000e+00 : f32
    %236 = vector.broadcast %cst_60 : f32 to vector<2x32xf32>
    %237 = arith.addf %236, %235 : vector<2x32xf32>
    %238 = arith.divf %236, %237 : vector<2x32xf32>
    %239 = vector.extract_strided_slice %232 {offsets = [0, 32], sizes = [2, 32], strides = [1, 1]} : vector<2x128xf32> to vector<2x32xf32>
    %240 = arith.negf %239 : vector<2x32xf32>
    %241 = math.exp %240 : vector<2x32xf32>
    %cst_61 = arith.constant 1.000000e+00 : f32
    %242 = vector.broadcast %cst_61 : f32 to vector<2x32xf32>
    %243 = arith.addf %242, %241 : vector<2x32xf32>
    %244 = arith.divf %242, %243 : vector<2x32xf32>
    %245 = vector.extract_strided_slice %232 {offsets = [0, 64], sizes = [2, 32], strides = [1, 1]} : vector<2x128xf32> to vector<2x32xf32>
    %246 = math.tanh %245 : vector<2x32xf32>
    %247 = vector.extract_strided_slice %232 {offsets = [0, 96], sizes = [2, 32], strides = [1, 1]} : vector<2x128xf32> to vector<2x32xf32>
    %248 = arith.negf %247 : vector<2x32xf32>
    %249 = math.exp %248 : vector<2x32xf32>
    %cst_62 = arith.constant 1.000000e+00 : f32
    %250 = vector.broadcast %cst_62 : f32 to vector<2x32xf32>
    %251 = arith.addf %250, %249 : vector<2x32xf32>
    %252 = arith.divf %250, %251 : vector<2x32xf32>
    %253 = arith.mulf %244, %193 : vector<2x32xf32>
    %254 = arith.mulf %238, %246 : vector<2x32xf32>
    %255 = arith.addf %253, %254 : vector<2x32xf32>
    %256 = math.tanh %255 : vector<2x32xf32>
    %257 = arith.mulf %252, %256 : vector<2x32xf32>
    %c4 = arith.constant 4 : index
    %c0_63 = arith.constant 0 : index
    %c0_64 = arith.constant 0 : index
    %258 = vector.load %arg0[%c4, %c0_63, %c0_64] : memref<8x2x10xf32, #tpu.memory_space<vmem>>, vector<1x2x10xf32>
    %259 = vector.shape_cast %258 : vector<1x2x10xf32> to vector<2x10xf32>
    %cst_65 = arith.constant dense<0.000000e+00> : vector<2x128xf32>
    %260 = tpu.matmul %259, %0, %cst_65 {dimension_numbers = #tpu.dot_dimension_numbers<[1], [0], [0], [1], [0, 0, 1, 1], [], []>} : vector<2x10xf32>, vector<10x128xf32>, vector<2x128xf32> -> vector<2x128xf32>
    %cst_66 = arith.constant dense<0.000000e+00> : vector<2x128xf32>
    %261 = tpu.matmul %227, %1, %cst_66 {dimension_numbers = #tpu.dot_dimension_numbers<[1], [0], [0], [1], [0, 0, 1, 1], [], []>} : vector<2x32xf32>, vector<32x128xf32>, vector<2x128xf32> -> vector<2x128xf32>
    %262 = arith.addf %260, %261 : vector<2x128xf32>
    %263 = vector.broadcast %2 : vector<1x128xf32> to vector<2x128xf32>
    %264 = arith.addf %262, %263 : vector<2x128xf32>
    %265 = vector.extract_strided_slice %264 {offsets = [0, 0], sizes = [2, 32], strides = [1, 1]} : vector<2x128xf32> to vector<2x32xf32>
    %266 = arith.negf %265 : vector<2x32xf32>
    %267 = math.exp %266 : vector<2x32xf32>
    %cst_67 = arith.constant 1.000000e+00 : f32
    %268 = vector.broadcast %cst_67 : f32 to vector<2x32xf32>
    %269 = arith.addf %268, %267 : vector<2x32xf32>
    %270 = arith.divf %268, %269 : vector<2x32xf32>
    %271 = vector.extract_strided_slice %264 {offsets = [0, 32], sizes = [2, 32], strides = [1, 1]} : vector<2x128xf32> to vector<2x32xf32>
    %272 = arith.negf %271 : vector<2x32xf32>
    %273 = math.exp %272 : vector<2x32xf32>
    %cst_68 = arith.constant 1.000000e+00 : f32
    %274 = vector.broadcast %cst_68 : f32 to vector<2x32xf32>
    %275 = arith.addf %274, %273 : vector<2x32xf32>
    %276 = arith.divf %274, %275 : vector<2x32xf32>
    %277 = vector.extract_strided_slice %264 {offsets = [0, 64], sizes = [2, 32], strides = [1, 1]} : vector<2x128xf32> to vector<2x32xf32>
    %278 = math.tanh %277 : vector<2x32xf32>
    %279 = vector.extract_strided_slice %264 {offsets = [0, 96], sizes = [2, 32], strides = [1, 1]} : vector<2x128xf32> to vector<2x32xf32>
    %280 = arith.negf %279 : vector<2x32xf32>
    %281 = math.exp %280 : vector<2x32xf32>
    %cst_69 = arith.constant 1.000000e+00 : f32
    %282 = vector.broadcast %cst_69 : f32 to vector<2x32xf32>
    %283 = arith.addf %282, %281 : vector<2x32xf32>
    %284 = arith.divf %282, %283 : vector<2x32xf32>
    %285 = arith.mulf %276, %225 : vector<2x32xf32>
    %286 = arith.mulf %270, %278 : vector<2x32xf32>
    %287 = arith.addf %285, %286 : vector<2x32xf32>
    %288 = math.tanh %287 : vector<2x32xf32>
    %289 = arith.mulf %284, %288 : vector<2x32xf32>
    %cst_70 = arith.constant dense<0.000000e+00> : vector<2x128xf32>
    %290 = tpu.matmul %289, %3, %cst_70 {dimension_numbers = #tpu.dot_dimension_numbers<[1], [0], [0], [1], [0, 0, 1, 1], [], []>} : vector<2x32xf32>, vector<32x128xf32>, vector<2x128xf32> -> vector<2x128xf32>
    %cst_71 = arith.constant dense<0.000000e+00> : vector<2x128xf32>
    %291 = tpu.matmul %257, %4, %cst_71 {dimension_numbers = #tpu.dot_dimension_numbers<[1], [0], [0], [1], [0, 0, 1, 1], [], []>} : vector<2x32xf32>, vector<32x128xf32>, vector<2x128xf32> -> vector<2x128xf32>
    %292 = arith.addf %290, %291 : vector<2x128xf32>
    %293 = vector.broadcast %5 : vector<1x128xf32> to vector<2x128xf32>
    %294 = arith.addf %292, %293 : vector<2x128xf32>
    %295 = vector.extract_strided_slice %294 {offsets = [0, 0], sizes = [2, 32], strides = [1, 1]} : vector<2x128xf32> to vector<2x32xf32>
    %296 = arith.negf %295 : vector<2x32xf32>
    %297 = math.exp %296 : vector<2x32xf32>
    %cst_72 = arith.constant 1.000000e+00 : f32
    %298 = vector.broadcast %cst_72 : f32 to vector<2x32xf32>
    %299 = arith.addf %298, %297 : vector<2x32xf32>
    %300 = arith.divf %298, %299 : vector<2x32xf32>
    %301 = vector.extract_strided_slice %294 {offsets = [0, 32], sizes = [2, 32], strides = [1, 1]} : vector<2x128xf32> to vector<2x32xf32>
    %302 = arith.negf %301 : vector<2x32xf32>
    %303 = math.exp %302 : vector<2x32xf32>
    %cst_73 = arith.constant 1.000000e+00 : f32
    %304 = vector.broadcast %cst_73 : f32 to vector<2x32xf32>
    %305 = arith.addf %304, %303 : vector<2x32xf32>
    %306 = arith.divf %304, %305 : vector<2x32xf32>
    %307 = vector.extract_strided_slice %294 {offsets = [0, 64], sizes = [2, 32], strides = [1, 1]} : vector<2x128xf32> to vector<2x32xf32>
    %308 = math.tanh %307 : vector<2x32xf32>
    %309 = vector.extract_strided_slice %294 {offsets = [0, 96], sizes = [2, 32], strides = [1, 1]} : vector<2x128xf32> to vector<2x32xf32>
    %310 = arith.negf %309 : vector<2x32xf32>
    %311 = math.exp %310 : vector<2x32xf32>
    %cst_74 = arith.constant 1.000000e+00 : f32
    %312 = vector.broadcast %cst_74 : f32 to vector<2x32xf32>
    %313 = arith.addf %312, %311 : vector<2x32xf32>
    %314 = arith.divf %312, %313 : vector<2x32xf32>
    %315 = arith.mulf %306, %255 : vector<2x32xf32>
    %316 = arith.mulf %300, %308 : vector<2x32xf32>
    %317 = arith.addf %315, %316 : vector<2x32xf32>
    %318 = math.tanh %317 : vector<2x32xf32>
    %319 = arith.mulf %314, %318 : vector<2x32xf32>
    %c5 = arith.constant 5 : index
    %c0_75 = arith.constant 0 : index
    %c0_76 = arith.constant 0 : index
    %320 = vector.load %arg0[%c5, %c0_75, %c0_76] : memref<8x2x10xf32, #tpu.memory_space<vmem>>, vector<1x2x10xf32>
    %321 = vector.shape_cast %320 : vector<1x2x10xf32> to vector<2x10xf32>
    %cst_77 = arith.constant dense<0.000000e+00> : vector<2x128xf32>
    %322 = tpu.matmul %321, %0, %cst_77 {dimension_numbers = #tpu.dot_dimension_numbers<[1], [0], [0], [1], [0, 0, 1, 1], [], []>} : vector<2x10xf32>, vector<10x128xf32>, vector<2x128xf32> -> vector<2x128xf32>
    %cst_78 = arith.constant dense<0.000000e+00> : vector<2x128xf32>
    %323 = tpu.matmul %289, %1, %cst_78 {dimension_numbers = #tpu.dot_dimension_numbers<[1], [0], [0], [1], [0, 0, 1, 1], [], []>} : vector<2x32xf32>, vector<32x128xf32>, vector<2x128xf32> -> vector<2x128xf32>
    %324 = arith.addf %322, %323 : vector<2x128xf32>
    %325 = vector.broadcast %2 : vector<1x128xf32> to vector<2x128xf32>
    %326 = arith.addf %324, %325 : vector<2x128xf32>
    %327 = vector.extract_strided_slice %326 {offsets = [0, 0], sizes = [2, 32], strides = [1, 1]} : vector<2x128xf32> to vector<2x32xf32>
    %328 = arith.negf %327 : vector<2x32xf32>
    %329 = math.exp %328 : vector<2x32xf32>
    %cst_79 = arith.constant 1.000000e+00 : f32
    %330 = vector.broadcast %cst_79 : f32 to vector<2x32xf32>
    %331 = arith.addf %330, %329 : vector<2x32xf32>
    %332 = arith.divf %330, %331 : vector<2x32xf32>
    %333 = vector.extract_strided_slice %326 {offsets = [0, 32], sizes = [2, 32], strides = [1, 1]} : vector<2x128xf32> to vector<2x32xf32>
    %334 = arith.negf %333 : vector<2x32xf32>
    %335 = math.exp %334 : vector<2x32xf32>
    %cst_80 = arith.constant 1.000000e+00 : f32
    %336 = vector.broadcast %cst_80 : f32 to vector<2x32xf32>
    %337 = arith.addf %336, %335 : vector<2x32xf32>
    %338 = arith.divf %336, %337 : vector<2x32xf32>
    %339 = vector.extract_strided_slice %326 {offsets = [0, 64], sizes = [2, 32], strides = [1, 1]} : vector<2x128xf32> to vector<2x32xf32>
    %340 = math.tanh %339 : vector<2x32xf32>
    %341 = vector.extract_strided_slice %326 {offsets = [0, 96], sizes = [2, 32], strides = [1, 1]} : vector<2x128xf32> to vector<2x32xf32>
    %342 = arith.negf %341 : vector<2x32xf32>
    %343 = math.exp %342 : vector<2x32xf32>
    %cst_81 = arith.constant 1.000000e+00 : f32
    %344 = vector.broadcast %cst_81 : f32 to vector<2x32xf32>
    %345 = arith.addf %344, %343 : vector<2x32xf32>
    %346 = arith.divf %344, %345 : vector<2x32xf32>
    %347 = arith.mulf %338, %287 : vector<2x32xf32>
    %348 = arith.mulf %332, %340 : vector<2x32xf32>
    %349 = arith.addf %347, %348 : vector<2x32xf32>
    %350 = math.tanh %349 : vector<2x32xf32>
    %351 = arith.mulf %346, %350 : vector<2x32xf32>
    %cst_82 = arith.constant dense<0.000000e+00> : vector<2x128xf32>
    %352 = tpu.matmul %351, %3, %cst_82 {dimension_numbers = #tpu.dot_dimension_numbers<[1], [0], [0], [1], [0, 0, 1, 1], [], []>} : vector<2x32xf32>, vector<32x128xf32>, vector<2x128xf32> -> vector<2x128xf32>
    %cst_83 = arith.constant dense<0.000000e+00> : vector<2x128xf32>
    %353 = tpu.matmul %319, %4, %cst_83 {dimension_numbers = #tpu.dot_dimension_numbers<[1], [0], [0], [1], [0, 0, 1, 1], [], []>} : vector<2x32xf32>, vector<32x128xf32>, vector<2x128xf32> -> vector<2x128xf32>
    %354 = arith.addf %352, %353 : vector<2x128xf32>
    %355 = vector.broadcast %5 : vector<1x128xf32> to vector<2x128xf32>
    %356 = arith.addf %354, %355 : vector<2x128xf32>
    %357 = vector.extract_strided_slice %356 {offsets = [0, 0], sizes = [2, 32], strides = [1, 1]} : vector<2x128xf32> to vector<2x32xf32>
    %358 = arith.negf %357 : vector<2x32xf32>
    %359 = math.exp %358 : vector<2x32xf32>
    %cst_84 = arith.constant 1.000000e+00 : f32
    %360 = vector.broadcast %cst_84 : f32 to vector<2x32xf32>
    %361 = arith.addf %360, %359 : vector<2x32xf32>
    %362 = arith.divf %360, %361 : vector<2x32xf32>
    %363 = vector.extract_strided_slice %356 {offsets = [0, 32], sizes = [2, 32], strides = [1, 1]} : vector<2x128xf32> to vector<2x32xf32>
    %364 = arith.negf %363 : vector<2x32xf32>
    %365 = math.exp %364 : vector<2x32xf32>
    %cst_85 = arith.constant 1.000000e+00 : f32
    %366 = vector.broadcast %cst_85 : f32 to vector<2x32xf32>
    %367 = arith.addf %366, %365 : vector<2x32xf32>
    %368 = arith.divf %366, %367 : vector<2x32xf32>
    %369 = vector.extract_strided_slice %356 {offsets = [0, 64], sizes = [2, 32], strides = [1, 1]} : vector<2x128xf32> to vector<2x32xf32>
    %370 = math.tanh %369 : vector<2x32xf32>
    %371 = vector.extract_strided_slice %356 {offsets = [0, 96], sizes = [2, 32], strides = [1, 1]} : vector<2x128xf32> to vector<2x32xf32>
    %372 = arith.negf %371 : vector<2x32xf32>
    %373 = math.exp %372 : vector<2x32xf32>
    %cst_86 = arith.constant 1.000000e+00 : f32
    %374 = vector.broadcast %cst_86 : f32 to vector<2x32xf32>
    %375 = arith.addf %374, %373 : vector<2x32xf32>
    %376 = arith.divf %374, %375 : vector<2x32xf32>
    %377 = arith.mulf %368, %317 : vector<2x32xf32>
    %378 = arith.mulf %362, %370 : vector<2x32xf32>
    %379 = arith.addf %377, %378 : vector<2x32xf32>
    %380 = math.tanh %379 : vector<2x32xf32>
    %381 = arith.mulf %376, %380 : vector<2x32xf32>
    %c6 = arith.constant 6 : index
    %c0_87 = arith.constant 0 : index
    %c0_88 = arith.constant 0 : index
    %382 = vector.load %arg0[%c6, %c0_87, %c0_88] : memref<8x2x10xf32, #tpu.memory_space<vmem>>, vector<1x2x10xf32>
    %383 = vector.shape_cast %382 : vector<1x2x10xf32> to vector<2x10xf32>
    %cst_89 = arith.constant dense<0.000000e+00> : vector<2x128xf32>
    %384 = tpu.matmul %383, %0, %cst_89 {dimension_numbers = #tpu.dot_dimension_numbers<[1], [0], [0], [1], [0, 0, 1, 1], [], []>} : vector<2x10xf32>, vector<10x128xf32>, vector<2x128xf32> -> vector<2x128xf32>
    %cst_90 = arith.constant dense<0.000000e+00> : vector<2x128xf32>
    %385 = tpu.matmul %351, %1, %cst_90 {dimension_numbers = #tpu.dot_dimension_numbers<[1], [0], [0], [1], [0, 0, 1, 1], [], []>} : vector<2x32xf32>, vector<32x128xf32>, vector<2x128xf32> -> vector<2x128xf32>
    %386 = arith.addf %384, %385 : vector<2x128xf32>
    %387 = vector.broadcast %2 : vector<1x128xf32> to vector<2x128xf32>
    %388 = arith.addf %386, %387 : vector<2x128xf32>
    %389 = vector.extract_strided_slice %388 {offsets = [0, 0], sizes = [2, 32], strides = [1, 1]} : vector<2x128xf32> to vector<2x32xf32>
    %390 = arith.negf %389 : vector<2x32xf32>
    %391 = math.exp %390 : vector<2x32xf32>
    %cst_91 = arith.constant 1.000000e+00 : f32
    %392 = vector.broadcast %cst_91 : f32 to vector<2x32xf32>
    %393 = arith.addf %392, %391 : vector<2x32xf32>
    %394 = arith.divf %392, %393 : vector<2x32xf32>
    %395 = vector.extract_strided_slice %388 {offsets = [0, 32], sizes = [2, 32], strides = [1, 1]} : vector<2x128xf32> to vector<2x32xf32>
    %396 = arith.negf %395 : vector<2x32xf32>
    %397 = math.exp %396 : vector<2x32xf32>
    %cst_92 = arith.constant 1.000000e+00 : f32
    %398 = vector.broadcast %cst_92 : f32 to vector<2x32xf32>
    %399 = arith.addf %398, %397 : vector<2x32xf32>
    %400 = arith.divf %398, %399 : vector<2x32xf32>
    %401 = vector.extract_strided_slice %388 {offsets = [0, 64], sizes = [2, 32], strides = [1, 1]} : vector<2x128xf32> to vector<2x32xf32>
    %402 = math.tanh %401 : vector<2x32xf32>
    %403 = vector.extract_strided_slice %388 {offsets = [0, 96], sizes = [2, 32], strides = [1, 1]} : vector<2x128xf32> to vector<2x32xf32>
    %404 = arith.negf %403 : vector<2x32xf32>
    %405 = math.exp %404 : vector<2x32xf32>
    %cst_93 = arith.constant 1.000000e+00 : f32
    %406 = vector.broadcast %cst_93 : f32 to vector<2x32xf32>
    %407 = arith.addf %406, %405 : vector<2x32xf32>
    %408 = arith.divf %406, %407 : vector<2x32xf32>
    %409 = arith.mulf %400, %349 : vector<2x32xf32>
    %410 = arith.mulf %394, %402 : vector<2x32xf32>
    %411 = arith.addf %409, %410 : vector<2x32xf32>
    %412 = math.tanh %411 : vector<2x32xf32>
    %413 = arith.mulf %408, %412 : vector<2x32xf32>
    %cst_94 = arith.constant dense<0.000000e+00> : vector<2x128xf32>
    %414 = tpu.matmul %413, %3, %cst_94 {dimension_numbers = #tpu.dot_dimension_numbers<[1], [0], [0], [1], [0, 0, 1, 1], [], []>} : vector<2x32xf32>, vector<32x128xf32>, vector<2x128xf32> -> vector<2x128xf32>
    %cst_95 = arith.constant dense<0.000000e+00> : vector<2x128xf32>
    %415 = tpu.matmul %381, %4, %cst_95 {dimension_numbers = #tpu.dot_dimension_numbers<[1], [0], [0], [1], [0, 0, 1, 1], [], []>} : vector<2x32xf32>, vector<32x128xf32>, vector<2x128xf32> -> vector<2x128xf32>
    %416 = arith.addf %414, %415 : vector<2x128xf32>
    %417 = vector.broadcast %5 : vector<1x128xf32> to vector<2x128xf32>
    %418 = arith.addf %416, %417 : vector<2x128xf32>
    %419 = vector.extract_strided_slice %418 {offsets = [0, 0], sizes = [2, 32], strides = [1, 1]} : vector<2x128xf32> to vector<2x32xf32>
    %420 = arith.negf %419 : vector<2x32xf32>
    %421 = math.exp %420 : vector<2x32xf32>
    %cst_96 = arith.constant 1.000000e+00 : f32
    %422 = vector.broadcast %cst_96 : f32 to vector<2x32xf32>
    %423 = arith.addf %422, %421 : vector<2x32xf32>
    %424 = arith.divf %422, %423 : vector<2x32xf32>
    %425 = vector.extract_strided_slice %418 {offsets = [0, 32], sizes = [2, 32], strides = [1, 1]} : vector<2x128xf32> to vector<2x32xf32>
    %426 = arith.negf %425 : vector<2x32xf32>
    %427 = math.exp %426 : vector<2x32xf32>
    %cst_97 = arith.constant 1.000000e+00 : f32
    %428 = vector.broadcast %cst_97 : f32 to vector<2x32xf32>
    %429 = arith.addf %428, %427 : vector<2x32xf32>
    %430 = arith.divf %428, %429 : vector<2x32xf32>
    %431 = vector.extract_strided_slice %418 {offsets = [0, 64], sizes = [2, 32], strides = [1, 1]} : vector<2x128xf32> to vector<2x32xf32>
    %432 = math.tanh %431 : vector<2x32xf32>
    %433 = vector.extract_strided_slice %418 {offsets = [0, 96], sizes = [2, 32], strides = [1, 1]} : vector<2x128xf32> to vector<2x32xf32>
    %434 = arith.negf %433 : vector<2x32xf32>
    %435 = math.exp %434 : vector<2x32xf32>
    %cst_98 = arith.constant 1.000000e+00 : f32
    %436 = vector.broadcast %cst_98 : f32 to vector<2x32xf32>
    %437 = arith.addf %436, %435 : vector<2x32xf32>
    %438 = arith.divf %436, %437 : vector<2x32xf32>
    %439 = arith.mulf %430, %379 : vector<2x32xf32>
    %440 = arith.mulf %424, %432 : vector<2x32xf32>
    %441 = arith.addf %439, %440 : vector<2x32xf32>
    %442 = math.tanh %441 : vector<2x32xf32>
    %443 = arith.mulf %438, %442 : vector<2x32xf32>
    %c7 = arith.constant 7 : index
    %c0_99 = arith.constant 0 : index
    %c0_100 = arith.constant 0 : index
    %444 = vector.load %arg0[%c7, %c0_99, %c0_100] : memref<8x2x10xf32, #tpu.memory_space<vmem>>, vector<1x2x10xf32>
    %445 = vector.shape_cast %444 : vector<1x2x10xf32> to vector<2x10xf32>
    %cst_101 = arith.constant dense<0.000000e+00> : vector<2x128xf32>
    %446 = tpu.matmul %445, %0, %cst_101 {dimension_numbers = #tpu.dot_dimension_numbers<[1], [0], [0], [1], [0, 0, 1, 1], [], []>} : vector<2x10xf32>, vector<10x128xf32>, vector<2x128xf32> -> vector<2x128xf32>
    %cst_102 = arith.constant dense<0.000000e+00> : vector<2x128xf32>
    %447 = tpu.matmul %413, %1, %cst_102 {dimension_numbers = #tpu.dot_dimension_numbers<[1], [0], [0], [1], [0, 0, 1, 1], [], []>} : vector<2x32xf32>, vector<32x128xf32>, vector<2x128xf32> -> vector<2x128xf32>
    %448 = arith.addf %446, %447 : vector<2x128xf32>
    %449 = vector.broadcast %2 : vector<1x128xf32> to vector<2x128xf32>
    %450 = arith.addf %448, %449 : vector<2x128xf32>
    %451 = vector.extract_strided_slice %450 {offsets = [0, 0], sizes = [2, 32], strides = [1, 1]} : vector<2x128xf32> to vector<2x32xf32>
    %452 = arith.negf %451 : vector<2x32xf32>
    %453 = math.exp %452 : vector<2x32xf32>
    %cst_103 = arith.constant 1.000000e+00 : f32
    %454 = vector.broadcast %cst_103 : f32 to vector<2x32xf32>
    %455 = arith.addf %454, %453 : vector<2x32xf32>
    %456 = arith.divf %454, %455 : vector<2x32xf32>
    %457 = vector.extract_strided_slice %450 {offsets = [0, 32], sizes = [2, 32], strides = [1, 1]} : vector<2x128xf32> to vector<2x32xf32>
    %458 = arith.negf %457 : vector<2x32xf32>
    %459 = math.exp %458 : vector<2x32xf32>
    %cst_104 = arith.constant 1.000000e+00 : f32
    %460 = vector.broadcast %cst_104 : f32 to vector<2x32xf32>
    %461 = arith.addf %460, %459 : vector<2x32xf32>
    %462 = arith.divf %460, %461 : vector<2x32xf32>
    %463 = vector.extract_strided_slice %450 {offsets = [0, 64], sizes = [2, 32], strides = [1, 1]} : vector<2x128xf32> to vector<2x32xf32>
    %464 = math.tanh %463 : vector<2x32xf32>
    %465 = vector.extract_strided_slice %450 {offsets = [0, 96], sizes = [2, 32], strides = [1, 1]} : vector<2x128xf32> to vector<2x32xf32>
    %466 = arith.negf %465 : vector<2x32xf32>
    %467 = math.exp %466 : vector<2x32xf32>
    %cst_105 = arith.constant 1.000000e+00 : f32
    %468 = vector.broadcast %cst_105 : f32 to vector<2x32xf32>
    %469 = arith.addf %468, %467 : vector<2x32xf32>
    %470 = arith.divf %468, %469 : vector<2x32xf32>
    %471 = arith.mulf %462, %411 : vector<2x32xf32>
    %472 = arith.mulf %456, %464 : vector<2x32xf32>
    %473 = arith.addf %471, %472 : vector<2x32xf32>
    %474 = math.tanh %473 : vector<2x32xf32>
    %475 = arith.mulf %470, %474 : vector<2x32xf32>
    %cst_106 = arith.constant dense<0.000000e+00> : vector<2x128xf32>
    %476 = tpu.matmul %475, %3, %cst_106 {dimension_numbers = #tpu.dot_dimension_numbers<[1], [0], [0], [1], [0, 0, 1, 1], [], []>} : vector<2x32xf32>, vector<32x128xf32>, vector<2x128xf32> -> vector<2x128xf32>
    %cst_107 = arith.constant dense<0.000000e+00> : vector<2x128xf32>
    %477 = tpu.matmul %443, %4, %cst_107 {dimension_numbers = #tpu.dot_dimension_numbers<[1], [0], [0], [1], [0, 0, 1, 1], [], []>} : vector<2x32xf32>, vector<32x128xf32>, vector<2x128xf32> -> vector<2x128xf32>
    %478 = arith.addf %476, %477 : vector<2x128xf32>
    %479 = vector.broadcast %5 : vector<1x128xf32> to vector<2x128xf32>
    %480 = arith.addf %478, %479 : vector<2x128xf32>
    %481 = vector.extract_strided_slice %480 {offsets = [0, 0], sizes = [2, 32], strides = [1, 1]} : vector<2x128xf32> to vector<2x32xf32>
    %482 = arith.negf %481 : vector<2x32xf32>
    %483 = math.exp %482 : vector<2x32xf32>
    %cst_108 = arith.constant 1.000000e+00 : f32
    %484 = vector.broadcast %cst_108 : f32 to vector<2x32xf32>
    %485 = arith.addf %484, %483 : vector<2x32xf32>
    %486 = arith.divf %484, %485 : vector<2x32xf32>
    %487 = vector.extract_strided_slice %480 {offsets = [0, 32], sizes = [2, 32], strides = [1, 1]} : vector<2x128xf32> to vector<2x32xf32>
    %488 = arith.negf %487 : vector<2x32xf32>
    %489 = math.exp %488 : vector<2x32xf32>
    %cst_109 = arith.constant 1.000000e+00 : f32
    %490 = vector.broadcast %cst_109 : f32 to vector<2x32xf32>
    %491 = arith.addf %490, %489 : vector<2x32xf32>
    %492 = arith.divf %490, %491 : vector<2x32xf32>
    %493 = vector.extract_strided_slice %480 {offsets = [0, 64], sizes = [2, 32], strides = [1, 1]} : vector<2x128xf32> to vector<2x32xf32>
    %494 = math.tanh %493 : vector<2x32xf32>
    %495 = vector.extract_strided_slice %480 {offsets = [0, 96], sizes = [2, 32], strides = [1, 1]} : vector<2x128xf32> to vector<2x32xf32>
    %496 = arith.negf %495 : vector<2x32xf32>
    %497 = math.exp %496 : vector<2x32xf32>
    %cst_110 = arith.constant 1.000000e+00 : f32
    %498 = vector.broadcast %cst_110 : f32 to vector<2x32xf32>
    %499 = arith.addf %498, %497 : vector<2x32xf32>
    %500 = arith.divf %498, %499 : vector<2x32xf32>
    %501 = arith.mulf %492, %441 : vector<2x32xf32>
    %502 = arith.mulf %486, %494 : vector<2x32xf32>
    %503 = arith.addf %501, %502 : vector<2x32xf32>
    %504 = math.tanh %503 : vector<2x32xf32>
    %505 = arith.mulf %500, %504 : vector<2x32xf32>
    %c0_111 = arith.constant 0 : index
    %c0_112 = arith.constant 0 : index
    %c0_113 = arith.constant 0 : index
    %506 = vector.load %arg7[%c0_111, %c0_112, %c0_113] : memref<2x2x32xf32, #tpu.memory_space<vmem>>, vector<1x2x32xf32>
    %507 = vector.shape_cast %506 : vector<1x2x32xf32> to vector<2x32xf32>
    %508 = vector.shape_cast %475 : vector<2x32xf32> to vector<1x2x32xf32>
    tpu.vector_store %arg7[%c0_111, %c0_112, %c0_113], %508 {strides = array<i32>} : memref<2x2x32xf32, #tpu.memory_space<vmem>>, vector<1x2x32xf32>,
    %c1_114 = arith.constant 1 : index
    %c0_115 = arith.constant 0 : index
    %c0_116 = arith.constant 0 : index
    %509 = vector.load %arg7[%c1_114, %c0_115, %c0_116] : memref<2x2x32xf32, #tpu.memory_space<vmem>>, vector<1x2x32xf32>
    %510 = vector.shape_cast %509 : vector<1x2x32xf32> to vector<2x32xf32>
    %511 = vector.shape_cast %505 : vector<2x32xf32> to vector<1x2x32xf32>
    tpu.vector_store %arg7[%c1_114, %c0_115, %c0_116], %511 {strides = array<i32>} : memref<2x2x32xf32, #tpu.memory_space<vmem>>, vector<1x2x32xf32>,
    %c0_117 = arith.constant 0 : index
    %c0_118 = arith.constant 0 : index
    %c0_119 = arith.constant 0 : index
    %512 = vector.load %arg8[%c0_117, %c0_118, %c0_119] : memref<2x2x32xf32, #tpu.memory_space<vmem>>, vector<1x2x32xf32>
    %513 = vector.shape_cast %512 : vector<1x2x32xf32> to vector<2x32xf32>
    %514 = vector.shape_cast %473 : vector<2x32xf32> to vector<1x2x32xf32>
    tpu.vector_store %arg8[%c0_117, %c0_118, %c0_119], %514 {strides = array<i32>} : memref<2x2x32xf32, #tpu.memory_space<vmem>>, vector<1x2x32xf32>,
    %c1_120 = arith.constant 1 : index
    %c0_121 = arith.constant 0 : index
    %c0_122 = arith.constant 0 : index
    %515 = vector.load %arg8[%c1_120, %c0_121, %c0_122] : memref<2x2x32xf32, #tpu.memory_space<vmem>>, vector<1x2x32xf32>
    %516 = vector.shape_cast %515 : vector<1x2x32xf32> to vector<2x32xf32>
    %517 = vector.shape_cast %503 : vector<2x32xf32> to vector<1x2x32xf32>
    tpu.vector_store %arg8[%c1_120, %c0_121, %c0_122], %517 {strides = array<i32>} : memref<2x2x32xf32, #tpu.memory_space<vmem>>, vector<1x2x32xf32>,
    return
  }
}

</mosaic_0001>

<bundles_post_ra>
// kernel: div.23
= control target key start
LH: loop header
LB: loop body
LE: loop exit
PB: predicated region body
PF: predicated region fallthrough
CT: control target
= control target key end

     0   :  { %vm7_vm0 = vcmask 31744   ;;  %vm13_vm1 = vcmask 64544   ;;  %s39_s0 = inlined_call_operand.vmem [shape: f32[2,4], index: 0, kind: input, shape index: {}]   ;;  %s40_s1 = inlined_call_operand.vmem [shape: f32[8], index: 1, kind: output, shape index: {}]  }
   0x1   :  { %v4_v0 = vld [vmem:[%s39_s0] sm:$0x3]  ;;  %s22_s0 = smov 4  }
   0x2   :  { %5 = vst [vmem:[#allocation1] sm:$0x3] %v4_v0 }
   0x9   :  { %v10_v1 = vld [vmem:[#allocation1 + $0x1] sm:$0x1]   ;;  %v6_v2 = vld [vmem:[#allocation1] sm:$0x1]  }
   0xa   :  { %11 = vrot.lane.b32.xlu0 %v10_v1, %s22_s0  ;;  %8 = vst.msk [vmem:[#allocation0] sm:$0x1] %vm7_vm0, %v6_v2  }
  0x7c   :  { %v12_v3 = vpop.permute.xlu0 %11  }
  0x7d   :  { %14 = vst.msk [vmem:[#allocation0] sm:$0x1] %vm13_vm1, %v12_v3  }
  0x84   :  { %v18_v4 = vld [vmem:[#allocation0] sm:$0x1] }
  0x85   :  { %20 = vst [vmem:[%s40_s1] sm:$0x1] %v18_v4 }

// kernel: t2tsb_forward.2
= control target key start
LH: loop header
LB: loop body
LE: loop exit
PB: predicated region body
PF: predicated region fallthrough
CT: control target
= control target key end

     0   :  { %vm123_vm0 = vcmask 1041408   ;;  %v3689_v0 = vmov 0.0|0.0   ;;  %vm3690_vm1 = vmmov 1   ;;  %vm3691_vm3 = vmmov 0   ;;  %s3693_s19 = smov 64   ;;  %s3694_s20 = smov 32   ;;  %s4211_s2 = inlined_call_operand.vmem [shape: f32[32,128], index: 2, kind: input, shape index: {}]   ;;  %s4212_s1 = inlined_call_operand.vmem [shape: f32[10,128], index: 1, kind: input, shape index: {}]   ;;  %s4213_s0 = inlined_call_operand.vmem [shape: f32[8,2,10], index: 0, kind: input, shape index: {}]   ;;  %s4214_s3 = inlined_call_operand.vmem [shape: f32[1,128], index: 3, kind: input, shape index: {}]   ;;  %s4215_s5 = inlined_call_operand.vmem [shape: f32[32,128], index: 5, kind: input, shape index: {}]   ;;  %s4216_s4 = inlined_call_operand.vmem [shape: f32[32,128], index: 4, kind: input, shape index: {}]   ;;  %s4217_s6 = inlined_call_operand.vmem [shape: f32[1,128], index: 6, kind: input, shape index: {}]   ;;  %s4218_s7 = inlined_call_operand.vmem [shape: f32[2,2,32], index: 7, kind: output, shape index: {0}]   ;;  %s4219_s8 = inlined_call_operand.vmem [shape: f32[2,2,32], index: 8, kind: output, shape index: {1}]  }
   0x1   :  { %3376 = vmatprep.subr.bf16.mxu0 %v3689_v0  ;;  %v30_v1 = vld [vmem:[%s4211_s2] sm:$0xff]  ;;  %v31_v2 = vld [vmem:[%s4211_s2 + $0x8] sm:$0xff]  ;;  %3382 = vmatprep.subr.bf16.mxu1 %v3689_v0  ;;  %vm3757_vm2 = vmpackc.low %vm123_vm0, %vm3690_vm1  ;;  %v3692_v8 = vmov 0.0   ;;  %vm119_vm4 = vcmask 80896   ;;  %vm45_vm5 = vcmask 261120   ;;  %vm2820_vm6 = vcmask 254976  }
   0x2   :  { %v28_v3 = vld [vmem:[%s4212_s1] sm:$0xff]  ;;  %v3752_v4 = vpack.c.bf16 %v31_v2, %v30_v1  ;;  %v29_v5 = vld [vmem:[%s4212_s1 + $0x8] sm:$0x3]  ;;  %v32_v7 = vld [vmem:[%s4211_s2 + $0x10] sm:$0xff]  ;;  %3071 = vmatprep.mubr.msk.f32.mxu1 %vm3691_vm3, %v3692_v8  ;;  %3064 = vmatprep.mubr.msk.f32.mxu0 %vm3691_vm3, %v3692_v8 }
   0x3   :  { %v3768_v9 = vpack.c.bf16 %v29_v5, %v28_v3  ;;  %v33_v10 = vld [vmem:[%s4211_s2 + $0x18] sm:$0xff]  ;;  %v44_v12 = vld [vmem:[%s4213_s0] sm:$0x3]  ;;  %v40_v31 = vld [vmem:[%s4215_s5 + $0x8] sm:$0xff] }
   0x4   :  { %3378 = vmatpush3.bf16.msra.mxu0 %v3752_v4  ;;  %v3774_v11 = vpack.c.bf16 %v33_v10, %v32_v7  ;;  %v3795_v15 = vld [vmem:[%s4214_s3] ss:$0 sm:$0xff]  ;;  %v41_v32 = vld [vmem:[%s4215_s5 + $0x10] sm:$0xff]  ;;  %v42_v34 = vld [vmem:[%s4215_s5 + $0x18] sm:$0xff] }
   0x5   :  { %3379 = vmatprep.subr.bf16.mxu0 %v3689_v0  ;;  %3385 = vmatpush3.bf16.msk.msra.mxu1 %vm3757_vm2, %v3768_v9  ;;  %v39_v30 = vld [vmem:[%s4215_s5] sm:$0xff]  ;;  %v36_v36 = vld [vmem:[%s4216_s4 + $0x8] sm:$0xff]  ;;  %v37_v38 = vld [vmem:[%s4216_s4 + $0x10] sm:$0xff]  ;;  %v3832_v40 = vpack.c.bf16 %v42_v34, %v41_v32 }
   0x6   :  { %3386 = vmatprep.subr.bf16.mxu1 %v3689_v0  ;;  %v3812_v33 = vpack.c.bf16 %v40_v31, %v39_v30  ;;  %v35_v35 = vld [vmem:[%s4216_s4] sm:$0xff]  ;;  %v38_v39 = vld [vmem:[%s4216_s4 + $0x18] sm:$0xff] }
   0x7   :  { %v3823_v37 = vpack.c.bf16 %v36_v36, %v35_v35  ;;  %v3836_v41 = vpack.c.bf16 %v38_v39, %v37_v38  ;;  %v2854_v48 = vld [vmem:[%s4213_s0 + $0x2] sm:$0x3]  ;;  %v3879_v49 = vld [vmem:[%s4217_s6] ss:$0 sm:$0xff]  ;;  %v2862_v31 = vld [vmem:[%s4213_s0 + $0x4] sm:$0x3] }
   0x8   :  { %3381 = vmatpush3.bf16.msra.mxu0 %v3774_v11  ;;  %3072 = vmatmul.mubr.msk.f32.vlgmr.msra.gmra.mrb[0].mxu1 %vm119_vm4, %v44_v12 }
   0x9   :  { %3392 = vmatprep.subr.bf16.mxu0 %v3689_v0  ;;  %3082 = vmatprep.mubr.msk.f32.mxu1 %vm3691_vm3, %v3692_v8 }
   0xa   :  { %3388 = vmatpush3.bf16.msra.mxu1 %v3812_v33 }
   0xb   :  { %3065 = vmatmul.mubr.f32.vlgmr.msra.gmra.mrb[0].mxu0 %v3692_v8  ;;  %3389 = vmatprep.subr.bf16.mxu1 %v3689_v0 }
   0xc   :  { %3093 = vmatprep.mubr.msk.f32.mxu0 %vm3691_vm3, %v3692_v8  ;;  %3394 = vmatpush3.bf16.msra.mxu0 %v3823_v37 }
   0xd   :  { %3395 = vmatprep.subr.bf16.mxu0 %v3689_v0 }
   0xe   :  { %3391 = vmatpush3.bf16.msra.mxu1 %v3832_v40 }
   0xf   :  { %3398 = vmatprep.subr.bf16.mxu1 %v3689_v0 }
  0x10   :  { %3397 = vmatpush3.bf16.msra.mxu0 %v3836_v41 }
  0x11   :  { %3404 = vmatprep.subr.bf16.mxu0 %v3689_v0  ;;  %3083 = vmatmul.mubr.f32.vlgmr.msra.gmra.mrb[2].mxu1 %v3692_v8 }
  0x12   :  { %3400 = vmatpush3.bf16.msra.mxu1 %v3752_v4  ;;  %3104 = vmatprep.mubr.msk.f32.mxu1 %vm3691_vm3, %v3692_v8 }
  0x13   :  { %3401 = vmatprep.subr.bf16.mxu1 %v3689_v0 }
  0x16   :  { %3403 = vmatpush3.bf16.msra.mxu1 %v3774_v11 }
  0x17   :  { %3414 = vmatprep.subr.bf16.mxu1 %v3689_v0 }
  0xdb   :  { %v193_v13 = vpop.f32.mrb[0].mxu1 }
  0xdc   :  { %v3073_v14 = vpop.f32.mrb[1].mxu1 }
  0xde   :  { %v115_v16 = vpop.f32.mrb[0].mxu0 }
  0xdf   :  { %v194_v17 = vadd.f32 %v193_v13, %v115_v16  ;;  %v3066_v18 = vpop.f32.mrb[1].mxu0 }
  0xe1   :  { %v203_v19 = vadd.f32 %v3795_v15, %v194_v17 }
  0xe3   :  { %3559 = vtanh.f32 %v203_v19  ;;  %v2850_v21 = vmul.f32 -1.442695, %v203_v19 }
  0xe4   :  { %v294_v45 = vpop.f32.mrb[2].mxu1 }
  0xe5   :  { %3561 = vpow2.f32 %v2850_v21  ;;  %v3084_v46 = vpop.f32.mrb[3].mxu1 }
  0xed   :  { %v3560_v20 = vpop.eup %3559 }
  0xee   :  { %213 = vrot.lane.b32.xlu0 %v3560_v20, %s3693_s19 }
  0xef   :  { %v3562_v22 = vpop.eup %3561 }
  0xf0   :  { %v207_v23 = vadd.f32 1.0, %v3562_v22 }
  0xf2   :  { %3563 = vrcp.f32 %v207_v23 }
  0xfc   :  { %v3564_v24 = vpop.eup %3563 }
  0xfd   :  { %v211_v27 = vmul.f32 0.0, %v3564_v24 }
 0x160   :  { %v214_v25 = vpop.permute.xlu0 %213 }
 0x161   :  { %v216_v26 = vmul.f32 %v3564_v24, %v214_v25 }
 0x163   :  { %218 = vrot.lane.b32.xlu0 %v216_v26, %s3694_s20 }
 0x1d5   :  { %v219_v28 = vpop.permute.xlu0 %218 }
 0x1d6   :  { %v3800_v29 = vadd.f32 %v219_v28, %v211_v27 }
 0x1d8   :  { %3565 = vtanh.f32 %v3800_v29 }
 0x1e2   :  { %v3566_v42 = vpop.eup %3565 }
 0x1e3   :  { %224 = vrot.lane.b32.xlu1 %v3566_v42, %s3693_s19 }
 0x255   :  { %v225_v43 = vpop.permute.xlu1 %224 }
 0x256   :  { %v227_v44 = vmul.f32 %v3564_v24, %v225_v43 }
 0x258   :  { %299 = vrot.lane.b32.xlu1 %v227_v44, %s3694_s20 }
 0x2ca   :  { %v300_v47 = vpop.permute.xlu1 %299 }
 0x2cb   :  { %3094 = vmatmul.mubr.msk.f32.vlgmr.msra.gmra.mrb[2].mxu0 %vm45_vm5, %v300_v47  ;;  %3105 = vmatmul.mubr.msk.f32.vlgmr.msra.gmra.mrb[4].mxu1 %vm45_vm5, %v300_v47 }
 0x2cc   :  { %3407 = vmatpush3.bf16.msk.msra.mxu0 %vm3757_vm2, %v3768_v9  ;;  %3111 = vmatprep.mubr.msk.f32.mxu0 %vm3691_vm3, %v3692_v8 }
 0x2cd   :  { %3408 = vmatprep.subr.bf16.mxu0 %v3689_v0  ;;  %3416 = vmatpush3.bf16.msra.mxu1 %v3823_v37 }
 0x2ce   :  { %3417 = vmatprep.subr.bf16.mxu1 %v3689_v0  ;;  %3133 = vmatprep.mubr.msk.f32.mxu1 %vm3691_vm3, %v3692_v8 }
 0x2cf   :  { %3112 = vmatmul.mubr.msk.f32.vlgmr.msra.gmra.mrb[4].mxu0 %vm119_vm4, %v2854_v48 }
 0x2d0   :  { %3410 = vmatpush3.bf16.msra.mxu0 %v3812_v33  ;;  %3122 = vmatprep.mubr.msk.f32.mxu0 %vm3691_vm3, %v3692_v8 }
 0x2d1   :  { %3411 = vmatprep.subr.bf16.mxu0 %v3689_v0  ;;  %3419 = vmatpush3.bf16.msra.mxu1 %v3836_v41 }
 0x2d2   :  { %3426 = vmatprep.subr.bf16.mxu1 %v3689_v0 }
 0x2d4   :  { %3413 = vmatpush3.bf16.msra.mxu0 %v3832_v40 }
 0x2d5   :  { %3420 = vmatprep.subr.bf16.mxu0 %v3689_v0 }
 0x39e   :  { %v369_v50 = vpop.f32.mrb[2].mxu0  ;;  %v472_v51 = vpop.f32.mrb[4].mxu1 }
 0x39f   :  { %v370_v52 = vadd.f32 %v369_v50, %v294_v45  ;;  %v3095_v53 = vpop.f32.mrb[3].mxu0  ;;  %v3106_v54 = vpop.f32.mrb[5].mxu1 }
 0x3a1   :  { %v379_v55 = vadd.f32 %v3879_v49, %v370_v52 }
 0x3a2   :  { %v545_v56 = vpop.f32.mrb[4].mxu0 }
 0x3a3   :  { %3567 = vtanh.f32 %v379_v55  ;;  %v546_v57 = vadd.f32 %v545_v56, %v472_v51  ;;  %v3113_v58 = vpop.f32.mrb[5].mxu0  ;;  %v2853_v62 = vmul.f32 -1.442695, %v379_v55 }
 0x3a5   :  { %v549_v59 = vadd.f32 %v3795_v15, %v546_v57 }
 0x3a7   :  { %3569 = vtanh.f32 %v549_v59  ;;  %v2858_v63 = vmul.f32 -1.442695, %v549_v59 }
 0x3a8   :  { %3571 = vpow2.f32 %v2853_v62 }
 0x3a9   :  { %3573 = vpow2.f32 %v2858_v63 }
 0x3ad   :  { %v3568_v60 = vpop.eup %3567 }
 0x3ae   :  { %389 = vrot.lane.b32.xlu0 %v3568_v60, %s3693_s19 }
 0x3b1   :  { %v3570_v61 = vpop.eup %3569 }
 0x3b2   :  { %559 = vrot.lane.b32.xlu1 %v3570_v61, %s3693_s19  ;;  %v3572_v1 = vpop.eup %3571 }
 0x3b3   :  { %v383_v2 = vadd.f32 1.0, %v3572_v1  ;;  %v3574_v3 = vpop.eup %3573 }
 0x3b4   :  { %v553_v5 = vadd.f32 1.0, %v3574_v3 }
 0x3b5   :  { %3575 = vrcp.f32 %v383_v2 }
 0x3b6   :  { %3577 = vrcp.f32 %v553_v5 }
 0x3bf   :  { %v3576_v7 = vpop.eup %3575 }
 0x3c0   :  { %v3578_v13 = vpop.eup %3577  ;;  %v387_v17 = vmul.f32 0.0, %v3576_v7 }
 0x3c1   :  { %v557_v20 = vmul.f32 %v3578_v13, %v3800_v29 }
 0x420   :  { %v390_v10 = vpop.permute.xlu0 %389 }
 0x421   :  { %v392_v12 = vmul.f32 %v3576_v7, %v390_v10 }
 0x423   :  { %394 = vrot.lane.b32.xlu0 %v392_v12, %s3694_s20 }
 0x424   :  { %v560_v14 = vpop.permute.xlu1 %559 }
 0x425   :  { %v562_v16 = vmul.f32 %v3578_v13, %v560_v14 }
 0x427   :  { %564 = vrot.lane.b32.xlu1 %v562_v16, %s3694_s20 }
 0x495   :  { %v395_v18 = vpop.permute.xlu0 %394 }
 0x496   :  { %v3887_v19 = vadd.f32 %v395_v18, %v387_v17 }
 0x498   :  { %3579 = vtanh.f32 %v3887_v19 }
 0x499   :  { %v565_v21 = vpop.permute.xlu1 %564 }
 0x49a   :  { %v3891_v22 = vadd.f32 %v565_v21, %v557_v20  ;;  %v2870_v20 = vld [vmem:[%s4213_s0 + $0x6] sm:$0x3] }
 0x49c   :  { %3581 = vtanh.f32 %v3891_v22 }
 0x4a2   :  { %v3580_v23 = vpop.eup %3579 }
 0x4a3   :  { %400 = vrot.lane.b32.xlu0 %v3580_v23, %s3693_s19 }
 0x4a6   :  { %v3582_v24 = vpop.eup %3581 }
 0x4a7   :  { %570 = vrot.lane.b32.xlu1 %v3582_v24, %s3693_s19 }
 0x515   :  { %v401_v25 = vpop.permute.xlu0 %400 }
 0x516   :  { %v403_v26 = vmul.f32 %v3576_v7, %v401_v25 }
 0x518   :  { %575 = vrot.lane.b32.xlu0 %v403_v26, %s3694_s20 }
 0x519   :  { %v571_v27 = vpop.permute.xlu1 %570 }
 0x51a   :  { %v573_v28 = vmul.f32 %v3578_v13, %v571_v27 }
 0x51c   :  { %650 = vrot.lane.b32.xlu1 %v573_v28, %s3694_s20 }
 0x58a   :  { %v576_v29 = vpop.permute.xlu0 %575 }
 0x58b   :  { %3123 = vmatmul.mubr.msk.f32.vlgmr.msra.gmra.mrb[6].mxu0 %vm45_vm5, %v576_v29 }
 0x58c   :  { %3422 = vmatpush3.bf16.msra.mxu0 %v3752_v4  ;;  %3144 = vmatprep.mubr.msk.f32.mxu0 %vm3691_vm3, %v3692_v8 }
 0x58d   :  { %3423 = vmatprep.subr.bf16.mxu0 %v3689_v0 }
 0x58e   :  { %v651_v30 = vpop.permute.xlu1 %650 }
 0x58f   :  { %3134 = vmatmul.mubr.msk.f32.vlgmr.msra.gmra.mrb[6].mxu1 %vm45_vm5, %v651_v30 }
 0x590   :  { %3425 = vmatpush3.bf16.msra.mxu0 %v3774_v11  ;;  %3429 = vmatpush3.bf16.msk.msra.mxu1 %vm3757_vm2, %v3768_v9 }
 0x591   :  { %3151 = vmatprep.mubr.msk.f32.mxu1 %vm3691_vm3, %v3692_v8  ;;  %3430 = vmatprep.subr.bf16.mxu1 %v3689_v0 }
 0x592   :  { %3436 = vmatprep.subr.bf16.mxu0 %v3689_v0 }
 0x593   :  { %3145 = vmatmul.mubr.msk.f32.vlgmr.msra.gmra.mrb[8].mxu0 %vm45_vm5, %v651_v30  ;;  %3152 = vmatmul.mubr.msk.f32.vlgmr.msra.gmra.mrb[8].mxu1 %vm119_vm4, %v2862_v31 }
 0x594   :  { %3432 = vmatpush3.bf16.msra.mxu1 %v3812_v33  ;;  %3438 = vmatpush3.bf16.msra.mxu0 %v3823_v37 }
 0x595   :  { %3433 = vmatprep.subr.bf16.mxu1 %v3689_v0  ;;  %3162 = vmatprep.mubr.msk.f32.mxu1 %vm3691_vm3, %v3692_v8 }
 0x596   :  { %3439 = vmatprep.subr.bf16.mxu0 %v3689_v0  ;;  %3173 = vmatprep.mubr.msk.f32.mxu0 %vm3691_vm3, %v3692_v8 }
 0x598   :  { %3435 = vmatpush3.bf16.msra.mxu1 %v3832_v40  ;;  %3441 = vmatpush3.bf16.msra.mxu0 %v3836_v41 }
 0x599   :  { %3442 = vmatprep.subr.bf16.mxu1 %v3689_v0  ;;  %3448 = vmatprep.subr.bf16.mxu0 %v3689_v0 }
 0x65e   :  { %v645_v32 = vpop.f32.mrb[6].mxu0 }
 0x65f   :  { %v3124_v34 = vpop.f32.mrb[7].mxu0 }
 0x662   :  { %v720_v35 = vpop.f32.mrb[6].mxu1 }
 0x663   :  { %v721_v36 = vadd.f32 %v720_v35, %v645_v32  ;;  %v3135_v38 = vpop.f32.mrb[7].mxu1 }
 0x665   :  { %v724_v39 = vadd.f32 %v3879_v49, %v721_v36 }
 0x666   :  { %v817_v42 = vpop.f32.mrb[8].mxu0  ;;  %v890_v43 = vpop.f32.mrb[8].mxu1 }
 0x667   :  { %3583 = vtanh.f32 %v724_v39  ;;  %v3146_v44 = vpop.f32.mrb[9].mxu0  ;;  %v891_v45 = vadd.f32 %v890_v43, %v817_v42  ;;  %v3153_v46 = vpop.f32.mrb[9].mxu1  ;;  %v2861_v51 = vmul.f32 -1.442695, %v724_v39 }
 0x669   :  { %v894_v47 = vadd.f32 %v3795_v15, %v891_v45 }
 0x66b   :  { %3585 = vtanh.f32 %v894_v47  ;;  %v2866_v52 = vmul.f32 -1.442695, %v894_v47 }
 0x66c   :  { %3587 = vpow2.f32 %v2861_v51 }
 0x66d   :  { %3589 = vpow2.f32 %v2866_v52 }
 0x671   :  { %v3584_v48 = vpop.eup %3583 }
 0x672   :  { %734 = vrot.lane.b32.xlu0 %v3584_v48, %s3693_s19 }
 0x675   :  { %v3586_v50 = vpop.eup %3585 }
 0x676   :  { %904 = vrot.lane.b32.xlu1 %v3586_v50, %s3693_s19  ;;  %v3588_v53 = vpop.eup %3587 }
 0x677   :  { %v728_v54 = vadd.f32 1.0, %v3588_v53  ;;  %v3590_v55 = vpop.eup %3589 }
 0x678   :  { %v898_v56 = vadd.f32 1.0, %v3590_v55 }
 0x679   :  { %3591 = vrcp.f32 %v728_v54 }
 0x67a   :  { %3593 = vrcp.f32 %v898_v56 }
 0x683   :  { %v3592_v57 = vpop.eup %3591 }
 0x684   :  { %v3594_v60 = vpop.eup %3593  ;;  %v732_v63 = vmul.f32 %v3592_v57, %v3887_v19 }
 0x685   :  { %v902_v3 = vmul.f32 %v3594_v60, %v3891_v22 }
 0x6e4   :  { %v735_v58 = vpop.permute.xlu0 %734 }
 0x6e5   :  { %v737_v59 = vmul.f32 %v3592_v57, %v735_v58 }
 0x6e7   :  { %739 = vrot.lane.b32.xlu0 %v737_v59, %s3694_s20 }
 0x6e8   :  { %v905_v61 = vpop.permute.xlu1 %904 }
 0x6e9   :  { %v907_v62 = vmul.f32 %v3594_v60, %v905_v61 }
 0x6eb   :  { %909 = vrot.lane.b32.xlu1 %v907_v62, %s3694_s20 }
 0x759   :  { %v740_v1 = vpop.permute.xlu0 %739 }
 0x75a   :  { %v3936_v2 = vadd.f32 %v740_v1, %v732_v63 }
 0x75c   :  { %3595 = vtanh.f32 %v3936_v2 }
 0x75d   :  { %v910_v5 = vpop.permute.xlu1 %909 }
 0x75e   :  { %v3940_v7 = vadd.f32 %v910_v5, %v902_v3  ;;  %v2878_v3 = vld [vmem:[%s4213_s0 + $0x8] sm:$0x3] }
 0x760   :  { %3597 = vtanh.f32 %v3940_v7 }
 0x766   :  { %v3596_v10 = vpop.eup %3595 }
 0x767   :  { %745 = vrot.lane.b32.xlu0 %v3596_v10, %s3693_s19 }
 0x76a   :  { %v3598_v12 = vpop.eup %3597 }
 0x76b   :  { %915 = vrot.lane.b32.xlu1 %v3598_v12, %s3693_s19 }
 0x7d9   :  { %v746_v13 = vpop.permute.xlu0 %745 }
 0x7da   :  { %v748_v14 = vmul.f32 %v3592_v57, %v746_v13 }
 0x7dc   :  { %920 = vrot.lane.b32.xlu0 %v748_v14, %s3694_s20 }
 0x7dd   :  { %v916_v16 = vpop.permute.xlu1 %915 }
 0x7de   :  { %v918_v17 = vmul.f32 %v3594_v60, %v916_v16 }
 0x7e0   :  { %995 = vrot.lane.b32.xlu1 %v918_v17, %s3694_s20 }
 0x84e   :  { %v921_v18 = vpop.permute.xlu0 %920 }
 0x84f   :  { %3163 = vmatmul.mubr.msk.f32.vlgmr.msra.gmra.mrb[10].mxu1 %vm45_vm5, %v921_v18 }
 0x850   :  { %3444 = vmatpush3.bf16.msra.mxu1 %v3752_v4  ;;  %3184 = vmatprep.mubr.msk.f32.mxu1 %vm3691_vm3, %v3692_v8 }
 0x851   :  { %3445 = vmatprep.subr.bf16.mxu1 %v3689_v0 }
 0x852   :  { %v996_v19 = vpop.permute.xlu1 %995 }
 0x853   :  { %3174 = vmatmul.mubr.msk.f32.vlgmr.msra.gmra.mrb[10].mxu0 %vm45_vm5, %v996_v19 }
 0x854   :  { %3447 = vmatpush3.bf16.msra.mxu1 %v3774_v11  ;;  %3451 = vmatpush3.bf16.msk.msra.mxu0 %vm3757_vm2, %v3768_v9 }
 0x855   :  { %3191 = vmatprep.mubr.msk.f32.mxu0 %vm3691_vm3, %v3692_v8  ;;  %3452 = vmatprep.subr.bf16.mxu0 %v3689_v0 }
 0x856   :  { %3458 = vmatprep.subr.bf16.mxu1 %v3689_v0 }
 0x857   :  { %3185 = vmatmul.mubr.msk.f32.vlgmr.msra.gmra.mrb[12].mxu1 %vm45_vm5, %v996_v19  ;;  %3192 = vmatmul.mubr.msk.f32.vlgmr.msra.gmra.mrb[12].mxu0 %vm119_vm4, %v2870_v20 }
 0x858   :  { %3454 = vmatpush3.bf16.msra.mxu0 %v3812_v33  ;;  %3460 = vmatpush3.bf16.msra.mxu1 %v3823_v37 }
 0x859   :  { %3455 = vmatprep.subr.bf16.mxu0 %v3689_v0  ;;  %3202 = vmatprep.mubr.msk.f32.mxu0 %vm3691_vm3, %v3692_v8 }
 0x85a   :  { %3461 = vmatprep.subr.bf16.mxu1 %v3689_v0  ;;  %3213 = vmatprep.mubr.msk.f32.mxu1 %vm3691_vm3, %v3692_v8 }
 0x85c   :  { %3457 = vmatpush3.bf16.msra.mxu0 %v3832_v40  ;;  %3463 = vmatpush3.bf16.msra.mxu1 %v3836_v41 }
 0x85d   :  { %3464 = vmatprep.subr.bf16.mxu0 %v3689_v0  ;;  %3470 = vmatprep.subr.bf16.mxu1 %v3689_v0 }
 0x922   :  { %v990_v21 = vpop.f32.mrb[10].mxu1 }
 0x923   :  { %v3164_v22 = vpop.f32.mrb[11].mxu1 }
 0x926   :  { %v1065_v23 = vpop.f32.mrb[10].mxu0 }
 0x927   :  { %v1066_v24 = vadd.f32 %v1065_v23, %v990_v21  ;;  %v3175_v25 = vpop.f32.mrb[11].mxu0 }
 0x929   :  { %v1069_v26 = vadd.f32 %v3879_v49, %v1066_v24 }
 0x92a   :  { %v1162_v27 = vpop.f32.mrb[12].mxu1  ;;  %v1235_v28 = vpop.f32.mrb[12].mxu0 }
 0x92b   :  { %3599 = vtanh.f32 %v1069_v26  ;;  %v3186_v29 = vpop.f32.mrb[13].mxu1  ;;  %v1236_v30 = vadd.f32 %v1235_v28, %v1162_v27  ;;  %v3193_v31 = vpop.f32.mrb[13].mxu0  ;;  %v2869_v36 = vmul.f32 -1.442695, %v1069_v26 }
 0x92d   :  { %v1239_v32 = vadd.f32 %v3795_v15, %v1236_v30 }
 0x92f   :  { %3601 = vtanh.f32 %v1239_v32  ;;  %v2874_v38 = vmul.f32 -1.442695, %v1239_v32 }
 0x930   :  { %3603 = vpow2.f32 %v2869_v36 }
 0x931   :  { %3605 = vpow2.f32 %v2874_v38 }
 0x935   :  { %v3600_v34 = vpop.eup %3599 }
 0x936   :  { %1079 = vrot.lane.b32.xlu0 %v3600_v34, %s3693_s19 }
 0x939   :  { %v3602_v35 = vpop.eup %3601 }
 0x93a   :  { %1249 = vrot.lane.b32.xlu1 %v3602_v35, %s3693_s19  ;;  %v3604_v39 = vpop.eup %3603 }
 0x93b   :  { %v1073_v42 = vadd.f32 1.0, %v3604_v39  ;;  %v3606_v43 = vpop.eup %3605 }
 0x93c   :  { %v1243_v44 = vadd.f32 1.0, %v3606_v43 }
 0x93d   :  { %3607 = vrcp.f32 %v1073_v42 }
 0x93e   :  { %3609 = vrcp.f32 %v1243_v44 }
 0x947   :  { %v3608_v45 = vpop.eup %3607 }
 0x948   :  { %v3610_v48 = vpop.eup %3609  ;;  %v1077_v52 = vmul.f32 %v3608_v45, %v3936_v2 }
 0x949   :  { %v1247_v55 = vmul.f32 %v3610_v48, %v3940_v7 }
 0x9a8   :  { %v1080_v46 = vpop.permute.xlu0 %1079 }
 0x9a9   :  { %v1082_v47 = vmul.f32 %v3608_v45, %v1080_v46 }
 0x9ab   :  { %1084 = vrot.lane.b32.xlu0 %v1082_v47, %s3694_s20 }
 0x9ac   :  { %v1250_v50 = vpop.permute.xlu1 %1249 }
 0x9ad   :  { %v1252_v51 = vmul.f32 %v3610_v48, %v1250_v50 }
 0x9af   :  { %1254 = vrot.lane.b32.xlu1 %v1252_v51, %s3694_s20 }
 0xa1d   :  { %v1085_v53 = vpop.permute.xlu0 %1084 }
 0xa1e   :  { %v3985_v54 = vadd.f32 %v1085_v53, %v1077_v52 }
 0xa20   :  { %3611 = vtanh.f32 %v3985_v54 }
 0xa21   :  { %v1255_v56 = vpop.permute.xlu1 %1254 }
 0xa22   :  { %v3989_v57 = vadd.f32 %v1255_v56, %v1247_v55  ;;  %v2886_v55 = vld [vmem:[%s4213_s0 + $0xa] sm:$0x3] }
 0xa24   :  { %3613 = vtanh.f32 %v3989_v57 }
 0xa2a   :  { %v3612_v58 = vpop.eup %3611 }
 0xa2b   :  { %1090 = vrot.lane.b32.xlu0 %v3612_v58, %s3693_s19 }
 0xa2e   :  { %v3614_v59 = vpop.eup %3613 }
 0xa2f   :  { %1260 = vrot.lane.b32.xlu1 %v3614_v59, %s3693_s19 }
 0xa9d   :  { %v1091_v60 = vpop.permute.xlu0 %1090 }
 0xa9e   :  { %v1093_v61 = vmul.f32 %v3608_v45, %v1091_v60 }
 0xaa0   :  { %1265 = vrot.lane.b32.xlu0 %v1093_v61, %s3694_s20 }
 0xaa1   :  { %v1261_v62 = vpop.permute.xlu1 %1260 }
 0xaa2   :  { %v1263_v63 = vmul.f32 %v3610_v48, %v1261_v62 }
 0xaa4   :  { %1340 = vrot.lane.b32.xlu1 %v1263_v63, %s3694_s20 }
 0xb12   :  { %v1266_v1 = vpop.permute.xlu0 %1265 }
 0xb13   :  { %3203 = vmatmul.mubr.msk.f32.vlgmr.msra.gmra.mrb[14].mxu0 %vm45_vm5, %v1266_v1 }
 0xb14   :  { %3466 = vmatpush3.bf16.msra.mxu0 %v3752_v4  ;;  %3224 = vmatprep.mubr.msk.f32.mxu0 %vm3691_vm3, %v3692_v8 }
 0xb15   :  { %3467 = vmatprep.subr.bf16.mxu0 %v3689_v0 }
 0xb16   :  { %v1341_v2 = vpop.permute.xlu1 %1340 }
 0xb17   :  { %3214 = vmatmul.mubr.msk.f32.vlgmr.msra.gmra.mrb[14].mxu1 %vm45_vm5, %v1341_v2 }
 0xb18   :  { %3469 = vmatpush3.bf16.msra.mxu0 %v3774_v11  ;;  %3473 = vmatpush3.bf16.msk.msra.mxu1 %vm3757_vm2, %v3768_v9 }
 0xb19   :  { %3231 = vmatprep.mubr.msk.f32.mxu1 %vm3691_vm3, %v3692_v8  ;;  %3474 = vmatprep.subr.bf16.mxu1 %v3689_v0 }
 0xb1a   :  { %3480 = vmatprep.subr.bf16.mxu0 %v3689_v0 }
 0xb1b   :  { %3225 = vmatmul.mubr.msk.f32.vlgmr.msra.gmra.mrb[16].mxu0 %vm45_vm5, %v1341_v2  ;;  %3232 = vmatmul.mubr.msk.f32.vlgmr.msra.gmra.mrb[16].mxu1 %vm119_vm4, %v2878_v3 }
 0xb1c   :  { %3476 = vmatpush3.bf16.msra.mxu1 %v3812_v33  ;;  %3482 = vmatpush3.bf16.msra.mxu0 %v3823_v37 }
 0xb1d   :  { %3477 = vmatprep.subr.bf16.mxu1 %v3689_v0  ;;  %3242 = vmatprep.mubr.msk.f32.mxu1 %vm3691_vm3, %v3692_v8 }
 0xb1e   :  { %3483 = vmatprep.subr.bf16.mxu0 %v3689_v0  ;;  %3253 = vmatprep.mubr.msk.f32.mxu0 %vm3691_vm3, %v3692_v8 }
 0xb20   :  { %3479 = vmatpush3.bf16.msra.mxu1 %v3832_v40  ;;  %3485 = vmatpush3.bf16.msra.mxu0 %v3836_v41 }
 0xb21   :  { %3486 = vmatprep.subr.bf16.mxu1 %v3689_v0  ;;  %3492 = vmatprep.subr.bf16.mxu0 %v3689_v0 }
 0xbe6   :  { %v1335_v5 = vpop.f32.mrb[14].mxu0 }
 0xbe7   :  { %v3204_v7 = vpop.f32.mrb[15].mxu0 }
 0xbea   :  { %v1410_v10 = vpop.f32.mrb[14].mxu1 }
 0xbeb   :  { %v1411_v12 = vadd.f32 %v1410_v10, %v1335_v5  ;;  %v3215_v13 = vpop.f32.mrb[15].mxu1 }
 0xbed   :  { %v1414_v14 = vadd.f32 %v3879_v49, %v1411_v12 }
 0xbee   :  { %v1507_v16 = vpop.f32.mrb[16].mxu0  ;;  %v1580_v17 = vpop.f32.mrb[16].mxu1 }
 0xbef   :  { %3615 = vtanh.f32 %v1414_v14  ;;  %v3226_v18 = vpop.f32.mrb[17].mxu0  ;;  %v1581_v19 = vadd.f32 %v1580_v17, %v1507_v16  ;;  %v3233_v20 = vpop.f32.mrb[17].mxu1  ;;  %v2877_v24 = vmul.f32 -1.442695, %v1414_v14 }
 0xbf1   :  { %v1584_v21 = vadd.f32 %v3795_v15, %v1581_v19 }
 0xbf3   :  { %3617 = vtanh.f32 %v1584_v21  ;;  %v2882_v25 = vmul.f32 -1.442695, %v1584_v21 }
 0xbf4   :  { %3619 = vpow2.f32 %v2877_v24 }
 0xbf5   :  { %3621 = vpow2.f32 %v2882_v25 }
 0xbf9   :  { %v3616_v22 = vpop.eup %3615 }
 0xbfa   :  { %1424 = vrot.lane.b32.xlu0 %v3616_v22, %s3693_s19 }
 0xbfd   :  { %v3618_v23 = vpop.eup %3617 }
 0xbfe   :  { %1594 = vrot.lane.b32.xlu1 %v3618_v23, %s3693_s19  ;;  %v3620_v26 = vpop.eup %3619 }
 0xbff   :  { %v1418_v27 = vadd.f32 1.0, %v3620_v26  ;;  %v3622_v28 = vpop.eup %3621 }
 0xc00   :  { %v1588_v29 = vadd.f32 1.0, %v3622_v28 }
 0xc01   :  { %3623 = vrcp.f32 %v1418_v27 }
 0xc02   :  { %3625 = vrcp.f32 %v1588_v29 }
 0xc0b   :  { %v3624_v30 = vpop.eup %3623 }
 0xc0c   :  { %v3626_v34 = vpop.eup %3625  ;;  %v1422_v38 = vmul.f32 %v3624_v30, %v3985_v54 }
 0xc0d   :  { %v1592_v43 = vmul.f32 %v3626_v34, %v3989_v57 }
 0xc6c   :  { %v1425_v31 = vpop.permute.xlu0 %1424 }
 0xc6d   :  { %v1427_v32 = vmul.f32 %v3624_v30, %v1425_v31 }
 0xc6f   :  { %1429 = vrot.lane.b32.xlu0 %v1427_v32, %s3694_s20 }
 0xc70   :  { %v1595_v35 = vpop.permute.xlu1 %1594 }
 0xc71   :  { %v1597_v36 = vmul.f32 %v3626_v34, %v1595_v35 }
 0xc73   :  { %1599 = vrot.lane.b32.xlu1 %v1597_v36, %s3694_s20 }
 0xce1   :  { %v1430_v39 = vpop.permute.xlu0 %1429 }
 0xce2   :  { %v4034_v42 = vadd.f32 %v1430_v39, %v1422_v38 }
 0xce4   :  { %3627 = vtanh.f32 %v4034_v42 }
 0xce5   :  { %v1600_v44 = vpop.permute.xlu1 %1599 }
 0xce6   :  { %v4038_v45 = vadd.f32 %v1600_v44, %v1592_v43  ;;  %v2894_v43 = vld [vmem:[%s4213_s0 + $0xc] sm:$0x3] }
 0xce8   :  { %3629 = vtanh.f32 %v4038_v45 }
 0xcee   :  { %v3628_v46 = vpop.eup %3627 }
 0xcef   :  { %1435 = vrot.lane.b32.xlu0 %v3628_v46, %s3693_s19 }
 0xcf2   :  { %v3630_v47 = vpop.eup %3629 }
 0xcf3   :  { %1605 = vrot.lane.b32.xlu1 %v3630_v47, %s3693_s19 }
 0xd61   :  { %v1436_v48 = vpop.permute.xlu0 %1435 }
 0xd62   :  { %v1438_v50 = vmul.f32 %v3624_v30, %v1436_v48 }
 0xd64   :  { %1610 = vrot.lane.b32.xlu0 %v1438_v50, %s3694_s20 }
 0xd65   :  { %v1606_v51 = vpop.permute.xlu1 %1605 }
 0xd66   :  { %v1608_v52 = vmul.f32 %v3626_v34, %v1606_v51 }
 0xd68   :  { %1685 = vrot.lane.b32.xlu1 %v1608_v52, %s3694_s20 }
 0xdd6   :  { %v1611_v53 = vpop.permute.xlu0 %1610 }
 0xdd7   :  { %3243 = vmatmul.mubr.msk.f32.vlgmr.msra.gmra.mrb[18].mxu1 %vm45_vm5, %v1611_v53 }
 0xdd8   :  { %3488 = vmatpush3.bf16.msra.mxu1 %v3752_v4  ;;  %3264 = vmatprep.mubr.msk.f32.mxu1 %vm3691_vm3, %v3692_v8 }
 0xdd9   :  { %3489 = vmatprep.subr.bf16.mxu1 %v3689_v0 }
 0xdda   :  { %v1686_v54 = vpop.permute.xlu1 %1685 }
 0xddb   :  { %3254 = vmatmul.mubr.msk.f32.vlgmr.msra.gmra.mrb[18].mxu0 %vm45_vm5, %v1686_v54 }
 0xddc   :  { %3491 = vmatpush3.bf16.msra.mxu1 %v3774_v11  ;;  %3495 = vmatpush3.bf16.msk.msra.mxu0 %vm3757_vm2, %v3768_v9 }
 0xddd   :  { %3271 = vmatprep.mubr.msk.f32.mxu0 %vm3691_vm3, %v3692_v8  ;;  %3496 = vmatprep.subr.bf16.mxu0 %v3689_v0 }
 0xdde   :  { %3502 = vmatprep.subr.bf16.mxu1 %v3689_v0 }
 0xddf   :  { %3265 = vmatmul.mubr.msk.f32.vlgmr.msra.gmra.mrb[20].mxu1 %vm45_vm5, %v1686_v54  ;;  %3272 = vmatmul.mubr.msk.f32.vlgmr.msra.gmra.mrb[20].mxu0 %vm119_vm4, %v2886_v55 }
 0xde0   :  { %3498 = vmatpush3.bf16.msra.mxu0 %v3812_v33  ;;  %3504 = vmatpush3.bf16.msra.mxu1 %v3823_v37 }
 0xde1   :  { %3499 = vmatprep.subr.bf16.mxu0 %v3689_v0  ;;  %3282 = vmatprep.mubr.msk.f32.mxu0 %vm3691_vm3, %v3692_v8 }
 0xde2   :  { %3505 = vmatprep.subr.bf16.mxu1 %v3689_v0  ;;  %3293 = vmatprep.mubr.msk.f32.mxu1 %vm3691_vm3, %v3692_v8 }
 0xde4   :  { %3501 = vmatpush3.bf16.msra.mxu0 %v3832_v40  ;;  %3507 = vmatpush3.bf16.msra.mxu1 %v3836_v41 }
 0xde5   :  { %3508 = vmatprep.subr.bf16.mxu0 %v3689_v0  ;;  %3514 = vmatprep.subr.bf16.mxu1 %v3689_v0 }
 0xeaa   :  { %v1680_v56 = vpop.f32.mrb[18].mxu1 }
 0xeab   :  { %v3244_v57 = vpop.f32.mrb[19].mxu1 }
 0xeae   :  { %v1755_v58 = vpop.f32.mrb[18].mxu0 }
 0xeaf   :  { %v1756_v59 = vadd.f32 %v1755_v58, %v1680_v56  ;;  %v3255_v60 = vpop.f32.mrb[19].mxu0 }
 0xeb1   :  { %v1759_v61 = vadd.f32 %v3879_v49, %v1756_v59 }
 0xeb2   :  { %v1852_v62 = vpop.f32.mrb[20].mxu1  ;;  %v1925_v63 = vpop.f32.mrb[20].mxu0 }
 0xeb3   :  { %3631 = vtanh.f32 %v1759_v61  ;;  %v3266_v1 = vpop.f32.mrb[21].mxu1  ;;  %v1926_v2 = vadd.f32 %v1925_v63, %v1852_v62  ;;  %v3273_v3 = vpop.f32.mrb[21].mxu0  ;;  %v2885_v12 = vmul.f32 -1.442695, %v1759_v61 }
 0xeb5   :  { %v1929_v5 = vadd.f32 %v3795_v15, %v1926_v2 }
 0xeb7   :  { %3633 = vtanh.f32 %v1929_v5  ;;  %v2890_v13 = vmul.f32 -1.442695, %v1929_v5 }
 0xeb8   :  { %3635 = vpow2.f32 %v2885_v12 }
 0xeb9   :  { %3637 = vpow2.f32 %v2890_v13 }
 0xebd   :  { %v3632_v7 = vpop.eup %3631 }
 0xebe   :  { %1769 = vrot.lane.b32.xlu0 %v3632_v7, %s3693_s19 }
 0xec1   :  { %v3634_v10 = vpop.eup %3633 }
 0xec2   :  { %1939 = vrot.lane.b32.xlu1 %v3634_v10, %s3693_s19  ;;  %v3636_v14 = vpop.eup %3635 }
 0xec3   :  { %v1763_v16 = vadd.f32 1.0, %v3636_v14  ;;  %v3638_v17 = vpop.eup %3637 }
 0xec4   :  { %v1933_v18 = vadd.f32 1.0, %v3638_v17 }
 0xec5   :  { %3639 = vrcp.f32 %v1763_v16 }
 0xec6   :  { %3641 = vrcp.f32 %v1933_v18 }
 0xecf   :  { %v3640_v19 = vpop.eup %3639 }
 0xed0   :  { %v3642_v22 = vpop.eup %3641  ;;  %v1767_v25 = vmul.f32 %v3640_v19, %v4034_v42 }
 0xed1   :  { %v1937_v28 = vmul.f32 %v3642_v22, %v4038_v45 }
 0xf30   :  { %v1770_v20 = vpop.permute.xlu0 %1769 }
 0xf31   :  { %v1772_v21 = vmul.f32 %v3640_v19, %v1770_v20 }
 0xf33   :  { %1774 = vrot.lane.b32.xlu0 %v1772_v21, %s3694_s20 }
 0xf34   :  { %v1940_v23 = vpop.permute.xlu1 %1939 }
 0xf35   :  { %v1942_v24 = vmul.f32 %v3642_v22, %v1940_v23 }
 0xf37   :  { %1944 = vrot.lane.b32.xlu1 %v1942_v24, %s3694_s20 }
 0xfa5   :  { %v1775_v26 = vpop.permute.xlu0 %1774 }
 0xfa6   :  { %v4083_v27 = vadd.f32 %v1775_v26, %v1767_v25 }
 0xfa8   :  { %3643 = vtanh.f32 %v4083_v27 }
 0xfa9   :  { %v1945_v29 = vpop.permute.xlu1 %1944 }
 0xfaa   :  { %v4087_v30 = vadd.f32 %v1945_v29, %v1937_v28 }
 0xfac   :  { %3645 = vtanh.f32 %v4087_v30 }
 0xfb2   :  { %v3644_v31 = vpop.eup %3643 }
 0xfb3   :  { %1780 = vrot.lane.b32.xlu0 %v3644_v31, %s3693_s19 }
 0xfb6   :  { %v3646_v32 = vpop.eup %3645 }
 0xfb7   :  { %1950 = vrot.lane.b32.xlu1 %v3646_v32, %s3693_s19 }
0x1025   :  { %v1781_v34 = vpop.permute.xlu0 %1780 }
0x1026   :  { %v1783_v35 = vmul.f32 %v3640_v19, %v1781_v34 }
0x1028   :  { %1955 = vrot.lane.b32.xlu0 %v1783_v35, %s3694_s20 }
0x1029   :  { %v1951_v36 = vpop.permute.xlu1 %1950 }
0x102a   :  { %v1953_v38 = vmul.f32 %v3642_v22, %v1951_v36 }
0x102c   :  { %2030 = vrot.lane.b32.xlu1 %v1953_v38, %s3694_s20 }
0x109a   :  { %v1956_v39 = vpop.permute.xlu0 %1955 }
0x109b   :  { %3283 = vmatmul.mubr.msk.f32.vlgmr.msra.gmra.mrb[22].mxu0 %vm45_vm5, %v1956_v39 }
0x109c   :  { %3510 = vmatpush3.bf16.msra.mxu0 %v3752_v4  ;;  %3304 = vmatprep.mubr.msk.f32.mxu0 %vm3691_vm3, %v3692_v8 }
0x109d   :  { %3511 = vmatprep.subr.bf16.mxu0 %v3689_v0 }
0x109e   :  { %v2031_v42 = vpop.permute.xlu1 %2030 }
0x109f   :  { %3294 = vmatmul.mubr.msk.f32.vlgmr.msra.gmra.mrb[22].mxu1 %vm45_vm5, %v2031_v42 }
0x10a0   :  { %3513 = vmatpush3.bf16.msra.mxu0 %v3774_v11  ;;  %3517 = vmatpush3.bf16.msk.msra.mxu1 %vm3757_vm2, %v3768_v9 }
0x10a1   :  { %3311 = vmatprep.mubr.msk.f32.mxu1 %vm3691_vm3, %v3692_v8  ;;  %3518 = vmatprep.subr.bf16.mxu1 %v3689_v0 }
0x10a2   :  { %3524 = vmatprep.subr.bf16.mxu0 %v3689_v0 }
0x10a3   :  { %3305 = vmatmul.mubr.msk.f32.vlgmr.msra.gmra.mrb[24].mxu0 %vm45_vm5, %v2031_v42  ;;  %3312 = vmatmul.mubr.msk.f32.vlgmr.msra.gmra.mrb[24].mxu1 %vm119_vm4, %v2894_v43 }
0x10a4   :  { %3520 = vmatpush3.bf16.msra.mxu1 %v3812_v33  ;;  %3526 = vmatpush3.bf16.msra.mxu0 %v3823_v37 }
0x10a5   :  { %3521 = vmatprep.subr.bf16.mxu1 %v3689_v0  ;;  %3322 = vmatprep.mubr.msk.f32.mxu1 %vm3691_vm3, %v3692_v8 }
0x10a6   :  { %3527 = vmatprep.subr.bf16.mxu0 %v3689_v0  ;;  %3333 = vmatprep.mubr.msk.f32.mxu0 %vm3691_vm3, %v3692_v8 }
0x10a8   :  { %3523 = vmatpush3.bf16.msra.mxu1 %v3832_v40  ;;  %3529 = vmatpush3.bf16.msra.mxu0 %v3836_v41 }
0x10a9   :  { %3530 = vmatprep.subr.bf16.mxu1 %v3689_v0  ;;  %3536 = vmatprep.subr.bf16.mxu0 %v3689_v0 }
0x116e   :  { %v2025_v44 = vpop.f32.mrb[22].mxu0 }
0x116f   :  { %v3284_v45 = vpop.f32.mrb[23].mxu0 }
0x1172   :  { %v2100_v46 = vpop.f32.mrb[22].mxu1 }
0x1173   :  { %v2101_v47 = vadd.f32 %v2100_v46, %v2025_v44  ;;  %v3295_v48 = vpop.f32.mrb[23].mxu1 }
0x1175   :  { %v2104_v50 = vadd.f32 %v3879_v49, %v2101_v47 }
0x1176   :  { %v2197_v51 = vpop.f32.mrb[24].mxu0  ;;  %v2270_v52 = vpop.f32.mrb[24].mxu1 }
0x1177   :  { %3647 = vtanh.f32 %v2104_v50  ;;  %v3306_v53 = vpop.f32.mrb[25].mxu0  ;;  %v2271_v54 = vadd.f32 %v2270_v52, %v2197_v51  ;;  %v3313_v55 = vpop.f32.mrb[25].mxu1  ;;  %v2893_v59 = vmul.f32 -1.442695, %v2104_v50 }
0x1179   :  { %v2274_v56 = vadd.f32 %v3795_v15, %v2271_v54 }
0x117b   :  { %3649 = vtanh.f32 %v2274_v56  ;;  %v2898_v60 = vmul.f32 -1.442695, %v2274_v56 }
0x117c   :  { %3651 = vpow2.f32 %v2893_v59 }
0x117d   :  { %3653 = vpow2.f32 %v2898_v60 }
0x1181   :  { %v3648_v57 = vpop.eup %3647 }
0x1182   :  { %2114 = vrot.lane.b32.xlu0 %v3648_v57, %s3693_s19 }
0x1185   :  { %v3650_v58 = vpop.eup %3649 }
0x1186   :  { %2284 = vrot.lane.b32.xlu1 %v3650_v58, %s3693_s19  ;;  %v3652_v61 = vpop.eup %3651 }
0x1187   :  { %v2108_v62 = vadd.f32 1.0, %v3652_v61  ;;  %v3654_v63 = vpop.eup %3653 }
0x1188   :  { %v2278_v1 = vadd.f32 1.0, %v3654_v63 }
0x1189   :  { %3655 = vrcp.f32 %v2108_v62 }
0x118a   :  { %3657 = vrcp.f32 %v2278_v1 }
0x1193   :  { %v3656_v2 = vpop.eup %3655 }
0x1194   :  { %v3658_v5 = vpop.eup %3657  ;;  %v2112_v12 = vmul.f32 %v3656_v2, %v4083_v27  ;;  %v2902_v27 = vld [vmem:[%s4213_s0 + $0xe] sm:$0x3] }
0x1195   :  { %v2282_v16 = vmul.f32 %v3658_v5, %v4087_v30 }
0x11f4   :  { %v2115_v3 = vpop.permute.xlu0 %2114 }
0x11f5   :  { %v2117_v15 = vmul.f32 %v3656_v2, %v2115_v3 }
0x11f7   :  { %2119 = vrot.lane.b32.xlu0 %v2117_v15, %s3694_s20 }
0x11f8   :  { %v2285_v7 = vpop.permute.xlu1 %2284 }
0x11f9   :  { %v2287_v10 = vmul.f32 %v3658_v5, %v2285_v7 }
0x11fb   :  { %2289 = vrot.lane.b32.xlu1 %v2287_v10, %s3694_s20 }
0x1269   :  { %v2120_v13 = vpop.permute.xlu0 %2119 }
0x126a   :  { %v4132_v14 = vadd.f32 %v2120_v13, %v2112_v12 }
0x126c   :  { %3659 = vtanh.f32 %v4132_v14 }
0x126d   :  { %v2290_v17 = vpop.permute.xlu1 %2289 }
0x126e   :  { %v4136_v18 = vadd.f32 %v2290_v17, %v2282_v16 }
0x1270   :  { %3661 = vtanh.f32 %v4136_v18 }
0x1276   :  { %v3660_v19 = vpop.eup %3659 }
0x1277   :  { %2125 = vrot.lane.b32.xlu0 %v3660_v19, %s3693_s19 }
0x127a   :  { %v3662_v20 = vpop.eup %3661 }
0x127b   :  { %2295 = vrot.lane.b32.xlu1 %v3662_v20, %s3693_s19 }
0x12e9   :  { %v2126_v21 = vpop.permute.xlu0 %2125 }
0x12ea   :  { %v2128_v22 = vmul.f32 %v3656_v2, %v2126_v21 }
0x12ec   :  { %2300 = vrot.lane.b32.xlu0 %v2128_v22, %s3694_s20 }
0x12ed   :  { %v2296_v23 = vpop.permute.xlu1 %2295 }
0x12ee   :  { %v2298_v24 = vmul.f32 %v3658_v5, %v2296_v23  ;;  %v3688_v5 = vld [vmem:[%s4217_s6] ss:$0 sm:$0xff]  ;;  %s3695_s6 = smov 96  }
0x12f0   :  { %2375 = vrot.lane.b32.xlu1 %v2298_v24, %s3694_s20 }
0x135e   :  { %v2301_v25 = vpop.permute.xlu0 %2300 }
0x135f   :  { %3323 = vmatmul.mubr.msk.f32.vlgmr.msra.gmra.mrb[26].mxu1 %vm45_vm5, %v2301_v25 }
0x1360   :  { %3532 = vmatpush3.bf16.msra.mxu1 %v3752_v4  ;;  %3344 = vmatprep.mubr.msk.f32.mxu1 %vm3691_vm3, %v3692_v8 }
0x1361   :  { %3533 = vmatprep.subr.bf16.mxu1 %v3689_v0 }
0x1362   :  { %v2376_v26 = vpop.permute.xlu1 %2375 }
0x1363   :  { %3334 = vmatmul.mubr.msk.f32.vlgmr.msra.gmra.mrb[26].mxu0 %vm45_vm5, %v2376_v26 }
0x1364   :  { %3535 = vmatpush3.bf16.msra.mxu1 %v3774_v11  ;;  %3539 = vmatpush3.bf16.msk.msra.mxu0 %vm3757_vm2, %v3768_v9 }
0x1365   :  { %3351 = vmatprep.mubr.msk.f32.mxu0 %vm3691_vm3, %v3692_v8  ;;  %3540 = vmatprep.subr.bf16.mxu0 %v3689_v0 }
0x1366   :  { %3546 = vmatprep.subr.bf16.mxu1 %v3689_v0 }
0x1367   :  { %3345 = vmatmul.mubr.msk.f32.vlgmr.msra.gmra.mrb[28].mxu1 %vm45_vm5, %v2376_v26  ;;  %3352 = vmatmul.mubr.msk.f32.vlgmr.msra.gmra.mrb[28].mxu0 %vm119_vm4, %v2902_v27 }
0x1368   :  { %3542 = vmatpush3.bf16.msra.mxu0 %v3812_v33  ;;  %3548 = vmatpush3.bf16.msra.mxu1 %v3823_v37 }
0x1369   :  { %3543 = vmatprep.subr.bf16.mxu0 %v3689_v0  ;;  %3362 = vmatprep.mubr.msk.f32.mxu0 %vm3691_vm3, %v3692_v8 }
0x136a   :  { %3549 = vmatprep.subr.bf16.mxu1 %v3689_v0  ;;  %3373 = vmatprep.mubr.msk.f32.mxu1 %vm3691_vm3, %v3692_v8  ;;  %v3687_v8 = vld [vmem:[%s4214_s3] ss:$0 sm:$0xff] }
0x136c   :  { %3545 = vmatpush3.bf16.msra.mxu0 %v3832_v40  ;;  %3551 = vmatpush3.bf16.msra.mxu1 %v3836_v41 }
0x1432   :  { %v2370_v4 = vpop.f32.mrb[26].mxu1 }
0x1433   :  { %v3324_v6 = vpop.f32.mrb[27].mxu1 }
0x1436   :  { %v2445_v9 = vpop.f32.mrb[26].mxu0 }
0x1437   :  { %v2446_v11 = vadd.f32 %v2445_v9, %v2370_v4  ;;  %v3335_v33 = vpop.f32.mrb[27].mxu0 }
0x1439   :  { %v2449_v37 = vadd.f32 %v3879_v49, %v2446_v11 }
0x143a   :  { %v2542_v28 = vpop.f32.mrb[28].mxu1  ;;  %v2615_v29 = vpop.f32.mrb[28].mxu0 }
0x143b   :  { %3663 = vtanh.f32 %v2449_v37  ;;  %v3346_v30 = vpop.f32.mrb[29].mxu1  ;;  %v2616_v31 = vadd.f32 %v2615_v29, %v2542_v28  ;;  %v3353_v0 = vpop.f32.mrb[29].mxu0  ;;  %v2901_v34 = vmul.f32 -1.442695, %v2449_v37 }
0x143d   :  { %v2619_v40 = vadd.f32 %v3687_v8, %v2616_v31 }
0x143f   :  { %3665 = vtanh.f32 %v2619_v40  ;;  %v2906_v49 = vmul.f32 -1.442695, %v2619_v40 }
0x1440   :  { %3667 = vpow2.f32 %v2901_v34 }
0x1441   :  { %3669 = vpow2.f32 %v2906_v49 }
0x1445   :  { %v3664_v41 = vpop.eup %3663 }
0x1446   :  { %2459 = vrot.lane.b32.xlu0 %v3664_v41, %s3693_s19 }
0x1449   :  { %v3666_v32 = vpop.eup %3665 }
0x144a   :  { %2629 = vrot.lane.b32.xlu1 %v3666_v32, %s3693_s19  ;;  %v3668_v35 = vpop.eup %3667 }
0x144b   :  { %v2453_v36 = vadd.f32 1.0, %v3668_v35  ;;  %v3670_v38 = vpop.eup %3669 }
0x144c   :  { %v2623_v39 = vadd.f32 1.0, %v3670_v38 }
0x144d   :  { %3671 = vrcp.f32 %v2453_v36 }
0x144e   :  { %3673 = vrcp.f32 %v2623_v39 }
0x1457   :  { %v3672_v42 = vpop.eup %3671 }
0x1458   :  { %v3674_v45 = vpop.eup %3673  ;;  %v2457_v48 = vmul.f32 %v3672_v42, %v4132_v14 }
0x1459   :  { %v2627_v52 = vmul.f32 %v3674_v45, %v4136_v18 }
0x14b8   :  { %v2460_v43 = vpop.permute.xlu0 %2459 }
0x14b9   :  { %v2462_v44 = vmul.f32 %v3672_v42, %v2460_v43 }
0x14bb   :  { %2464 = vrot.lane.b32.xlu0 %v2462_v44, %s3694_s20 }
0x14bc   :  { %v2630_v46 = vpop.permute.xlu1 %2629 }
0x14bd   :  { %v2632_v47 = vmul.f32 %v3674_v45, %v2630_v46 }
0x14bf   :  { %2634 = vrot.lane.b32.xlu1 %v2632_v47, %s3694_s20 }
0x152d   :  { %v2465_v50 = vpop.permute.xlu0 %2464 }
0x152e   :  { %v2467_v51 = vadd.f32 %v2465_v50, %v2457_v48 }
0x1530   :  { %3675 = vtanh.f32 %v2467_v51 }
0x1531   :  { %v2635_v53 = vpop.permute.xlu1 %2634 }
0x1532   :  { %v2637_v54 = vadd.f32 %v2635_v53, %v2627_v52 }
0x1534   :  { %3677 = vtanh.f32 %v2637_v54 }
0x153a   :  { %v3676_v55 = vpop.eup %3675 }
0x153b   :  { %2470 = vrot.lane.b32.xlu0 %v3676_v55, %s3693_s19 }
0x153e   :  { %v3678_v56 = vpop.eup %3677 }
0x153f   :  { %2640 = vrot.lane.b32.xlu1 %v3678_v56, %s3693_s19 }
0x15ad   :  { %v2471_v57 = vpop.permute.xlu0 %2470 }
0x15ae   :  { %v2473_v58 = vmul.f32 %v3672_v42, %v2471_v57 }
0x15b0   :  { %2645 = vrot.lane.b32.xlu0 %v2473_v58, %s3694_s20 }
0x15b1   :  { %v2641_v59 = vpop.permute.xlu1 %2640 }
0x15b2   :  { %v2643_v60 = vmul.f32 %v3674_v45, %v2641_v59 }
0x15b4   :  { %2720 = vrot.lane.b32.xlu1 %v2643_v60, %s3694_s20 }
0x1622   :  { %v2646_v61 = vpop.permute.xlu0 %2645 }
0x1623   :  { %3363 = vmatmul.mubr.msk.f32.vlgmr.msra.gmra.mrb[30].mxu0 %vm45_vm5, %v2646_v61 }
0x1626   :  { %v2721_v62 = vpop.permute.xlu1 %2720 }
0x1627   :  { %2821 = vst.msk [vmem:[%s4218_s7] sm:$0x3] %vm2820_vm6, %v2721_v62  ;;  %3374 = vmatmul.mubr.msk.f32.vlgmr.msra.gmra.mrb[30].mxu1 %vm45_vm5, %v2721_v62 }
0x16f6   :  { %v2715_v63 = vpop.f32.mrb[30].mxu0 }
0x16f7   :  { %v3364_v1 = vpop.f32.mrb[31].mxu0 }
0x16fa   :  { %v2790_v2 = vpop.f32.mrb[30].mxu1 }
0x16fb   :  { %v2791_v3 = vadd.f32 %v2790_v2, %v2715_v63  ;;  %v3375_v15 = vpop.f32.mrb[31].mxu1 }
0x16fd   :  { %v2794_v7 = vadd.f32 %v3688_v5, %v2791_v3 }
0x16ff   :  { %3679 = vtanh.f32 %v2794_v7  ;;  %v2909_v12 = vmul.f32 -1.442695, %v2794_v7 }
0x1701   :  { %3681 = vpow2.f32 %v2909_v12 }
0x1709   :  { %v3680_v10 = vpop.eup %3679 }
0x170a   :  { %2804 = vrot.lane.b32.xlu0 %v3680_v10, %s3693_s19 }
0x170b   :  { %v3682_v13 = vpop.eup %3681 }
0x170c   :  { %v2798_v14 = vadd.f32 1.0, %v3682_v13 }
0x170e   :  { %3683 = vrcp.f32 %v2798_v14 }
0x1718   :  { %v3684_v16 = vpop.eup %3683 }
0x1719   :  { %v2802_v19 = vmul.f32 %v3684_v16, %v2467_v51 }
0x177c   :  { %v2805_v17 = vpop.permute.xlu0 %2804 }
0x177d   :  { %v2807_v18 = vmul.f32 %v3684_v16, %v2805_v17 }
0x177f   :  { %2809 = vrot.lane.b32.xlu1 %v2807_v18, %s3694_s20 }
0x17f1   :  { %v2810_v20 = vpop.permute.xlu1 %2809 }
0x17f2   :  { %v2812_v21 = vadd.f32 %v2810_v20, %v2802_v19 }
0x17f4   :  { %3685 = vtanh.f32 %v2812_v21 }
0x17fe   :  { %v3686_v22 = vpop.eup %3685 }
0x17ff   :  { %2815 = vrot.lane.b32.xlu0 %v3686_v22, %s3693_s19 }
0x1803   :  { %2829 = vrot.lane.b32.xlu0 %v2637_v54, %s3695_s6 }
0x1871   :  { %v2816_v23 = vpop.permute.xlu0 %2815 }
0x1872   :  { %v2818_v24 = vmul.f32 %v3684_v16, %v2816_v23 }
0x1874   :  { %2823 = vrot.lane.b32.xlu1 %v2818_v24, %s3694_s20 }
0x1875   :  { %v2830_v25 = vpop.permute.xlu0 %2829 }
0x1876   :  { %2832 = vst.msk [vmem:[%s4219_s8] sm:$0x3] %vm2820_vm6, %v2830_v25 }
0x1878   :  { %2834 = vrot.lane.b32.xlu1 %v2812_v21, %s3695_s6 }
0x18e6   :  { %v2824_v26 = vpop.permute.xlu1 %2823 }
0x18e7   :  { %2910 = vst.msk [vmem:[%s4218_s7 + $0x2] sm:$0x3] %vm2820_vm6, %v2824_v26 }
0x18ea   :  { %v2835_v27 = vpop.permute.xlu1 %2834 }
0x18eb   :  { %2911 = vst.msk [vmem:[%s4219_s8 + $0x2] sm:$0x3] %vm2820_vm6, %v2835_v27 }

// kernel: t2tsb_forward.3
= control target key start
LH: loop header
LB: loop body
LE: loop exit
PB: predicated region body
PF: predicated region fallthrough
CT: control target
= control target key end

     0   :  { %s12039_s0 = inlined_call_operand.vmem [shape: f32[2,8,32], index: 0, kind: input, shape index: {}]   ;;  %s12040_s1 = inlined_call_operand.vmem [shape: f32[2,8,32], index: 1, kind: input, shape index: {}]   ;;  %s12041_s2 = inlined_call_operand.vmem [shape: f32[8,2], index: 2, kind: input, shape index: {}]   ;;  %s12042_s3 = inlined_call_operand.vmem [shape: f32[4,8,7], index: 3, kind: input, shape index: {}]   ;;  %s12043_s4 = inlined_call_operand.vmem [shape: f32[4,7,8,1], index: 4, kind: input, shape index: {}]   ;;  %s12044_s5 = inlined_call_operand.vmem [shape: f32[7,64], index: 5, kind: input, shape index: {}]   ;;  %s12045_s6 = inlined_call_operand.vmem [shape: f32[7,4], index: 6, kind: input, shape index: {}]   ;;  %s12046_s7 = inlined_call_operand.vmem [shape: f32[10,128], index: 7, kind: input, shape index: {}]   ;;  %s12047_s8 = inlined_call_operand.vmem [shape: f32[32,128], index: 8, kind: input, shape index: {}]   ;;  %s12048_s9 = inlined_call_operand.vmem [shape: f32[1,128], index: 9, kind: input, shape index: {}]   ;;  %s12049_s10 = inlined_call_operand.vmem [shape: f32[32,128], index: 10, kind: input, shape index: {}]   ;;  %s12050_s11 = inlined_call_operand.vmem [shape: f32[32,128], index: 11, kind: input, shape index: {}]   ;;  %s12051_s12 = inlined_call_operand.vmem [shape: f32[1,128], index: 12, kind: input, shape index: {}]   ;;  %s12052_s13 = inlined_call_operand.vmem [shape: f32[1,64], index: 13, kind: input, shape index: {}]   ;;  %s12053_s14 = inlined_call_operand.vmem [shape: f32[32,64], index: 14, kind: input, shape index: {}]   ;;  %s12054_s15 = inlined_call_operand.vmem [shape: f32[1,64], index: 15, kind: input, shape index: {}]   ;;  %s12055_s16 = inlined_call_operand.vmem [shape: f32[64,64], index: 16, kind: input, shape index: {}]   ;;  %s12056_s17 = inlined_call_operand.vmem [shape: f32[1,64], index: 17, kind: input, shape index: {}]   ;;  %s12057_s18 = inlined_call_operand.vmem [shape: f32[64,1], index: 18, kind: input, shape index: {}]   ;;  %s12058_s19 = inlined_call_operand.<no memory space> [shape: f32[1,1], index: 19, kind: input, shape index: {}]   ;;  %s12059_s20 = inlined_call_operand.vmem [shape: f32[8,4], index: 20, kind: output, shape index: {}]  }
   0x1   :  { %12065 = sst [smem:[#allocation6_spill]] %s12039_s0  ;;  %v25_v0 = vstv %s12058_s19 }
   0x2   :  { %12066 = sst [smem:[#allocation7_spill]] %s12040_s1  ;;  %26 = vst [vmem:[#allocation2] sm:$0x1] %v25_v0 }
   0x3   :  { %12067 = sst [smem:[#allocation8_spill]] %s12041_s2 }
   0x4   :  { %12068 = sst [smem:[#allocation9_spill]] %s12042_s3 }
   0x5   :  { %12069 = sst [smem:[#allocation10_spill]] %s12043_s4 }
   0x6   :  { %27 = vsyncpa [#allocation4], 0  ;;  %s46_s2 = sshll.u32 %s12045_s6, 4  ;;  %s47_s2 = int_to_ptr.vmem [resolvable:$true] %s46_s2 }
   0x7   :  { %s10315_s25 = scalar_lea.vmem %s47_s2, 128  ;;  %p10320_p1 = scmp.lt.s32.totalorder %s47_s2, %s47_s2 }
   0x8   :  { %p10316_p0 = scmp.ne.s32.totalorder %s47_s2, %s10315_s25  ;;  %p10321_p2 = scmp.lt.s32.totalorder %s10315_s25, %s10315_s25 }
   0xa   :  { %p10322_p3 = por %p10321_p2, %p10320_p1 }
   0xc   :  { %p10323_p4 = pnand %p10322_p3, %p10316_p0 }
   0xe   :  { %10326 = shalt.err (!%p10323_p4)
}
   0xf   :  { %s10329_s3 = smov [#allocation3]  }
  0x10   :  { %49 = dma.vmem_to_smem %s47_s2, 128, %s10329_s3, [#allocation4]  }
  0x11   :  { %10327 = dma.done.wait [#allocation4], 128  }
  0x12   :  { %10328 = vsyncadd [#allocation4], 4294967168 }
  0x13   :  { %79 = sfence }
  0x14   :  { %v97_v1 = vld [vmem:[%s12053_s14] sm:$0xff]  ;;  %v98_v2 = vld [vmem:[%s12053_s14 + $0x8] sm:$0xff]  ;;  %v99_v3 = vld [vmem:[%s12053_s14 + $0x10] sm:$0xff]  ;;  %v10330_v4 = vmov 0.0|0.0   ;;  %vm10331_vm0 = vmmov 0   ;;  %v10332_v7 = vmov 0.0  }
  0x15   :  { %9248 = vmatprep.subr.bf16.mxu0 %v10330_v4  ;;  %v10462_v5 = vpack.c.bf16 %v98_v2, %v97_v1  ;;  %v100_v6 = vld [vmem:[%s12053_s14 + $0x18] sm:$0xff]  ;;  %8028 = vmatprep.mubr.msk.f32.mxu0 %vm10331_vm0, %v10332_v7  ;;  %s12070_s1 = sld [smem:[#allocation8_spill]]  ;;  %v10333_v9 = vmov 1   ;;  %s12071_s23 = sld [smem:[#allocation6_spill]]  ;;  %vm133_vm1 = vcmask 261120   ;;  %v102_v12 = vld [vmem:[%s12055_s16] sm:$0xff] }
  0x16   :  { %10022 = vset.pattern.permute.xlu0 %v10333_v9  ;;  %9254 = vmatprep.subr.bf16.mxu1 %v10330_v4  ;;  %v10476_v10 = vpack.c.bf16 %v100_v6, %v99_v3  ;;  %v103_v13 = vld [vmem:[%s12055_s16 + $0x8] sm:$0xff]  ;;  %v104_v14 = vld [vmem:[%s12055_s16 + $0x10] sm:$0xff]  ;;  %v105_v16 = vld [vmem:[%s12055_s16 + $0x18] sm:$0xff]  ;;  %vm239_vm2 = vcmask 523264   ;;  %s12072_s6 = sld [smem:[#allocation10_spill]]  ;;  %s10334_s4 = smov 1  }
  0x17   :  { %9250 = vmatpush3.bf16.msra.mxu0 %v10462_v5  ;;  %8047 = vmatprep.mubr.msk.f32.mxu1 %vm10331_vm0, %v10332_v7  ;;  %v10499_v15 = vpack.c.bf16 %v103_v13, %v102_v12  ;;  %v10505_v17 = vpack.c.bf16 %v105_v16, %v104_v14  ;;  %v106_v18 = vld [vmem:[%s12055_s16 + $0x20] sm:$0xff]  ;;  %v107_v19 = vld [vmem:[%s12055_s16 + $0x28] sm:$0xff]  ;;  %v108_v21 = vld [vmem:[%s12055_s16 + $0x30] sm:$0xff]  ;;  %s400_s29 = sld [smem:[#allocation3]]  ;;  %s7144_s30 = sld [smem:[#allocation3 + $0x2]]  ;;  %vm1715_vm3 = vcmask 1041408  }
  0x18   :  { %9251 = vmatprep.subr.bf16.mxu0 %v10330_v4  ;;  %10023 = vset.pattern.permute.xlu1 %v10333_v9  ;;  %v10515_v20 = vpack.c.bf16 %v107_v19, %v106_v18  ;;  %v109_v22 = vld [vmem:[%s12055_s16 + $0x38] sm:$0xff]  ;;  %v10533_v25 = vld [vmem:[%s12052_s13] ss:$0 sm:$0xff]  ;;  %v112_v40 = vld [vmem:[%s12057_s18 + $0x8] sm:$0xff]  ;;  %s7143_s0 = sld [smem:[#allocation3 + $0x1]]  ;;  %s7154_s22 = sld [smem:[#allocation3 + $0x83]] }
  0x19   :  { %9256 = vmatpush3.bf16.msra.mxu1 %v10499_v15  ;;  %v10525_v23 = vpack.c.bf16 %v109_v22, %v108_v21  ;;  %v7133_v26 = vld [vmem:[%s12054_s15] ss:$0 sm:$0xff]  ;;  %v113_v42 = vld [vmem:[%s12057_s18 + $0x10] sm:$0xff]  ;;  %v114_v43 = vld [vmem:[%s12057_s18 + $0x18] sm:$0xff]  ;;  %s7151_s25 = sld [smem:[#allocation3 + $0x80]]  ;;  %s7152_s3 = sld [smem:[#allocation3 + $0x81]] }
  0x1a   :  { %9257 = vmatprep.subr.bf16.mxu1 %v10330_v4  ;;  %v7136_v31 = vld [vmem:[%s12044_s5] ss:$0 sm:$0xff]  ;;  %v10572_v44 = vpack.c.bf16 %v114_v43, %v113_v42  ;;  %v116_v46 = vld [vmem:[%s12057_s18 + $0x28] sm:$0xff]  ;;  %v117_v48 = vld [vmem:[%s12057_s18 + $0x30] sm:$0xff]  ;;  %s7153_s16 = sld [smem:[#allocation3 + $0x82]]  ;;  %s7202_s24 = sld [smem:[#allocation3 + $0x301]] }
  0x1b   :  { %v10472_v8 = vld [vmem:[%s12070_s1] sm:$0xff]  ;;  %9253 = vmatpush3.bf16.msra.mxu0 %v10476_v10  ;;  %v7131_v11 = vld [vmem:[%s12071_s23 + $0x8] sm:$0xff]  ;;  %v118_v49 = vld [vmem:[%s12057_s18 + $0x38] sm:$0xff]  ;;  %s7203_s2 = sld [smem:[#allocation3 + $0x302]]  ;;  %vm10336_vm4 = vmmov 1   ;;  %s12075_s14 = sld [smem:[#allocation9_spill]] }
  0x1c   :  { %210 = vperm.xlu0 %10022, %v10472_v8   ;;  %9266 = vmatprep.subr.bf16.mxu0 %v10330_v4  ;;  %v111_v39 = vld [vmem:[%s12057_s18] sm:$0xff]  ;;  %v10592_v50 = vpack.c.bf16 %v118_v49, %v117_v48  ;;  %v7155_v48 = vld [vmem:[%s12072_s6 + $0x8] sm:$0xff]  ;;  %vm10868_vm5 = vmpackc.low %vm1715_vm3, %vm10336_vm4  ;;  %vm1622_vm6 = vcmask 7168   ;;  %vm1628_vm7 = vcmask 15360   ;;  %vm1636_vm8 = vcmask 23552   ;;  %s7233_s21 = sld [smem:[#allocation3 + $0x82]] }
  0x1d   :  { %9259 = vmatpush3.bf16.msra.mxu1 %v10505_v17  ;;  %v10562_v41 = vpack.c.bf16 %v112_v40, %v111_v39  ;;  %v115_v45 = vld [vmem:[%s12057_s18 + $0x20] sm:$0xff]  ;;  %s7145_s18 = sld [smem:[#allocation3 + $0x3]]  ;;  %v404_v2 = vstv %s400_s29  ;;  %s7161_s29 = sld [smem:[#allocation3 + $0x100]]  ;;  %vm1711_vm9 = vcmask 80896   ;;  %vm3471_vm10 = vcmask 15368  }
  0x1e   :  { %8029 = vmatmul.mubr.msk.f32.vlgmr.msra.gmra.mrb[0].mxu0 %vm133_vm1, %v7131_v11  ;;  %9260 = vmatprep.subr.bf16.mxu1 %v10330_v4  ;;  %v10582_v47 = vpack.c.bf16 %v116_v46, %v115_v45  ;;  %v10599_v51 = vld [vmem:[%s12056_s17] ss:$0 sm:$0xff]  ;;  %v413_v11 = vstv %s7144_s30  ;;  %v411_v12 = vstv %s7143_s0  ;;  %v616_v49 = vstv %s7154_s22  ;;  %s7162_s30 = sld [smem:[#allocation3 + $0x101]]  ;;  %s7163_s0 = sld [smem:[#allocation3 + $0x102]] }
  0x1f   :  { %8066 = vmatprep.mubr.msk.f32.mxu0 %vm10331_vm0, %v10332_v7  ;;  %9268 = vmatpush3.bf16.msra.mxu0 %v10562_v41  ;;  %v416_v61 = vld [vmem:[%s12072_s6] sm:$0xff]  ;;  %v414_v16 = vmul.f32 %v413_v11, %v10472_v8  ;;  %s7174_s22 = sld [smem:[#allocation3 + $0x183]]  ;;  %s7243_s19 = sld [smem:[#allocation3 + $0x102]]  ;;  %vm5298_vm11 = vcmask 23568   ;;  %vm7124_vm12 = vcmask 31768  }
  0x20   :  { %9269 = vmatprep.subr.bf16.mxu0 %v10330_v4  ;;  %v10617_v0 = vld [vmem:[#allocation2] ss:$0 sm:$0xff]  ;;  %v7156_v11 = vld [vmem:[%s12044_s5 + $0x2] ss:$0 sm:$0xff]  ;;  %s7254_s27 = sld [smem:[#allocation3 + $0x183]]  ;;  %s7263_s26 = sld [smem:[#allocation3 + $0x202]] }
  0x21   :  { %9262 = vmatpush3.bf16.msra.mxu1 %v10515_v20  ;;  %s7274_s28 = sld [smem:[#allocation3 + $0x283]] }
  0x22   :  { %9263 = vmatprep.subr.bf16.mxu1 %v10330_v4 }
  0x23   :  { %9271 = vmatpush3.bf16.msra.mxu0 %v10572_v44  ;;  %v417_v62 = vstv %s7145_s18  ;;  %s7164_s18 = sld [smem:[#allocation3 + $0x103]] }
  0x24   :  { %9272 = vmatprep.subr.bf16.mxu0 %v10330_v4  ;;  %v418_v63 = vmul.f32 %v417_v62, %v416_v61 }
  0x25   :  { %9265 = vmatpush3.bf16.msra.mxu1 %v10525_v23 }
  0x26   :  { %9278 = vmatprep.subr.bf16.mxu1 %v10330_v4  ;;  %420 = vrot.lane.b32.xlu1 %v418_v63, %s10334_s4 }
  0x27   :  { %9274 = vmatpush3.bf16.msra.mxu0 %v10582_v47 }
  0x28   :  { %9275 = vmatprep.subr.bf16.mxu0 %v10330_v4 }
  0x2b   :  { %9277 = vmatpush3.bf16.msra.mxu0 %v10592_v50 }
  0x2c   :  { %9290 = vmatprep.subr.bf16.mxu0 %v10330_v4 }
  0x98   :  { %v421_v19 = vpop.permute.xlu1 %420 }
  0x9b   :  { %v211_v24 = vpop.permute.xlu0 %210 }
  0x9c   :  { %v219_v27 = vmul.f32 %v10533_v25, %v211_v24 }
  0xf1   :  { %v203_v28 = vpop.f32.mrb[0].mxu0 }
  0xf2   :  { %v10539_v29 = vadd.f32 %v7133_v26, %v203_v28  ;;  %v8030_v30 = vpop.f32.mrb[1].mxu0 }
  0xf4   :  { %v220_v32 = vadd.f32 %v219_v27, %v10539_v29  ;;  %v7146_v27 = vld [vmem:[%s12044_s5 + $0x1] ss:$0 sm:$0xff] }
  0xf6   :  { %v225_v33 = vadd.f32 %v7136_v31, %v220_v32 }
  0xf8   :  { %v7137_v34 = vmul.f32 -1.442695, %v225_v33 }
  0xfa   :  { %10024 = vpow2.f32 %v7137_v34 }
 0x104   :  { %v10025_v35 = vpop.eup %10024 }
 0x105   :  { %v229_v36 = vadd.f32 1.0, %v10025_v35 }
 0x107   :  { %10026 = vrcp.f32 %v229_v36 }
 0x111   :  { %v10027_v37 = vpop.eup %10026 }
 0x112   :  { %v232_v38 = vmul.f32 %v10027_v37, %v225_v33 }
 0x114   :  { %8048 = vmatmul.mubr.msk.f32.vlgmr.msra.gmra.mrb[0].mxu1 %vm239_vm2, %v232_v38 }
 0x115   :  { %9280 = vmatpush3.bf16.msra.mxu1 %v10499_v15  ;;  %8085 = vmatprep.mubr.msk.f32.mxu1 %vm10331_vm0, %v10332_v7 }
 0x116   :  { %9281 = vmatprep.subr.bf16.mxu1 %v10330_v4 }
 0x119   :  { %9283 = vmatpush3.bf16.msra.mxu1 %v10505_v17 }
 0x11a   :  { %9284 = vmatprep.subr.bf16.mxu1 %v10330_v4 }
 0x11d   :  { %9286 = vmatpush3.bf16.msra.mxu1 %v10515_v20 }
 0x11e   :  { %9287 = vmatprep.subr.bf16.mxu1 %v10330_v4 }
 0x121   :  { %9289 = vmatpush3.bf16.msra.mxu1 %v10525_v23 }
 0x122   :  { %9302 = vmatprep.subr.bf16.mxu1 %v10330_v4 }
 0x1e7   :  { %v309_v52 = vpop.f32.mrb[0].mxu1 }
 0x1e8   :  { %v310_v53 = vadd.f32 %v10599_v51, %v309_v52  ;;  %v8049_v54 = vpop.f32.mrb[1].mxu1  ;;  %v617_v52 = vmul.f32 %v7155_v48, %v616_v49 }
 0x1e9   :  { %v602_v54 = vstv %s7151_s25  ;;  %s7171_s25 = sld [smem:[#allocation3 + $0x180]] }
 0x1ea   :  { %v7140_v55 = vmul.f32 -1.442695, %v310_v53 }
 0x1ec   :  { %10028 = vpow2.f32 %v7140_v55 }
 0x1f6   :  { %v10029_v56 = vpop.eup %10028 }
 0x1f7   :  { %v316_v57 = vadd.f32 1.0, %v10029_v56 }
 0x1f9   :  { %10030 = vrcp.f32 %v316_v57 }
 0x203   :  { %v10031_v58 = vpop.eup %10030 }
 0x204   :  { %v319_v59 = vmul.f32 %v10031_v58, %v310_v53  ;;  %v609_v58 = vstv %s7152_s3  ;;  %s7172_s3 = sld [smem:[#allocation3 + $0x181]] }
 0x206   :  { %v320_v60 = vadd.f32 %v319_v59, %v232_v38 }
 0x208   :  { %8067 = vmatmul.mubr.msk.f32.vlgmr.msra.gmra.mrb[2].mxu0 %vm239_vm2, %v320_v60  ;;  %v611_v60 = vstv %s7153_s16  ;;  %s7173_s16 = sld [smem:[#allocation3 + $0x182]] }
 0x209   :  { %9292 = vmatpush3.bf16.msra.mxu0 %v10562_v41  ;;  %8104 = vmatprep.mubr.msk.f32.mxu0 %vm10331_vm0, %v10332_v7 }
 0x20a   :  { %9293 = vmatprep.subr.bf16.mxu0 %v10330_v4 }
 0x20d   :  { %9295 = vmatpush3.bf16.msra.mxu0 %v10572_v44 }
 0x20e   :  { %9296 = vmatprep.subr.bf16.mxu0 %v10330_v4 }
 0x211   :  { %9298 = vmatpush3.bf16.msra.mxu0 %v10582_v47 }
 0x212   :  { %9299 = vmatprep.subr.bf16.mxu0 %v10330_v4 }
 0x215   :  { %9301 = vmatpush3.bf16.msra.mxu0 %v10592_v50 }
 0x216   :  { %9314 = vmatprep.subr.bf16.mxu0 %v10330_v4 }
 0x2db   :  { %v396_v1 = vpop.f32.mrb[2].mxu0 }
 0x2dc   :  { %v397_v3 = vadd.f32 %v10617_v0, %v396_v1  ;;  %v8068_v6 = vpop.f32.mrb[3].mxu0 }
 0x2de   :  { %v405_v9 = vmul.f32 %v404_v2, %v397_v3 }
 0x2e0   :  { %407 = vrot.lane.b32.xlu0 %v405_v9, %s10334_s4 }
 0x352   :  { %v408_v13 = vpop.permute.xlu0 %407 }
 0x353   :  { %v410_v14 = vsub.f32 %v10472_v8, %v408_v13 }
 0x355   :  { %v412_v18 = vmul.f32 %v411_v12, %v410_v14 }
 0x357   :  { %v415_v21 = vadd.f32 %v414_v16, %v412_v18 }
 0x359   :  { %v10623_v22 = vadd.f32 %v421_v19, %v415_v21 }
 0x35b   :  { %427 = vperm.xlu1 %10023, %v10623_v22   ;;  %v612_v63 = vmul.f32 %v611_v60, %v10623_v22 }
 0x35f   :  { %619 = vrot.lane.b32.xlu1 %v617_v52, %s10334_s4 }
 0x3da   :  { %v428_v24 = vpop.permute.xlu1 %427 }
 0x3db   :  { %v430_v26 = vmul.f32 %v10533_v25, %v428_v24 }
 0x3dd   :  { %v431_v28 = vadd.f32 %v430_v26, %v10539_v29 }
 0x3de   :  { %v620_v1 = vpop.permute.xlu1 %619 }
 0x3df   :  { %v436_v30 = vadd.f32 %v7146_v27, %v431_v28 }
 0x3e1   :  { %v7147_v31 = vmul.f32 -1.442695, %v436_v30 }
 0x3e3   :  { %10032 = vpow2.f32 %v7147_v31 }
 0x3ed   :  { %v10033_v32 = vpop.eup %10032 }
 0x3ee   :  { %v440_v33 = vadd.f32 1.0, %v10033_v32 }
 0x3f0   :  { %10034 = vrcp.f32 %v440_v33 }
 0x3fa   :  { %v10035_v34 = vpop.eup %10034 }
 0x3fb   :  { %v443_v35 = vmul.f32 %v10035_v34, %v436_v30  ;;  %v7165_v34 = vld [vmem:[%s12072_s6 + $0x10] sm:$0xff] }
 0x3fd   :  { %8086 = vmatmul.mubr.msk.f32.vlgmr.msra.gmra.mrb[2].mxu1 %vm239_vm2, %v443_v35 }
 0x3fe   :  { %9304 = vmatpush3.bf16.msra.mxu1 %v10499_v15  ;;  %8123 = vmatprep.mubr.msk.f32.mxu1 %vm10331_vm0, %v10332_v7 }
 0x3ff   :  { %9305 = vmatprep.subr.bf16.mxu1 %v10330_v4 }
 0x402   :  { %9307 = vmatpush3.bf16.msra.mxu1 %v10505_v17 }
 0x403   :  { %9308 = vmatprep.subr.bf16.mxu1 %v10330_v4 }
 0x406   :  { %9310 = vmatpush3.bf16.msra.mxu1 %v10515_v20 }
 0x407   :  { %9311 = vmatprep.subr.bf16.mxu1 %v10330_v4 }
 0x40a   :  { %9313 = vmatpush3.bf16.msra.mxu1 %v10525_v23 }
 0x40b   :  { %9326 = vmatprep.subr.bf16.mxu1 %v10330_v4 }
 0x4d0   :  { %v513_v36 = vpop.f32.mrb[2].mxu1 }
 0x4d1   :  { %v514_v37 = vadd.f32 %v10599_v51, %v513_v36  ;;  %v8087_v38 = vpop.f32.mrb[3].mxu1 }
 0x4d2   :  { %v801_v38 = vstv %s7161_s29  ;;  %s7181_s29 = sld [smem:[#allocation3 + $0x200]] }
 0x4d3   :  { %v7149_v39 = vmul.f32 -1.442695, %v514_v37 }
 0x4d5   :  { %10036 = vpow2.f32 %v7149_v39 }
 0x4df   :  { %v10037_v40 = vpop.eup %10036 }
 0x4e0   :  { %v520_v42 = vadd.f32 1.0, %v10037_v40 }
 0x4e2   :  { %10038 = vrcp.f32 %v520_v42 }
 0x4ec   :  { %v10039_v43 = vpop.eup %10038 }
 0x4ed   :  { %v523_v45 = vmul.f32 %v10039_v43, %v514_v37  ;;  %v808_v43 = vstv %s7162_s30  ;;  %s7182_s30 = sld [smem:[#allocation3 + $0x201]] }
 0x4ef   :  { %v524_v46 = vadd.f32 %v523_v45, %v443_v35  ;;  %v815_v35 = vstv %s7164_s18  ;;  %s7184_s18 = sld [smem:[#allocation3 + $0x203]] }
 0x4f0   :  { %v816_v36 = vmul.f32 %v7165_v34, %v815_v35 }
 0x4f1   :  { %8105 = vmatmul.mubr.msk.f32.vlgmr.msra.gmra.mrb[4].mxu0 %vm239_vm2, %v524_v46  ;;  %v810_v46 = vstv %s7163_s0  ;;  %s7183_s0 = sld [smem:[#allocation3 + $0x202]] }
 0x4f2   :  { %9316 = vmatpush3.bf16.msra.mxu0 %v10562_v41  ;;  %8142 = vmatprep.mubr.msk.f32.mxu0 %vm10331_vm0, %v10332_v7 }
 0x4f3   :  { %9317 = vmatprep.subr.bf16.mxu0 %v10330_v4 }
 0x4f6   :  { %9319 = vmatpush3.bf16.msra.mxu0 %v10572_v44 }
 0x4f7   :  { %9320 = vmatprep.subr.bf16.mxu0 %v10330_v4 }
 0x4fa   :  { %9322 = vmatpush3.bf16.msra.mxu0 %v10582_v47 }
 0x4fb   :  { %9323 = vmatprep.subr.bf16.mxu0 %v10330_v4 }
 0x4fe   :  { %9325 = vmatpush3.bf16.msra.mxu0 %v10592_v50 }
 0x4ff   :  { %9338 = vmatprep.subr.bf16.mxu0 %v10330_v4 }
 0x5c4   :  { %v594_v53 = vpop.f32.mrb[4].mxu0 }
 0x5c5   :  { %v595_v55 = vadd.f32 %v10617_v0, %v594_v53  ;;  %v8106_v56 = vpop.f32.mrb[5].mxu0 }
 0x5c7   :  { %v603_v57 = vmul.f32 %v602_v54, %v595_v55 }
 0x5c9   :  { %605 = vrot.lane.b32.xlu0 %v603_v57, %s10334_s4 }
 0x63b   :  { %v606_v59 = vpop.permute.xlu0 %605 }
 0x63c   :  { %v608_v61 = vsub.f32 %v10623_v22, %v606_v59 }
 0x63e   :  { %v610_v62 = vmul.f32 %v609_v58, %v608_v61  ;;  %v7166_v58 = vld [vmem:[%s12044_s5 + $0x3] ss:$0 sm:$0xff] }
 0x640   :  { %v613_v2 = vadd.f32 %v612_v63, %v610_v62 }
 0x642   :  { %v10662_v3 = vadd.f32 %v620_v1, %v613_v2 }
 0x644   :  { %626 = vperm.xlu0 %10022, %v10662_v3   ;;  %v811_v52 = vmul.f32 %v810_v46, %v10662_v3 }
 0x648   :  { %818 = vrot.lane.b32.xlu0 %v816_v36, %s10334_s4 }
 0x6c3   :  { %v627_v6 = vpop.permute.xlu0 %626 }
 0x6c4   :  { %v629_v9 = vmul.f32 %v10533_v25, %v627_v6 }
 0x6c6   :  { %v630_v12 = vadd.f32 %v629_v9, %v10539_v29 }
 0x6c7   :  { %v819_v53 = vpop.permute.xlu0 %818 }
 0x6c8   :  { %v635_v13 = vadd.f32 %v7156_v11, %v630_v12 }
 0x6ca   :  { %v7157_v14 = vmul.f32 -1.442695, %v635_v13 }
 0x6cc   :  { %10040 = vpow2.f32 %v7157_v14 }
 0x6d6   :  { %v10041_v16 = vpop.eup %10040 }
 0x6d7   :  { %v639_v18 = vadd.f32 1.0, %v10041_v16 }
 0x6d9   :  { %10042 = vrcp.f32 %v639_v18 }
 0x6e3   :  { %v10043_v19 = vpop.eup %10042 }
 0x6e4   :  { %v642_v21 = vmul.f32 %v10043_v19, %v635_v13  ;;  %v7175_v19 = vld [vmem:[%s12072_s6 + $0x18] sm:$0xff] }
 0x6e6   :  { %8124 = vmatmul.mubr.msk.f32.vlgmr.msra.gmra.mrb[4].mxu1 %vm239_vm2, %v642_v21 }
 0x6e7   :  { %9328 = vmatpush3.bf16.msra.mxu1 %v10499_v15  ;;  %8161 = vmatprep.mubr.msk.f32.mxu1 %vm10331_vm0, %v10332_v7 }
 0x6e8   :  { %9329 = vmatprep.subr.bf16.mxu1 %v10330_v4 }
 0x6eb   :  { %9331 = vmatpush3.bf16.msra.mxu1 %v10505_v17 }
 0x6ec   :  { %9332 = vmatprep.subr.bf16.mxu1 %v10330_v4 }
 0x6ef   :  { %9334 = vmatpush3.bf16.msra.mxu1 %v10515_v20 }
 0x6f0   :  { %9335 = vmatprep.subr.bf16.mxu1 %v10330_v4 }
 0x6f3   :  { %9337 = vmatpush3.bf16.msra.mxu1 %v10525_v23 }
 0x6f4   :  { %9350 = vmatprep.subr.bf16.mxu1 %v10330_v4 }
 0x7b9   :  { %v712_v22 = vpop.f32.mrb[4].mxu1 }
 0x7ba   :  { %v713_v24 = vadd.f32 %v10599_v51, %v712_v22  ;;  %v8125_v26 = vpop.f32.mrb[5].mxu1 }
 0x7bb   :  { %v1000_v26 = vstv %s7171_s25  ;;  %s7191_s25 = sld [smem:[#allocation3 + $0x280]] }
 0x7bc   :  { %v7159_v27 = vmul.f32 -1.442695, %v713_v24 }
 0x7be   :  { %10044 = vpow2.f32 %v7159_v27 }
 0x7c8   :  { %v10045_v28 = vpop.eup %10044 }
 0x7c9   :  { %v719_v30 = vadd.f32 1.0, %v10045_v28 }
 0x7cb   :  { %10046 = vrcp.f32 %v719_v30 }
 0x7d5   :  { %v10047_v31 = vpop.eup %10046 }
 0x7d6   :  { %v722_v32 = vmul.f32 %v10047_v31, %v713_v24  ;;  %v1007_v31 = vstv %s7172_s3  ;;  %s7192_s3 = sld [smem:[#allocation3 + $0x281]] }
 0x7d8   :  { %v723_v33 = vadd.f32 %v722_v32, %v642_v21  ;;  %v1014_v21 = vstv %s7174_s22  ;;  %s7194_s22 = sld [smem:[#allocation3 + $0x283]] }
 0x7d9   :  { %v1015_v22 = vmul.f32 %v7175_v19, %v1014_v21 }
 0x7da   :  { %8143 = vmatmul.mubr.msk.f32.vlgmr.msra.gmra.mrb[6].mxu0 %vm239_vm2, %v723_v33  ;;  %v1009_v33 = vstv %s7173_s16  ;;  %s7193_s16 = sld [smem:[#allocation3 + $0x282]] }
 0x7db   :  { %9340 = vmatpush3.bf16.msra.mxu0 %v10562_v41  ;;  %8180 = vmatprep.mubr.msk.f32.mxu0 %vm10331_vm0, %v10332_v7 }
 0x7dc   :  { %9341 = vmatprep.subr.bf16.mxu0 %v10330_v4 }
 0x7df   :  { %9343 = vmatpush3.bf16.msra.mxu0 %v10572_v44 }
 0x7e0   :  { %9344 = vmatprep.subr.bf16.mxu0 %v10330_v4 }
 0x7e3   :  { %9346 = vmatpush3.bf16.msra.mxu0 %v10582_v47 }
 0x7e4   :  { %9347 = vmatprep.subr.bf16.mxu0 %v10330_v4 }
 0x7e7   :  { %9349 = vmatpush3.bf16.msra.mxu0 %v10592_v50 }
 0x7e8   :  { %9362 = vmatprep.subr.bf16.mxu0 %v10330_v4 }
 0x8ad   :  { %v793_v37 = vpop.f32.mrb[6].mxu0 }
 0x8ae   :  { %v794_v39 = vadd.f32 %v10617_v0, %v793_v37  ;;  %v8144_v40 = vpop.f32.mrb[7].mxu0 }
 0x8b0   :  { %v802_v42 = vmul.f32 %v801_v38, %v794_v39 }
 0x8b2   :  { %804 = vrot.lane.b32.xlu1 %v802_v42, %s10334_s4 }
 0x924   :  { %v805_v45 = vpop.permute.xlu1 %804 }
 0x925   :  { %v807_v48 = vsub.f32 %v10662_v3, %v805_v45 }
 0x927   :  { %v809_v49 = vmul.f32 %v808_v43, %v807_v48  ;;  %v7176_v43 = vld [vmem:[%s12044_s5 + $0x4] ss:$0 sm:$0xff] }
 0x929   :  { %v812_v54 = vadd.f32 %v811_v52, %v809_v49 }
 0x92b   :  { %v10701_v55 = vadd.f32 %v819_v53, %v812_v54 }
 0x92d   :  { %825 = vperm.xlu1 %10023, %v10701_v55   ;;  %v1010_v36 = vmul.f32 %v1009_v33, %v10701_v55 }
 0x931   :  { %1017 = vrot.lane.b32.xlu1 %v1015_v22, %s10334_s4 }
 0x9ac   :  { %v826_v56 = vpop.permute.xlu1 %825 }
 0x9ad   :  { %v828_v57 = vmul.f32 %v10533_v25, %v826_v56 }
 0x9af   :  { %v829_v59 = vadd.f32 %v828_v57, %v10539_v29 }
 0x9b0   :  { %v1018_v37 = vpop.permute.xlu1 %1017 }
 0x9b1   :  { %v834_v60 = vadd.f32 %v7166_v58, %v829_v59 }
 0x9b3   :  { %v7167_v61 = vmul.f32 -1.442695, %v834_v60 }
 0x9b5   :  { %10048 = vpow2.f32 %v7167_v61 }
 0x9bf   :  { %v10049_v62 = vpop.eup %10048 }
 0x9c0   :  { %v838_v63 = vadd.f32 1.0, %v10049_v62 }
 0x9c2   :  { %10050 = vrcp.f32 %v838_v63 }
 0x9cc   :  { %v10051_v1 = vpop.eup %10050 }
 0x9cd   :  { %v841_v2 = vmul.f32 %v10051_v1, %v834_v60  ;;  %v7185_v1 = vld [vmem:[%s12072_s6 + $0x20] sm:$0xff] }
 0x9cf   :  { %8162 = vmatmul.mubr.msk.f32.vlgmr.msra.gmra.mrb[6].mxu1 %vm239_vm2, %v841_v2 }
 0x9d0   :  { %9352 = vmatpush3.bf16.msra.mxu1 %v10499_v15  ;;  %8199 = vmatprep.mubr.msk.f32.mxu1 %vm10331_vm0, %v10332_v7 }
 0x9d1   :  { %9353 = vmatprep.subr.bf16.mxu1 %v10330_v4 }
 0x9d4   :  { %9355 = vmatpush3.bf16.msra.mxu1 %v10505_v17 }
 0x9d5   :  { %9356 = vmatprep.subr.bf16.mxu1 %v10330_v4 }
 0x9d8   :  { %9358 = vmatpush3.bf16.msra.mxu1 %v10515_v20 }
 0x9d9   :  { %9359 = vmatprep.subr.bf16.mxu1 %v10330_v4 }
 0x9dc   :  { %9361 = vmatpush3.bf16.msra.mxu1 %v10525_v23 }
 0x9dd   :  { %9374 = vmatprep.subr.bf16.mxu1 %v10330_v4 }
 0xaa2   :  { %v911_v3 = vpop.f32.mrb[6].mxu1 }
 0xaa3   :  { %v912_v6 = vadd.f32 %v10599_v51, %v911_v3  ;;  %v8163_v9 = vpop.f32.mrb[7].mxu1 }
 0xaa4   :  { %v1199_v9 = vstv %s7181_s29  ;;  %s7201_s29 = sld [smem:[#allocation3 + $0x300]] }
 0xaa5   :  { %v7169_v11 = vmul.f32 -1.442695, %v912_v6 }
 0xaa7   :  { %10052 = vpow2.f32 %v7169_v11 }
 0xab1   :  { %v10053_v12 = vpop.eup %10052 }
 0xab2   :  { %v918_v13 = vadd.f32 1.0, %v10053_v12 }
 0xab4   :  { %10054 = vrcp.f32 %v918_v13 }
 0xabe   :  { %v10055_v14 = vpop.eup %10054 }
 0xabf   :  { %v921_v16 = vmul.f32 %v10055_v14, %v912_v6  ;;  %v1206_v14 = vstv %s7182_s30  ;;  %s10335_s30 = smov 2  }
 0xac1   :  { %v922_v18 = vadd.f32 %v921_v16, %v841_v2  ;;  %v1213_v2 = vstv %s7184_s18  ;;  %s7204_s18 = sld [smem:[#allocation3 + $0x303]] }
 0xac2   :  { %v1214_v3 = vmul.f32 %v7185_v1, %v1213_v2 }
 0xac3   :  { %8181 = vmatmul.mubr.msk.f32.vlgmr.msra.gmra.mrb[8].mxu0 %vm239_vm2, %v922_v18  ;;  %v1208_v18 = vstv %s7183_s0  ;;  %s7232_s0 = sld [smem:[#allocation3 + $0x81]] }
 0xac4   :  { %9364 = vmatpush3.bf16.msra.mxu0 %v10562_v41  ;;  %8218 = vmatprep.mubr.msk.f32.mxu0 %vm10331_vm0, %v10332_v7 }
 0xac5   :  { %9365 = vmatprep.subr.bf16.mxu0 %v10330_v4 }
 0xac8   :  { %9367 = vmatpush3.bf16.msra.mxu0 %v10572_v44 }
 0xac9   :  { %9368 = vmatprep.subr.bf16.mxu0 %v10330_v4 }
 0xacc   :  { %9370 = vmatpush3.bf16.msra.mxu0 %v10582_v47 }
 0xacd   :  { %9371 = vmatprep.subr.bf16.mxu0 %v10330_v4 }
 0xad0   :  { %9373 = vmatpush3.bf16.msra.mxu0 %v10592_v50 }
 0xad1   :  { %9386 = vmatprep.subr.bf16.mxu0 %v10330_v4 }
 0xb96   :  { %v992_v24 = vpop.f32.mrb[8].mxu0 }
 0xb97   :  { %v993_v27 = vadd.f32 %v10617_v0, %v992_v24  ;;  %v8182_v28 = vpop.f32.mrb[9].mxu0 }
 0xb99   :  { %v1001_v30 = vmul.f32 %v1000_v26, %v993_v27 }
 0xb9b   :  { %1003 = vrot.lane.b32.xlu0 %v1001_v30, %s10334_s4 }
 0xc0d   :  { %v1004_v32 = vpop.permute.xlu0 %1003 }
 0xc0e   :  { %v1006_v34 = vsub.f32 %v10701_v55, %v1004_v32 }
 0xc10   :  { %v1008_v35 = vmul.f32 %v1007_v31, %v1006_v34  ;;  %v7186_v31 = vld [vmem:[%s12044_s5 + $0x5] ss:$0 sm:$0xff] }
 0xc12   :  { %v1011_v38 = vadd.f32 %v1010_v36, %v1008_v35 }
 0xc14   :  { %v10740_v39 = vadd.f32 %v1018_v37, %v1011_v38 }
 0xc16   :  { %1024 = vperm.xlu0 %10022, %v10740_v39   ;;  %v1209_v22 = vmul.f32 %v1208_v18, %v10740_v39 }
 0xc1a   :  { %1216 = vrot.lane.b32.xlu0 %v1214_v3, %s10334_s4 }
 0xc95   :  { %v1025_v40 = vpop.permute.xlu0 %1024 }
 0xc96   :  { %v1027_v42 = vmul.f32 %v10533_v25, %v1025_v40 }
 0xc98   :  { %v1028_v45 = vadd.f32 %v1027_v42, %v10539_v29 }
 0xc99   :  { %v1217_v24 = vpop.permute.xlu0 %1216 }
 0xc9a   :  { %v1033_v46 = vadd.f32 %v7176_v43, %v1028_v45 }
 0xc9c   :  { %v7177_v48 = vmul.f32 -1.442695, %v1033_v46 }
 0xc9e   :  { %10056 = vpow2.f32 %v7177_v48 }
 0xca8   :  { %v10057_v49 = vpop.eup %10056 }
 0xca9   :  { %v1037_v52 = vadd.f32 1.0, %v10057_v49 }
 0xcab   :  { %10058 = vrcp.f32 %v1037_v52 }
 0xcb5   :  { %v10059_v53 = vpop.eup %10058 }
 0xcb6   :  { %v1040_v54 = vmul.f32 %v10059_v53, %v1033_v46  ;;  %v7195_v53 = vld [vmem:[%s12072_s6 + $0x28] sm:$0xff] }
 0xcb8   :  { %8200 = vmatmul.mubr.msk.f32.vlgmr.msra.gmra.mrb[8].mxu1 %vm239_vm2, %v1040_v54 }
 0xcb9   :  { %9376 = vmatpush3.bf16.msra.mxu1 %v10499_v15  ;;  %8237 = vmatprep.mubr.msk.f32.mxu1 %vm10331_vm0, %v10332_v7 }
 0xcba   :  { %9377 = vmatprep.subr.bf16.mxu1 %v10330_v4 }
 0xcbd   :  { %9379 = vmatpush3.bf16.msra.mxu1 %v10505_v17 }
 0xcbe   :  { %9380 = vmatprep.subr.bf16.mxu1 %v10330_v4 }
 0xcc1   :  { %9382 = vmatpush3.bf16.msra.mxu1 %v10515_v20 }
 0xcc2   :  { %9383 = vmatprep.subr.bf16.mxu1 %v10330_v4 }
 0xcc5   :  { %9385 = vmatpush3.bf16.msra.mxu1 %v10525_v23 }
 0xcc6   :  { %9398 = vmatprep.subr.bf16.mxu1 %v10330_v4 }
 0xd8b   :  { %v1110_v55 = vpop.f32.mrb[8].mxu1 }
 0xd8c   :  { %v1111_v56 = vadd.f32 %v10599_v51, %v1110_v55  ;;  %v8201_v57 = vpop.f32.mrb[9].mxu1 }
 0xd8d   :  { %v1398_v57 = vstv %s7191_s25  ;;  %s12076_s25 = sld [smem:[#allocation7_spill]] }
 0xd8e   :  { %v7179_v58 = vmul.f32 -1.442695, %v1111_v56 }
 0xd90   :  { %10060 = vpow2.f32 %v7179_v58 }
 0xd9a   :  { %v10061_v59 = vpop.eup %10060 }
 0xd9b   :  { %v1117_v60 = vadd.f32 1.0, %v10061_v59 }
 0xd9d   :  { %10062 = vrcp.f32 %v1117_v60 }
 0xda7   :  { %v10063_v61 = vpop.eup %10062 }
 0xda8   :  { %v1120_v62 = vmul.f32 %v10063_v61, %v1111_v56  ;;  %v1405_v61 = vstv %s7192_s3  ;;  %s10339_s3 = smov 32  }
 0xdaa   :  { %v1121_v63 = vadd.f32 %v1120_v62, %v1040_v54  ;;  %v1412_v54 = vstv %s7194_s22  ;;  %s10338_s22 = smov 3  }
 0xdab   :  { %v1413_v55 = vmul.f32 %v7195_v53, %v1412_v54 }
 0xdac   :  { %8219 = vmatmul.mubr.msk.f32.vlgmr.msra.gmra.mrb[10].mxu0 %vm239_vm2, %v1121_v63  ;;  %v1407_v63 = vstv %s7193_s16  ;;  %s7222_s16 = sld [smem:[#allocation3 + $0x1]] }
 0xdad   :  { %9388 = vmatpush3.bf16.msra.mxu0 %v10562_v41  ;;  %8256 = vmatprep.mubr.msk.f32.mxu0 %vm10331_vm0, %v10332_v7 }
 0xdae   :  { %9389 = vmatprep.subr.bf16.mxu0 %v10330_v4 }
 0xdb1   :  { %9391 = vmatpush3.bf16.msra.mxu0 %v10572_v44 }
 0xdb2   :  { %9392 = vmatprep.subr.bf16.mxu0 %v10330_v4 }
 0xdb5   :  { %9394 = vmatpush3.bf16.msra.mxu0 %v10582_v47 }
 0xdb6   :  { %9395 = vmatprep.subr.bf16.mxu0 %v10330_v4 }
 0xdb9   :  { %9397 = vmatpush3.bf16.msra.mxu0 %v10592_v50 }
 0xdba   :  { %9410 = vmatprep.subr.bf16.mxu0 %v10330_v4 }
 0xe7f   :  { %v1191_v6 = vpop.f32.mrb[10].mxu0 }
 0xe80   :  { %v1192_v11 = vadd.f32 %v10617_v0, %v1191_v6  ;;  %v8220_v12 = vpop.f32.mrb[11].mxu0 }
 0xe82   :  { %v1200_v13 = vmul.f32 %v1199_v9, %v1192_v11 }
 0xe84   :  { %1202 = vrot.lane.b32.xlu1 %v1200_v13, %s10334_s4 }
 0xef6   :  { %v1203_v16 = vpop.permute.xlu1 %1202 }
 0xef7   :  { %v1205_v19 = vsub.f32 %v10740_v39, %v1203_v16 }
 0xef9   :  { %v1207_v21 = vmul.f32 %v1206_v14, %v1205_v19  ;;  %v7196_v14 = vld [vmem:[%s12044_s5 + $0x6] ss:$0 sm:$0xff] }
 0xefb   :  { %v1210_v26 = vadd.f32 %v1209_v22, %v1207_v21 }
 0xefd   :  { %v10779_v27 = vadd.f32 %v1217_v24, %v1210_v26 }
 0xeff   :  { %1223 = vperm.xlu1 %10023, %v10779_v27   ;;  %v1408_v3 = vmul.f32 %v1407_v63, %v10779_v27 }
 0xf03   :  { %1415 = vrot.lane.b32.xlu1 %v1413_v55, %s10334_s4  ;;  %v120_v55 = vld [vmem:[%s12071_s23] sm:$0xff] }
 0xf7e   :  { %v1224_v28 = vpop.permute.xlu1 %1223 }
 0xf7f   :  { %v1226_v30 = vmul.f32 %v10533_v25, %v1224_v28 }
 0xf81   :  { %v1227_v32 = vadd.f32 %v1226_v30, %v10539_v29 }
 0xf82   :  { %v1416_v6 = vpop.permute.xlu1 %1415 }
 0xf83   :  { %v1232_v33 = vadd.f32 %v7186_v31, %v1227_v32 }
 0xf85   :  { %v7187_v34 = vmul.f32 -1.442695, %v1232_v33 }
 0xf87   :  { %10064 = vpow2.f32 %v7187_v34 }
 0xf91   :  { %v10065_v35 = vpop.eup %10064 }
 0xf92   :  { %v1236_v36 = vadd.f32 1.0, %v10065_v35  ;;  %v7205_v35 = vld [vmem:[%s12072_s6 + $0x30] sm:$0xff] }
 0xf94   :  { %10066 = vrcp.f32 %v1236_v36 }
 0xf9e   :  { %v10067_v37 = vpop.eup %10066 }
 0xf9f   :  { %v1239_v38 = vmul.f32 %v10067_v37, %v1232_v33 }
 0xfa1   :  { %8238 = vmatmul.mubr.msk.f32.vlgmr.msra.gmra.mrb[10].mxu1 %vm239_vm2, %v1239_v38 }
 0xfa2   :  { %9400 = vmatpush3.bf16.msra.mxu1 %v10499_v15  ;;  %8275 = vmatprep.mubr.msk.f32.mxu1 %vm10331_vm0, %v10332_v7 }
 0xfa3   :  { %9401 = vmatprep.subr.bf16.mxu1 %v10330_v4 }
 0xfa6   :  { %9403 = vmatpush3.bf16.msra.mxu1 %v10505_v17 }
 0xfa7   :  { %9404 = vmatprep.subr.bf16.mxu1 %v10330_v4 }
 0xfaa   :  { %9406 = vmatpush3.bf16.msra.mxu1 %v10515_v20 }
 0xfab   :  { %9407 = vmatprep.subr.bf16.mxu1 %v10330_v4 }
 0xfae   :  { %9409 = vmatpush3.bf16.msra.mxu1 %v10525_v23 }
 0xfaf   :  { %9422 = vmatprep.subr.bf16.mxu1 %v10330_v4 }
0x1074   :  { %v1309_v39 = vpop.f32.mrb[10].mxu1 }
0x1075   :  { %v1310_v40 = vadd.f32 %v10599_v51, %v1309_v39  ;;  %v8239_v42 = vpop.f32.mrb[11].mxu1 }
0x1077   :  { %v7189_v43 = vmul.f32 -1.442695, %v1310_v40 }
0x1079   :  { %10068 = vpow2.f32 %v7189_v43  ;;  %v82_v43 = vld [vmem:[%s12047_s8] sm:$0xff] }
0x1083   :  { %v10069_v45 = vpop.eup %10068 }
0x1084   :  { %v1316_v46 = vadd.f32 1.0, %v10069_v45  ;;  %v83_v45 = vld [vmem:[%s12047_s8 + $0x8] sm:$0xff] }
0x1086   :  { %10070 = vrcp.f32 %v1316_v46  ;;  %v10847_v46 = vpack.c.bf16 %v83_v45, %v82_v43  ;;  %v93_v43 = vld [vmem:[%s12050_s11 + $0x10] sm:$0xff]  ;;  %v94_v45 = vld [vmem:[%s12050_s11 + $0x18] sm:$0xff] }
0x1090   :  { %v10071_v48 = vpop.eup %10070 }
0x1091   :  { %v1319_v49 = vmul.f32 %v10071_v48, %v1310_v40 }
0x1093   :  { %v1320_v52 = vadd.f32 %v1319_v49, %v1239_v38  ;;  %v1597_v38 = vstv %s7201_s29  ;;  %v80_v49 = vld [vmem:[%s12046_s7] sm:$0xff]  ;;  %s7231_s29 = sld [smem:[#allocation3 + $0x80]] }
0x1095   :  { %8257 = vmatmul.mubr.msk.f32.vlgmr.msra.gmra.mrb[12].mxu0 %vm239_vm2, %v1320_v52  ;;  %v81_v52 = vld [vmem:[%s12046_s7 + $0x8] sm:$0x3]  ;;  %s10337_s7 = smov 127  }
0x1096   :  { %9412 = vmatpush3.bf16.msra.mxu0 %v10562_v41  ;;  %8294 = vmatprep.mubr.msk.f32.mxu0 %vm10331_vm0, %v10332_v7  ;;  %v10865_v53 = vpack.c.bf16 %v81_v52, %v80_v49  ;;  %v90_v49 = vld [vmem:[%s12049_s10 + $0x18] sm:$0xff]  ;;  %v10947_v52 = vpack.c.bf16 %v94_v45, %v93_v43 }
0x1097   :  { %9413 = vmatprep.subr.bf16.mxu0 %v10330_v4 }
0x109a   :  { %9415 = vmatpush3.bf16.msra.mxu0 %v10572_v44 }
0x109b   :  { %9416 = vmatprep.subr.bf16.mxu0 %v10330_v4 }
0x109e   :  { %9418 = vmatpush3.bf16.msra.mxu0 %v10582_v47 }
0x109f   :  { %9419 = vmatprep.subr.bf16.mxu0 %v10330_v4 }
0x10a2   :  { %9421 = vmatpush3.bf16.msra.mxu0 %v10592_v50 }
0x10a3   :  { %9428 = vmatprep.subr.bf16.mxu0 %v10330_v4 }
0x1168   :  { %v1390_v56 = vpop.f32.mrb[12].mxu0 }
0x1169   :  { %v1391_v58 = vadd.f32 %v10617_v0, %v1390_v56  ;;  %v8258_v59 = vpop.f32.mrb[13].mxu0  ;;  %v1604_v56 = vstv %s7202_s24  ;;  %s7253_s24 = sld [smem:[#allocation3 + $0x182]] }
0x116b   :  { %v1399_v60 = vmul.f32 %v1398_v57, %v1391_v58  ;;  %v1606_v58 = vstv %s7203_s2  ;;  %s7224_s2 = sld [smem:[#allocation3 + $0x3]] }
0x116d   :  { %1401 = vrot.lane.b32.xlu0 %v1399_v60, %s10334_s4 }
0x11df   :  { %v1402_v62 = vpop.permute.xlu0 %1401 }
0x11e0   :  { %v1404_v1 = vsub.f32 %v10779_v27, %v1402_v62 }
0x11e2   :  { %v1406_v2 = vmul.f32 %v1405_v61, %v1404_v1 }
0x11e4   :  { %v1409_v9 = vadd.f32 %v1408_v3, %v1406_v2  ;;  %v7206_v2 = vld [vmem:[%s12075_s14 + $0x8] sm:$0xff]  ;;  %v123_v3 = vld [vmem:[%s12076_s25] sm:$0xff] }
0x11e6   :  { %v10818_v11 = vadd.f32 %v1416_v6, %v1409_v9  ;;  %v10296_v9 = vld [vmem:[%s12070_s1] sm:$0xff] }
0x11e8   :  { %1422 = vperm.xlu0 %10022, %v10818_v11   ;;  %v1607_v61 = vmul.f32 %v1606_v58, %v10818_v11 }
0x1267   :  { %v1423_v12 = vpop.permute.xlu0 %1422 }
0x1268   :  { %v1425_v13 = vmul.f32 %v10533_v25, %v1423_v12 }
0x126a   :  { %v1426_v16 = vadd.f32 %v1425_v13, %v10539_v29 }
0x126c   :  { %v1431_v18 = vadd.f32 %v7196_v14, %v1426_v16 }
0x126e   :  { %v7197_v19 = vmul.f32 -1.442695, %v1431_v18 }
0x1270   :  { %10072 = vpow2.f32 %v7197_v19 }
0x127a   :  { %v10073_v21 = vpop.eup %10072 }
0x127b   :  { %v1435_v22 = vadd.f32 1.0, %v10073_v21  ;;  %v7210_v21 = vld [vmem:[%s12048_s9] ss:$0 sm:$0xff] }
0x127d   :  { %10074 = vrcp.f32 %v1435_v22 }
0x1287   :  { %v10075_v24 = vpop.eup %10074 }
0x1288   :  { %v1438_v26 = vmul.f32 %v10075_v24, %v1431_v18 }
0x128a   :  { %8276 = vmatmul.mubr.msk.f32.vlgmr.msra.gmra.mrb[12].mxu1 %vm239_vm2, %v1438_v26 }
0x128b   :  { %8305 = vmatprep.mubr.msk.f32.mxu1 %vm10331_vm0, %v10332_v7  ;;  %9424 = vmatpush3.bf16.msra.mxu1 %v10847_v46 }
0x128c   :  { %9425 = vmatprep.subr.bf16.mxu1 %v10330_v4 }
0x135d   :  { %v1508_v25 = vpop.f32.mrb[12].mxu1 }
0x135e   :  { %v1509_v27 = vadd.f32 %v10599_v51, %v1508_v25  ;;  %v8277_v28 = vpop.f32.mrb[13].mxu1  ;;  %v1611_v51 = vstv %s7204_s18  ;;  %s7234_s18 = sld [smem:[#allocation3 + $0x83]] }
0x135f   :  { %v1612_v36 = vmul.f32 %v7205_v35, %v1611_v51 }
0x1360   :  { %v7199_v30 = vmul.f32 -1.442695, %v1509_v27 }
0x1361   :  { %1614 = vrot.lane.b32.xlu0 %v1612_v36, %s10334_s4 }
0x1362   :  { %10076 = vpow2.f32 %v7199_v30 }
0x1365   :  { %1624 = vrot.lane.b32.xlu0 %v10472_v8, %s10335_s30  ;;  %v84_v8 = vld [vmem:[%s12047_s8 + $0x10] sm:$0xff] }
0x136c   :  { %v10077_v29 = vpop.eup %10076 }
0x136d   :  { %v1515_v31 = vadd.f32 1.0, %v10077_v29 }
0x136f   :  { %10078 = vrcp.f32 %v1515_v31 }
0x1379   :  { %v10079_v32 = vpop.eup %10078 }
0x137a   :  { %v1518_v33 = vmul.f32 %v10079_v32, %v1509_v27 }
0x137c   :  { %v1519_v34 = vadd.f32 %v1518_v33, %v1438_v26 }
0x137e   :  { %8295 = vmatmul.mubr.msk.f32.vlgmr.msra.gmra.mrb[14].mxu0 %vm239_vm2, %v1519_v34 }
0x137f   :  { %8312 = vmatprep.mubr.msk.f32.mxu0 %vm10331_vm0, %v10332_v7  ;;  %9431 = vmatpush3.bf16.msk.msra.mxu0 %vm10868_vm5, %v10865_v53 }
0x1380   :  { %9438 = vmatprep.subr.bf16.mxu0 %v10330_v4 }
0x13d3   :  { %v1615_v62 = vpop.permute.xlu0 %1614 }
0x13d7   :  { %v1625_v12 = vpop.permute.xlu0 %1624 }
0x1451   :  { %v1589_v37 = vpop.f32.mrb[14].mxu0 }
0x1452   :  { %v1590_v39 = vadd.f32 %v10617_v0, %v1589_v37  ;;  %v8296_v40 = vpop.f32.mrb[15].mxu0  ;;  %v85_v0 = vld [vmem:[%s12047_s8 + $0x18] sm:$0xff]  ;;  %s10340_s8 = smov 64   ;;  %v91_v37 = vld [vmem:[%s12050_s11] sm:$0xff] }
0x1453   :  { %v10857_v48 = vpack.c.bf16 %v85_v0, %v84_v8  ;;  %v89_v0 = vld [vmem:[%s12049_s10 + $0x10] sm:$0xff] }
0x1454   :  { %v1598_v42 = vmul.f32 %v1597_v38, %v1590_v39  ;;  %v92_v38 = vld [vmem:[%s12050_s11 + $0x8] sm:$0xff]  ;;  %v87_v39 = vld [vmem:[%s12049_s10] sm:$0xff]  ;;  %s7264_s11 = sld [smem:[#allocation3 + $0x203]] }
0x1455   :  { %9427 = vmatpush3.bf16.msra.mxu1 %v10857_v48  ;;  %v10927_v40 = vpack.c.bf16 %v92_v38, %v91_v37  ;;  %v7217_v38 = vld [vmem:[%s12044_s5] ss:$0 sm:$0xff] }
0x1456   :  { %1600 = vrot.lane.b32.xlu1 %v1598_v42, %s10334_s4  ;;  %9432 = vmatprep.subr.bf16.mxu1 %v10330_v4  ;;  %v88_v42 = vld [vmem:[%s12049_s10 + $0x8] sm:$0xff]  ;;  %s7244_s10 = sld [smem:[#allocation3 + $0x103]] }
0x1457   :  { %v10938_v8 = vpack.c.bf16 %v88_v42, %v87_v39 }
0x1458   :  { %8306 = vmatmul.mubr.msk.f32.vlgmr.msra.gmra.mrb[14].mxu1 %vm133_vm1, %v120_v55  ;;  %v10951_v55 = vpack.c.bf16 %v90_v49, %v89_v0 }
0x1459   :  { %8323 = vmatprep.mubr.msk.f32.mxu1 %vm10331_vm0, %v10332_v7  ;;  %9434 = vmatpush3.bf16.msra.mxu1 %v10927_v40 }
0x145a   :  { %9435 = vmatprep.subr.bf16.mxu1 %v10330_v4 }
0x145d   :  { %9437 = vmatpush3.bf16.msra.mxu1 %v10947_v52 }
0x145e   :  { %9444 = vmatprep.subr.bf16.mxu1 %v10330_v4 }
0x14c8   :  { %v1601_v57 = vpop.permute.xlu1 %1600 }
0x14c9   :  { %v1603_v59 = vsub.f32 %v10818_v11, %v1601_v57  ;;  %v10297_v57 = vld [vmem:[%s12071_s23 + $0x8] sm:$0xff]  ;;  %s2252_s23 = sld [smem:[#allocation3]] }
0x14ca   :  { %8324 = vmatmul.mubr.msk.f32.vlgmr.msra.gmra.mrb[16].mxu1 %vm133_vm1, %v10297_v57 }
0x14cb   :  { %v1605_v60 = vmul.f32 %v1604_v56, %v1603_v59  ;;  %9446 = vmatpush3.bf16.msra.mxu1 %v10462_v5  ;;  %8345 = vmatprep.mubr.msk.f32.mxu1 %vm10331_vm0, %v10332_v7 }
0x14cc   :  { %9447 = vmatprep.subr.bf16.mxu1 %v10330_v4 }
0x14cd   :  { %v1608_v63 = vadd.f32 %v1607_v61, %v1605_v60  ;;  %v7132_v60 = vld [vmem:[%s12076_s25 + $0x8] sm:$0xff]  ;;  %s7223_s25 = sld [smem:[#allocation3 + $0x2]] }
0x14cf   :  { %v10885_v1 = vadd.f32 %v1615_v62, %v1608_v63  ;;  %9449 = vmatpush3.bf16.msra.mxu1 %v10476_v10 }
0x14d0   :  { %9462 = vmatprep.subr.bf16.mxu1 %v10330_v4 }
0x14d1   :  { %1619 = vrot.lane.b32.xlu1 %v10885_v1, %s10337_s7 }
0x14d5   :  { %1633 = vrot.lane.b32.xlu1 %v7206_v2, %s10338_s22  ;;  %v7214_v2 = vld [vmem:[%s12051_s12] ss:$0 sm:$0xff] }
0x14d9   :  { %1804 = vrot.lane.b32.xlu1 %v123_v3, %s10339_s3 }
0x152b   :  { %v1707_v18 = vpop.f32.mrb[14].mxu1 }
0x152c   :  { %v8307_v19 = vpop.f32.mrb[15].mxu1 }
0x1543   :  { %v1620_v6 = vpop.permute.xlu1 %1619 }
0x1544   :  { %1623 = vst.msk [vmem:[%s12059_s20] sm:$0xff] %vm1622_vm6, %v1620_v6  ;;  %v1627_v11 = vsel %vm1622_vm6, %v1620_v6, %v10296_v9 }
0x1545   :  { %v1629_v13 = vsel %vm1628_vm7, %v1627_v11, %v1625_v12 }
0x1547   :  { %v1634_v14 = vpop.permute.xlu1 %1633 }
0x1548   :  { %v1637_v16 = vsel %vm1636_vm8, %v1629_v13, %v1634_v14 }
0x1549   :  { %8313 = vmatmul.mubr.msk.f32.vlgmr.msra.gmra.mrb[16].mxu0 %vm1711_vm9, %v1637_v16 }
0x154a   :  { %8334 = vmatprep.mubr.msk.f32.mxu0 %vm10331_vm0, %v10332_v7  ;;  %9440 = vmatpush3.bf16.msra.mxu0 %v10938_v8 }
0x154b   :  { %v1805_v34 = vpop.permute.xlu1 %1804  ;;  %9441 = vmatprep.subr.bf16.mxu0 %v10330_v4 }
0x154e   :  { %9443 = vmatpush3.bf16.msra.mxu0 %v10951_v55 }
0x154f   :  { %9450 = vmatprep.subr.bf16.mxu0 %v10330_v4 }
0x159d   :  { %v1890_v61 = vpop.f32.mrb[16].mxu1 }
0x159e   :  { %v8325_v62 = vpop.f32.mrb[17].mxu1 }
0x161c   :  { %v1785_v22 = vpop.f32.mrb[16].mxu0 }
0x161d   :  { %v1786_v24 = vadd.f32 %v1785_v22, %v1707_v18  ;;  %v8314_v26 = vpop.f32.mrb[17].mxu0 }
0x161f   :  { %v1795_v25 = vadd.f32 %v7210_v21, %v1786_v24 }
0x1621   :  { %10080 = vtanh.f32 %v1795_v25  ;;  %v7211_v28 = vmul.f32 -1.442695, %v1795_v25 }
0x1623   :  { %10082 = vpow2.f32 %v7211_v28 }
0x162b   :  { %v10081_v27 = vpop.eup %10080 }
0x162c   :  { %1809 = vrot.lane.b32.xlu0 %v10081_v27, %s10340_s8 }
0x162d   :  { %v10083_v30 = vpop.eup %10082 }
0x162e   :  { %v1799_v29 = vadd.f32 1.0, %v10083_v30 }
0x1630   :  { %10084 = vrcp.f32 %v1799_v29 }
0x163a   :  { %v10085_v31 = vpop.eup %10084 }
0x163b   :  { %v1807_v35 = vmul.f32 %v10085_v31, %v1805_v34 }
0x169e   :  { %v1810_v32 = vpop.permute.xlu0 %1809 }
0x169f   :  { %v1812_v33 = vmul.f32 %v10085_v31, %v1810_v32 }
0x16a1   :  { %1814 = vrot.lane.b32.xlu0 %v1812_v33, %s10339_s3  ;;  %v11016_v33 = vld [vmem:[%s12052_s13] ss:$0 sm:$0xff] }
0x1713   :  { %v1815_v51 = vpop.permute.xlu0 %1814 }
0x1714   :  { %v10915_v36 = vadd.f32 %v1815_v51, %v1807_v35  ;;  %v10299_v35 = vld [vmem:[%s12054_s15] ss:$0 sm:$0xff] }
0x1716   :  { %10086 = vtanh.f32 %v10915_v36 }
0x1720   :  { %v10087_v56 = vpop.eup %10086 }
0x1721   :  { %1820 = vrot.lane.b32.xlu1 %v10087_v56, %s10340_s8 }
0x1793   :  { %v1821_v58 = vpop.permute.xlu1 %1820 }
0x1794   :  { %v1823_v59 = vmul.f32 %v10085_v31, %v1821_v58  ;;  %v11042_v58 = vld [vmem:[%s12056_s17] ss:$0 sm:$0xff] }
0x1796   :  { %1895 = vrot.lane.b32.xlu0 %v1823_v59, %s10339_s3 }
0x179a   :  { %1984 = vrot.lane.b32.xlu0 %v7132_v60, %s10339_s3 }
0x1808   :  { %v10974_v63 = vpop.permute.xlu0 %1895 }
0x1809   :  { %8335 = vmatmul.mubr.msk.f32.vlgmr.msra.gmra.mrb[18].mxu0 %vm133_vm1, %v10974_v63 }
0x180a   :  { %9452 = vmatpush3.bf16.msra.mxu0 %v10499_v15  ;;  %8364 = vmatprep.mubr.msk.f32.mxu0 %vm10331_vm0, %v10332_v7 }
0x180b   :  { %9453 = vmatprep.subr.bf16.mxu0 %v10330_v4 }
0x180c   :  { %v1985_v22 = vpop.permute.xlu0 %1984 }
0x180e   :  { %9455 = vmatpush3.bf16.msra.mxu0 %v10505_v17 }
0x180f   :  { %9456 = vmatprep.subr.bf16.mxu0 %v10330_v4 }
0x1812   :  { %9458 = vmatpush3.bf16.msra.mxu0 %v10515_v20 }
0x1813   :  { %9459 = vmatprep.subr.bf16.mxu0 %v10330_v4 }
0x1816   :  { %9461 = vmatpush3.bf16.msra.mxu0 %v10525_v23 }
0x1817   :  { %9474 = vmatprep.subr.bf16.mxu0 %v10330_v4 }
0x18dc   :  { %v1965_v3 = vpop.f32.mrb[18].mxu0 }
0x18dd   :  { %v1966_v6 = vadd.f32 %v1965_v3, %v1890_v61  ;;  %v8336_v9 = vpop.f32.mrb[19].mxu0 }
0x18df   :  { %v1975_v11 = vadd.f32 %v7214_v2, %v1966_v6 }
0x18e1   :  { %10088 = vtanh.f32 %v1975_v11  ;;  %v7215_v13 = vmul.f32 -1.442695, %v1975_v11  ;;  %v7225_v11 = vld [vmem:[%s12072_s6 + $0x38] sm:$0xff] }
0x18e3   :  { %10090 = vpow2.f32 %v7215_v13 }
0x18eb   :  { %v10089_v12 = vpop.eup %10088 }
0x18ec   :  { %1989 = vrot.lane.b32.xlu1 %v10089_v12, %s10340_s8  ;;  %v2270_v12 = vstv %s7224_s2  ;;  %s7273_s2 = sld [smem:[#allocation3 + $0x282]] }
0x18ed   :  { %v10091_v14 = vpop.eup %10090  ;;  %v2271_v13 = vmul.f32 %v7225_v11, %v2270_v12  ;;  %v7235_v12 = vld [vmem:[%s12072_s6 + $0x40] sm:$0xff] }
0x18ee   :  { %v1979_v16 = vadd.f32 1.0, %v10091_v14 }
0x18f0   :  { %10092 = vrcp.f32 %v1979_v16  ;;  %v2256_v16 = vstv %s2252_s23  ;;  %s11302_s23 = sld [smem:[#allocation3 + $0x303]] }
0x18fa   :  { %v10093_v18 = vpop.eup %10092 }
0x18fb   :  { %v1987_v24 = vmul.f32 %v10093_v18, %v1985_v22 }
0x195e   :  { %v1990_v19 = vpop.permute.xlu1 %1989 }
0x195f   :  { %v1992_v21 = vmul.f32 %v10093_v18, %v1990_v19 }
0x1961   :  { %1994 = vrot.lane.b32.xlu1 %v1992_v21, %s10339_s3 }
0x19d3   :  { %v1995_v26 = vpop.permute.xlu1 %1994 }
0x19d4   :  { %v10993_v25 = vadd.f32 %v1995_v26, %v1987_v24  ;;  %v2263_v24 = vstv %s7222_s16  ;;  %s7241_s16 = sld [smem:[#allocation3 + $0x100]] }
0x19d6   :  { %10094 = vtanh.f32 %v10993_v25 }
0x19e0   :  { %v10095_v27 = vpop.eup %10094 }
0x19e1   :  { %2000 = vrot.lane.b32.xlu0 %v10095_v27, %s10340_s8  ;;  %v2265_v27 = vstv %s7223_s25  ;;  %s7242_s25 = sld [smem:[#allocation3 + $0x101]] }
0x19e5   :  { %2081 = vperm.xlu0 %10022, %v10885_v1  }
0x19e9   :  { %2273 = vrot.lane.b32.xlu0 %v2271_v13, %s10334_s4  ;;  %v2469_v13 = vstv %s7234_s18  ;;  %s7281_s18 = sld [smem:[#allocation3 + $0x300]] }
0x1a53   :  { %v2001_v28 = vpop.permute.xlu0 %2000 }
0x1a54   :  { %v2003_v30 = vmul.f32 %v10093_v18, %v2001_v28  ;;  %v11060_v18 = vld [vmem:[#allocation2] ss:$0 sm:$0xff] }
0x1a56   :  { %2005 = vrot.lane.b32.xlu1 %v2003_v30, %s10339_s3 }
0x1a64   :  { %v2082_v31 = vpop.permute.xlu0 %2081 }
0x1a65   :  { %v2084_v34 = vmul.f32 %v11016_v33, %v2082_v31  ;;  %v2266_v31 = vmul.f32 %v2265_v27, %v10885_v1 }
0x1ac8   :  { %v10999_v29 = vpop.permute.xlu1 %2005 }
0x1ac9   :  { %8346 = vmatmul.mubr.msk.f32.vlgmr.msra.gmra.mrb[18].mxu1 %vm133_vm1, %v10999_v29 }
0x1aca   :  { %9464 = vmatpush3.bf16.msra.mxu1 %v10562_v41  ;;  %8383 = vmatprep.mubr.msk.f32.mxu1 %vm10331_vm0, %v10332_v7 }
0x1acb   :  { %9465 = vmatprep.subr.bf16.mxu1 %v10330_v4 }
0x1ace   :  { %9467 = vmatpush3.bf16.msra.mxu1 %v10572_v44 }
0x1acf   :  { %9468 = vmatprep.subr.bf16.mxu1 %v10330_v4 }
0x1ad2   :  { %9470 = vmatpush3.bf16.msra.mxu1 %v10582_v47 }
0x1ad3   :  { %9471 = vmatprep.subr.bf16.mxu1 %v10330_v4 }
0x1ad6   :  { %9473 = vmatpush3.bf16.msra.mxu1 %v10592_v50 }
0x1ad7   :  { %9486 = vmatprep.subr.bf16.mxu1 %v10330_v4 }
0x1b9c   :  { %v2075_v32 = vpop.f32.mrb[18].mxu1 }
0x1b9d   :  { %v11022_v51 = vadd.f32 %v10299_v35, %v2075_v32  ;;  %v8347_v37 = vpop.f32.mrb[19].mxu1  ;;  %v2274_v32 = vpop.permute.xlu0 %2273 }
0x1b9f   :  { %v2085_v39 = vadd.f32 %v2084_v34, %v11022_v51 }
0x1ba1   :  { %v2090_v42 = vadd.f32 %v7217_v38, %v2085_v39  ;;  %v7226_v39 = vld [vmem:[%s12044_s5 + $0x1] ss:$0 sm:$0xff] }
0x1ba3   :  { %v7218_v43 = vmul.f32 -1.442695, %v2090_v42 }
0x1ba5   :  { %10096 = vpow2.f32 %v7218_v43 }
0x1baf   :  { %v10097_v45 = vpop.eup %10096 }
0x1bb0   :  { %v2094_v0 = vadd.f32 1.0, %v10097_v45 }
0x1bb2   :  { %10098 = vrcp.f32 %v2094_v0 }
0x1bbc   :  { %v10099_v49 = vpop.eup %10098 }
0x1bbd   :  { %v2097_v56 = vmul.f32 %v10099_v49, %v2090_v42 }
0x1bbf   :  { %8365 = vmatmul.mubr.msk.f32.vlgmr.msra.gmra.mrb[20].mxu0 %vm239_vm2, %v2097_v56 }
0x1bc0   :  { %9476 = vmatpush3.bf16.msra.mxu0 %v10499_v15  ;;  %8402 = vmatprep.mubr.msk.f32.mxu0 %vm10331_vm0, %v10332_v7 }
0x1bc1   :  { %9477 = vmatprep.subr.bf16.mxu0 %v10330_v4 }
0x1bc4   :  { %9479 = vmatpush3.bf16.msra.mxu0 %v10505_v17 }
0x1bc5   :  { %9480 = vmatprep.subr.bf16.mxu0 %v10330_v4 }
0x1bc8   :  { %9482 = vmatpush3.bf16.msra.mxu0 %v10515_v20 }
0x1bc9   :  { %9483 = vmatprep.subr.bf16.mxu0 %v10330_v4 }
0x1bcc   :  { %9485 = vmatpush3.bf16.msra.mxu0 %v10525_v23 }
0x1bcd   :  { %9498 = vmatprep.subr.bf16.mxu0 %v10330_v4 }
0x1c92   :  { %v2167_v57 = vpop.f32.mrb[20].mxu0 }
0x1c93   :  { %v2168_v59 = vadd.f32 %v11042_v58, %v2167_v57  ;;  %v8366_v60 = vpop.f32.mrb[21].mxu0 }
0x1c95   :  { %v7220_v61 = vmul.f32 -1.442695, %v2168_v59 }
0x1c97   :  { %10100 = vpow2.f32 %v7220_v61 }
0x1ca1   :  { %v10101_v62 = vpop.eup %10100 }
0x1ca2   :  { %v2174_v2 = vadd.f32 1.0, %v10101_v62 }
0x1ca4   :  { %10102 = vrcp.f32 %v2174_v2 }
0x1cae   :  { %v10103_v3 = vpop.eup %10102 }
0x1caf   :  { %v2177_v6 = vmul.f32 %v10103_v3, %v2168_v59 }
0x1cb1   :  { %v2178_v9 = vadd.f32 %v2177_v6, %v2097_v56 }
0x1cb3   :  { %8384 = vmatmul.mubr.msk.f32.vlgmr.msra.gmra.mrb[20].mxu1 %vm239_vm2, %v2178_v9 }
0x1cb4   :  { %9488 = vmatpush3.bf16.msra.mxu1 %v10562_v41  ;;  %8421 = vmatprep.mubr.msk.f32.mxu1 %vm10331_vm0, %v10332_v7 }
0x1cb5   :  { %9489 = vmatprep.subr.bf16.mxu1 %v10330_v4 }
0x1cb8   :  { %9491 = vmatpush3.bf16.msra.mxu1 %v10572_v44 }
0x1cb9   :  { %9492 = vmatprep.subr.bf16.mxu1 %v10330_v4 }
0x1cbc   :  { %9494 = vmatpush3.bf16.msra.mxu1 %v10582_v47 }
0x1cbd   :  { %9495 = vmatprep.subr.bf16.mxu1 %v10330_v4 }
0x1cc0   :  { %9497 = vmatpush3.bf16.msra.mxu1 %v10592_v50 }
0x1cc1   :  { %9510 = vmatprep.subr.bf16.mxu1 %v10330_v4 }
0x1d86   :  { %v2248_v14 = vpop.f32.mrb[20].mxu1 }
0x1d87   :  { %v2249_v19 = vadd.f32 %v11060_v18, %v2248_v14  ;;  %v8385_v21 = vpop.f32.mrb[21].mxu1  ;;  %v2470_v14 = vmul.f32 %v7235_v12, %v2469_v13  ;;  %v7245_v13 = vld [vmem:[%s12072_s6 + $0x48] sm:$0xff] }
0x1d89   :  { %v2257_v22 = vmul.f32 %v2256_v16, %v2249_v19  ;;  %v2455_v19 = vstv %s7231_s29  ;;  %s7311_s29 = sld [smem:[#allocation3 + $0x82]] }
0x1d8b   :  { %2259 = vrot.lane.b32.xlu1 %v2257_v22, %s10334_s4 }
0x1dfd   :  { %v2260_v26 = vpop.permute.xlu1 %2259 }
0x1dfe   :  { %v2262_v28 = vsub.f32 %v10885_v1, %v2260_v26  ;;  %v2462_v26 = vstv %s7232_s0  ;;  %s7251_s0 = sld [smem:[#allocation3 + $0x180]] }
0x1e00   :  { %v2264_v30 = vmul.f32 %v2263_v24, %v2262_v28  ;;  %v2464_v28 = vstv %s7233_s21  ;;  %s7252_s21 = sld [smem:[#allocation3 + $0x181]] }
0x1e02   :  { %v2267_v34 = vadd.f32 %v2266_v31, %v2264_v30 }
0x1e04   :  { %v11066_v35 = vadd.f32 %v2274_v32, %v2267_v34 }
0x1e06   :  { %2280 = vperm.xlu1 %10023, %v11066_v35   ;;  %v2465_v32 = vmul.f32 %v2464_v28, %v11066_v35 }
0x1e0a   :  { %2472 = vrot.lane.b32.xlu1 %v2470_v14, %s10334_s4  ;;  %v2668_v14 = vstv %s7244_s10  ;;  %s7300_s10 = sld [smem:[#allocation3 + $0x1]] }
0x1e85   :  { %v2281_v37 = vpop.permute.xlu1 %2280 }
0x1e86   :  { %v2283_v38 = vmul.f32 %v11016_v33, %v2281_v37 }
0x1e88   :  { %v2284_v42 = vadd.f32 %v2283_v38, %v11022_v51 }
0x1e89   :  { %v2473_v34 = vpop.permute.xlu1 %2472 }
0x1e8a   :  { %v2289_v43 = vadd.f32 %v7226_v39, %v2284_v42 }
0x1e8c   :  { %v7227_v45 = vmul.f32 -1.442695, %v2289_v43 }
0x1e8e   :  { %10104 = vpow2.f32 %v7227_v45 }
0x1e98   :  { %v10105_v0 = vpop.eup %10104 }
0x1e99   :  { %v2293_v49 = vadd.f32 1.0, %v10105_v0 }
0x1e9b   :  { %10106 = vrcp.f32 %v2293_v49 }
0x1ea5   :  { %v10107_v56 = vpop.eup %10106 }
0x1ea6   :  { %v2296_v57 = vmul.f32 %v10107_v56, %v2289_v43  ;;  %v7236_v43 = vld [vmem:[%s12044_s5 + $0x2] ss:$0 sm:$0xff] }
0x1ea8   :  { %8403 = vmatmul.mubr.msk.f32.vlgmr.msra.gmra.mrb[22].mxu0 %vm239_vm2, %v2296_v57 }
0x1ea9   :  { %9500 = vmatpush3.bf16.msra.mxu0 %v10499_v15  ;;  %8440 = vmatprep.mubr.msk.f32.mxu0 %vm10331_vm0, %v10332_v7 }
0x1eaa   :  { %9501 = vmatprep.subr.bf16.mxu0 %v10330_v4 }
0x1ead   :  { %9503 = vmatpush3.bf16.msra.mxu0 %v10505_v17 }
0x1eae   :  { %9504 = vmatprep.subr.bf16.mxu0 %v10330_v4 }
0x1eb1   :  { %9506 = vmatpush3.bf16.msra.mxu0 %v10515_v20 }
0x1eb2   :  { %9507 = vmatprep.subr.bf16.mxu0 %v10330_v4 }
0x1eb5   :  { %9509 = vmatpush3.bf16.msra.mxu0 %v10525_v23 }
0x1eb6   :  { %9522 = vmatprep.subr.bf16.mxu0 %v10330_v4 }
0x1f7b   :  { %v2366_v59 = vpop.f32.mrb[22].mxu0 }
0x1f7c   :  { %v2367_v60 = vadd.f32 %v11042_v58, %v2366_v59  ;;  %v8404_v61 = vpop.f32.mrb[23].mxu0 }
0x1f7e   :  { %v7229_v62 = vmul.f32 -1.442695, %v2367_v60 }
0x1f80   :  { %10108 = vpow2.f32 %v7229_v62 }
0x1f8a   :  { %v10109_v2 = vpop.eup %10108 }
0x1f8b   :  { %v2373_v3 = vadd.f32 1.0, %v10109_v2 }
0x1f8d   :  { %10110 = vrcp.f32 %v2373_v3 }
0x1f97   :  { %v10111_v6 = vpop.eup %10110 }
0x1f98   :  { %v2376_v9 = vmul.f32 %v10111_v6, %v2367_v60 }
0x1f9a   :  { %v2377_v11 = vadd.f32 %v2376_v9, %v2296_v57 }
0x1f9c   :  { %8422 = vmatmul.mubr.msk.f32.vlgmr.msra.gmra.mrb[22].mxu1 %vm239_vm2, %v2377_v11 }
0x1f9d   :  { %9512 = vmatpush3.bf16.msra.mxu1 %v10562_v41  ;;  %8459 = vmatprep.mubr.msk.f32.mxu1 %vm10331_vm0, %v10332_v7 }
0x1f9e   :  { %9513 = vmatprep.subr.bf16.mxu1 %v10330_v4 }
0x1fa1   :  { %9515 = vmatpush3.bf16.msra.mxu1 %v10572_v44 }
0x1fa2   :  { %9516 = vmatprep.subr.bf16.mxu1 %v10330_v4 }
0x1fa5   :  { %9518 = vmatpush3.bf16.msra.mxu1 %v10582_v47 }
0x1fa6   :  { %9519 = vmatprep.subr.bf16.mxu1 %v10330_v4 }
0x1fa9   :  { %9521 = vmatpush3.bf16.msra.mxu1 %v10592_v50 }
0x1faa   :  { %9534 = vmatprep.subr.bf16.mxu1 %v10330_v4 }
0x206f   :  { %v2447_v16 = vpop.f32.mrb[22].mxu1 }
0x2070   :  { %v2448_v21 = vadd.f32 %v11060_v18, %v2447_v16  ;;  %v8423_v22 = vpop.f32.mrb[23].mxu1  ;;  %v2669_v16 = vmul.f32 %v7245_v13, %v2668_v14  ;;  %v7255_v14 = vld [vmem:[%s12072_s6 + $0x50] sm:$0xff] }
0x2072   :  { %v2456_v24 = vmul.f32 %v2455_v19, %v2448_v21  ;;  %v2654_v21 = vstv %s7241_s16  ;;  %s7320_s16 = sld [smem:[#allocation3 + $0x101]] }
0x2074   :  { %2458 = vrot.lane.b32.xlu0 %v2456_v24, %s10334_s4 }
0x20e6   :  { %v2459_v27 = vpop.permute.xlu0 %2458 }
0x20e7   :  { %v2461_v30 = vsub.f32 %v11066_v35, %v2459_v27  ;;  %v2661_v27 = vstv %s7242_s25  ;;  %s7261_s25 = sld [smem:[#allocation3 + $0x200]] }
0x20e9   :  { %v2463_v31 = vmul.f32 %v2462_v26, %v2461_v30  ;;  %v2663_v30 = vstv %s7243_s19  ;;  %s7262_s19 = sld [smem:[#allocation3 + $0x201]] }
0x20eb   :  { %v2466_v37 = vadd.f32 %v2465_v32, %v2463_v31 }
0x20ed   :  { %v11105_v38 = vadd.f32 %v2473_v34, %v2466_v37 }
0x20ef   :  { %2479 = vperm.xlu0 %10022, %v11105_v38   ;;  %v2664_v34 = vmul.f32 %v2663_v30, %v11105_v38 }
0x20f3   :  { %2671 = vrot.lane.b32.xlu0 %v2669_v16, %s10334_s4  ;;  %v2867_v16 = vstv %s7254_s27  ;;  %s7282_s27 = sld [smem:[#allocation3 + $0x301]] }
0x216e   :  { %v2480_v39 = vpop.permute.xlu0 %2479 }
0x216f   :  { %v2482_v42 = vmul.f32 %v11016_v33, %v2480_v39 }
0x2171   :  { %v2483_v45 = vadd.f32 %v2482_v42, %v11022_v51 }
0x2172   :  { %v2672_v37 = vpop.permute.xlu0 %2671 }
0x2173   :  { %v2488_v0 = vadd.f32 %v7236_v43, %v2483_v45 }
0x2175   :  { %v7237_v49 = vmul.f32 -1.442695, %v2488_v0 }
0x2177   :  { %10112 = vpow2.f32 %v7237_v49 }
0x2181   :  { %v10113_v56 = vpop.eup %10112 }
0x2182   :  { %v2492_v35 = vadd.f32 1.0, %v10113_v56 }
0x2184   :  { %10114 = vrcp.f32 %v2492_v35 }
0x218e   :  { %v10115_v57 = vpop.eup %10114 }
0x218f   :  { %v2495_v59 = vmul.f32 %v10115_v57, %v2488_v0  ;;  %v7246_v0 = vld [vmem:[%s12044_s5 + $0x3] ss:$0 sm:$0xff] }
0x2191   :  { %8441 = vmatmul.mubr.msk.f32.vlgmr.msra.gmra.mrb[24].mxu0 %vm239_vm2, %v2495_v59 }
0x2192   :  { %9524 = vmatpush3.bf16.msra.mxu0 %v10499_v15  ;;  %8478 = vmatprep.mubr.msk.f32.mxu0 %vm10331_vm0, %v10332_v7 }
0x2193   :  { %9525 = vmatprep.subr.bf16.mxu0 %v10330_v4 }
0x2196   :  { %9527 = vmatpush3.bf16.msra.mxu0 %v10505_v17 }
0x2197   :  { %9528 = vmatprep.subr.bf16.mxu0 %v10330_v4 }
0x219a   :  { %9530 = vmatpush3.bf16.msra.mxu0 %v10515_v20 }
0x219b   :  { %9531 = vmatprep.subr.bf16.mxu0 %v10330_v4 }
0x219e   :  { %9533 = vmatpush3.bf16.msra.mxu0 %v10525_v23 }
0x219f   :  { %9546 = vmatprep.subr.bf16.mxu0 %v10330_v4 }
0x2264   :  { %v2565_v60 = vpop.f32.mrb[24].mxu0 }
0x2265   :  { %v2566_v61 = vadd.f32 %v11042_v58, %v2565_v60  ;;  %v8442_v62 = vpop.f32.mrb[25].mxu0 }
0x2267   :  { %v7239_v2 = vmul.f32 -1.442695, %v2566_v61 }
0x2269   :  { %10116 = vpow2.f32 %v7239_v2 }
0x2273   :  { %v10117_v3 = vpop.eup %10116 }
0x2274   :  { %v2572_v6 = vadd.f32 1.0, %v10117_v3 }
0x2276   :  { %10118 = vrcp.f32 %v2572_v6 }
0x2280   :  { %v10119_v9 = vpop.eup %10118 }
0x2281   :  { %v2575_v11 = vmul.f32 %v10119_v9, %v2566_v61 }
0x2283   :  { %v2576_v12 = vadd.f32 %v2575_v11, %v2495_v59 }
0x2285   :  { %8460 = vmatmul.mubr.msk.f32.vlgmr.msra.gmra.mrb[24].mxu1 %vm239_vm2, %v2576_v12 }
0x2286   :  { %9536 = vmatpush3.bf16.msra.mxu1 %v10562_v41  ;;  %8497 = vmatprep.mubr.msk.f32.mxu1 %vm10331_vm0, %v10332_v7 }
0x2287   :  { %9537 = vmatprep.subr.bf16.mxu1 %v10330_v4 }
0x228a   :  { %9539 = vmatpush3.bf16.msra.mxu1 %v10572_v44 }
0x228b   :  { %9540 = vmatprep.subr.bf16.mxu1 %v10330_v4 }
0x228e   :  { %9542 = vmatpush3.bf16.msra.mxu1 %v10582_v47 }
0x228f   :  { %9543 = vmatprep.subr.bf16.mxu1 %v10330_v4 }
0x2292   :  { %9545 = vmatpush3.bf16.msra.mxu1 %v10592_v50 }
0x2293   :  { %9558 = vmatprep.subr.bf16.mxu1 %v10330_v4 }
0x2358   :  { %v2646_v19 = vpop.f32.mrb[24].mxu1 }
0x2359   :  { %v2647_v22 = vadd.f32 %v11060_v18, %v2646_v19  ;;  %v8461_v24 = vpop.f32.mrb[25].mxu1  ;;  %v2868_v19 = vmul.f32 %v7255_v14, %v2867_v16  ;;  %v7265_v16 = vld [vmem:[%s12072_s6 + $0x58] sm:$0xff] }
0x235b   :  { %v2655_v26 = vmul.f32 %v2654_v21, %v2647_v22  ;;  %v2853_v22 = vstv %s7251_s0  ;;  %s7302_s0 = sld [smem:[#allocation3 + $0x3]] }
0x235d   :  { %2657 = vrot.lane.b32.xlu1 %v2655_v26, %s10334_s4 }
0x23cf   :  { %v2658_v28 = vpop.permute.xlu1 %2657 }
0x23d0   :  { %v2660_v31 = vsub.f32 %v11105_v38, %v2658_v28  ;;  %v2860_v28 = vstv %s7252_s21  ;;  %s7271_s21 = sld [smem:[#allocation3 + $0x280]] }
0x23d2   :  { %v2662_v32 = vmul.f32 %v2661_v27, %v2660_v31  ;;  %v2862_v31 = vstv %s7253_s24  ;;  %s7272_s24 = sld [smem:[#allocation3 + $0x281]] }
0x23d4   :  { %v2665_v39 = vadd.f32 %v2664_v34, %v2662_v32 }
0x23d6   :  { %v11144_v42 = vadd.f32 %v2672_v37, %v2665_v39 }
0x23d8   :  { %2678 = vperm.xlu1 %10023, %v11144_v42   ;;  %v2863_v37 = vmul.f32 %v2862_v31, %v11144_v42 }
0x23dc   :  { %2870 = vrot.lane.b32.xlu1 %v2868_v19, %s10334_s4  ;;  %v3066_v19 = vstv %s7264_s11  ;;  %s7301_s11 = sld [smem:[#allocation3 + $0x2]] }
0x2457   :  { %v2679_v43 = vpop.permute.xlu1 %2678 }
0x2458   :  { %v2681_v45 = vmul.f32 %v11016_v33, %v2679_v43 }
0x245a   :  { %v2682_v49 = vadd.f32 %v2681_v45, %v11022_v51 }
0x245b   :  { %v2871_v39 = vpop.permute.xlu1 %2870 }
0x245c   :  { %v2687_v56 = vadd.f32 %v7246_v0, %v2682_v49 }
0x245e   :  { %v7247_v35 = vmul.f32 -1.442695, %v2687_v56 }
0x2460   :  { %10120 = vpow2.f32 %v7247_v35 }
0x246a   :  { %v10121_v57 = vpop.eup %10120 }
0x246b   :  { %v2691_v38 = vadd.f32 1.0, %v10121_v57 }
0x246d   :  { %10122 = vrcp.f32 %v2691_v38 }
0x2477   :  { %v10123_v59 = vpop.eup %10122 }
0x2478   :  { %v2694_v60 = vmul.f32 %v10123_v59, %v2687_v56  ;;  %v7256_v56 = vld [vmem:[%s12044_s5 + $0x4] ss:$0 sm:$0xff] }
0x247a   :  { %8479 = vmatmul.mubr.msk.f32.vlgmr.msra.gmra.mrb[26].mxu0 %vm239_vm2, %v2694_v60 }
0x247b   :  { %9548 = vmatpush3.bf16.msra.mxu0 %v10499_v15  ;;  %8516 = vmatprep.mubr.msk.f32.mxu0 %vm10331_vm0, %v10332_v7 }
0x247c   :  { %9549 = vmatprep.subr.bf16.mxu0 %v10330_v4 }
0x247f   :  { %9551 = vmatpush3.bf16.msra.mxu0 %v10505_v17 }
0x2480   :  { %9552 = vmatprep.subr.bf16.mxu0 %v10330_v4 }
0x2483   :  { %9554 = vmatpush3.bf16.msra.mxu0 %v10515_v20 }
0x2484   :  { %9555 = vmatprep.subr.bf16.mxu0 %v10330_v4 }
0x2487   :  { %9557 = vmatpush3.bf16.msra.mxu0 %v10525_v23 }
0x2488   :  { %9570 = vmatprep.subr.bf16.mxu0 %v10330_v4 }
0x254d   :  { %v2764_v61 = vpop.f32.mrb[26].mxu0 }
0x254e   :  { %v2765_v62 = vadd.f32 %v11042_v58, %v2764_v61  ;;  %v8480_v2 = vpop.f32.mrb[27].mxu0 }
0x2550   :  { %v7249_v3 = vmul.f32 -1.442695, %v2765_v62 }
0x2552   :  { %10124 = vpow2.f32 %v7249_v3 }
0x255c   :  { %v10125_v6 = vpop.eup %10124 }
0x255d   :  { %v2771_v9 = vadd.f32 1.0, %v10125_v6 }
0x255f   :  { %10126 = vrcp.f32 %v2771_v9 }
0x2569   :  { %v10127_v11 = vpop.eup %10126 }
0x256a   :  { %v2774_v12 = vmul.f32 %v10127_v11, %v2765_v62 }
0x256c   :  { %v2775_v13 = vadd.f32 %v2774_v12, %v2694_v60 }
0x256e   :  { %8498 = vmatmul.mubr.msk.f32.vlgmr.msra.gmra.mrb[26].mxu1 %vm239_vm2, %v2775_v13 }
0x256f   :  { %9560 = vmatpush3.bf16.msra.mxu1 %v10562_v41  ;;  %8535 = vmatprep.mubr.msk.f32.mxu1 %vm10331_vm0, %v10332_v7 }
0x2570   :  { %9561 = vmatprep.subr.bf16.mxu1 %v10330_v4 }
0x2573   :  { %9563 = vmatpush3.bf16.msra.mxu1 %v10572_v44 }
0x2574   :  { %9564 = vmatprep.subr.bf16.mxu1 %v10330_v4 }
0x2577   :  { %9566 = vmatpush3.bf16.msra.mxu1 %v10582_v47 }
0x2578   :  { %9567 = vmatprep.subr.bf16.mxu1 %v10330_v4 }
0x257b   :  { %9569 = vmatpush3.bf16.msra.mxu1 %v10592_v50 }
0x257c   :  { %9582 = vmatprep.subr.bf16.mxu1 %v10330_v4 }
0x2641   :  { %v2845_v21 = vpop.f32.mrb[26].mxu1 }
0x2642   :  { %v2846_v24 = vadd.f32 %v11060_v18, %v2845_v21  ;;  %v8499_v26 = vpop.f32.mrb[27].mxu1  ;;  %v3067_v21 = vmul.f32 %v7265_v16, %v3066_v19  ;;  %v7275_v19 = vld [vmem:[%s12072_s6 + $0x60] sm:$0xff] }
0x2644   :  { %v2854_v27 = vmul.f32 %v2853_v22, %v2846_v24  ;;  %v3052_v24 = vstv %s7261_s25  ;;  %s7321_s25 = sld [smem:[#allocation3 + $0x102]] }
0x2646   :  { %2856 = vrot.lane.b32.xlu0 %v2854_v27, %s10334_s4 }
0x26b8   :  { %v2857_v30 = vpop.permute.xlu0 %2856 }
0x26b9   :  { %v2859_v32 = vsub.f32 %v11144_v42, %v2857_v30  ;;  %v3059_v30 = vstv %s7262_s19  ;;  %s7312_s19 = sld [smem:[#allocation3 + $0x83]] }
0x26bb   :  { %v2861_v34 = vmul.f32 %v2860_v28, %v2859_v32  ;;  %v3061_v32 = vstv %s7263_s26  ;;  %s7341_s26 = sld [smem:[#allocation3 + $0x202]] }
0x26bd   :  { %v2864_v43 = vadd.f32 %v2863_v37, %v2861_v34 }
0x26bf   :  { %v11183_v45 = vadd.f32 %v2871_v39, %v2864_v43 }
0x26c1   :  { %2877 = vperm.xlu0 %10022, %v11183_v45   ;;  %v3062_v39 = vmul.f32 %v3061_v32, %v11183_v45 }
0x26c5   :  { %3069 = vrot.lane.b32.xlu0 %v3067_v21, %s10334_s4  ;;  %v3265_v21 = vstv %s7274_s28  ;;  %s11317_s28 = sld [smem:[#allocation3 + $0x302]] }
0x2740   :  { %v2878_v0 = vpop.permute.xlu0 %2877 }
0x2741   :  { %v2880_v49 = vmul.f32 %v11016_v33, %v2878_v0 }
0x2743   :  { %v2881_v35 = vadd.f32 %v2880_v49, %v11022_v51 }
0x2744   :  { %v3070_v43 = vpop.permute.xlu0 %3069 }
0x2745   :  { %v2886_v57 = vadd.f32 %v7256_v56, %v2881_v35 }
0x2747   :  { %v7257_v38 = vmul.f32 -1.442695, %v2886_v57 }
0x2749   :  { %10128 = vpow2.f32 %v7257_v38 }
0x2753   :  { %v10129_v59 = vpop.eup %10128 }
0x2754   :  { %v2890_v42 = vadd.f32 1.0, %v10129_v59 }
0x2756   :  { %10130 = vrcp.f32 %v2890_v42 }
0x2760   :  { %v10131_v60 = vpop.eup %10130 }
0x2761   :  { %v2893_v61 = vmul.f32 %v10131_v60, %v2886_v57  ;;  %v7266_v57 = vld [vmem:[%s12044_s5 + $0x5] ss:$0 sm:$0xff] }
0x2763   :  { %8517 = vmatmul.mubr.msk.f32.vlgmr.msra.gmra.mrb[28].mxu0 %vm239_vm2, %v2893_v61 }
0x2764   :  { %9572 = vmatpush3.bf16.msra.mxu0 %v10499_v15  ;;  %8554 = vmatprep.mubr.msk.f32.mxu0 %vm10331_vm0, %v10332_v7 }
0x2765   :  { %9573 = vmatprep.subr.bf16.mxu0 %v10330_v4 }
0x2768   :  { %9575 = vmatpush3.bf16.msra.mxu0 %v10505_v17 }
0x2769   :  { %9576 = vmatprep.subr.bf16.mxu0 %v10330_v4 }
0x276c   :  { %9578 = vmatpush3.bf16.msra.mxu0 %v10515_v20 }
0x276d   :  { %9579 = vmatprep.subr.bf16.mxu0 %v10330_v4 }
0x2770   :  { %9581 = vmatpush3.bf16.msra.mxu0 %v10525_v23 }
0x2771   :  { %9594 = vmatprep.subr.bf16.mxu0 %v10330_v4 }
0x2836   :  { %v2963_v62 = vpop.f32.mrb[28].mxu0 }
0x2837   :  { %v2964_v2 = vadd.f32 %v11042_v58, %v2963_v62  ;;  %v8518_v3 = vpop.f32.mrb[29].mxu0 }
0x2839   :  { %v7259_v6 = vmul.f32 -1.442695, %v2964_v2 }
0x283b   :  { %10132 = vpow2.f32 %v7259_v6 }
0x2845   :  { %v10133_v9 = vpop.eup %10132 }
0x2846   :  { %v2970_v11 = vadd.f32 1.0, %v10133_v9 }
0x2848   :  { %10134 = vrcp.f32 %v2970_v11 }
0x2852   :  { %v10135_v12 = vpop.eup %10134 }
0x2853   :  { %v2973_v13 = vmul.f32 %v10135_v12, %v2964_v2 }
0x2855   :  { %v2974_v14 = vadd.f32 %v2973_v13, %v2893_v61 }
0x2857   :  { %8536 = vmatmul.mubr.msk.f32.vlgmr.msra.gmra.mrb[28].mxu1 %vm239_vm2, %v2974_v14 }
0x2858   :  { %9584 = vmatpush3.bf16.msra.mxu1 %v10562_v41  ;;  %8573 = vmatprep.mubr.msk.f32.mxu1 %vm10331_vm0, %v10332_v7 }
0x2859   :  { %9585 = vmatprep.subr.bf16.mxu1 %v10330_v4 }
0x285c   :  { %9587 = vmatpush3.bf16.msra.mxu1 %v10572_v44 }
0x285d   :  { %9588 = vmatprep.subr.bf16.mxu1 %v10330_v4 }
0x2860   :  { %9590 = vmatpush3.bf16.msra.mxu1 %v10582_v47 }
0x2861   :  { %9591 = vmatprep.subr.bf16.mxu1 %v10330_v4 }
0x2864   :  { %9593 = vmatpush3.bf16.msra.mxu1 %v10592_v50 }
0x2865   :  { %9606 = vmatprep.subr.bf16.mxu1 %v10330_v4 }
0x292a   :  { %v3044_v22 = vpop.f32.mrb[28].mxu1 }
0x292b   :  { %v3045_v26 = vadd.f32 %v11060_v18, %v3044_v22  ;;  %v8537_v27 = vpop.f32.mrb[29].mxu1  ;;  %v3266_v22 = vmul.f32 %v7275_v19, %v3265_v21  ;;  %v3464_v21 = vstv %s11302_s23  ;;  %s11696_s23 = sld [smem:[#allocation3 + $0x300]] }
0x292d   :  { %v3053_v28 = vmul.f32 %v3052_v24, %v3045_v26  ;;  %v3251_v26 = vstv %s7271_s21  ;;  %s7331_s21 = sld [smem:[#allocation3 + $0x182]] }
0x292f   :  { %3055 = vrot.lane.b32.xlu1 %v3053_v28, %s10334_s4 }
0x29a1   :  { %v3056_v31 = vpop.permute.xlu1 %3055 }
0x29a2   :  { %v3058_v34 = vsub.f32 %v11183_v45, %v3056_v31  ;;  %v3258_v31 = vstv %s7272_s24  ;;  %s7322_s24 = sld [smem:[#allocation3 + $0x103]] }
0x29a4   :  { %v3060_v37 = vmul.f32 %v3059_v30, %v3058_v34  ;;  %v3260_v34 = vstv %s7273_s2  ;;  %s4075_s2 = sld [smem:[#allocation3]] }
0x29a6   :  { %v3063_v0 = vadd.f32 %v3062_v39, %v3060_v37 }
0x29a8   :  { %v11222_v49 = vadd.f32 %v3070_v43, %v3063_v0 }
0x29aa   :  { %3076 = vperm.xlu1 %10023, %v11222_v49   ;;  %v3261_v43 = vmul.f32 %v3260_v34, %v11222_v49 }
0x29ae   :  { %3268 = vrot.lane.b32.xlu1 %v3266_v22, %s10334_s4 }
0x2a29   :  { %v3077_v56 = vpop.permute.xlu1 %3076 }
0x2a2a   :  { %v3079_v35 = vmul.f32 %v11016_v33, %v3077_v56 }
0x2a2c   :  { %v3080_v38 = vadd.f32 %v3079_v35, %v11022_v51 }
0x2a2d   :  { %v3269_v0 = vpop.permute.xlu1 %3268 }
0x2a2e   :  { %v3085_v59 = vadd.f32 %v7266_v57, %v3080_v38 }
0x2a30   :  { %v7267_v42 = vmul.f32 -1.442695, %v3085_v59 }
0x2a32   :  { %10136 = vpow2.f32 %v7267_v42 }
0x2a3c   :  { %v10137_v60 = vpop.eup %10136 }
0x2a3d   :  { %v3089_v45 = vadd.f32 1.0, %v10137_v60 }
0x2a3f   :  { %10138 = vrcp.f32 %v3089_v45 }
0x2a49   :  { %v10139_v61 = vpop.eup %10138 }
0x2a4a   :  { %v3092_v62 = vmul.f32 %v10139_v61, %v3085_v59  ;;  %v7276_v59 = vld [vmem:[%s12044_s5 + $0x6] ss:$0 sm:$0xff] }
0x2a4c   :  { %8555 = vmatmul.mubr.msk.f32.vlgmr.msra.gmra.mrb[30].mxu0 %vm239_vm2, %v3092_v62 }
0x2a4d   :  { %9596 = vmatpush3.bf16.msra.mxu0 %v10499_v15  ;;  %8592 = vmatprep.mubr.msk.f32.mxu0 %vm10331_vm0, %v10332_v7 }
0x2a4e   :  { %9597 = vmatprep.subr.bf16.mxu0 %v10330_v4 }
0x2a51   :  { %9599 = vmatpush3.bf16.msra.mxu0 %v10505_v17 }
0x2a52   :  { %9600 = vmatprep.subr.bf16.mxu0 %v10330_v4 }
0x2a55   :  { %9602 = vmatpush3.bf16.msra.mxu0 %v10515_v20 }
0x2a56   :  { %9603 = vmatprep.subr.bf16.mxu0 %v10330_v4 }
0x2a59   :  { %9605 = vmatpush3.bf16.msra.mxu0 %v10525_v23 }
0x2a5a   :  { %9618 = vmatprep.subr.bf16.mxu0 %v10330_v4 }
0x2b1f   :  { %v3162_v2 = vpop.f32.mrb[30].mxu0 }
0x2b20   :  { %v3163_v3 = vadd.f32 %v11042_v58, %v3162_v2  ;;  %v8556_v6 = vpop.f32.mrb[31].mxu0 }
0x2b22   :  { %v7269_v9 = vmul.f32 -1.442695, %v3163_v3 }
0x2b24   :  { %10140 = vpow2.f32 %v7269_v9 }
0x2b2e   :  { %v10141_v11 = vpop.eup %10140 }
0x2b2f   :  { %v3169_v12 = vadd.f32 1.0, %v10141_v11 }
0x2b31   :  { %10142 = vrcp.f32 %v3169_v12 }
0x2b3b   :  { %v10143_v13 = vpop.eup %10142 }
0x2b3c   :  { %v3172_v14 = vmul.f32 %v10143_v13, %v3163_v3 }
0x2b3e   :  { %v3173_v16 = vadd.f32 %v3172_v14, %v3092_v62 }
0x2b40   :  { %8574 = vmatmul.mubr.msk.f32.vlgmr.msra.gmra.mrb[30].mxu1 %vm239_vm2, %v3173_v16 }
0x2b41   :  { %9608 = vmatpush3.bf16.msra.mxu1 %v10562_v41  ;;  %8611 = vmatprep.mubr.msk.f32.mxu1 %vm10331_vm0, %v10332_v7 }
0x2b42   :  { %9609 = vmatprep.subr.bf16.mxu1 %v10330_v4 }
0x2b45   :  { %9611 = vmatpush3.bf16.msra.mxu1 %v10572_v44 }
0x2b46   :  { %9612 = vmatprep.subr.bf16.mxu1 %v10330_v4 }
0x2b49   :  { %9614 = vmatpush3.bf16.msra.mxu1 %v10582_v47 }
0x2b4a   :  { %9615 = vmatprep.subr.bf16.mxu1 %v10330_v4 }
0x2b4d   :  { %9617 = vmatpush3.bf16.msra.mxu1 %v10592_v50 }
0x2b4e   :  { %9624 = vmatprep.subr.bf16.mxu1 %v10330_v4 }
0x2c13   :  { %v3243_v24 = vpop.f32.mrb[30].mxu1 }
0x2c14   :  { %v3244_v27 = vadd.f32 %v11060_v18, %v3243_v24  ;;  %v8575_v28 = vpop.f32.mrb[31].mxu1  ;;  %v10302_v24 = vld [vmem:[%s12070_s1] sm:$0xff]  ;;  %s7310_s1 = sld [smem:[#allocation3 + $0x81]] }
0x2c16   :  { %v3252_v30 = vmul.f32 %v3251_v26, %v3244_v27  ;;  %v3450_v27 = vstv %s7281_s18  ;;  %s7332_s18 = sld [smem:[#allocation3 + $0x183]] }
0x2c18   :  { %3254 = vrot.lane.b32.xlu0 %v3252_v30, %s10334_s4 }
0x2c8a   :  { %v3255_v32 = vpop.permute.xlu0 %3254 }
0x2c8b   :  { %v3257_v37 = vsub.f32 %v11222_v49, %v3255_v32  ;;  %v3457_v32 = vstv %s7282_s27  ;;  %s7309_s27 = sld [smem:[#allocation3 + $0x80]] }
0x2c8d   :  { %v3259_v39 = vmul.f32 %v3258_v31, %v3257_v37  ;;  %v3459_v37 = vstv %s11317_s28  ;;  %s7397_s28 = sld [smem:[#allocation3 + $0x100]] }
0x2c8f   :  { %v3262_v56 = vadd.f32 %v3261_v43, %v3259_v39 }
0x2c91   :  { %v11261_v35 = vadd.f32 %v3269_v0, %v3262_v56 }
0x2c93   :  { %3275 = vperm.xlu0 %10022, %v11261_v35   ;;  %v3460_v0 = vmul.f32 %v3459_v37, %v11261_v35 }
0x2d12   :  { %v3276_v57 = vpop.permute.xlu0 %3275 }
0x2d13   :  { %v3278_v38 = vmul.f32 %v11016_v33, %v3276_v57 }
0x2d15   :  { %v3279_v42 = vadd.f32 %v3278_v38, %v11022_v51  ;;  %v7286_v38 = vld [vmem:[%s12075_s14 + $0x10] sm:$0xff] }
0x2d17   :  { %v3284_v60 = vadd.f32 %v7276_v59, %v3279_v42 }
0x2d19   :  { %v7277_v45 = vmul.f32 -1.442695, %v3284_v60 }
0x2d1b   :  { %10144 = vpow2.f32 %v7277_v45 }
0x2d25   :  { %v10145_v61 = vpop.eup %10144 }
0x2d26   :  { %v3288_v49 = vadd.f32 1.0, %v10145_v61 }
0x2d28   :  { %10146 = vrcp.f32 %v3288_v49 }
0x2d32   :  { %v10147_v62 = vpop.eup %10146 }
0x2d33   :  { %v3291_v2 = vmul.f32 %v10147_v62, %v3284_v60 }
0x2d35   :  { %8593 = vmatmul.mubr.msk.f32.vlgmr.msra.gmra.mrb[32].mxu0 %vm239_vm2, %v3291_v2 }
0x2d36   :  { %9620 = vmatpush3.bf16.msra.mxu0 %v10847_v46  ;;  %8622 = vmatprep.mubr.msk.f32.mxu0 %vm10331_vm0, %v10332_v7 }
0x2d37   :  { %9621 = vmatprep.subr.bf16.mxu0 %v10330_v4 }
0x2d3a   :  { %9623 = vmatpush3.bf16.msra.mxu0 %v10857_v48 }
0x2d3b   :  { %9628 = vmatprep.subr.bf16.mxu0 %v10330_v4 }
0x2d3d   :  { %8623 = vmatmul.mubr.msk.f32.vlgmr.msra.gmra.mrb[34].mxu0 %vm133_vm1, %v10974_v63 }
0x2d3e   :  { %9630 = vmatpush3.bf16.msra.mxu0 %v10927_v40  ;;  %8640 = vmatprep.mubr.msk.f32.mxu0 %vm10331_vm0, %v10332_v7 }
0x2d3f   :  { %9631 = vmatprep.subr.bf16.mxu0 %v10330_v4 }
0x2d42   :  { %9633 = vmatpush3.bf16.msra.mxu0 %v10947_v52 }
0x2d43   :  { %9640 = vmatprep.subr.bf16.mxu0 %v10330_v4 }
0x2d45   :  { %8641 = vmatmul.mubr.msk.f32.vlgmr.msra.gmra.mrb[36].mxu0 %vm133_vm1, %v10999_v29 }
0x2d46   :  { %9642 = vmatpush3.bf16.msra.mxu0 %v10462_v5  ;;  %8662 = vmatprep.mubr.msk.f32.mxu0 %vm10331_vm0, %v10332_v7 }
0x2d47   :  { %9643 = vmatprep.subr.bf16.mxu0 %v10330_v4 }
0x2d4a   :  { %9645 = vmatpush3.bf16.msra.mxu0 %v10476_v10 }
0x2d4b   :  { %9658 = vmatprep.subr.bf16.mxu0 %v10330_v4 }
0x2e08   :  { %v3361_v63 = vpop.f32.mrb[32].mxu0 }
0x2e09   :  { %v3362_v33 = vadd.f32 %v11042_v58, %v3361_v63  ;;  %v8594_v51 = vpop.f32.mrb[33].mxu0  ;;  %v7285_v58 = vld [vmem:[%s12072_s6 + $0x68] sm:$0xff]  ;;  %v10303_v63 = vld [vmem:[%s12048_s9] ss:$0 sm:$0xff] }
0x2e0a   :  { %v3465_v22 = vmul.f32 %v7285_v58, %v3464_v21 }
0x2e0b   :  { %v7279_v3 = vmul.f32 -1.442695, %v3362_v33 }
0x2e0c   :  { %3467 = vrot.lane.b32.xlu0 %v3465_v22, %s10334_s4 }
0x2e0d   :  { %10148 = vpow2.f32 %v7279_v3 }
0x2e10   :  { %v3555_v6 = vpop.f32.mrb[34].mxu0  ;;  %3477 = vrot.lane.b32.xlu0 %v10302_v24, %s10334_s4 }
0x2e11   :  { %v8624_v9 = vpop.f32.mrb[35].mxu0 }
0x2e17   :  { %v10149_v29 = vpop.eup %10148 }
0x2e18   :  { %v3368_v11 = vadd.f32 1.0, %v10149_v29  ;;  %v11293_v12 = vpop.f32.mrb[36].mxu0 }
0x2e19   :  { %v8642_v13 = vpop.f32.mrb[37].mxu0 }
0x2e1a   :  { %10150 = vrcp.f32 %v3368_v11 }
0x2e24   :  { %v10151_v14 = vpop.eup %10150 }
0x2e25   :  { %v3371_v16 = vmul.f32 %v10151_v14, %v3362_v33 }
0x2e27   :  { %v3372_v19 = vadd.f32 %v3371_v16, %v3291_v2 }
0x2e29   :  { %8612 = vmatmul.mubr.msk.f32.vlgmr.msra.gmra.mrb[32].mxu1 %vm239_vm2, %v3372_v19 }
0x2e2a   :  { %9627 = vmatpush3.bf16.msk.msra.mxu1 %vm10868_vm5, %v10865_v53  ;;  %8629 = vmatprep.mubr.msk.f32.mxu1 %vm10331_vm0, %v10332_v7 }
0x2e2b   :  { %9634 = vmatprep.subr.bf16.mxu1 %v10330_v4 }
0x2e7e   :  { %v3468_v56 = vpop.permute.xlu0 %3467 }
0x2e82   :  { %v3478_v42 = vpop.permute.xlu0 %3477 }
0x2efc   :  { %v3442_v26 = vpop.f32.mrb[32].mxu1 }
0x2efd   :  { %v3443_v28 = vadd.f32 %v11060_v18, %v3442_v26  ;;  %v8613_v30 = vpop.f32.mrb[33].mxu1 }
0x2efe   :  { %v10304_v30 = vld [vmem:[%s12051_s12] ss:$0 sm:$0xff] }
0x2eff   :  { %v3451_v31 = vmul.f32 %v3450_v27, %v3443_v28 }
0x2f01   :  { %3453 = vrot.lane.b32.xlu1 %v3451_v31, %s10334_s4 }
0x2f73   :  { %v3454_v34 = vpop.permute.xlu1 %3453 }
0x2f74   :  { %v3456_v39 = vsub.f32 %v11261_v35, %v3454_v34 }
0x2f76   :  { %v3458_v43 = vmul.f32 %v3457_v32, %v3456_v39 }
0x2f78   :  { %v3461_v18 = vadd.f32 %v3460_v0, %v3458_v43 }
0x2f7a   :  { %v11324_v57 = vadd.f32 %v3468_v56, %v3461_v18 }
0x2f7c   :  { %3474 = vrot.lane.b32.xlu1 %v11324_v57, %s10337_s7  ;;  %3472 = vst.msk [vmem:[%s12059_s20] sm:$0xff] %vm3471_vm10, %v11324_v57 }
0x2f80   :  { %3485 = vrot.lane.b32.xlu1 %v7286_v38, %s10338_s22 }
0x2fee   :  { %v3475_v35 = vpop.permute.xlu1 %3474 }
0x2fef   :  { %v3480_v59 = vsel %vm1622_vm6, %v3475_v35, %v10885_v1 }
0x2ff0   :  { %v3481_v60 = vsel %vm1628_vm7, %v3480_v59, %v3478_v42 }
0x2ff2   :  { %v3486_v45 = vpop.permute.xlu1 %3485 }
0x2ff3   :  { %v3488_v61 = vsel %vm1636_vm8, %v3481_v60, %v3486_v45 }
0x2ff4   :  { %8630 = vmatmul.mubr.msk.f32.vlgmr.msra.gmra.mrb[34].mxu1 %vm1711_vm9, %v3488_v61 }
0x2ff5   :  { %9636 = vmatpush3.bf16.msra.mxu1 %v10938_v8  ;;  %8651 = vmatprep.mubr.msk.f32.mxu1 %vm10331_vm0, %v10332_v7 }
0x2ff6   :  { %9637 = vmatprep.subr.bf16.mxu1 %v10330_v4 }
0x2ff9   :  { %9639 = vmatpush3.bf16.msra.mxu1 %v10951_v55 }
0x2ffa   :  { %9646 = vmatprep.subr.bf16.mxu1 %v10330_v4 }
0x30c7   :  { %v3628_v49 = vpop.f32.mrb[34].mxu1 }
0x30c8   :  { %v3629_v62 = vadd.f32 %v3628_v49, %v3555_v6  ;;  %v8631_v2 = vpop.f32.mrb[35].mxu1  ;;  %v11402_v49 = vld [vmem:[%s12052_s13] ss:$0 sm:$0xff] }
0x30c9   :  { %v10306_v2 = vld [vmem:[%s12054_s15] ss:$0 sm:$0xff] }
0x30ca   :  { %v3632_v33 = vadd.f32 %v10303_v63, %v3629_v62 }
0x30cc   :  { %10152 = vtanh.f32 %v3632_v33  ;;  %v7290_v3 = vmul.f32 -1.442695, %v3632_v33 }
0x30ce   :  { %10154 = vpow2.f32 %v7290_v3 }
0x30d6   :  { %v10153_v51 = vpop.eup %10152 }
0x30d7   :  { %3642 = vrot.lane.b32.xlu0 %v10153_v51, %s10340_s8  ;;  %v7295_v51 = vld [vmem:[%s12044_s5] ss:$0 sm:$0xff] }
0x30d8   :  { %v10155_v9 = vpop.eup %10154 }
0x30d9   :  { %v3636_v29 = vadd.f32 1.0, %v10155_v9 }
0x30db   :  { %10156 = vrcp.f32 %v3636_v29 }
0x30e5   :  { %v10157_v11 = vpop.eup %10156 }
0x30e6   :  { %v3640_v6 = vmul.f32 %v10157_v11, %v10915_v36 }
0x3149   :  { %v3643_v13 = vpop.permute.xlu0 %3642 }
0x314a   :  { %v3645_v14 = vmul.f32 %v10157_v11, %v3643_v13 }
0x314c   :  { %3647 = vrot.lane.b32.xlu1 %v3645_v14, %s10339_s3 }
0x31be   :  { %v3648_v16 = vpop.permute.xlu1 %3647 }
0x31bf   :  { %v11353_v19 = vadd.f32 %v3648_v16, %v3640_v6 }
0x31c1   :  { %10158 = vtanh.f32 %v11353_v19 }
0x31cb   :  { %v10159_v58 = vpop.eup %10158 }
0x31cc   :  { %3653 = vrot.lane.b32.xlu0 %v10159_v58, %s10340_s8  ;;  %v11428_v58 = vld [vmem:[%s12056_s17] ss:$0 sm:$0xff] }
0x323e   :  { %v3654_v22 = vpop.permute.xlu0 %3653 }
0x323f   :  { %v3656_v24 = vmul.f32 %v10157_v11, %v3654_v22 }
0x3241   :  { %3728 = vrot.lane.b32.xlu1 %v3656_v24, %s10339_s3 }
0x32b3   :  { %v11358_v26 = vpop.permute.xlu1 %3728 }
0x32b4   :  { %8652 = vmatmul.mubr.msk.f32.vlgmr.msra.gmra.mrb[36].mxu1 %vm133_vm1, %v11358_v26 }
0x32b5   :  { %9648 = vmatpush3.bf16.msra.mxu1 %v10499_v15  ;;  %8681 = vmatprep.mubr.msk.f32.mxu1 %vm10331_vm0, %v10332_v7 }
0x32b6   :  { %9649 = vmatprep.subr.bf16.mxu1 %v10330_v4 }
0x32b9   :  { %9651 = vmatpush3.bf16.msra.mxu1 %v10505_v17 }
0x32ba   :  { %9652 = vmatprep.subr.bf16.mxu1 %v10330_v4 }
0x32bd   :  { %9654 = vmatpush3.bf16.msra.mxu1 %v10515_v20 }
0x32be   :  { %9655 = vmatprep.subr.bf16.mxu1 %v10330_v4 }
0x32c1   :  { %9657 = vmatpush3.bf16.msra.mxu1 %v10525_v23 }
0x32c2   :  { %9670 = vmatprep.subr.bf16.mxu1 %v10330_v4 }
0x3387   :  { %v3798_v36 = vpop.f32.mrb[36].mxu1 }
0x3388   :  { %v3799_v27 = vadd.f32 %v3798_v36, %v11293_v12  ;;  %v8653_v28 = vpop.f32.mrb[37].mxu1 }
0x338a   :  { %v3802_v31 = vadd.f32 %v10304_v30, %v3799_v27 }
0x338c   :  { %10160 = vtanh.f32 %v3802_v31  ;;  %v7293_v34 = vmul.f32 -1.442695, %v3802_v31 }
0x338e   :  { %10162 = vpow2.f32 %v7293_v34  ;;  %v7303_v34 = vld [vmem:[%s12072_s6 + $0x70] sm:$0xff] }
0x3396   :  { %v10161_v32 = vpop.eup %10160 }
0x3397   :  { %3812 = vrot.lane.b32.xlu0 %v10161_v32, %s10340_s8 }
0x3398   :  { %v10163_v39 = vpop.eup %10162 }
0x3399   :  { %v3806_v43 = vadd.f32 1.0, %v10163_v39  ;;  %v4093_v39 = vstv %s7302_s0  ;;  %s7330_s0 = sld [smem:[#allocation3 + $0x181]] }
0x339b   :  { %10164 = vrcp.f32 %v3806_v43  ;;  %v4094_v43 = vmul.f32 %v7303_v34, %v4093_v39 }
0x33a5   :  { %v10165_v0 = vpop.eup %10164 }
0x33a6   :  { %v3810_v12 = vmul.f32 %v10165_v0, %v10993_v25 }
0x3409   :  { %v3813_v56 = vpop.permute.xlu0 %3812 }
0x340a   :  { %v3815_v18 = vmul.f32 %v10165_v0, %v3813_v56  ;;  %v4079_v56 = vstv %s4075_s2  ;;  %s7351_s2 = sld [smem:[#allocation3 + $0x282]] }
0x340c   :  { %3817 = vrot.lane.b32.xlu1 %v3815_v18, %s10339_s3  ;;  %v11446_v18 = vld [vmem:[#allocation2] ss:$0 sm:$0xff] }
0x347e   :  { %v3818_v38 = vpop.permute.xlu1 %3817 }
0x347f   :  { %v11379_v35 = vadd.f32 %v3818_v38, %v3810_v12 }
0x3481   :  { %10166 = vtanh.f32 %v11379_v35 }
0x348b   :  { %v10167_v59 = vpop.eup %10166 }
0x348c   :  { %3823 = vrot.lane.b32.xlu0 %v10167_v59, %s10340_s8 }
0x3490   :  { %3904 = vperm.xlu0 %10022, %v11324_v57  }
0x3494   :  { %4096 = vrot.lane.b32.xlu0 %v4094_v43, %s10334_s4 }
0x34fe   :  { %v3824_v42 = vpop.permute.xlu0 %3823 }
0x34ff   :  { %v3826_v60 = vmul.f32 %v10165_v0, %v3824_v42  ;;  %v4086_v42 = vstv %s7300_s10  ;;  %s7342_s10 = sld [smem:[#allocation3 + $0x203]] }
0x3501   :  { %3828 = vrot.lane.b32.xlu1 %v3826_v60, %s10339_s3 }
0x350f   :  { %v3905_v25 = vpop.permute.xlu0 %3904 }
0x3510   :  { %v3907_v62 = vmul.f32 %v11402_v49, %v3905_v25  ;;  %v4088_v25 = vstv %s7301_s11  ;;  %s7319_s11 = sld [smem:[#allocation3 + $0x100]] }
0x3573   :  { %v11385_v45 = vpop.permute.xlu1 %3828 }
0x3574   :  { %8663 = vmatmul.mubr.msk.f32.vlgmr.msra.gmra.mrb[38].mxu0 %vm133_vm1, %v11385_v45 }
0x3575   :  { %9660 = vmatpush3.bf16.msra.mxu0 %v10562_v41  ;;  %8700 = vmatprep.mubr.msk.f32.mxu0 %vm10331_vm0, %v10332_v7 }
0x3576   :  { %9661 = vmatprep.subr.bf16.mxu0 %v10330_v4 }
0x3579   :  { %9663 = vmatpush3.bf16.msra.mxu0 %v10572_v44 }
0x357a   :  { %9664 = vmatprep.subr.bf16.mxu0 %v10330_v4 }
0x357d   :  { %9666 = vmatpush3.bf16.msra.mxu0 %v10582_v47 }
0x357e   :  { %9667 = vmatprep.subr.bf16.mxu0 %v10330_v4 }
0x3581   :  { %9669 = vmatpush3.bf16.msra.mxu0 %v10592_v50 }
0x3582   :  { %9682 = vmatprep.subr.bf16.mxu0 %v10330_v4 }
0x3647   :  { %v3898_v61 = vpop.f32.mrb[38].mxu0 }
0x3648   :  { %v11408_v63 = vadd.f32 %v10306_v2, %v3898_v61  ;;  %v8664_v33 = vpop.f32.mrb[39].mxu0  ;;  %v4089_v2 = vmul.f32 %v4088_v25, %v11324_v57 }
0x3649   :  { %v4097_v33 = vpop.permute.xlu0 %4096 }
0x364a   :  { %v3908_v3 = vadd.f32 %v3907_v62, %v11408_v63 }
0x364c   :  { %v3913_v9 = vadd.f32 %v7295_v51, %v3908_v3 }
0x364e   :  { %v7296_v29 = vmul.f32 -1.442695, %v3913_v9 }
0x3650   :  { %10168 = vpow2.f32 %v7296_v29 }
0x365a   :  { %v10169_v11 = vpop.eup %10168 }
0x365b   :  { %v3917_v13 = vadd.f32 1.0, %v10169_v11  ;;  %v7304_v11 = vld [vmem:[%s12044_s5 + $0x1] ss:$0 sm:$0xff] }
0x365d   :  { %10170 = vrcp.f32 %v3917_v13 }
0x3667   :  { %v10171_v14 = vpop.eup %10170 }
0x3668   :  { %v3920_v6 = vmul.f32 %v10171_v14, %v3913_v9 }
0x366a   :  { %8682 = vmatmul.mubr.msk.f32.vlgmr.msra.gmra.mrb[38].mxu1 %vm239_vm2, %v3920_v6 }
0x366b   :  { %9672 = vmatpush3.bf16.msra.mxu1 %v10499_v15  ;;  %8719 = vmatprep.mubr.msk.f32.mxu1 %vm10331_vm0, %v10332_v7 }
0x366c   :  { %9673 = vmatprep.subr.bf16.mxu1 %v10330_v4 }
0x366f   :  { %9675 = vmatpush3.bf16.msra.mxu1 %v10505_v17 }
0x3670   :  { %9676 = vmatprep.subr.bf16.mxu1 %v10330_v4 }
0x3673   :  { %9678 = vmatpush3.bf16.msra.mxu1 %v10515_v20 }
0x3674   :  { %9679 = vmatprep.subr.bf16.mxu1 %v10330_v4 }
0x3677   :  { %9681 = vmatpush3.bf16.msra.mxu1 %v10525_v23 }
0x3678   :  { %9694 = vmatprep.subr.bf16.mxu1 %v10330_v4 }
0x373d   :  { %v3990_v16 = vpop.f32.mrb[38].mxu1 }
0x373e   :  { %v3991_v22 = vadd.f32 %v11428_v58, %v3990_v16  ;;  %v8683_v24 = vpop.f32.mrb[39].mxu1 }
0x3740   :  { %v7298_v36 = vmul.f32 -1.442695, %v3991_v22 }
0x3742   :  { %10172 = vpow2.f32 %v7298_v36 }
0x374c   :  { %v10173_v27 = vpop.eup %10172 }
0x374d   :  { %v3997_v28 = vadd.f32 1.0, %v10173_v27 }
0x374f   :  { %10174 = vrcp.f32 %v3997_v28 }
0x3759   :  { %v10175_v30 = vpop.eup %10174 }
0x375a   :  { %v4000_v31 = vmul.f32 %v10175_v30, %v3991_v22 }
0x375c   :  { %v4001_v32 = vadd.f32 %v4000_v31, %v3920_v6 }
0x375e   :  { %8701 = vmatmul.mubr.msk.f32.vlgmr.msra.gmra.mrb[40].mxu0 %vm239_vm2, %v4001_v32 }
0x375f   :  { %9684 = vmatpush3.bf16.msra.mxu0 %v10562_v41  ;;  %8738 = vmatprep.mubr.msk.f32.mxu0 %vm10331_vm0, %v10332_v7 }
0x3760   :  { %9685 = vmatprep.subr.bf16.mxu0 %v10330_v4 }
0x3763   :  { %9687 = vmatpush3.bf16.msra.mxu0 %v10572_v44 }
0x3764   :  { %9688 = vmatprep.subr.bf16.mxu0 %v10330_v4 }
0x3767   :  { %9690 = vmatpush3.bf16.msra.mxu0 %v10582_v47 }
0x3768   :  { %9691 = vmatprep.subr.bf16.mxu0 %v10330_v4 }
0x376b   :  { %9693 = vmatpush3.bf16.msra.mxu0 %v10592_v50 }
0x376c   :  { %9706 = vmatprep.subr.bf16.mxu0 %v10330_v4 }
0x3831   :  { %v4071_v0 = vpop.f32.mrb[40].mxu0 }
0x3832   :  { %v4072_v12 = vadd.f32 %v11446_v18, %v4071_v0  ;;  %v8702_v38 = vpop.f32.mrb[41].mxu0 }
0x3834   :  { %v4080_v59 = vmul.f32 %v4079_v56, %v4072_v12  ;;  %v7313_v56 = vld [vmem:[%s12072_s6 + $0x78] sm:$0xff]  ;;  %v4292_v12 = vstv %s7312_s19  ;;  %s7340_s19 = sld [smem:[#allocation3 + $0x201]] }
0x3835   :  { %v4293_v38 = vmul.f32 %v7313_v56, %v4292_v12 }
0x3836   :  { %4082 = vrot.lane.b32.xlu1 %v4080_v59, %s10334_s4 }
0x38a8   :  { %v4083_v60 = vpop.permute.xlu1 %4082 }
0x38a9   :  { %v4085_v61 = vsub.f32 %v11324_v57, %v4083_v60 }
0x38ab   :  { %v4087_v62 = vmul.f32 %v4086_v42, %v4085_v61  ;;  %v4278_v42 = vstv %s7309_s27  ;;  %s7398_s27 = sld [smem:[#allocation3 + $0x101]] }
0x38ad   :  { %v4090_v51 = vadd.f32 %v4089_v2, %v4087_v62  ;;  %v4285_v62 = vstv %s7310_s1  ;;  %s7352_s1 = sld [smem:[#allocation3 + $0x283]] }
0x38af   :  { %v11452_v3 = vadd.f32 %v4097_v33, %v4090_v51  ;;  %v4287_v33 = vstv %s7311_s29  ;;  %s7329_s29 = sld [smem:[#allocation3 + $0x180]] }
0x38b1   :  { %4103 = vperm.xlu1 %10023, %v11452_v3  }
0x38b5   :  { %4295 = vrot.lane.b32.xlu1 %v4293_v38, %s10334_s4 }
0x3930   :  { %v4104_v9 = vpop.permute.xlu1 %4103 }
0x3931   :  { %v4106_v29 = vmul.f32 %v11402_v49, %v4104_v9 }
0x3933   :  { %v4107_v13 = vadd.f32 %v4106_v29, %v11408_v63  ;;  %v4288_v29 = vmul.f32 %v4287_v33, %v11452_v3 }
0x3935   :  { %v4112_v14 = vadd.f32 %v7304_v11, %v4107_v13  ;;  %v4296_v11 = vpop.permute.xlu1 %4295 }
0x3937   :  { %v7305_v6 = vmul.f32 -1.442695, %v4112_v14 }
0x3939   :  { %10176 = vpow2.f32 %v7305_v6 }
0x3943   :  { %v10177_v16 = vpop.eup %10176 }
0x3944   :  { %v4116_v22 = vadd.f32 1.0, %v10177_v16 }
0x3946   :  { %10178 = vrcp.f32 %v4116_v22  ;;  %v7314_v22 = vld [vmem:[%s12044_s5 + $0x2] ss:$0 sm:$0xff] }
0x3950   :  { %v10179_v24 = vpop.eup %10178 }
0x3951   :  { %v4119_v36 = vmul.f32 %v10179_v24, %v4112_v14 }
0x3953   :  { %8720 = vmatmul.mubr.msk.f32.vlgmr.msra.gmra.mrb[40].mxu1 %vm239_vm2, %v4119_v36 }
0x3954   :  { %9696 = vmatpush3.bf16.msra.mxu1 %v10499_v15  ;;  %8757 = vmatprep.mubr.msk.f32.mxu1 %vm10331_vm0, %v10332_v7 }
0x3955   :  { %9697 = vmatprep.subr.bf16.mxu1 %v10330_v4 }
0x3958   :  { %9699 = vmatpush3.bf16.msra.mxu1 %v10505_v17 }
0x3959   :  { %9700 = vmatprep.subr.bf16.mxu1 %v10330_v4 }
0x395c   :  { %9702 = vmatpush3.bf16.msra.mxu1 %v10515_v20 }
0x395d   :  { %9703 = vmatprep.subr.bf16.mxu1 %v10330_v4 }
0x3960   :  { %9705 = vmatpush3.bf16.msra.mxu1 %v10525_v23 }
0x3961   :  { %9718 = vmatprep.subr.bf16.mxu1 %v10330_v4 }
0x3a26   :  { %v4189_v27 = vpop.f32.mrb[40].mxu1 }
0x3a27   :  { %v4190_v28 = vadd.f32 %v11428_v58, %v4189_v27  ;;  %v8721_v30 = vpop.f32.mrb[41].mxu1 }
0x3a29   :  { %v7307_v31 = vmul.f32 -1.442695, %v4190_v28 }
0x3a2b   :  { %10180 = vpow2.f32 %v7307_v31 }
0x3a35   :  { %v10181_v32 = vpop.eup %10180 }
0x3a36   :  { %v4196_v34 = vadd.f32 1.0, %v10181_v32 }
0x3a38   :  { %10182 = vrcp.f32 %v4196_v34 }
0x3a42   :  { %v10183_v39 = vpop.eup %10182 }
0x3a43   :  { %v4199_v43 = vmul.f32 %v10183_v39, %v4190_v28 }
0x3a45   :  { %v4200_v0 = vadd.f32 %v4199_v43, %v4119_v36 }
0x3a47   :  { %8739 = vmatmul.mubr.msk.f32.vlgmr.msra.gmra.mrb[42].mxu0 %vm239_vm2, %v4200_v0 }
0x3a48   :  { %9708 = vmatpush3.bf16.msra.mxu0 %v10562_v41  ;;  %8776 = vmatprep.mubr.msk.f32.mxu0 %vm10331_vm0, %v10332_v7 }
0x3a49   :  { %9709 = vmatprep.subr.bf16.mxu0 %v10330_v4 }
0x3a4c   :  { %9711 = vmatpush3.bf16.msra.mxu0 %v10572_v44 }
0x3a4d   :  { %9712 = vmatprep.subr.bf16.mxu0 %v10330_v4 }
0x3a50   :  { %9714 = vmatpush3.bf16.msra.mxu0 %v10582_v47 }
0x3a51   :  { %9715 = vmatprep.subr.bf16.mxu0 %v10330_v4 }
0x3a54   :  { %9717 = vmatpush3.bf16.msra.mxu0 %v10592_v50 }
0x3a55   :  { %9730 = vmatprep.subr.bf16.mxu0 %v10330_v4 }
0x3b1a   :  { %v4270_v59 = vpop.f32.mrb[42].mxu0 }
0x3b1b   :  { %v4271_v60 = vadd.f32 %v11446_v18, %v4270_v59  ;;  %v8740_v25 = vpop.f32.mrb[43].mxu0 }
0x3b1d   :  { %v4279_v61 = vmul.f32 %v4278_v42, %v4271_v60  ;;  %v7323_v42 = vld [vmem:[%s12072_s6 + $0x80] sm:$0xff]  ;;  %v4491_v60 = vstv %s7322_s24  ;;  %s7350_s24 = sld [smem:[#allocation3 + $0x281]] }
0x3b1e   :  { %v4492_v25 = vmul.f32 %v7323_v42, %v4491_v60 }
0x3b1f   :  { %4281 = vrot.lane.b32.xlu0 %v4279_v61, %s10334_s4 }
0x3b91   :  { %v4282_v2 = vpop.permute.xlu0 %4281 }
0x3b92   :  { %v4284_v51 = vsub.f32 %v11452_v3, %v4282_v2 }
0x3b94   :  { %v4286_v9 = vmul.f32 %v4285_v62, %v4284_v51  ;;  %v4477_v62 = vstv %s7319_s11 }
0x3b96   :  { %v4289_v13 = vadd.f32 %v4288_v29, %v4286_v9  ;;  %v4484_v9 = vstv %s7320_s16  ;;  %s7390_s16 = sld [smem:[#allocation3 + $0x83]] }
0x3b98   :  { %v11491_v14 = vadd.f32 %v4296_v11, %v4289_v13  ;;  %v4486_v11 = vstv %s7321_s25  ;;  %s7339_s25 = sld [smem:[#allocation3 + $0x200]] }
0x3b9a   :  { %4302 = vperm.xlu0 %10022, %v11491_v14  }
0x3b9e   :  { %4494 = vrot.lane.b32.xlu0 %v4492_v25, %s10334_s4 }
0x3c19   :  { %v4303_v6 = vpop.permute.xlu0 %4302 }
0x3c1a   :  { %v4305_v16 = vmul.f32 %v11402_v49, %v4303_v6 }
0x3c1c   :  { %v4306_v24 = vadd.f32 %v4305_v16, %v11408_v63  ;;  %v4487_v16 = vmul.f32 %v4486_v11, %v11491_v14 }
0x3c1e   :  { %v4311_v36 = vadd.f32 %v7314_v22, %v4306_v24  ;;  %v4495_v22 = vpop.permute.xlu0 %4494 }
0x3c20   :  { %v7315_v27 = vmul.f32 -1.442695, %v4311_v36 }
0x3c22   :  { %10184 = vpow2.f32 %v7315_v27 }
0x3c2c   :  { %v10185_v28 = vpop.eup %10184 }
0x3c2d   :  { %v4315_v3 = vadd.f32 1.0, %v10185_v28 }
0x3c2f   :  { %10186 = vrcp.f32 %v4315_v3  ;;  %v7324_v3 = vld [vmem:[%s12044_s5 + $0x3] ss:$0 sm:$0xff] }
0x3c39   :  { %v10187_v30 = vpop.eup %10186 }
0x3c3a   :  { %v4318_v31 = vmul.f32 %v10187_v30, %v4311_v36 }
0x3c3c   :  { %8758 = vmatmul.mubr.msk.f32.vlgmr.msra.gmra.mrb[42].mxu1 %vm239_vm2, %v4318_v31 }
0x3c3d   :  { %9720 = vmatpush3.bf16.msra.mxu1 %v10499_v15  ;;  %8795 = vmatprep.mubr.msk.f32.mxu1 %vm10331_vm0, %v10332_v7 }
0x3c3e   :  { %9721 = vmatprep.subr.bf16.mxu1 %v10330_v4 }
0x3c41   :  { %9723 = vmatpush3.bf16.msra.mxu1 %v10505_v17 }
0x3c42   :  { %9724 = vmatprep.subr.bf16.mxu1 %v10330_v4 }
0x3c45   :  { %9726 = vmatpush3.bf16.msra.mxu1 %v10515_v20 }
0x3c46   :  { %9727 = vmatprep.subr.bf16.mxu1 %v10330_v4 }
0x3c49   :  { %9729 = vmatpush3.bf16.msra.mxu1 %v10525_v23 }
0x3c4a   :  { %9742 = vmatprep.subr.bf16.mxu1 %v10330_v4 }
0x3d0f   :  { %v4388_v32 = vpop.f32.mrb[42].mxu1 }
0x3d10   :  { %v4389_v34 = vadd.f32 %v11428_v58, %v4388_v32  ;;  %v8759_v39 = vpop.f32.mrb[43].mxu1 }
0x3d12   :  { %v7317_v43 = vmul.f32 -1.442695, %v4389_v34 }
0x3d14   :  { %10188 = vpow2.f32 %v7317_v43 }
0x3d1e   :  { %v10189_v0 = vpop.eup %10188 }
0x3d1f   :  { %v4395_v56 = vadd.f32 1.0, %v10189_v0 }
0x3d21   :  { %10190 = vrcp.f32 %v4395_v56 }
0x3d2b   :  { %v10191_v12 = vpop.eup %10190 }
0x3d2c   :  { %v4398_v38 = vmul.f32 %v10191_v12, %v4389_v34 }
0x3d2e   :  { %v4399_v59 = vadd.f32 %v4398_v38, %v4318_v31 }
0x3d30   :  { %8777 = vmatmul.mubr.msk.f32.vlgmr.msra.gmra.mrb[44].mxu0 %vm239_vm2, %v4399_v59 }
0x3d31   :  { %9732 = vmatpush3.bf16.msra.mxu0 %v10562_v41  ;;  %8814 = vmatprep.mubr.msk.f32.mxu0 %vm10331_vm0, %v10332_v7 }
0x3d32   :  { %9733 = vmatprep.subr.bf16.mxu0 %v10330_v4 }
0x3d35   :  { %9735 = vmatpush3.bf16.msra.mxu0 %v10572_v44 }
0x3d36   :  { %9736 = vmatprep.subr.bf16.mxu0 %v10330_v4 }
0x3d39   :  { %9738 = vmatpush3.bf16.msra.mxu0 %v10582_v47 }
0x3d3a   :  { %9739 = vmatprep.subr.bf16.mxu0 %v10330_v4 }
0x3d3d   :  { %9741 = vmatpush3.bf16.msra.mxu0 %v10592_v50 }
0x3d3e   :  { %9754 = vmatprep.subr.bf16.mxu0 %v10330_v4 }
0x3e03   :  { %v4469_v61 = vpop.f32.mrb[44].mxu0 }
0x3e04   :  { %v4470_v2 = vadd.f32 %v11446_v18, %v4469_v61  ;;  %v8778_v33 = vpop.f32.mrb[45].mxu0 }
0x3e06   :  { %v4478_v51 = vmul.f32 %v4477_v62, %v4470_v2  ;;  %v7333_v62 = vld [vmem:[%s12072_s6 + $0x88] sm:$0xff]  ;;  %v4690_v2 = vstv %s7332_s18  ;;  %s7387_s18 = sld [smem:[#allocation3 + $0x80]] }
0x3e07   :  { %v4691_v33 = vmul.f32 %v7333_v62, %v4690_v2 }
0x3e08   :  { %4480 = vrot.lane.b32.xlu1 %v4478_v51, %s10334_s4 }
0x3e7a   :  { %v4481_v29 = vpop.permute.xlu1 %4480 }
0x3e7b   :  { %v4483_v13 = vsub.f32 %v11491_v14, %v4481_v29 }
0x3e7d   :  { %v4485_v6 = vmul.f32 %v4484_v9, %v4483_v13  ;;  %v4676_v9 = vstv %s7329_s29 }
0x3e7f   :  { %v4488_v24 = vadd.f32 %v4487_v16, %v4485_v6  ;;  %v4683_v6 = vstv %s7330_s0  ;;  %s7439_s0 = sld [smem:[#allocation3 + $0x302]] }
0x3e81   :  { %v11530_v36 = vadd.f32 %v4495_v22, %v4488_v24  ;;  %v4685_v22 = vstv %s7331_s21  ;;  %s7349_s21 = sld [smem:[#allocation3 + $0x280]] }
0x3e83   :  { %4501 = vperm.xlu1 %10023, %v11530_v36  }
0x3e87   :  { %4693 = vrot.lane.b32.xlu1 %v4691_v33, %s10334_s4 }
0x3f02   :  { %v4502_v27 = vpop.permute.xlu1 %4501 }
0x3f03   :  { %v4504_v28 = vmul.f32 %v11402_v49, %v4502_v27 }
0x3f05   :  { %v4505_v30 = vadd.f32 %v4504_v28, %v11408_v63  ;;  %v4686_v28 = vmul.f32 %v4685_v22, %v11530_v36 }
0x3f07   :  { %v4510_v31 = vadd.f32 %v7324_v3, %v4505_v30  ;;  %v4694_v3 = vpop.permute.xlu1 %4693 }
0x3f09   :  { %v7325_v32 = vmul.f32 -1.442695, %v4510_v31 }
0x3f0b   :  { %10192 = vpow2.f32 %v7325_v32 }
0x3f15   :  { %v10193_v34 = vpop.eup %10192 }
0x3f16   :  { %v4514_v14 = vadd.f32 1.0, %v10193_v34 }
0x3f18   :  { %10194 = vrcp.f32 %v4514_v14  ;;  %v7334_v14 = vld [vmem:[%s12044_s5 + $0x4] ss:$0 sm:$0xff] }
0x3f22   :  { %v10195_v39 = vpop.eup %10194 }
0x3f23   :  { %v4517_v43 = vmul.f32 %v10195_v39, %v4510_v31 }
0x3f25   :  { %8796 = vmatmul.mubr.msk.f32.vlgmr.msra.gmra.mrb[44].mxu1 %vm239_vm2, %v4517_v43 }
0x3f26   :  { %9744 = vmatpush3.bf16.msra.mxu1 %v10499_v15  ;;  %8833 = vmatprep.mubr.msk.f32.mxu1 %vm10331_vm0, %v10332_v7 }
0x3f27   :  { %9745 = vmatprep.subr.bf16.mxu1 %v10330_v4 }
0x3f2a   :  { %9747 = vmatpush3.bf16.msra.mxu1 %v10505_v17 }
0x3f2b   :  { %9748 = vmatprep.subr.bf16.mxu1 %v10330_v4 }
0x3f2e   :  { %9750 = vmatpush3.bf16.msra.mxu1 %v10515_v20 }
0x3f2f   :  { %9751 = vmatprep.subr.bf16.mxu1 %v10330_v4 }
0x3f32   :  { %9753 = vmatpush3.bf16.msra.mxu1 %v10525_v23 }
0x3f33   :  { %9766 = vmatprep.subr.bf16.mxu1 %v10330_v4 }
0x3ff8   :  { %v4587_v0 = vpop.f32.mrb[44].mxu1 }
0x3ff9   :  { %v4588_v56 = vadd.f32 %v11428_v58, %v4587_v0  ;;  %v8797_v12 = vpop.f32.mrb[45].mxu1 }
0x3ffb   :  { %v7327_v38 = vmul.f32 -1.442695, %v4588_v56 }
0x3ffd   :  { %10196 = vpow2.f32 %v7327_v38 }
0x4007   :  { %v10197_v59 = vpop.eup %10196 }
0x4008   :  { %v4594_v42 = vadd.f32 1.0, %v10197_v59 }
0x400a   :  { %10198 = vrcp.f32 %v4594_v42 }
0x4014   :  { %v10199_v60 = vpop.eup %10198 }
0x4015   :  { %v4597_v25 = vmul.f32 %v10199_v60, %v4588_v56 }
0x4017   :  { %v4598_v61 = vadd.f32 %v4597_v25, %v4517_v43 }
0x4019   :  { %8815 = vmatmul.mubr.msk.f32.vlgmr.msra.gmra.mrb[46].mxu0 %vm239_vm2, %v4598_v61 }
0x401a   :  { %9756 = vmatpush3.bf16.msra.mxu0 %v10562_v41  ;;  %8852 = vmatprep.mubr.msk.f32.mxu0 %vm10331_vm0, %v10332_v7 }
0x401b   :  { %9757 = vmatprep.subr.bf16.mxu0 %v10330_v4 }
0x401e   :  { %9759 = vmatpush3.bf16.msra.mxu0 %v10572_v44 }
0x401f   :  { %9760 = vmatprep.subr.bf16.mxu0 %v10330_v4 }
0x4022   :  { %9762 = vmatpush3.bf16.msra.mxu0 %v10582_v47 }
0x4023   :  { %9763 = vmatprep.subr.bf16.mxu0 %v10330_v4 }
0x4026   :  { %9765 = vmatpush3.bf16.msra.mxu0 %v10592_v50 }
0x4027   :  { %9778 = vmatprep.subr.bf16.mxu0 %v10330_v4 }
0x40ec   :  { %v4668_v51 = vpop.f32.mrb[46].mxu0 }
0x40ed   :  { %v4669_v29 = vadd.f32 %v11446_v18, %v4668_v51  ;;  %v8816_v11 = vpop.f32.mrb[47].mxu0 }
0x40ef   :  { %v4677_v13 = vmul.f32 %v4676_v9, %v4669_v29  ;;  %v7343_v9 = vld [vmem:[%s12072_s6 + $0x90] sm:$0xff]  ;;  %v4889_v29 = vstv %s7342_s10 }
0x40f0   :  { %v4890_v11 = vmul.f32 %v7343_v9, %v4889_v29 }
0x40f1   :  { %4679 = vrot.lane.b32.xlu0 %v4677_v13, %s10334_s4 }
0x4163   :  { %v4680_v16 = vpop.permute.xlu0 %4679 }
0x4164   :  { %v4682_v24 = vsub.f32 %v11530_v36, %v4680_v16 }
0x4166   :  { %v4684_v27 = vmul.f32 %v4683_v6, %v4682_v24  ;;  %v4875_v6 = vstv %s7339_s25 }
0x4168   :  { %v4687_v30 = vadd.f32 %v4686_v28, %v4684_v27  ;;  %v4882_v27 = vstv %s7340_s19  ;;  %s11703_s19 = sld [smem:[#allocation3 + $0x301]] }
0x416a   :  { %v11569_v31 = vadd.f32 %v4694_v3, %v4687_v30  ;;  %v4884_v3 = vstv %s7341_s26 }
0x416c   :  { %4700 = vperm.xlu0 %10022, %v11569_v31  }
0x4170   :  { %4892 = vrot.lane.b32.xlu0 %v4890_v11, %s10334_s4 }
0x41eb   :  { %v4701_v32 = vpop.permute.xlu0 %4700 }
0x41ec   :  { %v4703_v34 = vmul.f32 %v11402_v49, %v4701_v32 }
0x41ee   :  { %v4704_v39 = vadd.f32 %v4703_v34, %v11408_v63  ;;  %v4885_v34 = vmul.f32 %v4884_v3, %v11569_v31 }
0x41f0   :  { %v4709_v43 = vadd.f32 %v7334_v14, %v4704_v39  ;;  %v4893_v14 = vpop.permute.xlu0 %4892 }
0x41f2   :  { %v7335_v0 = vmul.f32 -1.442695, %v4709_v43 }
0x41f4   :  { %10200 = vpow2.f32 %v7335_v0 }
0x41fe   :  { %v10201_v56 = vpop.eup %10200 }
0x41ff   :  { %v4713_v36 = vadd.f32 1.0, %v10201_v56 }
0x4201   :  { %10202 = vrcp.f32 %v4713_v36  ;;  %v7344_v36 = vld [vmem:[%s12044_s5 + $0x5] ss:$0 sm:$0xff] }
0x420b   :  { %v10203_v12 = vpop.eup %10202 }
0x420c   :  { %v4716_v38 = vmul.f32 %v10203_v12, %v4709_v43 }
0x420e   :  { %8834 = vmatmul.mubr.msk.f32.vlgmr.msra.gmra.mrb[46].mxu1 %vm239_vm2, %v4716_v38 }
0x420f   :  { %9768 = vmatpush3.bf16.msra.mxu1 %v10499_v15  ;;  %8871 = vmatprep.mubr.msk.f32.mxu1 %vm10331_vm0, %v10332_v7 }
0x4210   :  { %9769 = vmatprep.subr.bf16.mxu1 %v10330_v4 }
0x4213   :  { %9771 = vmatpush3.bf16.msra.mxu1 %v10505_v17 }
0x4214   :  { %9772 = vmatprep.subr.bf16.mxu1 %v10330_v4 }
0x4217   :  { %9774 = vmatpush3.bf16.msra.mxu1 %v10515_v20 }
0x4218   :  { %9775 = vmatprep.subr.bf16.mxu1 %v10330_v4 }
0x421b   :  { %9777 = vmatpush3.bf16.msra.mxu1 %v10525_v23 }
0x421c   :  { %9790 = vmatprep.subr.bf16.mxu1 %v10330_v4 }
0x42e1   :  { %v4786_v59 = vpop.f32.mrb[46].mxu1 }
0x42e2   :  { %v4787_v42 = vadd.f32 %v11428_v58, %v4786_v59  ;;  %v8835_v60 = vpop.f32.mrb[47].mxu1 }
0x42e4   :  { %v7337_v25 = vmul.f32 -1.442695, %v4787_v42 }
0x42e6   :  { %10204 = vpow2.f32 %v7337_v25 }
0x42f0   :  { %v10205_v61 = vpop.eup %10204 }
0x42f1   :  { %v4793_v62 = vadd.f32 1.0, %v10205_v61 }
0x42f3   :  { %10206 = vrcp.f32 %v4793_v62 }
0x42fd   :  { %v10207_v2 = vpop.eup %10206 }
0x42fe   :  { %v4796_v33 = vmul.f32 %v10207_v2, %v4787_v42 }
0x4300   :  { %v4797_v51 = vadd.f32 %v4796_v33, %v4716_v38 }
0x4302   :  { %8853 = vmatmul.mubr.msk.f32.vlgmr.msra.gmra.mrb[48].mxu0 %vm239_vm2, %v4797_v51 }
0x4303   :  { %9780 = vmatpush3.bf16.msra.mxu0 %v10562_v41  ;;  %8890 = vmatprep.mubr.msk.f32.mxu0 %vm10331_vm0, %v10332_v7 }
0x4304   :  { %9781 = vmatprep.subr.bf16.mxu0 %v10330_v4 }
0x4307   :  { %9783 = vmatpush3.bf16.msra.mxu0 %v10572_v44 }
0x4308   :  { %9784 = vmatprep.subr.bf16.mxu0 %v10330_v4 }
0x430b   :  { %9786 = vmatpush3.bf16.msra.mxu0 %v10582_v47 }
0x430c   :  { %9787 = vmatprep.subr.bf16.mxu0 %v10330_v4 }
0x430f   :  { %9789 = vmatpush3.bf16.msra.mxu0 %v10592_v50 }
0x4310   :  { %9802 = vmatprep.subr.bf16.mxu0 %v10330_v4 }
0x43d5   :  { %v4867_v13 = vpop.f32.mrb[48].mxu0 }
0x43d6   :  { %v4868_v16 = vadd.f32 %v11446_v18, %v4867_v13  ;;  %v8854_v22 = vpop.f32.mrb[49].mxu0 }
0x43d8   :  { %v4876_v24 = vmul.f32 %v4875_v6, %v4868_v16  ;;  %v7353_v6 = vld [vmem:[%s12072_s6 + $0x98] sm:$0xff]  ;;  %v5088_v16 = vstv %s7352_s1  ;;  %s7399_s1 = sld [smem:[#allocation3 + $0x102]] }
0x43d9   :  { %v5089_v22 = vmul.f32 %v7353_v6, %v5088_v16 }
0x43da   :  { %4878 = vrot.lane.b32.xlu1 %v4876_v24, %s10334_s4 }
0x444c   :  { %v4879_v28 = vpop.permute.xlu1 %4878 }
0x444d   :  { %v4881_v30 = vsub.f32 %v11569_v31, %v4879_v28 }
0x444f   :  { %v4883_v32 = vmul.f32 %v4882_v27, %v4881_v30  ;;  %v5074_v27 = vstv %s7349_s21  ;;  %s5901_s21 = sld [smem:[#allocation3]] }
0x4451   :  { %v4886_v39 = vadd.f32 %v4885_v34, %v4883_v32  ;;  %v5081_v32 = vstv %s7350_s24  ;;  %s7378_s24 = sld [smem:[#allocation3 + $0x1]] }
0x4453   :  { %v11608_v43 = vadd.f32 %v4893_v14, %v4886_v39  ;;  %v5083_v14 = vstv %s7351_s2  ;;  %s7379_s2 = sld [smem:[#allocation3 + $0x2]] }
0x4455   :  { %4899 = vperm.xlu1 %10023, %v11608_v43  }
0x4459   :  { %5091 = vrot.lane.b32.xlu1 %v5089_v22, %s10334_s4 }
0x44d4   :  { %v4900_v0 = vpop.permute.xlu1 %4899 }
0x44d5   :  { %v4902_v56 = vmul.f32 %v11402_v49, %v4900_v0 }
0x44d7   :  { %v4903_v12 = vadd.f32 %v4902_v56, %v11408_v63  ;;  %v5084_v56 = vmul.f32 %v5083_v14, %v11608_v43 }
0x44d9   :  { %v4908_v38 = vadd.f32 %v7344_v36, %v4903_v12  ;;  %v5092_v36 = vpop.permute.xlu1 %5091 }
0x44db   :  { %v7345_v59 = vmul.f32 -1.442695, %v4908_v38 }
0x44dd   :  { %10208 = vpow2.f32 %v7345_v59 }
0x44e7   :  { %v10209_v42 = vpop.eup %10208 }
0x44e8   :  { %v4912_v31 = vadd.f32 1.0, %v10209_v42 }
0x44ea   :  { %10210 = vrcp.f32 %v4912_v31 }
0x44f4   :  { %v10211_v60 = vpop.eup %10210 }
0x44f5   :  { %v4915_v25 = vmul.f32 %v10211_v60, %v4908_v38  ;;  %v7363_v38 = vld [vmem:[%s12072_s6 + $0xa0] sm:$0xff] }
0x44f6   :  { %v5288_v42 = vmul.f32 %v7363_v38, %v3464_v21  ;;  %v7354_v60 = vld [vmem:[%s12044_s5 + $0x6] ss:$0 sm:$0xff] }
0x44f7   :  { %8872 = vmatmul.mubr.msk.f32.vlgmr.msra.gmra.mrb[48].mxu1 %vm239_vm2, %v4915_v25 }
0x44f8   :  { %9792 = vmatpush3.bf16.msra.mxu1 %v10499_v15  ;;  %8909 = vmatprep.mubr.msk.f32.mxu1 %vm10331_vm0, %v10332_v7 }
0x44f9   :  { %9793 = vmatprep.subr.bf16.mxu1 %v10330_v4 }
0x44fc   :  { %9795 = vmatpush3.bf16.msra.mxu1 %v10505_v17 }
0x44fd   :  { %9796 = vmatprep.subr.bf16.mxu1 %v10330_v4 }
0x4500   :  { %9798 = vmatpush3.bf16.msra.mxu1 %v10515_v20 }
0x4501   :  { %9799 = vmatprep.subr.bf16.mxu1 %v10330_v4 }
0x4504   :  { %9801 = vmatpush3.bf16.msra.mxu1 %v10525_v23 }
0x4505   :  { %9814 = vmatprep.subr.bf16.mxu1 %v10330_v4 }
0x45ca   :  { %v4985_v61 = vpop.f32.mrb[48].mxu1 }
0x45cb   :  { %v4986_v62 = vadd.f32 %v11428_v58, %v4985_v61  ;;  %v8873_v2 = vpop.f32.mrb[49].mxu1 }
0x45cd   :  { %v7347_v33 = vmul.f32 -1.442695, %v4986_v62 }
0x45cf   :  { %10212 = vpow2.f32 %v7347_v33 }
0x45d9   :  { %v10213_v51 = vpop.eup %10212 }
0x45da   :  { %v4992_v9 = vadd.f32 1.0, %v10213_v51 }
0x45dc   :  { %10214 = vrcp.f32 %v4992_v9 }
0x45e6   :  { %v10215_v29 = vpop.eup %10214 }
0x45e7   :  { %v4995_v11 = vmul.f32 %v10215_v29, %v4986_v62 }
0x45e9   :  { %v4996_v13 = vadd.f32 %v4995_v11, %v4915_v25 }
0x45eb   :  { %8891 = vmatmul.mubr.msk.f32.vlgmr.msra.gmra.mrb[50].mxu0 %vm239_vm2, %v4996_v13 }
0x45ec   :  { %9804 = vmatpush3.bf16.msra.mxu0 %v10562_v41  ;;  %8928 = vmatprep.mubr.msk.f32.mxu0 %vm10331_vm0, %v10332_v7 }
0x45ed   :  { %9805 = vmatprep.subr.bf16.mxu0 %v10330_v4 }
0x45f0   :  { %9807 = vmatpush3.bf16.msra.mxu0 %v10572_v44 }
0x45f1   :  { %9808 = vmatprep.subr.bf16.mxu0 %v10330_v4 }
0x45f4   :  { %9810 = vmatpush3.bf16.msra.mxu0 %v10582_v47 }
0x45f5   :  { %9811 = vmatprep.subr.bf16.mxu0 %v10330_v4 }
0x45f8   :  { %9813 = vmatpush3.bf16.msra.mxu0 %v10592_v50 }
0x45f9   :  { %9820 = vmatprep.subr.bf16.mxu0 %v10330_v4 }
0x46be   :  { %v5066_v24 = vpop.f32.mrb[50].mxu0 }
0x46bf   :  { %v5067_v28 = vadd.f32 %v11446_v18, %v5066_v24  ;;  %v8892_v3 = vpop.f32.mrb[51].mxu0 }
0x46c1   :  { %v5075_v30 = vmul.f32 %v5074_v27, %v5067_v28 }
0x46c3   :  { %5077 = vrot.lane.b32.xlu0 %v5075_v30, %s10334_s4  ;;  %v7364_v30 = vld [vmem:[%s12075_s14 + $0x18] sm:$0xff]  ;;  %s7389_s14 = sld [smem:[#allocation3 + $0x82]] }
0x4735   :  { %v5078_v34 = vpop.permute.xlu0 %5077 }
0x4736   :  { %v5080_v39 = vsub.f32 %v11608_v43, %v5078_v34 }
0x4738   :  { %v5082_v0 = vmul.f32 %v5081_v32, %v5080_v39 }
0x473a   :  { %v5085_v12 = vadd.f32 %v5084_v56, %v5082_v0 }
0x473c   :  { %v11650_v59 = vadd.f32 %v5092_v36, %v5085_v12  ;;  %v10309_v12 = vld [vmem:[%s12048_s9] ss:$0 sm:$0xff] }
0x473e   :  { %5098 = vperm.xlu0 %10022, %v11650_v59   ;;  %v5283_v24 = vmul.f32 %v11650_v59, %v3459_v37 }
0x4742   :  { %5290 = vrot.lane.b32.xlu0 %v5288_v42, %s10334_s4 }
0x4746   :  { %5303 = vrot.lane.b32.xlu0 %v10885_v1, %s10334_s4 }
0x47bd   :  { %v5099_v31 = vpop.permute.xlu0 %5098 }
0x47be   :  { %v5101_v43 = vmul.f32 %v11402_v49, %v5099_v31 }
0x47c0   :  { %v5102_v25 = vadd.f32 %v5101_v43, %v11408_v63 }
0x47c2   :  { %v5107_v61 = vadd.f32 %v7354_v60, %v5102_v25 }
0x47c4   :  { %v7355_v62 = vmul.f32 -1.442695, %v5107_v61 }
0x47c6   :  { %10216 = vpow2.f32 %v7355_v62 }
0x47d0   :  { %v10217_v2 = vpop.eup %10216 }
0x47d1   :  { %v5111_v33 = vadd.f32 1.0, %v10217_v2 }
0x47d3   :  { %10218 = vrcp.f32 %v5111_v33 }
0x47dd   :  { %v10219_v21 = vpop.eup %10218 }
0x47de   :  { %v5114_v51 = vmul.f32 %v10219_v21, %v5107_v61 }
0x47e0   :  { %8910 = vmatmul.mubr.msk.f32.vlgmr.msra.gmra.mrb[50].mxu1 %vm239_vm2, %v5114_v51 }
0x47e1   :  { %9816 = vmatpush3.bf16.msra.mxu1 %v10847_v46  ;;  %8939 = vmatprep.mubr.msk.f32.mxu1 %vm10331_vm0, %v10332_v7 }
0x47e2   :  { %9817 = vmatprep.subr.bf16.mxu1 %v10330_v4 }
0x47e5   :  { %9819 = vmatpush3.bf16.msra.mxu1 %v10857_v48 }
0x47e6   :  { %9824 = vmatprep.subr.bf16.mxu1 %v10330_v4 }
0x47e8   :  { %8940 = vmatmul.mubr.msk.f32.vlgmr.msra.gmra.mrb[52].mxu1 %vm133_vm1, %v11358_v26 }
0x47e9   :  { %9826 = vmatpush3.bf16.msra.mxu1 %v10927_v40  ;;  %8957 = vmatprep.mubr.msk.f32.mxu1 %vm10331_vm0, %v10332_v7 }
0x47ea   :  { %9827 = vmatprep.subr.bf16.mxu1 %v10330_v4 }
0x47ed   :  { %9829 = vmatpush3.bf16.msra.mxu1 %v10947_v52 }
0x47ee   :  { %9836 = vmatprep.subr.bf16.mxu1 %v10330_v4 }
0x47f0   :  { %8958 = vmatmul.mubr.msk.f32.vlgmr.msra.gmra.mrb[54].mxu1 %vm133_vm1, %v11385_v45 }
0x47f1   :  { %9838 = vmatpush3.bf16.msra.mxu1 %v10462_v5  ;;  %8979 = vmatprep.mubr.msk.f32.mxu1 %vm10331_vm0, %v10332_v7 }
0x47f2   :  { %9839 = vmatprep.subr.bf16.mxu1 %v10330_v4 }
0x47f5   :  { %9841 = vmatpush3.bf16.msra.mxu1 %v10476_v10 }
0x47f6   :  { %9854 = vmatprep.subr.bf16.mxu1 %v10330_v4 }
0x48b3   :  { %v5184_v46 = vpop.f32.mrb[50].mxu1 }
0x48b4   :  { %v5185_v48 = vadd.f32 %v11428_v58, %v5184_v46  ;;  %v8911_v1 = vpop.f32.mrb[51].mxu1  ;;  %v5273_v58 = vstv %s11696_s23 }
0x48b5   :  { %v10310_v1 = vld [vmem:[%s12051_s12] ss:$0 sm:$0xff]  ;;  %s7400_s12 = sld [smem:[#allocation3 + $0x103]] }
0x48b6   :  { %v7357_v40 = vmul.f32 -1.442695, %v5185_v48 }
0x48b8   :  { %10220 = vpow2.f32 %v7357_v40 }
0x48bb   :  { %v5381_v52 = vpop.f32.mrb[52].mxu1 }
0x48bc   :  { %v8941_v26 = vpop.f32.mrb[53].mxu1 }
0x48c2   :  { %v10221_v45 = vpop.eup %10220 }
0x48c3   :  { %v5191_v49 = vadd.f32 1.0, %v10221_v45  ;;  %v11687_v5 = vpop.f32.mrb[54].mxu1 }
0x48c4   :  { %v8959_v63 = vpop.f32.mrb[55].mxu1 }
0x48c5   :  { %10222 = vrcp.f32 %v5191_v49 }
0x48cf   :  { %v10223_v9 = vpop.eup %10222 }
0x48d0   :  { %v5194_v29 = vmul.f32 %v10223_v9, %v5185_v48 }
0x48d2   :  { %v5195_v11 = vadd.f32 %v5194_v29, %v5114_v51 }
0x48d4   :  { %8929 = vmatmul.mubr.msk.f32.vlgmr.msra.gmra.mrb[52].mxu0 %vm239_vm2, %v5195_v11 }
0x48d5   :  { %9823 = vmatpush3.bf16.msk.msra.mxu0 %vm10868_vm5, %v10865_v53  ;;  %8946 = vmatprep.mubr.msk.f32.mxu0 %vm10331_vm0, %v10332_v7  ;;  %v5280_v53 = vstv %s11703_s19 }
0x48d6   :  { %9830 = vmatprep.subr.bf16.mxu0 %v10330_v4 }
0x49a7   :  { %v5265_v10 = vpop.f32.mrb[52].mxu0 }
0x49a8   :  { %v5266_v13 = vadd.f32 %v11446_v18, %v5265_v10  ;;  %v8930_v6 = vpop.f32.mrb[53].mxu0  ;;  %v5291_v18 = vpop.permute.xlu0 %5290 }
0x49aa   :  { %v5274_v16 = vmul.f32 %v5273_v58, %v5266_v13 }
0x49ac   :  { %5276 = vrot.lane.b32.xlu1 %v5274_v16, %s10334_s4  ;;  %v5304_v37 = vpop.permute.xlu0 %5303 }
0x4a1e   :  { %v5277_v54 = vpop.permute.xlu1 %5276 }
0x4a1f   :  { %v5279_v22 = vsub.f32 %v11650_v59, %v5277_v54 }
0x4a21   :  { %v5281_v27 = vmul.f32 %v5280_v53, %v5279_v22 }
0x4a23   :  { %v5284_v28 = vadd.f32 %v5283_v24, %v5281_v27  ;;  %v11774_v24 = vld [vmem:[%s12052_s13] ss:$0 sm:$0xff] }
0x4a25   :  { %v11712_v3 = vadd.f32 %v5291_v18, %v5284_v28  ;;  %v10312_v28 = vld [vmem:[%s12054_s15] ss:$0 sm:$0xff] }
0x4a27   :  { %5300 = vrot.lane.b32.xlu1 %v11712_v3, %s10337_s7  ;;  %s7388_s7 = sld [smem:[#allocation3 + $0x81]] }
0x4a2b   :  { %5311 = vrot.lane.b32.xlu1 %v7364_v30, %s10338_s22 }
0x4a99   :  { %v5301_v32 = vpop.permute.xlu1 %5300 }
0x4a9a   :  { %v5306_v34 = vsel %vm1622_vm6, %v5301_v32, %v11324_v57  ;;  %v7373_v32 = vld [vmem:[%s12044_s5] ss:$0 sm:$0xff] }
0x4a9b   :  { %v5307_v14 = vsel %vm1628_vm7, %v5306_v34, %v5304_v37 }
0x4a9d   :  { %v5312_v39 = vpop.permute.xlu1 %5311 }
0x4a9e   :  { %v5314_v0 = vsel %vm1636_vm8, %v5307_v14, %v5312_v39 }
0x4a9f   :  { %8947 = vmatmul.mubr.msk.f32.vlgmr.msra.gmra.mrb[54].mxu0 %vm1711_vm9, %v5314_v0 }
0x4aa0   :  { %9832 = vmatpush3.bf16.msra.mxu0 %v10938_v8  ;;  %8968 = vmatprep.mubr.msk.f32.mxu0 %vm10331_vm0, %v10332_v7 }
0x4aa1   :  { %9833 = vmatprep.subr.bf16.mxu0 %v10330_v4 }
0x4aa4   :  { %9835 = vmatpush3.bf16.msra.mxu0 %v10951_v55 }
0x4aa5   :  { %9842 = vmatprep.subr.bf16.mxu0 %v10330_v4 }
0x4b72   :  { %v5454_v57 = vpop.f32.mrb[54].mxu0 }
0x4b73   :  { %v5455_v56 = vadd.f32 %v5454_v57, %v5381_v52  ;;  %v8948_v36 = vpop.f32.mrb[55].mxu0 }
0x4b75   :  { %v5458_v38 = vadd.f32 %v10309_v12, %v5455_v56  ;;  %v11800_v12 = vld [vmem:[%s12056_s17] ss:$0 sm:$0xff]  ;;  %s7380_s17 = sld [smem:[#allocation3 + $0x3]] }
0x4b77   :  { %10224 = vtanh.f32 %v5458_v38  ;;  %v7368_v8 = vmul.f32 -1.442695, %v5458_v38 }
0x4b79   :  { %10226 = vpow2.f32 %v7368_v8 }
0x4b81   :  { %v10225_v59 = vpop.eup %10224 }
0x4b82   :  { %5468 = vrot.lane.b32.xlu0 %v10225_v59, %s10340_s8 }
0x4b83   :  { %v10227_v42 = vpop.eup %10226 }
0x4b84   :  { %v5462_v31 = vadd.f32 1.0, %v10227_v42 }
0x4b86   :  { %10228 = vrcp.f32 %v5462_v31 }
0x4b90   :  { %v10229_v55 = vpop.eup %10228 }
0x4b91   :  { %v5466_v25 = vmul.f32 %v10229_v55, %v11353_v19 }
0x4bf4   :  { %v5469_v43 = vpop.permute.xlu0 %5468 }
0x4bf5   :  { %v5471_v60 = vmul.f32 %v10229_v55, %v5469_v43 }
0x4bf7   :  { %5473 = vrot.lane.b32.xlu1 %v5471_v60, %s10339_s3 }
0x4c69   :  { %v5474_v61 = vpop.permute.xlu1 %5473 }
0x4c6a   :  { %v5476_v62 = vadd.f32 %v5474_v61, %v5466_v25  ;;  %v7381_v25 = vld [vmem:[%s12072_s6 + $0xa8] sm:$0xff]  ;;  %v5919_v61 = vstv %s7380_s17  ;;  %s7410_s17 = sld [smem:[#allocation3 + $0x183]] }
0x4c6c   :  { %10230 = vtanh.f32 %v5476_v62  ;;  %v5920_v62 = vmul.f32 %v7381_v25, %v5919_v61 }
0x4c76   :  { %v10231_v2 = vpop.eup %10230 }
0x4c77   :  { %5479 = vrot.lane.b32.xlu0 %v10231_v2, %s10340_s8 }
0x4ce9   :  { %v5480_v33 = vpop.permute.xlu0 %5479 }
0x4cea   :  { %v5482_v21 = vmul.f32 %v10229_v55, %v5480_v33  ;;  %v5905_v33 = vstv %s5901_s21  ;;  %s7407_s21 = sld [smem:[#allocation3 + $0x180]] }
0x4cec   :  { %5554 = vrot.lane.b32.xlu1 %v5482_v21, %s10339_s3  ;;  %v11818_v21 = vld [vmem:[#allocation2] ss:$0 sm:$0xff] }
0x4d5e   :  { %v5555_v51 = vpop.permute.xlu1 %5554 }
0x4d5f   :  { %8969 = vmatmul.mubr.msk.f32.vlgmr.msra.gmra.mrb[56].mxu0 %vm133_vm1, %v5555_v51 }
0x4d60   :  { %9844 = vmatpush3.bf16.msra.mxu0 %v10499_v15  ;;  %8998 = vmatprep.mubr.msk.f32.mxu0 %vm10331_vm0, %v10332_v7 }
0x4d61   :  { %9845 = vmatprep.subr.bf16.mxu0 %v10330_v4 }
0x4d64   :  { %9847 = vmatpush3.bf16.msra.mxu0 %v10505_v17 }
0x4d65   :  { %9848 = vmatprep.subr.bf16.mxu0 %v10330_v4 }
0x4d68   :  { %9850 = vmatpush3.bf16.msra.mxu0 %v10515_v20 }
0x4d69   :  { %9851 = vmatprep.subr.bf16.mxu0 %v10330_v4 }
0x4d6c   :  { %9853 = vmatpush3.bf16.msra.mxu0 %v10525_v23 }
0x4d6d   :  { %9866 = vmatprep.subr.bf16.mxu0 %v10330_v4 }
0x4e32   :  { %v5624_v19 = vpop.f32.mrb[56].mxu0 }
0x4e33   :  { %v5625_v46 = vadd.f32 %v5624_v19, %v11687_v5  ;;  %v8970_v48 = vpop.f32.mrb[57].mxu0 }
0x4e34   :  { %v5912_v48 = vstv %s7378_s24  ;;  %s7408_s24 = sld [smem:[#allocation3 + $0x181]] }
0x4e35   :  { %v5628_v40 = vadd.f32 %v10310_v1, %v5625_v46 }
0x4e37   :  { %10232 = vtanh.f32 %v5628_v40  ;;  %v7371_v26 = vmul.f32 -1.442695, %v5628_v40  ;;  %v5914_v40 = vstv %s7379_s2  ;;  %s7409_s2 = sld [smem:[#allocation3 + $0x182]] }
0x4e39   :  { %10234 = vpow2.f32 %v7371_v26 }
0x4e41   :  { %v10233_v52 = vpop.eup %10232 }
0x4e42   :  { %5638 = vrot.lane.b32.xlu0 %v10233_v52, %s10340_s8 }
0x4e43   :  { %v10235_v45 = vpop.eup %10234 }
0x4e44   :  { %v5632_v49 = vadd.f32 1.0, %v10235_v45  ;;  %v5915_v45 = vmul.f32 %v5914_v40, %v11712_v3 }
0x4e46   :  { %10236 = vrcp.f32 %v5632_v49 }
0x4e50   :  { %v10237_v63 = vpop.eup %10236 }
0x4e51   :  { %v5636_v5 = vmul.f32 %v10237_v63, %v11379_v35 }
0x4eb4   :  { %v5639_v9 = vpop.permute.xlu0 %5638 }
0x4eb5   :  { %v5641_v29 = vmul.f32 %v10237_v63, %v5639_v9 }
0x4eb7   :  { %5643 = vrot.lane.b32.xlu1 %v5641_v29, %s10339_s3 }
0x4f29   :  { %v5644_v11 = vpop.permute.xlu1 %5643 }
0x4f2a   :  { %v5646_v10 = vadd.f32 %v5644_v11, %v5636_v5  ;;  %v7382_v11 = vld [vmem:[%s12044_s5 + $0x1] ss:$0 sm:$0xff] }
0x4f2c   :  { %10238 = vtanh.f32 %v5646_v10 }
0x4f36   :  { %v10239_v13 = vpop.eup %10238 }
0x4f37   :  { %5649 = vrot.lane.b32.xlu0 %v10239_v13, %s10340_s8 }
0x4f3b   :  { %5730 = vperm.xlu0 %10022, %v11712_v3  }
0x4f3f   :  { %5922 = vrot.lane.b32.xlu0 %v5920_v62, %s10334_s4 }
0x4fa9   :  { %v5650_v6 = vpop.permute.xlu0 %5649 }
0x4faa   :  { %v5652_v16 = vmul.f32 %v10237_v63, %v5650_v6 }
0x4fac   :  { %5654 = vrot.lane.b32.xlu1 %v5652_v16, %s10339_s3 }
0x4fba   :  { %v5731_v35 = vpop.permute.xlu0 %5730 }
0x4fbb   :  { %v5733_v27 = vmul.f32 %v11774_v24, %v5731_v35 }
0x4fbe   :  { %v5923_v49 = vpop.permute.xlu0 %5922 }
0x501e   :  { %v5655_v54 = vpop.permute.xlu1 %5654 }
0x501f   :  { %8980 = vmatmul.mubr.msk.f32.vlgmr.msra.gmra.mrb[56].mxu1 %vm133_vm1, %v5655_v54 }
0x5020   :  { %9856 = vmatpush3.bf16.msra.mxu1 %v10562_v41  ;;  %9017 = vmatprep.mubr.msk.f32.mxu1 %vm10331_vm0, %v10332_v7 }
0x5021   :  { %9857 = vmatprep.subr.bf16.mxu1 %v10330_v4 }
0x5024   :  { %9859 = vmatpush3.bf16.msra.mxu1 %v10572_v44 }
0x5025   :  { %9860 = vmatprep.subr.bf16.mxu1 %v10330_v4 }
0x5028   :  { %9862 = vmatpush3.bf16.msra.mxu1 %v10582_v47 }
0x5029   :  { %9863 = vmatprep.subr.bf16.mxu1 %v10330_v4 }
0x502c   :  { %9865 = vmatpush3.bf16.msra.mxu1 %v10592_v50 }
0x502d   :  { %9878 = vmatprep.subr.bf16.mxu1 %v10330_v4 }
0x50f2   :  { %v5724_v22 = vpop.f32.mrb[56].mxu1 }
0x50f3   :  { %v11780_v18 = vadd.f32 %v10312_v28, %v5724_v22  ;;  %v8981_v30 = vpop.f32.mrb[57].mxu1 }
0x50f5   :  { %v5734_v34 = vadd.f32 %v5733_v27, %v11780_v18 }
0x50f7   :  { %v5739_v37 = vadd.f32 %v7373_v32, %v5734_v34 }
0x50f9   :  { %v7374_v14 = vmul.f32 -1.442695, %v5739_v37 }
0x50fb   :  { %10240 = vpow2.f32 %v7374_v14 }
0x5105   :  { %v10241_v39 = vpop.eup %10240 }
0x5106   :  { %v5743_v0 = vadd.f32 1.0, %v10241_v39 }
0x5108   :  { %10242 = vrcp.f32 %v5743_v0 }
0x5112   :  { %v10243_v57 = vpop.eup %10242 }
0x5113   :  { %v5746_v56 = vmul.f32 %v10243_v57, %v5739_v37  ;;  %v7391_v57 = vld [vmem:[%s12072_s6 + $0xb0] sm:$0xff] }
0x5115   :  { %8999 = vmatmul.mubr.msk.f32.vlgmr.msra.gmra.mrb[58].mxu0 %vm239_vm2, %v5746_v56 }
0x5116   :  { %9868 = vmatpush3.bf16.msra.mxu0 %v10499_v15  ;;  %9036 = vmatprep.mubr.msk.f32.mxu0 %vm10331_vm0, %v10332_v7 }
0x5117   :  { %9869 = vmatprep.subr.bf16.mxu0 %v10330_v4 }
0x511a   :  { %9871 = vmatpush3.bf16.msra.mxu0 %v10505_v17 }
0x511b   :  { %9872 = vmatprep.subr.bf16.mxu0 %v10330_v4 }
0x511e   :  { %9874 = vmatpush3.bf16.msra.mxu0 %v10515_v20 }
0x511f   :  { %9875 = vmatprep.subr.bf16.mxu0 %v10330_v4 }
0x5122   :  { %9877 = vmatpush3.bf16.msra.mxu0 %v10525_v23 }
0x5123   :  { %9890 = vmatprep.subr.bf16.mxu0 %v10330_v4 }
0x51e8   :  { %v5816_v36 = vpop.f32.mrb[58].mxu0 }
0x51e9   :  { %v5817_v38 = vadd.f32 %v11800_v12, %v5816_v36  ;;  %v9000_v59 = vpop.f32.mrb[59].mxu0 }
0x51ea   :  { %v6104_v59 = vstv %s7387_s18  ;;  %s7417_s18 = sld [smem:[#allocation3 + $0x200]] }
0x51eb   :  { %v7376_v8 = vmul.f32 -1.442695, %v5817_v38 }
0x51ed   :  { %10244 = vpow2.f32 %v7376_v8 }
0x51f7   :  { %v10245_v42 = vpop.eup %10244 }
0x51f8   :  { %v5823_v31 = vadd.f32 1.0, %v10245_v42 }
0x51fa   :  { %10246 = vrcp.f32 %v5823_v31 }
0x5204   :  { %v10247_v55 = vpop.eup %10246 }
0x5205   :  { %v5826_v43 = vmul.f32 %v10247_v55, %v5817_v38  ;;  %v6111_v55 = vstv %s7388_s7  ;;  %s7418_s7 = sld [smem:[#allocation3 + $0x201]] }
0x5207   :  { %v5827_v60 = vadd.f32 %v5826_v43, %v5746_v56  ;;  %v6118_v56 = vstv %s7390_s16  ;;  %s7420_s16 = sld [smem:[#allocation3 + $0x203]] }
0x5208   :  { %v6119_v36 = vmul.f32 %v7391_v57, %v6118_v56 }
0x5209   :  { %9018 = vmatmul.mubr.msk.f32.vlgmr.msra.gmra.mrb[58].mxu1 %vm239_vm2, %v5827_v60  ;;  %v6113_v60 = vstv %s7389_s14  ;;  %s7419_s14 = sld [smem:[#allocation3 + $0x202]] }
0x520a   :  { %9880 = vmatpush3.bf16.msra.mxu1 %v10562_v41  ;;  %9055 = vmatprep.mubr.msk.f32.mxu1 %vm10331_vm0, %v10332_v7 }
0x520b   :  { %9881 = vmatprep.subr.bf16.mxu1 %v10330_v4 }
0x520e   :  { %9883 = vmatpush3.bf16.msra.mxu1 %v10572_v44 }
0x520f   :  { %9884 = vmatprep.subr.bf16.mxu1 %v10330_v4 }
0x5212   :  { %9886 = vmatpush3.bf16.msra.mxu1 %v10582_v47 }
0x5213   :  { %9887 = vmatprep.subr.bf16.mxu1 %v10330_v4 }
0x5216   :  { %9889 = vmatpush3.bf16.msra.mxu1 %v10592_v50 }
0x5217   :  { %9902 = vmatprep.subr.bf16.mxu1 %v10330_v4 }
0x52dc   :  { %v5897_v2 = vpop.f32.mrb[58].mxu1 }
0x52dd   :  { %v5898_v51 = vadd.f32 %v11818_v21, %v5897_v2  ;;  %v9019_v19 = vpop.f32.mrb[59].mxu1 }
0x52df   :  { %v5906_v46 = vmul.f32 %v5905_v33, %v5898_v51 }
0x52e1   :  { %5908 = vrot.lane.b32.xlu1 %v5906_v46, %s10334_s4 }
0x5353   :  { %v5909_v1 = vpop.permute.xlu1 %5908 }
0x5354   :  { %v5911_v52 = vsub.f32 %v11712_v3, %v5909_v1 }
0x5356   :  { %v5913_v26 = vmul.f32 %v5912_v48, %v5911_v52  ;;  %v7392_v48 = vld [vmem:[%s12044_s5 + $0x2] ss:$0 sm:$0xff] }
0x5358   :  { %v5916_v63 = vadd.f32 %v5915_v45, %v5913_v26 }
0x535a   :  { %v11824_v9 = vadd.f32 %v5923_v49, %v5916_v63 }
0x535c   :  { %5929 = vperm.xlu1 %10023, %v11824_v9   ;;  %v6114_v62 = vmul.f32 %v6113_v60, %v11824_v9 }
0x5360   :  { %6121 = vrot.lane.b32.xlu1 %v6119_v36, %s10334_s4 }
0x53db   :  { %v5930_v29 = vpop.permute.xlu1 %5929 }
0x53dc   :  { %v5932_v5 = vmul.f32 %v11774_v24, %v5930_v29 }
0x53de   :  { %v5933_v10 = vadd.f32 %v5932_v5, %v11780_v18 }
0x53df   :  { %v6122_v2 = vpop.permute.xlu1 %6121 }
0x53e0   :  { %v5938_v13 = vadd.f32 %v7382_v11, %v5933_v10 }
0x53e2   :  { %v7383_v6 = vmul.f32 -1.442695, %v5938_v13 }
0x53e4   :  { %10248 = vpow2.f32 %v7383_v6 }
0x53ee   :  { %v10249_v16 = vpop.eup %10248 }
0x53ef   :  { %v5942_v54 = vadd.f32 1.0, %v10249_v16 }
0x53f1   :  { %10250 = vrcp.f32 %v5942_v54 }
0x53fb   :  { %v10251_v35 = vpop.eup %10250 }
0x53fc   :  { %v5945_v22 = vmul.f32 %v10251_v35, %v5938_v13  ;;  %v7401_v35 = vld [vmem:[%s12072_s6 + $0xb8] sm:$0xff] }
0x53fe   :  { %9037 = vmatmul.mubr.msk.f32.vlgmr.msra.gmra.mrb[60].mxu0 %vm239_vm2, %v5945_v22 }
0x53ff   :  { %9892 = vmatpush3.bf16.msra.mxu0 %v10499_v15  ;;  %9074 = vmatprep.mubr.msk.f32.mxu0 %vm10331_vm0, %v10332_v7 }
0x5400   :  { %9893 = vmatprep.subr.bf16.mxu0 %v10330_v4 }
0x5403   :  { %9895 = vmatpush3.bf16.msra.mxu0 %v10505_v17 }
0x5404   :  { %9896 = vmatprep.subr.bf16.mxu0 %v10330_v4 }
0x5407   :  { %9898 = vmatpush3.bf16.msra.mxu0 %v10515_v20 }
0x5408   :  { %9899 = vmatprep.subr.bf16.mxu0 %v10330_v4 }
0x540b   :  { %9901 = vmatpush3.bf16.msra.mxu0 %v10525_v23 }
0x540c   :  { %9914 = vmatprep.subr.bf16.mxu0 %v10330_v4 }
0x54d1   :  { %v6015_v27 = vpop.f32.mrb[60].mxu0 }
0x54d2   :  { %v6016_v28 = vadd.f32 %v11800_v12, %v6015_v27  ;;  %v9038_v30 = vpop.f32.mrb[61].mxu0 }
0x54d3   :  { %v6303_v30 = vstv %s7397_s28  ;;  %s7427_s28 = sld [smem:[#allocation3 + $0x280]] }
0x54d4   :  { %v7385_v32 = vmul.f32 -1.442695, %v6016_v28 }
0x54d6   :  { %10252 = vpow2.f32 %v7385_v32 }
0x54e0   :  { %v10253_v34 = vpop.eup %10252 }
0x54e1   :  { %v6022_v37 = vadd.f32 1.0, %v10253_v34 }
0x54e3   :  { %10254 = vrcp.f32 %v6022_v37 }
0x54ed   :  { %v10255_v14 = vpop.eup %10254 }
0x54ee   :  { %v6025_v39 = vmul.f32 %v10255_v14, %v6016_v28  ;;  %v6310_v14 = vstv %s7398_s27  ;;  %s7428_s27 = sld [smem:[#allocation3 + $0x281]] }
0x54f0   :  { %v6026_v0 = vadd.f32 %v6025_v39, %v5945_v22  ;;  %v6317_v22 = vstv %s7400_s12  ;;  %s7430_s12 = sld [smem:[#allocation3 + $0x283]] }
0x54f1   :  { %v6318_v27 = vmul.f32 %v7401_v35, %v6317_v22 }
0x54f2   :  { %9056 = vmatmul.mubr.msk.f32.vlgmr.msra.gmra.mrb[60].mxu1 %vm239_vm2, %v6026_v0  ;;  %v6312_v0 = vstv %s7399_s1  ;;  %s7429_s1 = sld [smem:[#allocation3 + $0x282]] }
0x54f3   :  { %9904 = vmatpush3.bf16.msra.mxu1 %v10562_v41  ;;  %9093 = vmatprep.mubr.msk.f32.mxu1 %vm10331_vm0, %v10332_v7 }
0x54f4   :  { %9905 = vmatprep.subr.bf16.mxu1 %v10330_v4 }
0x54f7   :  { %9907 = vmatpush3.bf16.msra.mxu1 %v10572_v44 }
0x54f8   :  { %9908 = vmatprep.subr.bf16.mxu1 %v10330_v4 }
0x54fb   :  { %9910 = vmatpush3.bf16.msra.mxu1 %v10582_v47 }
0x54fc   :  { %9911 = vmatprep.subr.bf16.mxu1 %v10330_v4 }
0x54ff   :  { %9913 = vmatpush3.bf16.msra.mxu1 %v10592_v50 }
0x5500   :  { %9926 = vmatprep.subr.bf16.mxu1 %v10330_v4 }
0x55c5   :  { %v6096_v38 = vpop.f32.mrb[60].mxu1 }
0x55c6   :  { %v6097_v8 = vadd.f32 %v11818_v21, %v6096_v38  ;;  %v9057_v42 = vpop.f32.mrb[61].mxu1 }
0x55c8   :  { %v6105_v31 = vmul.f32 %v6104_v59, %v6097_v8 }
0x55ca   :  { %6107 = vrot.lane.b32.xlu0 %v6105_v31, %s10334_s4 }
0x563c   :  { %v6108_v43 = vpop.permute.xlu0 %6107 }
0x563d   :  { %v6110_v25 = vsub.f32 %v11824_v9, %v6108_v43 }
0x563f   :  { %v6112_v61 = vmul.f32 %v6111_v55, %v6110_v25  ;;  %v7402_v55 = vld [vmem:[%s12044_s5 + $0x3] ss:$0 sm:$0xff] }
0x5641   :  { %v6115_v33 = vadd.f32 %v6114_v62, %v6112_v61 }
0x5643   :  { %v11863_v51 = vadd.f32 %v6122_v2, %v6115_v33 }
0x5645   :  { %6128 = vperm.xlu0 %10022, %v11863_v51   ;;  %v6313_v36 = vmul.f32 %v6312_v0, %v11863_v51 }
0x5649   :  { %6320 = vrot.lane.b32.xlu0 %v6318_v27, %s10334_s4 }
0x56c4   :  { %v6129_v19 = vpop.permute.xlu0 %6128 }
0x56c5   :  { %v6131_v46 = vmul.f32 %v11774_v24, %v6129_v19 }
0x56c7   :  { %v6132_v1 = vadd.f32 %v6131_v46, %v11780_v18 }
0x56c8   :  { %v6321_v38 = vpop.permute.xlu0 %6320 }
0x56c9   :  { %v6137_v40 = vadd.f32 %v7392_v48, %v6132_v1 }
0x56cb   :  { %v7393_v52 = vmul.f32 -1.442695, %v6137_v40 }
0x56cd   :  { %10256 = vpow2.f32 %v7393_v52 }
0x56d7   :  { %v10257_v26 = vpop.eup %10256 }
0x56d8   :  { %v6141_v45 = vadd.f32 1.0, %v10257_v26 }
0x56da   :  { %10258 = vrcp.f32 %v6141_v45 }
0x56e4   :  { %v10259_v49 = vpop.eup %10258 }
0x56e5   :  { %v6144_v63 = vmul.f32 %v10259_v49, %v6137_v40  ;;  %v7411_v49 = vld [vmem:[%s12072_s6 + $0xc0] sm:$0xff] }
0x56e7   :  { %9075 = vmatmul.mubr.msk.f32.vlgmr.msra.gmra.mrb[62].mxu0 %vm239_vm2, %v6144_v63 }
0x56e8   :  { %9916 = vmatpush3.bf16.msra.mxu0 %v10499_v15  ;;  %9112 = vmatprep.mubr.msk.f32.mxu0 %vm10331_vm0, %v10332_v7 }
0x56e9   :  { %9917 = vmatprep.subr.bf16.mxu0 %v10330_v4 }
0x56ec   :  { %9919 = vmatpush3.bf16.msra.mxu0 %v10505_v17 }
0x56ed   :  { %9920 = vmatprep.subr.bf16.mxu0 %v10330_v4 }
0x56f0   :  { %9922 = vmatpush3.bf16.msra.mxu0 %v10515_v20 }
0x56f1   :  { %9923 = vmatprep.subr.bf16.mxu0 %v10330_v4 }
0x56f4   :  { %9925 = vmatpush3.bf16.msra.mxu0 %v10525_v23 }
0x56f5   :  { %9938 = vmatprep.subr.bf16.mxu0 %v10330_v4 }
0x57ba   :  { %v6214_v9 = vpop.f32.mrb[62].mxu0 }
0x57bb   :  { %v6215_v29 = vadd.f32 %v11800_v12, %v6214_v9  ;;  %v9076_v5 = vpop.f32.mrb[63].mxu0 }
0x57bc   :  { %v6502_v5 = vstv %s7407_s21 }
0x57bd   :  { %v7395_v11 = vmul.f32 -1.442695, %v6215_v29 }
0x57bf   :  { %10260 = vpow2.f32 %v7395_v11 }
0x57c9   :  { %v10261_v10 = vpop.eup %10260 }
0x57ca   :  { %v6221_v13 = vadd.f32 1.0, %v10261_v10 }
0x57cc   :  { %10262 = vrcp.f32 %v6221_v13 }
0x57d6   :  { %v10263_v6 = vpop.eup %10262 }
0x57d7   :  { %v6224_v16 = vmul.f32 %v10263_v6, %v6215_v29  ;;  %v6509_v6 = vstv %s7408_s24 }
0x57d9   :  { %v6225_v54 = vadd.f32 %v6224_v16, %v6144_v63  ;;  %v6516_v63 = vstv %s7410_s17 }
0x57da   :  { %v6517_v9 = vmul.f32 %v7411_v49, %v6516_v63 }
0x57db   :  { %9094 = vmatmul.mubr.msk.f32.vlgmr.msra.gmra.mrb[62].mxu1 %vm239_vm2, %v6225_v54  ;;  %v6511_v54 = vstv %s7409_s2 }
0x57dc   :  { %9928 = vmatpush3.bf16.msra.mxu1 %v10562_v41  ;;  %9131 = vmatprep.mubr.msk.f32.mxu1 %vm10331_vm0, %v10332_v7 }
0x57dd   :  { %9929 = vmatprep.subr.bf16.mxu1 %v10330_v4 }
0x57e0   :  { %9931 = vmatpush3.bf16.msra.mxu1 %v10572_v44 }
0x57e1   :  { %9932 = vmatprep.subr.bf16.mxu1 %v10330_v4 }
0x57e4   :  { %9934 = vmatpush3.bf16.msra.mxu1 %v10582_v47 }
0x57e5   :  { %9935 = vmatprep.subr.bf16.mxu1 %v10330_v4 }
0x57e8   :  { %9937 = vmatpush3.bf16.msra.mxu1 %v10592_v50 }
0x57e9   :  { %9950 = vmatprep.subr.bf16.mxu1 %v10330_v4 }
0x58ae   :  { %v6295_v28 = vpop.f32.mrb[62].mxu1 }
0x58af   :  { %v6296_v32 = vadd.f32 %v11818_v21, %v6295_v28  ;;  %v9095_v34 = vpop.f32.mrb[63].mxu1 }
0x58b1   :  { %v6304_v37 = vmul.f32 %v6303_v30, %v6296_v32 }
0x58b3   :  { %6306 = vrot.lane.b32.xlu1 %v6304_v37, %s10334_s4 }
0x5925   :  { %v6307_v39 = vpop.permute.xlu1 %6306 }
0x5926   :  { %v6309_v57 = vsub.f32 %v11863_v51, %v6307_v39 }
0x5928   :  { %v6311_v56 = vmul.f32 %v6310_v14, %v6309_v57  ;;  %v7412_v14 = vld [vmem:[%s12044_s5 + $0x4] ss:$0 sm:$0xff] }
0x592a   :  { %v6314_v59 = vadd.f32 %v6313_v36, %v6311_v56 }
0x592c   :  { %v11902_v8 = vadd.f32 %v6321_v38, %v6314_v59 }
0x592e   :  { %6327 = vperm.xlu1 %10023, %v11902_v8   ;;  %v6512_v27 = vmul.f32 %v6511_v54, %v11902_v8 }
0x5932   :  { %6519 = vrot.lane.b32.xlu1 %v6517_v9, %s10334_s4 }
0x59ad   :  { %v6328_v42 = vpop.permute.xlu1 %6327 }
0x59ae   :  { %v6330_v31 = vmul.f32 %v11774_v24, %v6328_v42 }
0x59b0   :  { %v6331_v43 = vadd.f32 %v6330_v31, %v11780_v18 }
0x59b1   :  { %v6520_v28 = vpop.permute.xlu1 %6519 }
0x59b2   :  { %v6336_v60 = vadd.f32 %v7402_v55, %v6331_v43 }
0x59b4   :  { %v7403_v25 = vmul.f32 -1.442695, %v6336_v60 }
0x59b6   :  { %10264 = vpow2.f32 %v7403_v25 }
0x59c0   :  { %v10265_v61 = vpop.eup %10264 }
0x59c1   :  { %v6340_v62 = vadd.f32 1.0, %v10265_v61 }
0x59c3   :  { %10266 = vrcp.f32 %v6340_v62 }
0x59cd   :  { %v10267_v2 = vpop.eup %10266 }
0x59ce   :  { %v6343_v33 = vmul.f32 %v10267_v2, %v6336_v60  ;;  %v7421_v2 = vld [vmem:[%s12072_s6 + $0xc8] sm:$0xff] }
0x59d0   :  { %9113 = vmatmul.mubr.msk.f32.vlgmr.msra.gmra.mrb[64].mxu0 %vm239_vm2, %v6343_v33 }
0x59d1   :  { %9940 = vmatpush3.bf16.msra.mxu0 %v10499_v15  ;;  %9150 = vmatprep.mubr.msk.f32.mxu0 %vm10331_vm0, %v10332_v7 }
0x59d2   :  { %9941 = vmatprep.subr.bf16.mxu0 %v10330_v4 }
0x59d5   :  { %9943 = vmatpush3.bf16.msra.mxu0 %v10505_v17 }
0x59d6   :  { %9944 = vmatprep.subr.bf16.mxu0 %v10330_v4 }
0x59d9   :  { %9946 = vmatpush3.bf16.msra.mxu0 %v10515_v20 }
0x59da   :  { %9947 = vmatprep.subr.bf16.mxu0 %v10330_v4 }
0x59dd   :  { %9949 = vmatpush3.bf16.msra.mxu0 %v10525_v23 }
0x59de   :  { %9962 = vmatprep.subr.bf16.mxu0 %v10330_v4 }
0x5aa3   :  { %v6413_v51 = vpop.f32.mrb[64].mxu0 }
0x5aa4   :  { %v6414_v19 = vadd.f32 %v11800_v12, %v6413_v51  ;;  %v9114_v46 = vpop.f32.mrb[65].mxu0 }
0x5aa5   :  { %v6701_v46 = vstv %s7417_s18 }
0x5aa6   :  { %v7405_v48 = vmul.f32 -1.442695, %v6414_v19 }
0x5aa8   :  { %10268 = vpow2.f32 %v7405_v48 }
0x5ab2   :  { %v10269_v1 = vpop.eup %10268 }
0x5ab3   :  { %v6420_v40 = vadd.f32 1.0, %v10269_v1 }
0x5ab5   :  { %10270 = vrcp.f32 %v6420_v40 }
0x5abf   :  { %v10271_v52 = vpop.eup %10270 }
0x5ac0   :  { %v6423_v26 = vmul.f32 %v10271_v52, %v6414_v19  ;;  %v6708_v52 = vstv %s7418_s7 }
0x5ac2   :  { %v6424_v45 = vadd.f32 %v6423_v26, %v6343_v33  ;;  %v6715_v33 = vstv %s7420_s16 }
0x5ac3   :  { %v6716_v51 = vmul.f32 %v7421_v2, %v6715_v33 }
0x5ac4   :  { %9132 = vmatmul.mubr.msk.f32.vlgmr.msra.gmra.mrb[64].mxu1 %vm239_vm2, %v6424_v45  ;;  %v6710_v45 = vstv %s7419_s14 }
0x5ac5   :  { %9952 = vmatpush3.bf16.msra.mxu1 %v10562_v41  ;;  %9169 = vmatprep.mubr.msk.f32.mxu1 %vm10331_vm0, %v10332_v7 }
0x5ac6   :  { %9953 = vmatprep.subr.bf16.mxu1 %v10330_v4 }
0x5ac9   :  { %9955 = vmatpush3.bf16.msra.mxu1 %v10572_v44 }
0x5aca   :  { %9956 = vmatprep.subr.bf16.mxu1 %v10330_v4 }
0x5acd   :  { %9958 = vmatpush3.bf16.msra.mxu1 %v10582_v47 }
0x5ace   :  { %9959 = vmatprep.subr.bf16.mxu1 %v10330_v4 }
0x5ad1   :  { %9961 = vmatpush3.bf16.msra.mxu1 %v10592_v50 }
0x5ad2   :  { %9974 = vmatprep.subr.bf16.mxu1 %v10330_v4 }
0x5b97   :  { %v6494_v29 = vpop.f32.mrb[64].mxu1 }
0x5b98   :  { %v6495_v11 = vadd.f32 %v11818_v21, %v6494_v29  ;;  %v9133_v10 = vpop.f32.mrb[65].mxu1 }
0x5b9a   :  { %v6503_v13 = vmul.f32 %v6502_v5, %v6495_v11 }
0x5b9c   :  { %6505 = vrot.lane.b32.xlu0 %v6503_v13, %s10334_s4 }
0x5c0e   :  { %v6506_v16 = vpop.permute.xlu0 %6505 }
0x5c0f   :  { %v6508_v35 = vsub.f32 %v11902_v8, %v6506_v16 }
0x5c11   :  { %v6510_v22 = vmul.f32 %v6509_v6, %v6508_v35  ;;  %v7422_v6 = vld [vmem:[%s12044_s5 + $0x5] ss:$0 sm:$0xff] }
0x5c13   :  { %v6513_v30 = vadd.f32 %v6512_v27, %v6510_v22 }
0x5c15   :  { %v11941_v32 = vadd.f32 %v6520_v28, %v6513_v30 }
0x5c17   :  { %6526 = vperm.xlu0 %10022, %v11941_v32   ;;  %v6711_v9 = vmul.f32 %v6710_v45, %v11941_v32 }
0x5c1b   :  { %6718 = vrot.lane.b32.xlu0 %v6716_v51, %s10334_s4 }
0x5c96   :  { %v6527_v34 = vpop.permute.xlu0 %6526 }
0x5c97   :  { %v6529_v37 = vmul.f32 %v11774_v24, %v6527_v34 }
0x5c99   :  { %v6530_v39 = vadd.f32 %v6529_v37, %v11780_v18 }
0x5c9a   :  { %v6719_v29 = vpop.permute.xlu0 %6718 }
0x5c9b   :  { %v6535_v0 = vadd.f32 %v7412_v14, %v6530_v39 }
0x5c9d   :  { %v7413_v57 = vmul.f32 -1.442695, %v6535_v0 }
0x5c9f   :  { %10272 = vpow2.f32 %v7413_v57 }
0x5ca9   :  { %v10273_v56 = vpop.eup %10272 }
0x5caa   :  { %v6539_v36 = vadd.f32 1.0, %v10273_v56 }
0x5cac   :  { %10274 = vrcp.f32 %v6539_v36 }
0x5cb6   :  { %v10275_v38 = vpop.eup %10274 }
0x5cb7   :  { %v6542_v59 = vmul.f32 %v10275_v38, %v6535_v0  ;;  %v6909_v38 = vstv %s7429_s1 }
0x5cb9   :  { %9151 = vmatmul.mubr.msk.f32.vlgmr.msra.gmra.mrb[66].mxu0 %vm239_vm2, %v6542_v59 }
0x5cba   :  { %9964 = vmatpush3.bf16.msra.mxu0 %v10499_v15  ;;  %9188 = vmatprep.mubr.msk.f32.mxu0 %vm10331_vm0, %v10332_v7 }
0x5cbb   :  { %9965 = vmatprep.subr.bf16.mxu0 %v10330_v4 }
0x5cbe   :  { %9967 = vmatpush3.bf16.msra.mxu0 %v10505_v17 }
0x5cbf   :  { %9968 = vmatprep.subr.bf16.mxu0 %v10330_v4 }
0x5cc2   :  { %9970 = vmatpush3.bf16.msra.mxu0 %v10515_v20 }
0x5cc3   :  { %9971 = vmatprep.subr.bf16.mxu0 %v10330_v4 }
0x5cc6   :  { %9973 = vmatpush3.bf16.msra.mxu0 %v10525_v23 }
0x5cc7   :  { %9986 = vmatprep.subr.bf16.mxu0 %v10330_v4 }
0x5d8c   :  { %v6612_v8 = vpop.f32.mrb[66].mxu0 }
0x5d8d   :  { %v6613_v42 = vadd.f32 %v11800_v12, %v6612_v8  ;;  %v9152_v31 = vpop.f32.mrb[67].mxu0 }
0x5d8f   :  { %v7415_v55 = vmul.f32 -1.442695, %v6613_v42 }
0x5d91   :  { %10276 = vpow2.f32 %v7415_v55 }
0x5d9b   :  { %v10277_v43 = vpop.eup %10276 }
0x5d9c   :  { %v6619_v60 = vadd.f32 1.0, %v10277_v43 }
0x5d9e   :  { %10278 = vrcp.f32 %v6619_v60 }
0x5da8   :  { %v10279_v25 = vpop.eup %10278 }
0x5da9   :  { %v6622_v61 = vmul.f32 %v10279_v25, %v6613_v42 }
0x5dab   :  { %v6623_v62 = vadd.f32 %v6622_v61, %v6542_v59  ;;  %v7432_v61 = vld [vmem:[%s12044_s5 + $0x6] ss:$0 sm:$0xff]  ;;  %s7440_s5 = sld [smem:[#allocation3 + $0x303]] }
0x5dad   :  { %9170 = vmatmul.mubr.msk.f32.vlgmr.msra.gmra.mrb[66].mxu1 %vm239_vm2, %v6623_v62 }
0x5dae   :  { %9976 = vmatpush3.bf16.msra.mxu1 %v10562_v41  ;;  %9207 = vmatprep.mubr.msk.f32.mxu1 %vm10331_vm0, %v10332_v7 }
0x5daf   :  { %9977 = vmatprep.subr.bf16.mxu1 %v10330_v4 }
0x5db2   :  { %9979 = vmatpush3.bf16.msra.mxu1 %v10572_v44 }
0x5db3   :  { %9980 = vmatprep.subr.bf16.mxu1 %v10330_v4 }
0x5db6   :  { %9982 = vmatpush3.bf16.msra.mxu1 %v10582_v47 }
0x5db7   :  { %9983 = vmatprep.subr.bf16.mxu1 %v10330_v4 }
0x5dba   :  { %9985 = vmatpush3.bf16.msra.mxu1 %v10592_v50 }
0x5dbb   :  { %9998 = vmatprep.subr.bf16.mxu1 %v10330_v4 }
0x5e80   :  { %v6693_v19 = vpop.f32.mrb[66].mxu1 }
0x5e81   :  { %v6694_v48 = vadd.f32 %v11818_v21, %v6693_v19  ;;  %v9171_v1 = vpop.f32.mrb[67].mxu1 }
0x5e83   :  { %v6702_v40 = vmul.f32 %v6701_v46, %v6694_v48 }
0x5e85   :  { %6704 = vrot.lane.b32.xlu1 %v6702_v40, %s10334_s4 }
0x5ef7   :  { %v6705_v26 = vpop.permute.xlu1 %6704 }
0x5ef8   :  { %v6707_v49 = vsub.f32 %v11941_v32, %v6705_v26 }
0x5efa   :  { %v6709_v63 = vmul.f32 %v6708_v52, %v6707_v49 }
0x5efc   :  { %v6712_v5 = vadd.f32 %v6711_v9, %v6709_v63  ;;  %v7441_v9 = vld [vmem:[%s12072_s6 + $0xd8] sm:$0xff] }
0x5efe   :  { %v6721_v11 = vadd.f32 %v6719_v29, %v6712_v5  ;;  %v7113_v29 = vstv %s7440_s5 }
0x5f00   :  { %6725 = vperm.xlu1 %10023, %v6721_v11   ;;  %v6910_v42 = vmul.f32 %v6909_v38, %v6721_v11 }
0x5f7f   :  { %v6726_v10 = vpop.permute.xlu1 %6725 }
0x5f80   :  { %v6728_v13 = vmul.f32 %v11774_v24, %v6726_v10 }
0x5f82   :  { %v6729_v16 = vadd.f32 %v6728_v13, %v11780_v18 }
0x5f84   :  { %v6734_v54 = vadd.f32 %v7422_v6, %v6729_v16  ;;  %v7108_v16 = vstv %s7439_s0 }
0x5f86   :  { %v7423_v35 = vmul.f32 -1.442695, %v6734_v54 }
0x5f88   :  { %10280 = vpow2.f32 %v7423_v35 }
0x5f92   :  { %v10281_v22 = vpop.eup %10280 }
0x5f93   :  { %v6738_v27 = vadd.f32 1.0, %v10281_v22 }
0x5f95   :  { %10282 = vrcp.f32 %v6738_v27 }
0x5f9f   :  { %v10283_v28 = vpop.eup %10282 }
0x5fa0   :  { %v6741_v30 = vmul.f32 %v10283_v28, %v6734_v54 }
0x5fa2   :  { %9189 = vmatmul.mubr.msk.f32.vlgmr.msra.gmra.mrb[68].mxu0 %vm239_vm2, %v6741_v30 }
0x5fa3   :  { %9988 = vmatpush3.bf16.msra.mxu0 %v10499_v15  ;;  %9226 = vmatprep.mubr.msk.f32.mxu0 %vm10331_vm0, %v10332_v7 }
0x5fa4   :  { %9989 = vmatprep.subr.bf16.mxu0 %v10330_v4 }
0x5fa7   :  { %9991 = vmatpush3.bf16.msra.mxu0 %v10505_v17 }
0x5fa8   :  { %9992 = vmatprep.subr.bf16.mxu0 %v10330_v4 }
0x5fab   :  { %9994 = vmatpush3.bf16.msra.mxu0 %v10515_v20  ;;  %v7431_v20 = vld [vmem:[%s12072_s6 + $0xd0] sm:$0xff] }
0x5fac   :  { %9995 = vmatprep.subr.bf16.mxu0 %v10330_v4 }
0x5faf   :  { %9997 = vmatpush3.bf16.msra.mxu0 %v10525_v23  ;;  %v6914_v23 = vstv %s7430_s12 }
0x6075   :  { %v6811_v32 = vpop.f32.mrb[68].mxu0 }
0x6076   :  { %v6812_v34 = vadd.f32 %v11800_v12, %v6811_v32  ;;  %v9190_v37 = vpop.f32.mrb[69].mxu0 }
0x6078   :  { %v7425_v15 = vmul.f32 -1.442695, %v6812_v34 }
0x607a   :  { %10284 = vpow2.f32 %v7425_v15 }
0x6084   :  { %v10285_v14 = vpop.eup %10284 }
0x6085   :  { %v6818_v39 = vadd.f32 1.0, %v10285_v14 }
0x6087   :  { %10286 = vrcp.f32 %v6818_v39 }
0x6091   :  { %v10287_v0 = vpop.eup %10286 }
0x6092   :  { %v6821_v57 = vmul.f32 %v10287_v0, %v6812_v34 }
0x6094   :  { %v6822_v17 = vadd.f32 %v6821_v57, %v6741_v30 }
0x6096   :  { %9208 = vmatmul.mubr.msk.f32.vlgmr.msra.gmra.mrb[68].mxu1 %vm239_vm2, %v6822_v17 }
0x6097   :  { %10000 = vmatpush3.bf16.msra.mxu1 %v10562_v41  ;;  %9245 = vmatprep.mubr.msk.f32.mxu1 %vm10331_vm0, %v10332_v7  ;;  %v6915_v41 = vmul.f32 %v7431_v20, %v6914_v23 }
0x6098   :  { %10001 = vmatprep.subr.bf16.mxu1 %v10330_v4 }
0x6099   :  { %6917 = vrot.lane.b32.xlu1 %v6915_v41, %s10334_s4 }
0x609b   :  { %10003 = vmatpush3.bf16.msra.mxu1 %v10572_v44  ;;  %v6900_v44 = vstv %s7427_s28 }
0x609c   :  { %10004 = vmatprep.subr.bf16.mxu1 %v10330_v4 }
0x609f   :  { %10006 = vmatpush3.bf16.msra.mxu1 %v10582_v47 }
0x60a0   :  { %10007 = vmatprep.subr.bf16.mxu1 %v10330_v4  ;;  %v6907_v4 = vstv %s7428_s27 }
0x60a3   :  { %10009 = vmatpush3.bf16.msra.mxu1 %v10592_v50 }
0x610b   :  { %v6918_v31 = vpop.permute.xlu1 %6917 }
0x6169   :  { %v6892_v7 = vpop.f32.mrb[68].mxu1 }
0x616a   :  { %v6893_v56 = vadd.f32 %v11818_v21, %v6892_v7  ;;  %v9209_v36 = vpop.f32.mrb[69].mxu1 }
0x616c   :  { %v6901_v47 = vmul.f32 %v6900_v44, %v6893_v56 }
0x616e   :  { %6903 = vrot.lane.b32.xlu0 %v6901_v47, %s10334_s4 }
0x61e0   :  { %v6904_v50 = vpop.permute.xlu0 %6903 }
0x61e1   :  { %v6906_v59 = vsub.f32 %v6721_v11, %v6904_v50 }
0x61e3   :  { %v6908_v8 = vmul.f32 %v6907_v4, %v6906_v59 }
0x61e5   :  { %v6911_v55 = vadd.f32 %v6910_v42, %v6908_v8 }
0x61e7   :  { %v6920_v43 = vadd.f32 %v6918_v31, %v6911_v55 }
0x61e9   :  { %6924 = vperm.xlu0 %10022, %v6920_v43   ;;  %v7109_v22 = vmul.f32 %v7108_v16, %v6920_v43 }
0x6268   :  { %v6925_v60 = vpop.permute.xlu0 %6924 }
0x6269   :  { %v6927_v25 = vmul.f32 %v11774_v24, %v6925_v60 }
0x626b   :  { %v6928_v62 = vadd.f32 %v6927_v25, %v11780_v18 }
0x626d   :  { %v6933_v2 = vadd.f32 %v7432_v61, %v6928_v62 }
0x626f   :  { %v7433_v33 = vmul.f32 -1.442695, %v6933_v2 }
0x6271   :  { %10288 = vpow2.f32 %v7433_v33 }
0x627b   :  { %v10289_v51 = vpop.eup %10288 }
0x627c   :  { %v6937_v19 = vadd.f32 1.0, %v10289_v51 }
0x627e   :  { %10290 = vrcp.f32 %v6937_v19 }
0x6288   :  { %v10291_v46 = vpop.eup %10290 }
0x6289   :  { %v6940_v48 = vmul.f32 %v10291_v46, %v6933_v2 }
0x628b   :  { %9227 = vmatmul.mubr.msk.f32.vlgmr.msra.gmra.mrb[70].mxu0 %vm239_vm2, %v6940_v48 }
0x635e   :  { %v7010_v1 = vpop.f32.mrb[70].mxu0 }
0x635f   :  { %v7011_v40 = vadd.f32 %v11800_v12, %v7010_v1  ;;  %v9228_v24 = vpop.f32.mrb[71].mxu0  ;;  %v7114_v12 = vmul.f32 %v7441_v9, %v7113_v29 }
0x6361   :  { %v7435_v52 = vmul.f32 -1.442695, %v7011_v40  ;;  %7116 = vrot.lane.b32.xlu0 %v7114_v12, %s10334_s4 }
0x6363   :  { %10292 = vpow2.f32 %v7435_v52 }
0x636d   :  { %v10293_v26 = vpop.eup %10292 }
0x636e   :  { %v7017_v45 = vadd.f32 1.0, %v10293_v26 }
0x6370   :  { %10294 = vrcp.f32 %v7017_v45 }
0x637a   :  { %v10295_v18 = vpop.eup %10294 }
0x637b   :  { %v7020_v49 = vmul.f32 %v10295_v18, %v7011_v40 }
0x637d   :  { %v7021_v63 = vadd.f32 %v7020_v49, %v6940_v48 }
0x637f   :  { %9246 = vmatmul.mubr.msk.f32.vlgmr.msra.gmra.mrb[70].mxu1 %vm239_vm2, %v7021_v63 }
0x63d3   :  { %v7117_v28 = vpop.permute.xlu0 %7116 }
0x6452   :  { %v7091_v5 = vpop.f32.mrb[70].mxu1 }
0x6453   :  { %v7092_v11 = vadd.f32 %v11818_v21, %v7091_v5  ;;  %v9247_v10 = vpop.f32.mrb[71].mxu1 }
0x6455   :  { %v7100_v13 = vmul.f32 %v7092_v11, %v5273_v58 }
0x6457   :  { %7102 = vrot.lane.b32.xlu1 %v7100_v13, %s10334_s4 }
0x645b   :  { %5295 = vrot.lane.b32.xlu1 %v11712_v3, %s10334_s4 }
0x64c9   :  { %v7103_v6 = vpop.permute.xlu1 %7102 }
0x64ca   :  { %v7105_v54 = vsub.f32 %v6920_v43, %v7103_v6 }
0x64cc   :  { %v7107_v35 = vmul.f32 %v7105_v54, %v5280_v53 }
0x64cd   :  { %v5296_v27 = vpop.permute.xlu1 %5295 }
0x64ce   :  { %5299 = vst.msk [vmem:[%s12059_s20] sm:$0xff] %vm5298_vm11, %v5296_v27  ;;  %v7110_v58 = vadd.f32 %v7109_v22, %v7107_v35 }
0x64d0   :  { %v7119_v21 = vadd.f32 %v7117_v28, %v7110_v58 }
0x64d2   :  { %7121 = vrot.lane.b32.xlu0 %v7119_v21, %s10335_s30 }
0x6544   :  { %v7122_v3 = vpop.permute.xlu0 %7121 }
0x6545   :  { %7125 = vst.msk [vmem:[%s12059_s20] sm:$0xff] %vm7124_vm12, %v7122_v3 }
0x6546   :  { %7130 = vsyncpa [#allocation4], 1 }

</bundles_post_ra>
